<compile_context>
chip_gen: v7x
topology: tpu7x:2x2x1
jax: 0.10.0
libtpu: 0.0.40
codegen_flags: <defaults>
</compile_context>

<pallas_src>
import functools

import numpy as np
import jax
import jax.numpy as jnp
from jax import lax
from jax.experimental import pallas as pl
from jax.experimental.pallas import tpu as pltpu

NHIDDEN = 128          # nhidden in the PyTorch module
NUM_GROUPS = 32        # nn.GroupNorm(32, norm_nc, affine=False)
EPS = 1e-5             # GroupNorm default eps (== module's self.eps)
PAD_L = 8              # left zero margin in the VMEM halo scratch (sublane-aligned)
# Tiny blocks at these shapes; 32 MiB scoped VMEM is safe on v5e/v6e/v7x.
VMEM_LIMIT = 32 * 1024 * 1024


def _cp(n_axes=1):
    return pltpu.CompilerParams(
        dimension_semantics=("parallel",) * n_axes,
        vmem_limit_bytes=VMEM_LIMIT)


# ----------------------------------------------------------------------------
# Host-side constant matrices (cached on static shapes).
# ----------------------------------------------------------------------------
@functools.lru_cache(maxsize=None)
def nearest_matrix(out_size, in_size):
    # matches F.interpolate(mode='nearest'): src = floor(dst * in / out)
    m = np.zeros((out_size, in_size), dtype=np.float32)
    for o in range(out_size):
        src = min(int(np.floor(o * in_size / out_size)), in_size - 1)
        m[o, src] = 1.0
    return m


@functools.lru_cache(maxsize=None)
def bilinear_matrix(out_size, in_size):
    # matches F.interpolate(mode='bilinear', align_corners=False)
    m = np.zeros((out_size, in_size), dtype=np.float64)
    scale = in_size / out_size
    for o in range(out_size):
        src = max((o + 0.5) * scale - 0.5, 0.0)
        i0 = min(int(np.floor(src)), in_size - 1)
        i1 = min(i0 + 1, in_size - 1)
        t = src - i0
        m[o, i0] += 1.0 - t
        m[o, i1] += t
    return m.astype(np.float32)


@functools.lru_cache(maxsize=None)
def group_avg_matrix(C, G, hw):
    # Block-diagonal averaging matrix: (row-vector of per-channel sums) @ gmat
    # gives the per-channel *group* mean of those sums divided by (Cg*H*W).
    cg = C // G
    m = np.zeros((C, C), dtype=np.float32)
    v = 1.0 / float(cg * hw)
    for g in range(G):
        m[g * cg:(g + 1) * cg, g * cg:(g + 1) * cg] = v
    return m


# ----------------------------------------------------------------------------
# Pallas kernels
# ----------------------------------------------------------------------------
def matmul_kernel(a_ref, b_ref, o_ref):
    # plain row-blocked (rb, K) @ (K, M) used by the separable resize
    o_ref[...] = jnp.dot(a_ref[...], b_ref[...],
                         preferred_element_type=jnp.float32)


def _conv3x3_from_slabs(slabs, w_ref):
    """3x3 'SAME' conv accumulator.

    slabs : list of 3 width-shifted arrays (H+2, W, Cin), one per dw tap,
            taken from a 1-px zero-padded activation.
    w_ref : (3, 3, Cin, Cout) HWIO weight Ref.
    Returns (H*W, Cout) float32.
    """
    Hp, W, cin = slabs[0].shape
    H = Hp - 2
    cout = w_ref.shape[-1]
    acc = jnp.zeros((H * W, cout), jnp.float32)
    if cin % 128 == 0:
        # im2col over the three width taps -> one K = 3*Cin MXU matmul per dh
        for dh in range(3):
            patch = jnp.concatenate([s[dh:dh + H] for s in slabs], axis=-1)
            wk = w_ref[dh].reshape(3 * cin, cout)          # (dw, cin) flattened
            acc = acc + jnp.dot(patch.reshape(H * W, 3 * cin), wk,
                                preferred_element_type=jnp.float32)
    else:
        for dh in range(3):
            for dw in range(3):
                patch = slabs[dw][dh:dh + H].reshape(H * W, cin)
                acc = acc + jnp.dot(patch, w_ref[dh, dw],
                                    preferred_element_type=jnp.float32)
    return acc


def spm_fused_kernel(seg_ref, guid_ref, x_ref, gmat_ref,
                     wms_ref, bms_ref, wm_ref, bm_ref,
                     wfs_ref, bfs_ref, wf_ref, bf_ref,
                     o_ref, pad_ref, *, eps):
    """Per-image fused SPM GroupNorm.

    seg_ref / guid_ref : (1, H+2, W+2, label_nc / feature_nc) zero-padded NHWC.
    x_ref              : (1, H, W, C) NHWC activations to normalize.
    gmat_ref           : (C, C) block-diagonal group-averaging matrix.
    w*/b* refs         : conv weights (HWIO) and (1, cout) biases.
    pad_ref            : VMEM scratch (H+2, W+2*PAD_L, NHIDDEN) used to build
                         the 1-px zero halo of the 128-ch intermediate.
    """
    H, W = o_ref.shape[1], o_ref.shape[2]
    C = o_ref.shape[-1]

    # Zero the halo scratch (do NOT gate on program_id: with megacore-parallel
    # grids each core owns its own scratch copy).  Interior is overwritten.
    pad_ref[...] = jnp.zeros(pad_ref.shape, pad_ref.dtype)

    def branch(inp_ref, w_shared_ref, b_shared_ref, w2_ref, b2_ref):
        # stage 1: shared 3x3 conv + bias + ReLU (input already 1-px padded)
        slabs1 = [inp_ref[0, :, dw:dw + W, :] for dw in range(3)]
        a = jnp.maximum(
            _conv3x3_from_slabs(slabs1, w_shared_ref) + b_shared_ref[...], 0.0)
        # stage 2: halo in VMEM (sublane-aligned interior store), wide conv
        pad_ref[1:H + 1, PAD_L:PAD_L + W, :] = a.reshape(H, W, NHIDDEN)
        slabs2 = [pad_ref[:, PAD_L - 1 + dw:PAD_L - 1 + dw + W, :]
                  for dw in range(3)]
        return _conv3x3_from_slabs(slabs2, w2_ref) + b2_ref[...]

    m = branch(seg_ref, wms_ref, bms_ref, wm_ref, bm_ref)    # (H*W, 4C)
    f = branch(guid_ref, wfs_ref, bfs_ref, wf_ref, bf_ref)   # (H*W, 2C)

    m_g1 = m[:, 0 * C:1 * C]
    m_b1 = m[:, 1 * C:2 * C]
    m_g2 = m[:, 2 * C:3 * C]
    m_b2 = m[:, 3 * C:4 * C]
    f_g1 = f[:, 0:C]
    f_b1 = f[:, C:2 * C]
    gamma = f_g1 * (1.0 + m_g1) + m_b1
    beta = f_b1 * (1.0 + m_g2) + m_b2

    # Fused GroupNorm statistics: per-channel sums -> group averages via one
    # small block-diagonal matmul (sums broadcast to 8 rows for a standard
    # MXU tile shape), then normalize in-register.
    x2d = x_ref[0].reshape(H * W, C)
    s1 = jnp.broadcast_to(jnp.sum(x2d, axis=0, keepdims=True), (8, C))
    s2 = jnp.broadcast_to(jnp.sum(x2d * x2d, axis=0, keepdims=True), (8, C))
    mean = jnp.dot(s1, gmat_ref[...], preferred_element_type=jnp.float32)[0:1]
    ex2 = jnp.dot(s2, gmat_ref[...], preferred_element_type=jnp.float32)[0:1]
    var = jnp.maximum(ex2 - mean * mean, 0.0)
    rsig = lax.rsqrt(var + eps)
    xn = (x2d - mean) * rsig

    o_ref[0] = (xn * (1.0 + gamma) + beta).reshape(H, W, C)


# ----------------------------------------------------------------------------
# pallas_call wrappers
# ----------------------------------------------------------------------------
def _pallas_matmul(a, b):
    R, K = a.shape
    M = b.shape[1]
    rb = next(r for r in (256, 128, 64, 32, 16, 8, R) if R % r == 0)
    return pl.pallas_call(
        matmul_kernel,
        out_shape=jax.ShapeDtypeStruct((R, M), jnp.float32),
        grid=(R // rb,),
        in_specs=[pl.BlockSpec((rb, K), lambda i: (i, 0)),
                  pl.BlockSpec((K, M), lambda i: (0, 0))],
        out_specs=pl.BlockSpec((rb, M), lambda i: (i, 0)),
        compiler_params=_cp(1),
    )(a, b)


def _resize_separable(src, mh, mwt):
    """src: (N, Cin, Sh, Sw) NCHW -> (N, H, W, Cin) NHWC.

    out[n, h, w, c] = sum_{s,t} mh[h, s] * src[n, c, s, t] * mwt[t, w]
    as two small row-blocked matmuls (width pass, then height pass).
    """
    N, Cin, Sh, Sw = src.shape
    W = mwt.shape[1]
    H = mh.shape[0]
    t1 = _pallas_matmul(src.reshape(N * Cin * Sh, Sw), mwt)      # (N*Cin*Sh, W)
    t1 = t1.reshape(N * Cin, Sh, W).transpose(0, 2, 1)           # small transpose
    t2 = _pallas_matmul(t1.reshape(N * Cin * W, Sh), mh.T)       # (N*Cin*W, H)
    return t2.reshape(N, Cin, W, H).transpose(0, 3, 2, 1)        # (N, H, W, Cin)


@jax.jit
def spm_group_norm_forward(x, segmap, guidance, params):
    N, C, H, W = x.shape
    assert C % NUM_GROUPS == 0

    # ---- 1. separable resizes (nearest for segmap, bilinear for guidance) ---
    Sh, Sw = segmap.shape[2], segmap.shape[3]
    Gh, Gw = guidance.shape[2], guidance.shape[3]
    mh_n = jnp.asarray(nearest_matrix(H, Sh))
    mw_n = jnp.asarray(nearest_matrix(W, Sw))
    mh_b = jnp.asarray(bilinear_matrix(H, Gh))
    mw_b = jnp.asarray(bilinear_matrix(W, Gw))
    seg_r = _resize_separable(segmap, mh_n, mw_n.T)       # (N, H, W, label_nc)
    guid_r = _resize_separable(guidance, mh_b, mw_b.T)    # (N, H, W, feature_nc)

    # 1-px zero pad of the *small-channel* branch inputs only (cheap).  The
    # 128-ch intermediate activations are padded in VMEM inside the kernel.
    seg_pad = jnp.pad(seg_r, ((0, 0), (1, 1), (1, 1), (0, 0)))
    guid_pad = jnp.pad(guid_r, ((0, 0), (1, 1), (1, 1), (0, 0)))
    label_nc = seg_pad.shape[-1]
    feature_nc = guid_pad.shape[-1]

    # ---- 2. constants / concatenated weights for the fused kernel ----------
    gmat = jnp.asarray(group_avg_matrix(C, NUM_GROUPS, H * W))
    wm = jnp.concatenate([params["w_mask_gamma1"], params["w_mask_beta1"],
                          params["w_mask_gamma2"], params["w_mask_beta2"]], axis=-1)
    bm = jnp.concatenate([params["b_mask_gamma1"], params["b_mask_beta1"],
                          params["b_mask_gamma2"], params["b_mask_beta2"]]
                         ).reshape(1, 4 * C)
    wf = jnp.concatenate([params["w_feat_gamma1"], params["w_feat_beta1"]], axis=-1)
    bf = jnp.concatenate([params["b_feat_gamma1"], params["b_feat_beta1"]]
                         ).reshape(1, 2 * C)

    x_nhwc = x.transpose(0, 2, 3, 1)
    # TODO(synk): read x as NCHW and transpose in-kernel (XLU) to drop the two
    # XLA layout passes on x / out, and add a spatial (row) grid axis with halo
    # DMA so the (H*W, 6C) accumulators are tiled for large resolutions.
    out_nhwc = pl.pallas_call(
        functools.partial(spm_fused_kernel, eps=EPS),
        out_shape=jax.ShapeDtypeStruct((N, H, W, C), jnp.float32),
        grid=(N,),
        in_specs=[
            pl.BlockSpec((1, H + 2, W + 2, label_nc), lambda n: (n, 0, 0, 0)),
            pl.BlockSpec((1, H + 2, W + 2, feature_nc), lambda n: (n, 0, 0, 0)),
            pl.BlockSpec((1, H, W, C), lambda n: (n, 0, 0, 0)),
            pl.BlockSpec((C, C), lambda n: (0, 0)),
            pl.BlockSpec((3, 3, label_nc, NHIDDEN), lambda n: (0, 0, 0, 0)),
            pl.BlockSpec((1, NHIDDEN), lambda n: (0, 0)),
            pl.BlockSpec((3, 3, NHIDDEN, 4 * C), lambda n: (0, 0, 0, 0)),
            pl.BlockSpec((1, 4 * C), lambda n: (0, 0)),
            pl.BlockSpec((3, 3, feature_nc, NHIDDEN), lambda n: (0, 0, 0, 0)),
            pl.BlockSpec((1, NHIDDEN), lambda n: (0, 0)),
            pl.BlockSpec((3, 3, NHIDDEN, 2 * C), lambda n: (0, 0, 0, 0)),
            pl.BlockSpec((1, 2 * C), lambda n: (0, 0)),
        ],
        out_specs=pl.BlockSpec((1, H, W, C), lambda n: (n, 0, 0, 0)),
        scratch_shapes=[pltpu.VMEM((H + 2, W + 2 * PAD_L, NHIDDEN), jnp.float32)],
        compiler_params=_cp(1),
    )(seg_pad, guid_pad, x_nhwc, gmat,
      params["w_mask_shared"], params["b_mask_shared"].reshape(1, NHIDDEN),
      wm, bm,
      params["w_feat_shared"], params["b_feat_shared"].reshape(1, NHIDDEN),
      wf, bf)

    return out_nhwc.transpose(0, 3, 1, 2)  # back to NCHW


# ----------------------------------------------------------------------------
# Pure-JAX reference (same resize matrices, XLA convs) for correctness check
# ----------------------------------------------------------------------------
def spm_group_norm_reference(x, segmap, guidance, params):
    N, C, H, W = x.shape
    xr = x.reshape(N, NUM_GROUPS, -1)
    mean = xr.mean(axis=2, keepdims=True)
    var = ((xr - mean) ** 2).mean(axis=2, keepdims=True)
    xn = ((xr - mean) / jnp.sqrt(var + EPS)).reshape(N, C, H, W)

    def resize(src, mh, mw):
        return jnp.einsum("hs,ncst,wt->nchw", mh, src, mw,
                          precision=lax.Precision.HIGHEST)

    seg_r = resize(segmap, jnp.asarray(nearest_matrix(H, segmap.shape[2])),
                   jnp.asarray(nearest_matrix(W, segmap.shape[3])))
    guid_r = resize(guidance, jnp.asarray(bilinear_matrix(H, guidance.shape[2])),
                    jnp.asarray(bilinear_matrix(W, guidance.shape[3])))

    def conv(inp_nhwc, w, b):
        y = lax.conv_general_dilated(inp_nhwc, w, (1, 1), "SAME",
                                     dimension_numbers=("NHWC", "HWIO", "NHWC"),
                                     precision=lax.Precision.HIGHEST)
        return y + b

    mask_actv = jax.nn.relu(conv(seg_r.transpose(0, 2, 3, 1),
                                 params["w_mask_shared"], params["b_mask_shared"]))
    feat_actv = jax.nn.relu(conv(guid_r.transpose(0, 2, 3, 1),
                                 params["w_feat_shared"], params["b_feat_shared"]))
    m_g1 = conv(mask_actv, params["w_mask_gamma1"], params["b_mask_gamma1"])
    m_b1 = conv(mask_actv, params["w_mask_beta1"], params["b_mask_beta1"])
    m_g2 = conv(mask_actv, params["w_mask_gamma2"], params["b_mask_gamma2"])
    m_b2 = conv(mask_actv, params["w_mask_beta2"], params["b_mask_beta2"])
    f_g1 = conv(feat_actv, params["w_feat_gamma1"], params["b_feat_gamma1"])
    f_b1 = conv(feat_actv, params["w_feat_beta1"], params["b_feat_beta1"])

    gamma = f_g1 * (1.0 + m_g1) + m_b1
    beta = f_b1 * (1.0 + m_g2) + m_b2
    out = xn.transpose(0, 2, 3, 1) * (1.0 + gamma) + beta
    return out.transpose(0, 3, 1, 2)


if __name__ == "__main__":
    # Small shapes consistent with the module: norm_nc divisible by 32,
    # segmap/guidance at lower resolution than x (they get resized up).
    N, norm_nc, H, W = 2, 64, 16, 16
    label_nc, Sh, Sw = 16, 8, 8
    feature_nc, Gh, Gw = 8, 8, 8

    key = jax.random.PRNGKey(0)
    ks = jax.random.split(key, 20)

    def rnd(i, shape, scale=0.05):
        return jax.random.normal(ks[i], shape, jnp.float32) * scale

    params = dict(
        w_mask_shared=rnd(0, (3, 3, label_nc, NHIDDEN)),
        b_mask_shared=rnd(1, (NHIDDEN,)),
        w_mask_gamma1=rnd(2, (3, 3, NHIDDEN, norm_nc)),
        b_mask_gamma1=rnd(3, (norm_nc,)),
        w_mask_beta1=rnd(4, (3, 3, NHIDDEN, norm_nc)),
        b_mask_beta1=rnd(5, (norm_nc,)),
        w_mask_gamma2=rnd(6, (3, 3, NHIDDEN, norm_nc)),
        b_mask_gamma2=rnd(7, (norm_nc,)),
        w_mask_beta2=rnd(8, (3, 3, NHIDDEN, norm_nc)),
        b_mask_beta2=rnd(9, (norm_nc,)),
        w_feat_shared=rnd(10, (3, 3, feature_nc, NHIDDEN)),
        b_feat_shared=rnd(11, (NHIDDEN,)),
        w_feat_gamma1=rnd(12, (3, 3, NHIDDEN, norm_nc)),
        b_feat_gamma1=rnd(13, (norm_nc,)),
        w_feat_beta1=rnd(14, (3, 3, NHIDDEN, norm_nc)),
        b_feat_beta1=rnd(15, (norm_nc,)),
    )

    x = jax.random.normal(ks[16], (N, norm_nc, H, W), jnp.float32)
    segmap = jax.random.normal(ks[17], (N, label_nc, Sh, Sw), jnp.float32)
    guidance = jax.random.normal(ks[18], (N, feature_nc, Gh, Gw), jnp.float32)

    out = jax.block_until_ready(spm_group_norm_forward(x, segmap, guidance, params))
    ref = jax.block_until_ready(spm_group_norm_reference(x, segmap, guidance, params))

    assert out.shape == (N, norm_nc, H, W)
    max_err = float(jnp.max(jnp.abs(out - ref)))
    assert bool(jnp.allclose(out, ref, rtol=1e-2, atol=1e-2)), max_err
    print("KERNEL_OK")
</pallas_src>

<mosaic_0001>
module attributes {stable_mosaic.version = 11 : i64} {
  func.func @matmul_kernel(%arg0: i32, %arg1: memref<256x8xf32, #tpu.memory_space<vmem>>, %arg2: memref<8x16xf32, #tpu.memory_space<vmem>>, %arg3: memref<256x16xf32, #tpu.memory_space<vmem>>) attributes {dimension_semantics = [#tpu.dimension_semantics<parallel>], iteration_bounds = array<i64: 1>, scalar_prefetch = 0 : i64, scratch_operands = 0 : i64, tpu.core_type = #tpu.core_type<tc>, window_params = [{transform_indices = @transform_0, window_bounds = array<i64: 256, 8>}, {pipeline_mode = #tpu.pipeline_mode<synchronous>, transform_indices = @transform_1, window_bounds = array<i64: 8, 16>}, {transform_indices = @transform_2, window_bounds = array<i64: 256, 16>}]} {
    %c0 = arith.constant 0 : index
    %c0_0 = arith.constant 0 : index
    %0 = vector.load %arg1[%c0, %c0_0] : memref<256x8xf32, #tpu.memory_space<vmem>>, vector<256x8xf32>
    %c0_1 = arith.constant 0 : index
    %c0_2 = arith.constant 0 : index
    %1 = vector.load %arg2[%c0_1, %c0_2] : memref<8x16xf32, #tpu.memory_space<vmem>>, vector<8x16xf32>
    %cst = arith.constant dense<0.000000e+00> : vector<256x16xf32>
    %2 = tpu.matmul %0, %1, %cst {dimension_numbers = #tpu.dot_dimension_numbers<[1], [0], [0], [1], [0, 0, 1, 1], [], []>} : vector<256x8xf32>, vector<8x16xf32>, vector<256x16xf32> -> vector<256x16xf32>
    %c0_3 = arith.constant 0 : index
    %c0_4 = arith.constant 0 : index
    %3 = vector.load %arg3[%c0_3, %c0_4] : memref<256x16xf32, #tpu.memory_space<vmem>>, vector<256x16xf32>
    tpu.vector_store %arg3[%c0_3, %c0_4], %2 {strides = array<i32>} : memref<256x16xf32, #tpu.memory_space<vmem>>, vector<256x16xf32>,
    return
  }
  func.func @transform_0(%arg0: i32) -> (i32, i32) {
    %c0_i32 = arith.constant 0 : i32
    %c0_i32_0 = arith.constant 0 : i32
    return %arg0, %c0_i32 : i32, i32
  }
  func.func @transform_1(%arg0: i32) -> (i32, i32) {
    %c0_i32 = arith.constant 0 : i32
    %c0_i32_0 = arith.constant 0 : i32
    %c0_i32_1 = arith.constant 0 : i32
    return %c0_i32, %c0_i32_0 : i32, i32
  }
  func.func @transform_2(%arg0: i32) -> (i32, i32) {
    %c0_i32 = arith.constant 0 : i32
    %c0_i32_0 = arith.constant 0 : i32
    return %arg0, %c0_i32 : i32, i32
  }
}

module attributes {stable_mosaic.version = 11 : i64} {
  func.func @matmul_kernel(%arg0: i32, %arg1: memref<256x8xf32, #tpu.memory_space<vmem>>, %arg2: memref<8x16xf32, #tpu.memory_space<vmem>>, %arg3: memref<256x16xf32, #tpu.memory_space<vmem>>) attributes {dimension_semantics = [#tpu.dimension_semantics<parallel>], iteration_bounds = array<i64: 2>, scalar_prefetch = 0 : i64, scratch_operands = 0 : i64, tpu.core_type = #tpu.core_type<tc>, window_params = [{transform_indices = @transform_0, window_bounds = array<i64: 256, 8>}, {pipeline_mode = #tpu.pipeline_mode<synchronous>, transform_indices = @transform_1, window_bounds = array<i64: 8, 16>}, {transform_indices = @transform_2, window_bounds = array<i64: 256, 16>}]} {
    %c0 = arith.constant 0 : index
    %c0_0 = arith.constant 0 : index
    %0 = vector.load %arg1[%c0, %c0_0] : memref<256x8xf32, #tpu.memory_space<vmem>>, vector<256x8xf32>
    %c0_1 = arith.constant 0 : index
    %c0_2 = arith.constant 0 : index
    %1 = vector.load %arg2[%c0_1, %c0_2] : memref<8x16xf32, #tpu.memory_space<vmem>>, vector<8x16xf32>
    %cst = arith.constant dense<0.000000e+00> : vector<256x16xf32>
    %2 = tpu.matmul %0, %1, %cst {dimension_numbers = #tpu.dot_dimension_numbers<[1], [0], [0], [1], [0, 0, 1, 1], [], []>} : vector<256x8xf32>, vector<8x16xf32>, vector<256x16xf32> -> vector<256x16xf32>
    %c0_3 = arith.constant 0 : index
    %c0_4 = arith.constant 0 : index
    %3 = vector.load %arg3[%c0_3, %c0_4] : memref<256x16xf32, #tpu.memory_space<vmem>>, vector<256x16xf32>
    tpu.vector_store %arg3[%c0_3, %c0_4], %2 {strides = array<i32>} : memref<256x16xf32, #tpu.memory_space<vmem>>, vector<256x16xf32>,
    return
  }
  func.func @transform_0(%arg0: i32) -> (i32, i32) {
    %c0_i32 = arith.constant 0 : i32
    %c0_i32_0 = arith.constant 0 : i32
    return %arg0, %c0_i32 : i32, i32
  }
  func.func @transform_1(%arg0: i32) -> (i32, i32) {
    %c0_i32 = arith.constant 0 : i32
    %c0_i32_0 = arith.constant 0 : i32
    %c0_i32_1 = arith.constant 0 : i32
    return %c0_i32, %c0_i32_0 : i32, i32
  }
  func.func @transform_2(%arg0: i32) -> (i32, i32) {
    %c0_i32 = arith.constant 0 : i32
    %c0_i32_0 = arith.constant 0 : i32
    return %arg0, %c0_i32 : i32, i32
  }
}

module attributes {stable_mosaic.version = 11 : i64} {
  func.func @matmul_kernel(%arg0: i32, %arg1: memref<128x8xf32, #tpu.memory_space<vmem>>, %arg2: memref<8x16xf32, #tpu.memory_space<vmem>>, %arg3: memref<128x16xf32, #tpu.memory_space<vmem>>) attributes {dimension_semantics = [#tpu.dimension_semantics<parallel>], iteration_bounds = array<i64: 1>, scalar_prefetch = 0 : i64, scratch_operands = 0 : i64, tpu.core_type = #tpu.core_type<tc>, window_params = [{transform_indices = @transform_0, window_bounds = array<i64: 128, 8>}, {pipeline_mode = #tpu.pipeline_mode<synchronous>, transform_indices = @transform_1, window_bounds = array<i64: 8, 16>}, {transform_indices = @transform_2, window_bounds = array<i64: 128, 16>}]} {
    %c0 = arith.constant 0 : index
    %c0_0 = arith.constant 0 : index
    %0 = vector.load %arg1[%c0, %c0_0] : memref<128x8xf32, #tpu.memory_space<vmem>>, vector<128x8xf32>
    %c0_1 = arith.constant 0 : index
    %c0_2 = arith.constant 0 : index
    %1 = vector.load %arg2[%c0_1, %c0_2] : memref<8x16xf32, #tpu.memory_space<vmem>>, vector<8x16xf32>
    %cst = arith.constant dense<0.000000e+00> : vector<128x16xf32>
    %2 = tpu.matmul %0, %1, %cst {dimension_numbers = #tpu.dot_dimension_numbers<[1], [0], [0], [1], [0, 0, 1, 1], [], []>} : vector<128x8xf32>, vector<8x16xf32>, vector<128x16xf32> -> vector<128x16xf32>
    %c0_3 = arith.constant 0 : index
    %c0_4 = arith.constant 0 : index
    %3 = vector.load %arg3[%c0_3, %c0_4] : memref<128x16xf32, #tpu.memory_space<vmem>>, vector<128x16xf32>
    tpu.vector_store %arg3[%c0_3, %c0_4], %2 {strides = array<i32>} : memref<128x16xf32, #tpu.memory_space<vmem>>, vector<128x16xf32>,
    return
  }
  func.func @transform_0(%arg0: i32) -> (i32, i32) {
    %c0_i32 = arith.constant 0 : i32
    %c0_i32_0 = arith.constant 0 : i32
    return %arg0, %c0_i32 : i32, i32
  }
  func.func @transform_1(%arg0: i32) -> (i32, i32) {
    %c0_i32 = arith.constant 0 : i32
    %c0_i32_0 = arith.constant 0 : i32
    %c0_i32_1 = arith.constant 0 : i32
    return %c0_i32, %c0_i32_0 : i32, i32
  }
  func.func @transform_2(%arg0: i32) -> (i32, i32) {
    %c0_i32 = arith.constant 0 : i32
    %c0_i32_0 = arith.constant 0 : i32
    return %arg0, %c0_i32 : i32, i32
  }
}

module attributes {stable_mosaic.version = 11 : i64} {
  func.func @spm_fused_kernel(%arg0: i32, %arg1: memref<1x18x18x16xf32, #tpu.memory_space<vmem>>, %arg2: memref<1x18x18x8xf32, #tpu.memory_space<vmem>>, %arg3: memref<1x16x16x64xf32, #tpu.memory_space<vmem>>, %arg4: memref<64x64xf32, #tpu.memory_space<vmem>>, %arg5: memref<3x3x16x128xf32, #tpu.memory_space<vmem>>, %arg6: memref<1x128xf32, #tpu.memory_space<vmem>>, %arg7: memref<3x3x128x256xf32, #tpu.memory_space<vmem>>, %arg8: memref<1x256xf32, #tpu.memory_space<vmem>>, %arg9: memref<3x3x8x128xf32, #tpu.memory_space<vmem>>, %arg10: memref<1x128xf32, #tpu.memory_space<vmem>>, %arg11: memref<3x3x128x128xf32, #tpu.memory_space<vmem>>, %arg12: memref<1x128xf32, #tpu.memory_space<vmem>>, %arg13: memref<1x16x16x64xf32, #tpu.memory_space<vmem>>, %arg14: memref<18x32x128xf32, #tpu.memory_space<vmem>>) attributes {dimension_semantics = [#tpu.dimension_semantics<parallel>], iteration_bounds = array<i64: 2>, scalar_prefetch = 0 : i64, scratch_operands = 1 : i64, tpu.core_type = #tpu.core_type<tc>, window_params = [{transform_indices = @transform_0, window_bounds = array<i64: 1, 18, 18, 16>}, {transform_indices = @transform_1, window_bounds = array<i64: 1, 18, 18, 8>}, {transform_indices = @transform_2, window_bounds = array<i64: 1, 16, 16, 64>}, {pipeline_mode = #tpu.pipeline_mode<synchronous>, transform_indices = @transform_3, window_bounds = array<i64: 64, 64>}, {pipeline_mode = #tpu.pipeline_mode<synchronous>, transform_indices = @transform_4, window_bounds = array<i64: 3, 3, 16, 128>}, {pipeline_mode = #tpu.pipeline_mode<synchronous>, transform_indices = @transform_5, window_bounds = array<i64: 1, 128>}, {pipeline_mode = #tpu.pipeline_mode<synchronous>, transform_indices = @transform_6, window_bounds = array<i64: 3, 3, 128, 256>}, {pipeline_mode = #tpu.pipeline_mode<synchronous>, transform_indices = @transform_7, window_bounds = array<i64: 1, 256>}, {pipeline_mode = #tpu.pipeline_mode<synchronous>, transform_indices = @transform_8, window_bounds = array<i64: 3, 3, 8, 128>}, {pipeline_mode = #tpu.pipeline_mode<synchronous>, transform_indices = @transform_9, window_bounds = array<i64: 1, 128>}, {pipeline_mode = #tpu.pipeline_mode<synchronous>, transform_indices = @transform_10, window_bounds = array<i64: 3, 3, 128, 128>}, {pipeline_mode = #tpu.pipeline_mode<synchronous>, transform_indices = @transform_11, window_bounds = array<i64: 1, 128>}, {transform_indices = @transform_12, window_bounds = array<i64: 1, 16, 16, 64>}]} {
    %cst = arith.constant 0.000000e+00 : f32
    %0 = vector.broadcast %cst : f32 to vector<18x32x128xf32>
    %c0 = arith.constant 0 : index
    %c0_0 = arith.constant 0 : index
    %c0_1 = arith.constant 0 : index
    %1 = vector.load %arg14[%c0, %c0_0, %c0_1] : memref<18x32x128xf32, #tpu.memory_space<vmem>>, vector<18x32x128xf32>
    tpu.vector_store %arg14[%c0, %c0_0, %c0_1], %0 {strides = array<i32>} : memref<18x32x128xf32, #tpu.memory_space<vmem>>, vector<18x32x128xf32>,
    %c0_2 = arith.constant 0 : index
    %c0_3 = arith.constant 0 : index
    %c0_4 = arith.constant 0 : index
    %c0_5 = arith.constant 0 : index
    %2 = vector.load %arg1[%c0_2, %c0_3, %c0_4, %c0_5] : memref<1x18x18x16xf32, #tpu.memory_space<vmem>>, vector<1x18x16x16xf32>
    %3 = vector.shape_cast %2 : vector<1x18x16x16xf32> to vector<18x16x16xf32>
    %c0_6 = arith.constant 0 : index
    %c0_7 = arith.constant 0 : index
    %c1 = arith.constant 1 : index
    %c0_8 = arith.constant 0 : index
    %4 = vector.load %arg1[%c0_6, %c0_7, %c1, %c0_8] : memref<1x18x18x16xf32, #tpu.memory_space<vmem>>, vector<1x18x16x16xf32>
    %5 = vector.shape_cast %4 : vector<1x18x16x16xf32> to vector<18x16x16xf32>
    %c0_9 = arith.constant 0 : index
    %c0_10 = arith.constant 0 : index
    %c2 = arith.constant 2 : index
    %c0_11 = arith.constant 0 : index
    %6 = vector.load %arg1[%c0_9, %c0_10, %c2, %c0_11] : memref<1x18x18x16xf32, #tpu.memory_space<vmem>>, vector<1x18x16x16xf32>
    %7 = vector.shape_cast %6 : vector<1x18x16x16xf32> to vector<18x16x16xf32>
    %cst_12 = arith.constant 0.000000e+00 : f32
    %8 = vector.broadcast %cst_12 : f32 to vector<256x128xf32>
    %9 = vector.extract_strided_slice %3 {offsets = [0, 0, 0], sizes = [16, 16, 16], strides = [1, 1, 1]} : vector<18x16x16xf32> to vector<16x16x16xf32>
    %10 = vector.shape_cast %9 : vector<16x16x16xf32> to vector<256x16xf32>
    %c0_13 = arith.constant 0 : index
    %c0_14 = arith.constant 0 : index
    %c0_15 = arith.constant 0 : index
    %c0_16 = arith.constant 0 : index
    %11 = vector.load %arg5[%c0_13, %c0_14, %c0_15, %c0_16] : memref<3x3x16x128xf32, #tpu.memory_space<vmem>>, vector<1x1x16x128xf32>
    %12 = vector.shape_cast %11 : vector<1x1x16x128xf32> to vector<16x128xf32>
    %cst_17 = arith.constant dense<0.000000e+00> : vector<256x128xf32>
    %13 = tpu.matmul %10, %12, %cst_17 {dimension_numbers = #tpu.dot_dimension_numbers<[1], [0], [0], [1], [0, 0, 1, 1], [], []>} : vector<256x16xf32>, vector<16x128xf32>, vector<256x128xf32> -> vector<256x128xf32>
    %14 = arith.addf %8, %13 : vector<256x128xf32>
    %15 = vector.extract_strided_slice %5 {offsets = [0, 0, 0], sizes = [16, 16, 16], strides = [1, 1, 1]} : vector<18x16x16xf32> to vector<16x16x16xf32>
    %16 = vector.shape_cast %15 : vector<16x16x16xf32> to vector<256x16xf32>
    %c0_18 = arith.constant 0 : index
    %c1_19 = arith.constant 1 : index
    %c0_20 = arith.constant 0 : index
    %c0_21 = arith.constant 0 : index
    %17 = vector.load %arg5[%c0_18, %c1_19, %c0_20, %c0_21] : memref<3x3x16x128xf32, #tpu.memory_space<vmem>>, vector<1x1x16x128xf32>
    %18 = vector.shape_cast %17 : vector<1x1x16x128xf32> to vector<16x128xf32>
    %cst_22 = arith.constant dense<0.000000e+00> : vector<256x128xf32>
    %19 = tpu.matmul %16, %18, %cst_22 {dimension_numbers = #tpu.dot_dimension_numbers<[1], [0], [0], [1], [0, 0, 1, 1], [], []>} : vector<256x16xf32>, vector<16x128xf32>, vector<256x128xf32> -> vector<256x128xf32>
    %20 = arith.addf %14, %19 : vector<256x128xf32>
    %21 = vector.extract_strided_slice %7 {offsets = [0, 0, 0], sizes = [16, 16, 16], strides = [1, 1, 1]} : vector<18x16x16xf32> to vector<16x16x16xf32>
    %22 = vector.shape_cast %21 : vector<16x16x16xf32> to vector<256x16xf32>
    %c0_23 = arith.constant 0 : index
    %c2_24 = arith.constant 2 : index
    %c0_25 = arith.constant 0 : index
    %c0_26 = arith.constant 0 : index
    %23 = vector.load %arg5[%c0_23, %c2_24, %c0_25, %c0_26] : memref<3x3x16x128xf32, #tpu.memory_space<vmem>>, vector<1x1x16x128xf32>
    %24 = vector.shape_cast %23 : vector<1x1x16x128xf32> to vector<16x128xf32>
    %cst_27 = arith.constant dense<0.000000e+00> : vector<256x128xf32>
    %25 = tpu.matmul %22, %24, %cst_27 {dimension_numbers = #tpu.dot_dimension_numbers<[1], [0], [0], [1], [0, 0, 1, 1], [], []>} : vector<256x16xf32>, vector<16x128xf32>, vector<256x128xf32> -> vector<256x128xf32>
    %26 = arith.addf %20, %25 : vector<256x128xf32>
    %27 = vector.extract_strided_slice %3 {offsets = [1, 0, 0], sizes = [16, 16, 16], strides = [1, 1, 1]} : vector<18x16x16xf32> to vector<16x16x16xf32>
    %28 = vector.shape_cast %27 : vector<16x16x16xf32> to vector<256x16xf32>
    %c1_28 = arith.constant 1 : index
    %c0_29 = arith.constant 0 : index
    %c0_30 = arith.constant 0 : index
    %c0_31 = arith.constant 0 : index
    %29 = vector.load %arg5[%c1_28, %c0_29, %c0_30, %c0_31] : memref<3x3x16x128xf32, #tpu.memory_space<vmem>>, vector<1x1x16x128xf32>
    %30 = vector.shape_cast %29 : vector<1x1x16x128xf32> to vector<16x128xf32>
    %cst_32 = arith.constant dense<0.000000e+00> : vector<256x128xf32>
    %31 = tpu.matmul %28, %30, %cst_32 {dimension_numbers = #tpu.dot_dimension_numbers<[1], [0], [0], [1], [0, 0, 1, 1], [], []>} : vector<256x16xf32>, vector<16x128xf32>, vector<256x128xf32> -> vector<256x128xf32>
    %32 = arith.addf %26, %31 : vector<256x128xf32>
    %33 = vector.extract_strided_slice %5 {offsets = [1, 0, 0], sizes = [16, 16, 16], strides = [1, 1, 1]} : vector<18x16x16xf32> to vector<16x16x16xf32>
    %34 = vector.shape_cast %33 : vector<16x16x16xf32> to vector<256x16xf32>
    %c1_33 = arith.constant 1 : index
    %c1_34 = arith.constant 1 : index
    %c0_35 = arith.constant 0 : index
    %c0_36 = arith.constant 0 : index
    %35 = vector.load %arg5[%c1_33, %c1_34, %c0_35, %c0_36] : memref<3x3x16x128xf32, #tpu.memory_space<vmem>>, vector<1x1x16x128xf32>
    %36 = vector.shape_cast %35 : vector<1x1x16x128xf32> to vector<16x128xf32>
    %cst_37 = arith.constant dense<0.000000e+00> : vector<256x128xf32>
    %37 = tpu.matmul %34, %36, %cst_37 {dimension_numbers = #tpu.dot_dimension_numbers<[1], [0], [0], [1], [0, 0, 1, 1], [], []>} : vector<256x16xf32>, vector<16x128xf32>, vector<256x128xf32> -> vector<256x128xf32>
    %38 = arith.addf %32, %37 : vector<256x128xf32>
    %39 = vector.extract_strided_slice %7 {offsets = [1, 0, 0], sizes = [16, 16, 16], strides = [1, 1, 1]} : vector<18x16x16xf32> to vector<16x16x16xf32>
    %40 = vector.shape_cast %39 : vector<16x16x16xf32> to vector<256x16xf32>
    %c1_38 = arith.constant 1 : index
    %c2_39 = arith.constant 2 : index
    %c0_40 = arith.constant 0 : index
    %c0_41 = arith.constant 0 : index
    %41 = vector.load %arg5[%c1_38, %c2_39, %c0_40, %c0_41] : memref<3x3x16x128xf32, #tpu.memory_space<vmem>>, vector<1x1x16x128xf32>
    %42 = vector.shape_cast %41 : vector<1x1x16x128xf32> to vector<16x128xf32>
    %cst_42 = arith.constant dense<0.000000e+00> : vector<256x128xf32>
    %43 = tpu.matmul %40, %42, %cst_42 {dimension_numbers = #tpu.dot_dimension_numbers<[1], [0], [0], [1], [0, 0, 1, 1], [], []>} : vector<256x16xf32>, vector<16x128xf32>, vector<256x128xf32> -> vector<256x128xf32>
    %44 = arith.addf %38, %43 : vector<256x128xf32>
    %45 = vector.extract_strided_slice %3 {offsets = [2, 0, 0], sizes = [16, 16, 16], strides = [1, 1, 1]} : vector<18x16x16xf32> to vector<16x16x16xf32>
    %46 = vector.shape_cast %45 : vector<16x16x16xf32> to vector<256x16xf32>
    %c2_43 = arith.constant 2 : index
    %c0_44 = arith.constant 0 : index
    %c0_45 = arith.constant 0 : index
    %c0_46 = arith.constant 0 : index
    %47 = vector.load %arg5[%c2_43, %c0_44, %c0_45, %c0_46] : memref<3x3x16x128xf32, #tpu.memory_space<vmem>>, vector<1x1x16x128xf32>
    %48 = vector.shape_cast %47 : vector<1x1x16x128xf32> to vector<16x128xf32>
    %cst_47 = arith.constant dense<0.000000e+00> : vector<256x128xf32>
    %49 = tpu.matmul %46, %48, %cst_47 {dimension_numbers = #tpu.dot_dimension_numbers<[1], [0], [0], [1], [0, 0, 1, 1], [], []>} : vector<256x16xf32>, vector<16x128xf32>, vector<256x128xf32> -> vector<256x128xf32>
    %50 = arith.addf %44, %49 : vector<256x128xf32>
    %51 = vector.extract_strided_slice %5 {offsets = [2, 0, 0], sizes = [16, 16, 16], strides = [1, 1, 1]} : vector<18x16x16xf32> to vector<16x16x16xf32>
    %52 = vector.shape_cast %51 : vector<16x16x16xf32> to vector<256x16xf32>
    %c2_48 = arith.constant 2 : index
    %c1_49 = arith.constant 1 : index
    %c0_50 = arith.constant 0 : index
    %c0_51 = arith.constant 0 : index
    %53 = vector.load %arg5[%c2_48, %c1_49, %c0_50, %c0_51] : memref<3x3x16x128xf32, #tpu.memory_space<vmem>>, vector<1x1x16x128xf32>
    %54 = vector.shape_cast %53 : vector<1x1x16x128xf32> to vector<16x128xf32>
    %cst_52 = arith.constant dense<0.000000e+00> : vector<256x128xf32>
    %55 = tpu.matmul %52, %54, %cst_52 {dimension_numbers = #tpu.dot_dimension_numbers<[1], [0], [0], [1], [0, 0, 1, 1], [], []>} : vector<256x16xf32>, vector<16x128xf32>, vector<256x128xf32> -> vector<256x128xf32>
    %56 = arith.addf %50, %55 : vector<256x128xf32>
    %57 = vector.extract_strided_slice %7 {offsets = [2, 0, 0], sizes = [16, 16, 16], strides = [1, 1, 1]} : vector<18x16x16xf32> to vector<16x16x16xf32>
    %58 = vector.shape_cast %57 : vector<16x16x16xf32> to vector<256x16xf32>
    %c2_53 = arith.constant 2 : index
    %c2_54 = arith.constant 2 : index
    %c0_55 = arith.constant 0 : index
    %c0_56 = arith.constant 0 : index
    %59 = vector.load %arg5[%c2_53, %c2_54, %c0_55, %c0_56] : memref<3x3x16x128xf32, #tpu.memory_space<vmem>>, vector<1x1x16x128xf32>
    %60 = vector.shape_cast %59 : vector<1x1x16x128xf32> to vector<16x128xf32>
    %cst_57 = arith.constant dense<0.000000e+00> : vector<256x128xf32>
    %61 = tpu.matmul %58, %60, %cst_57 {dimension_numbers = #tpu.dot_dimension_numbers<[1], [0], [0], [1], [0, 0, 1, 1], [], []>} : vector<256x16xf32>, vector<16x128xf32>, vector<256x128xf32> -> vector<256x128xf32>
    %62 = arith.addf %56, %61 : vector<256x128xf32>
    %c0_58 = arith.constant 0 : index
    %c0_59 = arith.constant 0 : index
    %63 = vector.load %arg6[%c0_58, %c0_59] : memref<1x128xf32, #tpu.memory_space<vmem>>, vector<1x128xf32>
    %64 = vector.broadcast %63 : vector<1x128xf32> to vector<256x128xf32>
    %65 = arith.addf %62, %64 : vector<256x128xf32>
    %cst_60 = arith.constant 0.000000e+00 : f32
    %66 = vector.broadcast %cst_60 : f32 to vector<256x128xf32>
    %67 = arith.maximumf %65, %66 : vector<256x128xf32>
    %68 = vector.shape_cast %67 : vector<256x128xf32> to vector<16x16x128xf32>
    %c1_61 = arith.constant 1 : index
    %c8 = arith.constant 8 : index
    %c0_62 = arith.constant 0 : index
    %69 = vector.load %arg14[%c1_61, %c8, %c0_62] : memref<18x32x128xf32, #tpu.memory_space<vmem>>, vector<16x16x128xf32>
    tpu.vector_store %arg14[%c1_61, %c8, %c0_62], %68 {strides = array<i32>} : memref<18x32x128xf32, #tpu.memory_space<vmem>>, vector<16x16x128xf32>,
    %c0_63 = arith.constant 0 : index
    %c7 = arith.constant 7 : index
    %c0_64 = arith.constant 0 : index
    %70 = vector.load %arg14[%c0_63, %c7, %c0_64] : memref<18x32x128xf32, #tpu.memory_space<vmem>>, vector<18x16x128xf32>
    %c0_65 = arith.constant 0 : index
    %c8_66 = arith.constant 8 : index
    %c0_67 = arith.constant 0 : index
    %71 = vector.load %arg14[%c0_65, %c8_66, %c0_67] : memref<18x32x128xf32, #tpu.memory_space<vmem>>, vector<18x16x128xf32>
    %c0_68 = arith.constant 0 : index
    %c9 = arith.constant 9 : index
    %c0_69 = arith.constant 0 : index
    %72 = vector.load %arg14[%c0_68, %c9, %c0_69] : memref<18x32x128xf32, #tpu.memory_space<vmem>>, vector<18x16x128xf32>
    %cst_70 = arith.constant 0.000000e+00 : f32
    %73 = vector.broadcast %cst_70 : f32 to vector<256x256xf32>
    %74 = vector.extract_strided_slice %70 {offsets = [0, 0, 0], sizes = [16, 16, 128], strides = [1, 1, 1]} : vector<18x16x128xf32> to vector<16x16x128xf32>
    %75 = vector.extract_strided_slice %71 {offsets = [0, 0, 0], sizes = [16, 16, 128], strides = [1, 1, 1]} : vector<18x16x128xf32> to vector<16x16x128xf32>
    %76 = vector.extract_strided_slice %72 {offsets = [0, 0, 0], sizes = [16, 16, 128], strides = [1, 1, 1]} : vector<18x16x128xf32> to vector<16x16x128xf32>
    %77 = tpu.concatenate %74, %75, %76 in 2 : vector<16x16x128xf32>, vector<16x16x128xf32>, vector<16x16x128xf32> -> vector<16x16x384xf32>
    %c0_71 = arith.constant 0 : index
    %c0_72 = arith.constant 0 : index
    %c0_73 = arith.constant 0 : index
    %c0_74 = arith.constant 0 : index
    %78 = vector.load %arg7[%c0_71, %c0_72, %c0_73, %c0_74] : memref<3x3x128x256xf32, #tpu.memory_space<vmem>>, vector<1x3x128x256xf32>
    %79 = vector.shape_cast %78 : vector<1x3x128x256xf32> to vector<3x128x256xf32>
    %80 = vector.shape_cast %79 : vector<3x128x256xf32> to vector<384x256xf32>
    %81 = vector.shape_cast %77 : vector<16x16x384xf32> to vector<256x384xf32>
    %cst_75 = arith.constant dense<0.000000e+00> : vector<256x256xf32>
    %82 = tpu.matmul %81, %80, %cst_75 {dimension_numbers = #tpu.dot_dimension_numbers<[1], [0], [0], [1], [0, 0, 1, 1], [], []>} : vector<256x384xf32>, vector<384x256xf32>, vector<256x256xf32> -> vector<256x256xf32>
    %83 = arith.addf %73, %82 : vector<256x256xf32>
    %84 = vector.extract_strided_slice %70 {offsets = [1, 0, 0], sizes = [16, 16, 128], strides = [1, 1, 1]} : vector<18x16x128xf32> to vector<16x16x128xf32>
    %85 = vector.extract_strided_slice %71 {offsets = [1, 0, 0], sizes = [16, 16, 128], strides = [1, 1, 1]} : vector<18x16x128xf32> to vector<16x16x128xf32>
    %86 = vector.extract_strided_slice %72 {offsets = [1, 0, 0], sizes = [16, 16, 128], strides = [1, 1, 1]} : vector<18x16x128xf32> to vector<16x16x128xf32>
    %87 = tpu.concatenate %84, %85, %86 in 2 : vector<16x16x128xf32>, vector<16x16x128xf32>, vector<16x16x128xf32> -> vector<16x16x384xf32>
    %c1_76 = arith.constant 1 : index
    %c0_77 = arith.constant 0 : index
    %c0_78 = arith.constant 0 : index
    %c0_79 = arith.constant 0 : index
    %88 = vector.load %arg7[%c1_76, %c0_77, %c0_78, %c0_79] : memref<3x3x128x256xf32, #tpu.memory_space<vmem>>, vector<1x3x128x256xf32>
    %89 = vector.shape_cast %88 : vector<1x3x128x256xf32> to vector<3x128x256xf32>
    %90 = vector.shape_cast %89 : vector<3x128x256xf32> to vector<384x256xf32>
    %91 = vector.shape_cast %87 : vector<16x16x384xf32> to vector<256x384xf32>
    %cst_80 = arith.constant dense<0.000000e+00> : vector<256x256xf32>
    %92 = tpu.matmul %91, %90, %cst_80 {dimension_numbers = #tpu.dot_dimension_numbers<[1], [0], [0], [1], [0, 0, 1, 1], [], []>} : vector<256x384xf32>, vector<384x256xf32>, vector<256x256xf32> -> vector<256x256xf32>
    %93 = arith.addf %83, %92 : vector<256x256xf32>
    %94 = vector.extract_strided_slice %70 {offsets = [2, 0, 0], sizes = [16, 16, 128], strides = [1, 1, 1]} : vector<18x16x128xf32> to vector<16x16x128xf32>
    %95 = vector.extract_strided_slice %71 {offsets = [2, 0, 0], sizes = [16, 16, 128], strides = [1, 1, 1]} : vector<18x16x128xf32> to vector<16x16x128xf32>
    %96 = vector.extract_strided_slice %72 {offsets = [2, 0, 0], sizes = [16, 16, 128], strides = [1, 1, 1]} : vector<18x16x128xf32> to vector<16x16x128xf32>
    %97 = tpu.concatenate %94, %95, %96 in 2 : vector<16x16x128xf32>, vector<16x16x128xf32>, vector<16x16x128xf32> -> vector<16x16x384xf32>
    %c2_81 = arith.constant 2 : index
    %c0_82 = arith.constant 0 : index
    %c0_83 = arith.constant 0 : index
    %c0_84 = arith.constant 0 : index
    %98 = vector.load %arg7[%c2_81, %c0_82, %c0_83, %c0_84] : memref<3x3x128x256xf32, #tpu.memory_space<vmem>>, vector<1x3x128x256xf32>
    %99 = vector.shape_cast %98 : vector<1x3x128x256xf32> to vector<3x128x256xf32>
    %100 = vector.shape_cast %99 : vector<3x128x256xf32> to vector<384x256xf32>
    %101 = vector.shape_cast %97 : vector<16x16x384xf32> to vector<256x384xf32>
    %cst_85 = arith.constant dense<0.000000e+00> : vector<256x256xf32>
    %102 = tpu.matmul %101, %100, %cst_85 {dimension_numbers = #tpu.dot_dimension_numbers<[1], [0], [0], [1], [0, 0, 1, 1], [], []>} : vector<256x384xf32>, vector<384x256xf32>, vector<256x256xf32> -> vector<256x256xf32>
    %103 = arith.addf %93, %102 : vector<256x256xf32>
    %c0_86 = arith.constant 0 : index
    %c0_87 = arith.constant 0 : index
    %104 = vector.load %arg8[%c0_86, %c0_87] : memref<1x256xf32, #tpu.memory_space<vmem>>, vector<1x256xf32>
    %105 = vector.broadcast %104 : vector<1x256xf32> to vector<256x256xf32>
    %106 = arith.addf %103, %105 : vector<256x256xf32>
    %c0_88 = arith.constant 0 : index
    %c0_89 = arith.constant 0 : index
    %c0_90 = arith.constant 0 : index
    %c0_91 = arith.constant 0 : index
    %107 = vector.load %arg2[%c0_88, %c0_89, %c0_90, %c0_91] : memref<1x18x18x8xf32, #tpu.memory_space<vmem>>, vector<1x18x16x8xf32>
    %108 = vector.shape_cast %107 : vector<1x18x16x8xf32> to vector<18x16x8xf32>
    %c0_92 = arith.constant 0 : index
    %c0_93 = arith.constant 0 : index
    %c1_94 = arith.constant 1 : index
    %c0_95 = arith.constant 0 : index
    %109 = vector.load %arg2[%c0_92, %c0_93, %c1_94, %c0_95] : memref<1x18x18x8xf32, #tpu.memory_space<vmem>>, vector<1x18x16x8xf32>
    %110 = vector.shape_cast %109 : vector<1x18x16x8xf32> to vector<18x16x8xf32>
    %c0_96 = arith.constant 0 : index
    %c0_97 = arith.constant 0 : index
    %c2_98 = arith.constant 2 : index
    %c0_99 = arith.constant 0 : index
    %111 = vector.load %arg2[%c0_96, %c0_97, %c2_98, %c0_99] : memref<1x18x18x8xf32, #tpu.memory_space<vmem>>, vector<1x18x16x8xf32>
    %112 = vector.shape_cast %111 : vector<1x18x16x8xf32> to vector<18x16x8xf32>
    %cst_100 = arith.constant 0.000000e+00 : f32
    %113 = vector.broadcast %cst_100 : f32 to vector<256x128xf32>
    %114 = vector.extract_strided_slice %108 {offsets = [0, 0, 0], sizes = [16, 16, 8], strides = [1, 1, 1]} : vector<18x16x8xf32> to vector<16x16x8xf32>
    %115 = vector.shape_cast %114 : vector<16x16x8xf32> to vector<256x8xf32>
    %c0_101 = arith.constant 0 : index
    %c0_102 = arith.constant 0 : index
    %c0_103 = arith.constant 0 : index
    %c0_104 = arith.constant 0 : index
    %116 = vector.load %arg9[%c0_101, %c0_102, %c0_103, %c0_104] : memref<3x3x8x128xf32, #tpu.memory_space<vmem>>, vector<1x1x8x128xf32>
    %117 = vector.shape_cast %116 : vector<1x1x8x128xf32> to vector<8x128xf32>
    %cst_105 = arith.constant dense<0.000000e+00> : vector<256x128xf32>
    %118 = tpu.matmul %115, %117, %cst_105 {dimension_numbers = #tpu.dot_dimension_numbers<[1], [0], [0], [1], [0, 0, 1, 1], [], []>} : vector<256x8xf32>, vector<8x128xf32>, vector<256x128xf32> -> vector<256x128xf32>
    %119 = arith.addf %113, %118 : vector<256x128xf32>
    %120 = vector.extract_strided_slice %110 {offsets = [0, 0, 0], sizes = [16, 16, 8], strides = [1, 1, 1]} : vector<18x16x8xf32> to vector<16x16x8xf32>
    %121 = vector.shape_cast %120 : vector<16x16x8xf32> to vector<256x8xf32>
    %c0_106 = arith.constant 0 : index
    %c1_107 = arith.constant 1 : index
    %c0_108 = arith.constant 0 : index
    %c0_109 = arith.constant 0 : index
    %122 = vector.load %arg9[%c0_106, %c1_107, %c0_108, %c0_109] : memref<3x3x8x128xf32, #tpu.memory_space<vmem>>, vector<1x1x8x128xf32>
    %123 = vector.shape_cast %122 : vector<1x1x8x128xf32> to vector<8x128xf32>
    %cst_110 = arith.constant dense<0.000000e+00> : vector<256x128xf32>
    %124 = tpu.matmul %121, %123, %cst_110 {dimension_numbers = #tpu.dot_dimension_numbers<[1], [0], [0], [1], [0, 0, 1, 1], [], []>} : vector<256x8xf32>, vector<8x128xf32>, vector<256x128xf32> -> vector<256x128xf32>
    %125 = arith.addf %119, %124 : vector<256x128xf32>
    %126 = vector.extract_strided_slice %112 {offsets = [0, 0, 0], sizes = [16, 16, 8], strides = [1, 1, 1]} : vector<18x16x8xf32> to vector<16x16x8xf32>
    %127 = vector.shape_cast %126 : vector<16x16x8xf32> to vector<256x8xf32>
    %c0_111 = arith.constant 0 : index
    %c2_112 = arith.constant 2 : index
    %c0_113 = arith.constant 0 : index
    %c0_114 = arith.constant 0 : index
    %128 = vector.load %arg9[%c0_111, %c2_112, %c0_113, %c0_114] : memref<3x3x8x128xf32, #tpu.memory_space<vmem>>, vector<1x1x8x128xf32>
    %129 = vector.shape_cast %128 : vector<1x1x8x128xf32> to vector<8x128xf32>
    %cst_115 = arith.constant dense<0.000000e+00> : vector<256x128xf32>
    %130 = tpu.matmul %127, %129, %cst_115 {dimension_numbers = #tpu.dot_dimension_numbers<[1], [0], [0], [1], [0, 0, 1, 1], [], []>} : vector<256x8xf32>, vector<8x128xf32>, vector<256x128xf32> -> vector<256x128xf32>
    %131 = arith.addf %125, %130 : vector<256x128xf32>
    %132 = vector.extract_strided_slice %108 {offsets = [1, 0, 0], sizes = [16, 16, 8], strides = [1, 1, 1]} : vector<18x16x8xf32> to vector<16x16x8xf32>
    %133 = vector.shape_cast %132 : vector<16x16x8xf32> to vector<256x8xf32>
    %c1_116 = arith.constant 1 : index
    %c0_117 = arith.constant 0 : index
    %c0_118 = arith.constant 0 : index
    %c0_119 = arith.constant 0 : index
    %134 = vector.load %arg9[%c1_116, %c0_117, %c0_118, %c0_119] : memref<3x3x8x128xf32, #tpu.memory_space<vmem>>, vector<1x1x8x128xf32>
    %135 = vector.shape_cast %134 : vector<1x1x8x128xf32> to vector<8x128xf32>
    %cst_120 = arith.constant dense<0.000000e+00> : vector<256x128xf32>
    %136 = tpu.matmul %133, %135, %cst_120 {dimension_numbers = #tpu.dot_dimension_numbers<[1], [0], [0], [1], [0, 0, 1, 1], [], []>} : vector<256x8xf32>, vector<8x128xf32>, vector<256x128xf32> -> vector<256x128xf32>
    %137 = arith.addf %131, %136 : vector<256x128xf32>
    %138 = vector.extract_strided_slice %110 {offsets = [1, 0, 0], sizes = [16, 16, 8], strides = [1, 1, 1]} : vector<18x16x8xf32> to vector<16x16x8xf32>
    %139 = vector.shape_cast %138 : vector<16x16x8xf32> to vector<256x8xf32>
    %c1_121 = arith.constant 1 : index
    %c1_122 = arith.constant 1 : index
    %c0_123 = arith.constant 0 : index
    %c0_124 = arith.constant 0 : index
    %140 = vector.load %arg9[%c1_121, %c1_122, %c0_123, %c0_124] : memref<3x3x8x128xf32, #tpu.memory_space<vmem>>, vector<1x1x8x128xf32>
    %141 = vector.shape_cast %140 : vector<1x1x8x128xf32> to vector<8x128xf32>
    %cst_125 = arith.constant dense<0.000000e+00> : vector<256x128xf32>
    %142 = tpu.matmul %139, %141, %cst_125 {dimension_numbers = #tpu.dot_dimension_numbers<[1], [0], [0], [1], [0, 0, 1, 1], [], []>} : vector<256x8xf32>, vector<8x128xf32>, vector<256x128xf32> -> vector<256x128xf32>
    %143 = arith.addf %137, %142 : vector<256x128xf32>
    %144 = vector.extract_strided_slice %112 {offsets = [1, 0, 0], sizes = [16, 16, 8], strides = [1, 1, 1]} : vector<18x16x8xf32> to vector<16x16x8xf32>
    %145 = vector.shape_cast %144 : vector<16x16x8xf32> to vector<256x8xf32>
    %c1_126 = arith.constant 1 : index
    %c2_127 = arith.constant 2 : index
    %c0_128 = arith.constant 0 : index
    %c0_129 = arith.constant 0 : index
    %146 = vector.load %arg9[%c1_126, %c2_127, %c0_128, %c0_129] : memref<3x3x8x128xf32, #tpu.memory_space<vmem>>, vector<1x1x8x128xf32>
    %147 = vector.shape_cast %146 : vector<1x1x8x128xf32> to vector<8x128xf32>
    %cst_130 = arith.constant dense<0.000000e+00> : vector<256x128xf32>
    %148 = tpu.matmul %145, %147, %cst_130 {dimension_numbers = #tpu.dot_dimension_numbers<[1], [0], [0], [1], [0, 0, 1, 1], [], []>} : vector<256x8xf32>, vector<8x128xf32>, vector<256x128xf32> -> vector<256x128xf32>
    %149 = arith.addf %143, %148 : vector<256x128xf32>
    %150 = vector.extract_strided_slice %108 {offsets = [2, 0, 0], sizes = [16, 16, 8], strides = [1, 1, 1]} : vector<18x16x8xf32> to vector<16x16x8xf32>
    %151 = vector.shape_cast %150 : vector<16x16x8xf32> to vector<256x8xf32>
    %c2_131 = arith.constant 2 : index
    %c0_132 = arith.constant 0 : index
    %c0_133 = arith.constant 0 : index
    %c0_134 = arith.constant 0 : index
    %152 = vector.load %arg9[%c2_131, %c0_132, %c0_133, %c0_134] : memref<3x3x8x128xf32, #tpu.memory_space<vmem>>, vector<1x1x8x128xf32>
    %153 = vector.shape_cast %152 : vector<1x1x8x128xf32> to vector<8x128xf32>
    %cst_135 = arith.constant dense<0.000000e+00> : vector<256x128xf32>
    %154 = tpu.matmul %151, %153, %cst_135 {dimension_numbers = #tpu.dot_dimension_numbers<[1], [0], [0], [1], [0, 0, 1, 1], [], []>} : vector<256x8xf32>, vector<8x128xf32>, vector<256x128xf32> -> vector<256x128xf32>
    %155 = arith.addf %149, %154 : vector<256x128xf32>
    %156 = vector.extract_strided_slice %110 {offsets = [2, 0, 0], sizes = [16, 16, 8], strides = [1, 1, 1]} : vector<18x16x8xf32> to vector<16x16x8xf32>
    %157 = vector.shape_cast %156 : vector<16x16x8xf32> to vector<256x8xf32>
    %c2_136 = arith.constant 2 : index
    %c1_137 = arith.constant 1 : index
    %c0_138 = arith.constant 0 : index
    %c0_139 = arith.constant 0 : index
    %158 = vector.load %arg9[%c2_136, %c1_137, %c0_138, %c0_139] : memref<3x3x8x128xf32, #tpu.memory_space<vmem>>, vector<1x1x8x128xf32>
    %159 = vector.shape_cast %158 : vector<1x1x8x128xf32> to vector<8x128xf32>
    %cst_140 = arith.constant dense<0.000000e+00> : vector<256x128xf32>
    %160 = tpu.matmul %157, %159, %cst_140 {dimension_numbers = #tpu.dot_dimension_numbers<[1], [0], [0], [1], [0, 0, 1, 1], [], []>} : vector<256x8xf32>, vector<8x128xf32>, vector<256x128xf32> -> vector<256x128xf32>
    %161 = arith.addf %155, %160 : vector<256x128xf32>
    %162 = vector.extract_strided_slice %112 {offsets = [2, 0, 0], sizes = [16, 16, 8], strides = [1, 1, 1]} : vector<18x16x8xf32> to vector<16x16x8xf32>
    %163 = vector.shape_cast %162 : vector<16x16x8xf32> to vector<256x8xf32>
    %c2_141 = arith.constant 2 : index
    %c2_142 = arith.constant 2 : index
    %c0_143 = arith.constant 0 : index
    %c0_144 = arith.constant 0 : index
    %164 = vector.load %arg9[%c2_141, %c2_142, %c0_143, %c0_144] : memref<3x3x8x128xf32, #tpu.memory_space<vmem>>, vector<1x1x8x128xf32>
    %165 = vector.shape_cast %164 : vector<1x1x8x128xf32> to vector<8x128xf32>
    %cst_145 = arith.constant dense<0.000000e+00> : vector<256x128xf32>
    %166 = tpu.matmul %163, %165, %cst_145 {dimension_numbers = #tpu.dot_dimension_numbers<[1], [0], [0], [1], [0, 0, 1, 1], [], []>} : vector<256x8xf32>, vector<8x128xf32>, vector<256x128xf32> -> vector<256x128xf32>
    %167 = arith.addf %161, %166 : vector<256x128xf32>
    %c0_146 = arith.constant 0 : index
    %c0_147 = arith.constant 0 : index
    %168 = vector.load %arg10[%c0_146, %c0_147] : memref<1x128xf32, #tpu.memory_space<vmem>>, vector<1x128xf32>
    %169 = vector.broadcast %168 : vector<1x128xf32> to vector<256x128xf32>
    %170 = arith.addf %167, %169 : vector<256x128xf32>
    %cst_148 = arith.constant 0.000000e+00 : f32
    %171 = vector.broadcast %cst_148 : f32 to vector<256x128xf32>
    %172 = arith.maximumf %170, %171 : vector<256x128xf32>
    %173 = vector.shape_cast %172 : vector<256x128xf32> to vector<16x16x128xf32>
    %c1_149 = arith.constant 1 : index
    %c8_150 = arith.constant 8 : index
    %c0_151 = arith.constant 0 : index
    %174 = vector.load %arg14[%c1_149, %c8_150, %c0_151] : memref<18x32x128xf32, #tpu.memory_space<vmem>>, vector<16x16x128xf32>
    tpu.vector_store %arg14[%c1_149, %c8_150, %c0_151], %173 {strides = array<i32>} : memref<18x32x128xf32, #tpu.memory_space<vmem>>, vector<16x16x128xf32>,
    %c0_152 = arith.constant 0 : index
    %c7_153 = arith.constant 7 : index
    %c0_154 = arith.constant 0 : index
    %175 = vector.load %arg14[%c0_152, %c7_153, %c0_154] : memref<18x32x128xf32, #tpu.memory_space<vmem>>, vector<18x16x128xf32>
    %c0_155 = arith.constant 0 : index
    %c8_156 = arith.constant 8 : index
    %c0_157 = arith.constant 0 : index
    %176 = vector.load %arg14[%c0_155, %c8_156, %c0_157] : memref<18x32x128xf32, #tpu.memory_space<vmem>>, vector<18x16x128xf32>
    %c0_158 = arith.constant 0 : index
    %c9_159 = arith.constant 9 : index
    %c0_160 = arith.constant 0 : index
    %177 = vector.load %arg14[%c0_158, %c9_159, %c0_160] : memref<18x32x128xf32, #tpu.memory_space<vmem>>, vector<18x16x128xf32>
    %cst_161 = arith.constant 0.000000e+00 : f32
    %178 = vector.broadcast %cst_161 : f32 to vector<256x128xf32>
    %179 = vector.extract_strided_slice %175 {offsets = [0, 0, 0], sizes = [16, 16, 128], strides = [1, 1, 1]} : vector<18x16x128xf32> to vector<16x16x128xf32>
    %180 = vector.extract_strided_slice %176 {offsets = [0, 0, 0], sizes = [16, 16, 128], strides = [1, 1, 1]} : vector<18x16x128xf32> to vector<16x16x128xf32>
    %181 = vector.extract_strided_slice %177 {offsets = [0, 0, 0], sizes = [16, 16, 128], strides = [1, 1, 1]} : vector<18x16x128xf32> to vector<16x16x128xf32>
    %182 = tpu.concatenate %179, %180, %181 in 2 : vector<16x16x128xf32>, vector<16x16x128xf32>, vector<16x16x128xf32> -> vector<16x16x384xf32>
    %c0_162 = arith.constant 0 : index
    %c0_163 = arith.constant 0 : index
    %c0_164 = arith.constant 0 : index
    %c0_165 = arith.constant 0 : index
    %183 = vector.load %arg11[%c0_162, %c0_163, %c0_164, %c0_165] : memref<3x3x128x128xf32, #tpu.memory_space<vmem>>, vector<1x3x128x128xf32>
    %184 = vector.shape_cast %183 : vector<1x3x128x128xf32> to vector<3x128x128xf32>
    %185 = vector.shape_cast %184 : vector<3x128x128xf32> to vector<384x128xf32>
    %186 = vector.shape_cast %182 : vector<16x16x384xf32> to vector<256x384xf32>
    %cst_166 = arith.constant dense<0.000000e+00> : vector<256x128xf32>
    %187 = tpu.matmul %186, %185, %cst_166 {dimension_numbers = #tpu.dot_dimension_numbers<[1], [0], [0], [1], [0, 0, 1, 1], [], []>} : vector<256x384xf32>, vector<384x128xf32>, vector<256x128xf32> -> vector<256x128xf32>
    %188 = arith.addf %178, %187 : vector<256x128xf32>
    %189 = vector.extract_strided_slice %175 {offsets = [1, 0, 0], sizes = [16, 16, 128], strides = [1, 1, 1]} : vector<18x16x128xf32> to vector<16x16x128xf32>
    %190 = vector.extract_strided_slice %176 {offsets = [1, 0, 0], sizes = [16, 16, 128], strides = [1, 1, 1]} : vector<18x16x128xf32> to vector<16x16x128xf32>
    %191 = vector.extract_strided_slice %177 {offsets = [1, 0, 0], sizes = [16, 16, 128], strides = [1, 1, 1]} : vector<18x16x128xf32> to vector<16x16x128xf32>
    %192 = tpu.concatenate %189, %190, %191 in 2 : vector<16x16x128xf32>, vector<16x16x128xf32>, vector<16x16x128xf32> -> vector<16x16x384xf32>
    %c1_167 = arith.constant 1 : index
    %c0_168 = arith.constant 0 : index
    %c0_169 = arith.constant 0 : index
    %c0_170 = arith.constant 0 : index
    %193 = vector.load %arg11[%c1_167, %c0_168, %c0_169, %c0_170] : memref<3x3x128x128xf32, #tpu.memory_space<vmem>>, vector<1x3x128x128xf32>
    %194 = vector.shape_cast %193 : vector<1x3x128x128xf32> to vector<3x128x128xf32>
    %195 = vector.shape_cast %194 : vector<3x128x128xf32> to vector<384x128xf32>
    %196 = vector.shape_cast %192 : vector<16x16x384xf32> to vector<256x384xf32>
    %cst_171 = arith.constant dense<0.000000e+00> : vector<256x128xf32>
    %197 = tpu.matmul %196, %195, %cst_171 {dimension_numbers = #tpu.dot_dimension_numbers<[1], [0], [0], [1], [0, 0, 1, 1], [], []>} : vector<256x384xf32>, vector<384x128xf32>, vector<256x128xf32> -> vector<256x128xf32>
    %198 = arith.addf %188, %197 : vector<256x128xf32>
    %199 = vector.extract_strided_slice %175 {offsets = [2, 0, 0], sizes = [16, 16, 128], strides = [1, 1, 1]} : vector<18x16x128xf32> to vector<16x16x128xf32>
    %200 = vector.extract_strided_slice %176 {offsets = [2, 0, 0], sizes = [16, 16, 128], strides = [1, 1, 1]} : vector<18x16x128xf32> to vector<16x16x128xf32>
    %201 = vector.extract_strided_slice %177 {offsets = [2, 0, 0], sizes = [16, 16, 128], strides = [1, 1, 1]} : vector<18x16x128xf32> to vector<16x16x128xf32>
    %202 = tpu.concatenate %199, %200, %201 in 2 : vector<16x16x128xf32>, vector<16x16x128xf32>, vector<16x16x128xf32> -> vector<16x16x384xf32>
    %c2_172 = arith.constant 2 : index
    %c0_173 = arith.constant 0 : index
    %c0_174 = arith.constant 0 : index
    %c0_175 = arith.constant 0 : index
    %203 = vector.load %arg11[%c2_172, %c0_173, %c0_174, %c0_175] : memref<3x3x128x128xf32, #tpu.memory_space<vmem>>, vector<1x3x128x128xf32>
    %204 = vector.shape_cast %203 : vector<1x3x128x128xf32> to vector<3x128x128xf32>
    %205 = vector.shape_cast %204 : vector<3x128x128xf32> to vector<384x128xf32>
    %206 = vector.shape_cast %202 : vector<16x16x384xf32> to vector<256x384xf32>
    %cst_176 = arith.constant dense<0.000000e+00> : vector<256x128xf32>
    %207 = tpu.matmul %206, %205, %cst_176 {dimension_numbers = #tpu.dot_dimension_numbers<[1], [0], [0], [1], [0, 0, 1, 1], [], []>} : vector<256x384xf32>, vector<384x128xf32>, vector<256x128xf32> -> vector<256x128xf32>
    %208 = arith.addf %198, %207 : vector<256x128xf32>
    %c0_177 = arith.constant 0 : index
    %c0_178 = arith.constant 0 : index
    %209 = vector.load %arg12[%c0_177, %c0_178] : memref<1x128xf32, #tpu.memory_space<vmem>>, vector<1x128xf32>
    %210 = vector.broadcast %209 : vector<1x128xf32> to vector<256x128xf32>
    %211 = arith.addf %208, %210 : vector<256x128xf32>
    %212 = vector.extract_strided_slice %106 {offsets = [0, 0], sizes = [256, 64], strides = [1, 1]} : vector<256x256xf32> to vector<256x64xf32>
    %213 = vector.extract_strided_slice %106 {offsets = [0, 64], sizes = [256, 64], strides = [1, 1]} : vector<256x256xf32> to vector<256x64xf32>
    %214 = vector.extract_strided_slice %106 {offsets = [0, 128], sizes = [256, 64], strides = [1, 1]} : vector<256x256xf32> to vector<256x64xf32>
    %215 = vector.extract_strided_slice %106 {offsets = [0, 192], sizes = [256, 64], strides = [1, 1]} : vector<256x256xf32> to vector<256x64xf32>
    %216 = vector.extract_strided_slice %211 {offsets = [0, 0], sizes = [256, 64], strides = [1, 1]} : vector<256x128xf32> to vector<256x64xf32>
    %217 = vector.extract_strided_slice %211 {offsets = [0, 64], sizes = [256, 64], strides = [1, 1]} : vector<256x128xf32> to vector<256x64xf32>
    %cst_179 = arith.constant 1.000000e+00 : f32
    %218 = vector.broadcast %cst_179 : f32 to vector<256x64xf32>
    %219 = arith.addf %218, %212 : vector<256x64xf32>
    %220 = arith.mulf %216, %219 : vector<256x64xf32>
    %221 = arith.addf %220, %213 : vector<256x64xf32>
    %cst_180 = arith.constant 1.000000e+00 : f32
    %222 = vector.broadcast %cst_180 : f32 to vector<256x64xf32>
    %223 = arith.addf %222, %214 : vector<256x64xf32>
    %224 = arith.mulf %217, %223 : vector<256x64xf32>
    %225 = arith.addf %224, %215 : vector<256x64xf32>
    %c0_181 = arith.constant 0 : index
    %c0_182 = arith.constant 0 : index
    %c0_183 = arith.constant 0 : index
    %c0_184 = arith.constant 0 : index
    %226 = vector.load %arg3[%c0_181, %c0_182, %c0_183, %c0_184] : memref<1x16x16x64xf32, #tpu.memory_space<vmem>>, vector<1x16x16x64xf32>
    %227 = vector.shape_cast %226 : vector<1x16x16x64xf32> to vector<16x16x64xf32>
    %228 = vector.shape_cast %227 : vector<16x16x64xf32> to vector<256x64xf32>
    %cst_185 = arith.constant dense<0.000000e+00> : vector<64xf32>
    %229 = vector.multi_reduction <add>, %228, %cst_185 [0] : vector<256x64xf32> to vector<64xf32>
    %230 = vector.shape_cast %229 : vector<64xf32> to vector<1x64xf32>
    %231 = vector.shape_cast %230 : vector<1x64xf32> to vector<1x64xf32>
    %232 = vector.broadcast %231 : vector<1x64xf32> to vector<8x64xf32>
    %233 = arith.mulf %228, %228 : vector<256x64xf32>
    %cst_186 = arith.constant dense<0.000000e+00> : vector<64xf32>
    %234 = vector.multi_reduction <add>, %233, %cst_186 [0] : vector<256x64xf32> to vector<64xf32>
    %235 = vector.shape_cast %234 : vector<64xf32> to vector<1x64xf32>
    %236 = vector.shape_cast %235 : vector<1x64xf32> to vector<1x64xf32>
    %237 = vector.broadcast %236 : vector<1x64xf32> to vector<8x64xf32>
    %c0_187 = arith.constant 0 : index
    %c0_188 = arith.constant 0 : index
    %238 = vector.load %arg4[%c0_187, %c0_188] : memref<64x64xf32, #tpu.memory_space<vmem>>, vector<64x64xf32>
    %cst_189 = arith.constant dense<0.000000e+00> : vector<8x64xf32>
    %239 = tpu.matmul %232, %238, %cst_189 {dimension_numbers = #tpu.dot_dimension_numbers<[1], [0], [0], [1], [0, 0, 1, 1], [], []>} : vector<8x64xf32>, vector<64x64xf32>, vector<8x64xf32> -> vector<8x64xf32>
    %240 = vector.extract_strided_slice %239 {offsets = [0, 0], sizes = [1, 64], strides = [1, 1]} : vector<8x64xf32> to vector<1x64xf32>
    %c0_190 = arith.constant 0 : index
    %c0_191 = arith.constant 0 : index
    %241 = vector.load %arg4[%c0_190, %c0_191] : memref<64x64xf32, #tpu.memory_space<vmem>>, vector<64x64xf32>
    %cst_192 = arith.constant dense<0.000000e+00> : vector<8x64xf32>
    %242 = tpu.matmul %237, %241, %cst_192 {dimension_numbers = #tpu.dot_dimension_numbers<[1], [0], [0], [1], [0, 0, 1, 1], [], []>} : vector<8x64xf32>, vector<64x64xf32>, vector<8x64xf32> -> vector<8x64xf32>
    %243 = vector.extract_strided_slice %242 {offsets = [0, 0], sizes = [1, 64], strides = [1, 1]} : vector<8x64xf32> to vector<1x64xf32>
    %244 = arith.mulf %240, %240 : vector<1x64xf32>
    %245 = arith.subf %243, %244 : vector<1x64xf32>
    %cst_193 = arith.constant 0.000000e+00 : f32
    %246 = vector.broadcast %cst_193 : f32 to vector<1x64xf32>
    %247 = arith.maximumf %245, %246 : vector<1x64xf32>
    %cst_194 = arith.constant 9.99999974E-6 : f32
    %248 = vector.broadcast %cst_194 : f32 to vector<1x64xf32>
    %249 = arith.addf %247, %248 : vector<1x64xf32>
    %250 = math.rsqrt %249 : vector<1x64xf32>
    %251 = vector.broadcast %240 : vector<1x64xf32> to vector<256x64xf32>
    %252 = arith.subf %228, %251 : vector<256x64xf32>
    %253 = vector.broadcast %250 : vector<1x64xf32> to vector<256x64xf32>
    %254 = arith.mulf %252, %253 : vector<256x64xf32>
    %cst_195 = arith.constant 1.000000e+00 : f32
    %255 = vector.broadcast %cst_195 : f32 to vector<256x64xf32>
    %256 = arith.addf %255, %221 : vector<256x64xf32>
    %257 = arith.mulf %254, %256 : vector<256x64xf32>
    %258 = arith.addf %257, %225 : vector<256x64xf32>
    %259 = vector.shape_cast %258 : vector<256x64xf32> to vector<16x16x64xf32>
    %c0_196 = arith.constant 0 : index
    %c0_197 = arith.constant 0 : index
    %c0_198 = arith.constant 0 : index
    %c0_199 = arith.constant 0 : index
    %260 = vector.load %arg13[%c0_196, %c0_197, %c0_198, %c0_199] : memref<1x16x16x64xf32, #tpu.memory_space<vmem>>, vector<1x16x16x64xf32>
    %261 = vector.shape_cast %260 : vector<1x16x16x64xf32> to vector<16x16x64xf32>
    %262 = vector.shape_cast %259 : vector<16x16x64xf32> to vector<1x16x16x64xf32>
    tpu.vector_store %arg13[%c0_196, %c0_197, %c0_198, %c0_199], %262 {strides = array<i32>} : memref<1x16x16x64xf32, #tpu.memory_space<vmem>>, vector<1x16x16x64xf32>,
    return
  }
  func.func @transform_0(%arg0: i32) -> (i32, i32, i32, i32) {
    %c0_i32 = arith.constant 0 : i32
    %c0_i32_0 = arith.constant 0 : i32
    %c0_i32_1 = arith.constant 0 : i32
    %c0_i32_2 = arith.constant 0 : i32
    return %arg0, %c0_i32, %c0_i32_0, %c0_i32_1 : i32, i32, i32, i32
  }
  func.func @transform_1(%arg0: i32) -> (i32, i32, i32, i32) {
    %c0_i32 = arith.constant 0 : i32
    %c0_i32_0 = arith.constant 0 : i32
    %c0_i32_1 = arith.constant 0 : i32
    %c0_i32_2 = arith.constant 0 : i32
    return %arg0, %c0_i32, %c0_i32_0, %c0_i32_1 : i32, i32, i32, i32
  }
  func.func @transform_2(%arg0: i32) -> (i32, i32, i32, i32) {
    %c0_i32 = arith.constant 0 : i32
    %c0_i32_0 = arith.constant 0 : i32
    %c0_i32_1 = arith.constant 0 : i32
    %c0_i32_2 = arith.constant 0 : i32
    return %arg0, %c0_i32, %c0_i32_0, %c0_i32_1 : i32, i32, i32, i32
  }
  func.func @transform_3(%arg0: i32) -> (i32, i32) {
    %c0_i32 = arith.constant 0 : i32
    %c0_i32_0 = arith.constant 0 : i32
    %c0_i32_1 = arith.constant 0 : i32
    return %c0_i32, %c0_i32_0 : i32, i32
  }
  func.func @transform_4(%arg0: i32) -> (i32, i32, i32, i32) {
    %c0_i32 = arith.constant 0 : i32
    %c0_i32_0 = arith.constant 0 : i32
    %c0_i32_1 = arith.constant 0 : i32
    %c0_i32_2 = arith.constant 0 : i32
    %c0_i32_3 = arith.constant 0 : i32
    return %c0_i32, %c0_i32_0, %c0_i32_1, %c0_i32_2 : i32, i32, i32, i32
  }
  func.func @transform_5(%arg0: i32) -> (i32, i32) {
    %c0_i32 = arith.constant 0 : i32
    %c0_i32_0 = arith.constant 0 : i32
    %c0_i32_1 = arith.constant 0 : i32
    return %c0_i32, %c0_i32_0 : i32, i32
  }
  func.func @transform_6(%arg0: i32) -> (i32, i32, i32, i32) {
    %c0_i32 = arith.constant 0 : i32
    %c0_i32_0 = arith.constant 0 : i32
    %c0_i32_1 = arith.constant 0 : i32
    %c0_i32_2 = arith.constant 0 : i32
    %c0_i32_3 = arith.constant 0 : i32
    return %c0_i32, %c0_i32_0, %c0_i32_1, %c0_i32_2 : i32, i32, i32, i32
  }
  func.func @transform_7(%arg0: i32) -> (i32, i32) {
    %c0_i32 = arith.constant 0 : i32
    %c0_i32_0 = arith.constant 0 : i32
    %c0_i32_1 = arith.constant 0 : i32
    return %c0_i32, %c0_i32_0 : i32, i32
  }
  func.func @transform_8(%arg0: i32) -> (i32, i32, i32, i32) {
    %c0_i32 = arith.constant 0 : i32
    %c0_i32_0 = arith.constant 0 : i32
    %c0_i32_1 = arith.constant 0 : i32
    %c0_i32_2 = arith.constant 0 : i32
    %c0_i32_3 = arith.constant 0 : i32
    return %c0_i32, %c0_i32_0, %c0_i32_1, %c0_i32_2 : i32, i32, i32, i32
  }
  func.func @transform_9(%arg0: i32) -> (i32, i32) {
    %c0_i32 = arith.constant 0 : i32
    %c0_i32_0 = arith.constant 0 : i32
    %c0_i32_1 = arith.constant 0 : i32
    return %c0_i32, %c0_i32_0 : i32, i32
  }
  func.func @transform_10(%arg0: i32) -> (i32, i32, i32, i32) {
    %c0_i32 = arith.constant 0 : i32
    %c0_i32_0 = arith.constant 0 : i32
    %c0_i32_1 = arith.constant 0 : i32
    %c0_i32_2 = arith.constant 0 : i32
    %c0_i32_3 = arith.constant 0 : i32
    return %c0_i32, %c0_i32_0, %c0_i32_1, %c0_i32_2 : i32, i32, i32, i32
  }
  func.func @transform_11(%arg0: i32) -> (i32, i32) {
    %c0_i32 = arith.constant 0 : i32
    %c0_i32_0 = arith.constant 0 : i32
    %c0_i32_1 = arith.constant 0 : i32
    return %c0_i32, %c0_i32_0 : i32, i32
  }
  func.func @transform_12(%arg0: i32) -> (i32, i32, i32, i32) {
    %c0_i32 = arith.constant 0 : i32
    %c0_i32_0 = arith.constant 0 : i32
    %c0_i32_1 = arith.constant 0 : i32
    %c0_i32_2 = arith.constant 0 : i32
    return %arg0, %c0_i32, %c0_i32_0, %c0_i32_1 : i32, i32, i32, i32
  }
}

</mosaic_0001>

<bundles_post_ra>
// kernel: spm_group_norm_forward.5
= control target key start
LH: loop header
LB: loop body
LE: loop exit
PB: predicated region body
PF: predicated region fallthrough
CT: control target
= control target key end

     0   :  { %vm44_vm0 = vcmask 64512   ;;  %vm366_vm1 = vcmask 130048   ;;  %s794_s1 = inlined_call_operand.vmem [shape: f32[8,16], index: 1, kind: input, shape index: {}]   ;;  %s795_s0 = inlined_call_operand.vmem [shape: f32[256,8], index: 0, kind: input, shape index: {}]   ;;  %s796_s2 = inlined_call_operand.vmem [shape: f32[256,16], index: 2, kind: output, shape index: {}]  }
   0x1   :  { %v43_v0 = vld [vmem:[%s794_s1] sm:$0xff]  ;;  %v12_v3 = vld [vmem:[%s795_s0 + $0x8] sm:$0xff]  ;;  %v13_v5 = vld [vmem:[%s795_s0 + $0x10] sm:$0xff] }
   0x2   :  { %v11_v1 = vld [vmem:[%s795_s0] sm:$0xff]  ;;  %468 = vmatprep.subr.mxu0 %v43_v0  ;;  %518 = vmatprep.subr.mxu1 %v43_v0  ;;  %v28_v4 = vld [vmem:[%s795_s0 + $0x88] sm:$0xff]  ;;  %v29_v6 = vld [vmem:[%s795_s0 + $0x90] sm:$0xff] }
   0x3   :  { %v27_v2 = vld [vmem:[%s795_s0 + $0x80] sm:$0xff]  ;;  %469 = vmatpush3.msra.mxu0 %v43_v0  ;;  %519 = vmatpush3.msra.mxu1 %v43_v0  ;;  %v14_v7 = vld [vmem:[%s795_s0 + $0x18] sm:$0xff]  ;;  %v16_v11 = vld [vmem:[%s795_s0 + $0x28] sm:$0xff] }
   0x4   :  { %470 = vmatprep.mubr.msk.f32.mxu0 %vm44_vm0, %v11_v1  ;;  %494 = vmatprep.mubr.msk.f32.mxu1 %vm44_vm0, %v27_v2  ;;  %v30_v8 = vld [vmem:[%s795_s0 + $0x98] sm:$0xff]  ;;  %v15_v9 = vld [vmem:[%s795_s0 + $0x20] sm:$0xff]  ;;  %v32_v12 = vld [vmem:[%s795_s0 + $0xa8] sm:$0xff] }
   0x5   :  { %471 = vmatmul.mubr.msk.f32.vlgmr.msra.gmra.mrb[0].mxu0 %vm44_vm0, %v12_v3  ;;  %495 = vmatmul.mubr.msk.f32.vlgmr.msra.gmra.mrb[0].mxu1 %vm44_vm0, %v28_v4  ;;  %v31_v10 = vld [vmem:[%s795_s0 + $0xa0] sm:$0xff]  ;;  %v17_v13 = vld [vmem:[%s795_s0 + $0x30] sm:$0xff]  ;;  %v18_v15 = vld [vmem:[%s795_s0 + $0x38] sm:$0xff] }
   0x6   :  { %473 = vmatprep.mubr.msk.f32.mxu0 %vm44_vm0, %v13_v5  ;;  %497 = vmatprep.mubr.msk.f32.mxu1 %vm44_vm0, %v29_v6  ;;  %v33_v14 = vld [vmem:[%s795_s0 + $0xb0] sm:$0xff]  ;;  %v34_v16 = vld [vmem:[%s795_s0 + $0xb8] sm:$0xff]  ;;  %v19_v17 = vld [vmem:[%s795_s0 + $0x40] sm:$0xff] }
   0x7   :  { %v35_v18 = vld [vmem:[%s795_s0 + $0xc0] sm:$0xff]  ;;  %v20_v19 = vld [vmem:[%s795_s0 + $0x48] sm:$0xff]  ;;  %v21_v21 = vld [vmem:[%s795_s0 + $0x50] sm:$0xff] }
   0x8   :  { %v36_v20 = vld [vmem:[%s795_s0 + $0xc8] sm:$0xff]  ;;  %v37_v22 = vld [vmem:[%s795_s0 + $0xd0] sm:$0xff]  ;;  %v22_v23 = vld [vmem:[%s795_s0 + $0x58] sm:$0xff] }
   0x9   :  { %474 = vmatmul.mubr.msk.f32.gmra.mrb[2].mxu0 %vm44_vm0, %v14_v7  ;;  %498 = vmatmul.mubr.msk.f32.gmra.mrb[2].mxu1 %vm44_vm0, %v30_v8  ;;  %v38_v24 = vld [vmem:[%s795_s0 + $0xd8] sm:$0xff]  ;;  %v23_v25 = vld [vmem:[%s795_s0 + $0x60] sm:$0xff]  ;;  %v24_v27 = vld [vmem:[%s795_s0 + $0x68] sm:$0xff] }
   0xa   :  { %476 = vmatprep.mubr.msk.f32.mxu0 %vm44_vm0, %v15_v9  ;;  %500 = vmatprep.mubr.msk.f32.mxu1 %vm44_vm0, %v31_v10  ;;  %v39_v26 = vld [vmem:[%s795_s0 + $0xe0] sm:$0xff]  ;;  %v40_v28 = vld [vmem:[%s795_s0 + $0xe8] sm:$0xff]  ;;  %v25_v29 = vld [vmem:[%s795_s0 + $0x70] sm:$0xff] }
   0xb   :  { %v41_v30 = vld [vmem:[%s795_s0 + $0xf0] sm:$0xff]  ;;  %v26_v31 = vld [vmem:[%s795_s0 + $0x78] sm:$0xff] }
   0xc   :  { %v42_v32 = vld [vmem:[%s795_s0 + $0xf8] sm:$0xff] }
   0xd   :  { %477 = vmatmul.mubr.msk.f32.gmra.mrb[4].mxu0 %vm44_vm0, %v16_v11  ;;  %501 = vmatmul.mubr.msk.f32.gmra.mrb[4].mxu1 %vm44_vm0, %v32_v12 }
   0xe   :  { %479 = vmatprep.mubr.msk.f32.mxu0 %vm44_vm0, %v17_v13  ;;  %503 = vmatprep.mubr.msk.f32.mxu1 %vm44_vm0, %v33_v14 }
  0x11   :  { %480 = vmatmul.mubr.msk.f32.gmra.mrb[6].mxu0 %vm44_vm0, %v18_v15  ;;  %504 = vmatmul.mubr.msk.f32.gmra.mrb[6].mxu1 %vm44_vm0, %v34_v16 }
  0x12   :  { %482 = vmatprep.mubr.msk.f32.mxu0 %vm44_vm0, %v19_v17  ;;  %506 = vmatprep.mubr.msk.f32.mxu1 %vm44_vm0, %v35_v18 }
  0x15   :  { %483 = vmatmul.mubr.msk.f32.gmra.mrb[8].mxu0 %vm44_vm0, %v20_v19  ;;  %507 = vmatmul.mubr.msk.f32.gmra.mrb[8].mxu1 %vm44_vm0, %v36_v20 }
  0x16   :  { %485 = vmatprep.mubr.msk.f32.mxu0 %vm44_vm0, %v21_v21  ;;  %509 = vmatprep.mubr.msk.f32.mxu1 %vm44_vm0, %v37_v22 }
  0x19   :  { %486 = vmatmul.mubr.msk.f32.gmra.mrb[10].mxu0 %vm44_vm0, %v22_v23  ;;  %510 = vmatmul.mubr.msk.f32.gmra.mrb[10].mxu1 %vm44_vm0, %v38_v24 }
  0x1a   :  { %488 = vmatprep.mubr.msk.f32.mxu0 %vm44_vm0, %v23_v25  ;;  %512 = vmatprep.mubr.msk.f32.mxu1 %vm44_vm0, %v39_v26 }
  0x1d   :  { %489 = vmatmul.mubr.msk.f32.gmra.mrb[12].mxu0 %vm44_vm0, %v24_v27  ;;  %513 = vmatmul.mubr.msk.f32.gmra.mrb[12].mxu1 %vm44_vm0, %v40_v28 }
  0x1e   :  { %491 = vmatprep.mubr.msk.f32.mxu0 %vm44_vm0, %v25_v29  ;;  %515 = vmatprep.mubr.msk.f32.mxu1 %vm44_vm0, %v41_v30 }
  0x21   :  { %492 = vmatmul.mubr.msk.f32.gmra.mrb[14].mxu0 %vm44_vm0, %v26_v31  ;;  %516 = vmatmul.mubr.msk.f32.gmra.mrb[14].mxu1 %vm44_vm0, %v42_v32 }
  0xd8   :  { %v472_v33 = vpop.f32.mrb[0].mxu0  ;;  %v496_v34 = vpop.f32.mrb[0].mxu1 }
  0xd9   :  { %368 = vst.msk [vmem:[%s796_s2 + $0x8] sm:$0xff] %vm366_vm1, %v472_v33  ;;  %384 = vst.msk [vmem:[%s796_s2 + $0x88] sm:$0xff] %vm366_vm1, %v496_v34  ;;  %v207_v35 = vpop.f32.mrb[1].mxu0  ;;  %v287_v36 = vpop.f32.mrb[1].mxu1 }
  0xda   :  { %367 = vst.msk [vmem:[%s796_s2] sm:$0xff] %vm366_vm1, %v207_v35  ;;  %383 = vst.msk [vmem:[%s796_s2 + $0x80] sm:$0xff] %vm366_vm1, %v287_v36 }
  0xdc   :  { %v475_v37 = vpop.f32.mrb[2].mxu0  ;;  %v499_v38 = vpop.f32.mrb[2].mxu1 }
  0xdd   :  { %370 = vst.msk [vmem:[%s796_s2 + $0x18] sm:$0xff] %vm366_vm1, %v475_v37  ;;  %386 = vst.msk [vmem:[%s796_s2 + $0x98] sm:$0xff] %vm366_vm1, %v499_v38  ;;  %v217_v39 = vpop.f32.mrb[3].mxu0  ;;  %v297_v40 = vpop.f32.mrb[3].mxu1 }
  0xde   :  { %369 = vst.msk [vmem:[%s796_s2 + $0x10] sm:$0xff] %vm366_vm1, %v217_v39  ;;  %385 = vst.msk [vmem:[%s796_s2 + $0x90] sm:$0xff] %vm366_vm1, %v297_v40 }
  0xe0   :  { %v478_v41 = vpop.f32.mrb[4].mxu0  ;;  %v502_v42 = vpop.f32.mrb[4].mxu1 }
  0xe1   :  { %372 = vst.msk [vmem:[%s796_s2 + $0x28] sm:$0xff] %vm366_vm1, %v478_v41  ;;  %388 = vst.msk [vmem:[%s796_s2 + $0xa8] sm:$0xff] %vm366_vm1, %v502_v42  ;;  %v227_v43 = vpop.f32.mrb[5].mxu0  ;;  %v307_v44 = vpop.f32.mrb[5].mxu1 }
  0xe2   :  { %371 = vst.msk [vmem:[%s796_s2 + $0x20] sm:$0xff] %vm366_vm1, %v227_v43  ;;  %387 = vst.msk [vmem:[%s796_s2 + $0xa0] sm:$0xff] %vm366_vm1, %v307_v44 }
  0xe4   :  { %v481_v45 = vpop.f32.mrb[6].mxu0  ;;  %v505_v46 = vpop.f32.mrb[6].mxu1 }
  0xe5   :  { %374 = vst.msk [vmem:[%s796_s2 + $0x38] sm:$0xff] %vm366_vm1, %v481_v45  ;;  %390 = vst.msk [vmem:[%s796_s2 + $0xb8] sm:$0xff] %vm366_vm1, %v505_v46  ;;  %v237_v47 = vpop.f32.mrb[7].mxu0  ;;  %v317_v48 = vpop.f32.mrb[7].mxu1 }
  0xe6   :  { %373 = vst.msk [vmem:[%s796_s2 + $0x30] sm:$0xff] %vm366_vm1, %v237_v47  ;;  %389 = vst.msk [vmem:[%s796_s2 + $0xb0] sm:$0xff] %vm366_vm1, %v317_v48 }
  0xe8   :  { %v484_v49 = vpop.f32.mrb[8].mxu0  ;;  %v508_v50 = vpop.f32.mrb[8].mxu1 }
  0xe9   :  { %376 = vst.msk [vmem:[%s796_s2 + $0x48] sm:$0xff] %vm366_vm1, %v484_v49  ;;  %392 = vst.msk [vmem:[%s796_s2 + $0xc8] sm:$0xff] %vm366_vm1, %v508_v50  ;;  %v247_v51 = vpop.f32.mrb[9].mxu0  ;;  %v327_v52 = vpop.f32.mrb[9].mxu1 }
  0xea   :  { %375 = vst.msk [vmem:[%s796_s2 + $0x40] sm:$0xff] %vm366_vm1, %v247_v51  ;;  %391 = vst.msk [vmem:[%s796_s2 + $0xc0] sm:$0xff] %vm366_vm1, %v327_v52 }
  0xec   :  { %v487_v53 = vpop.f32.mrb[10].mxu0  ;;  %v511_v54 = vpop.f32.mrb[10].mxu1 }
  0xed   :  { %378 = vst.msk [vmem:[%s796_s2 + $0x58] sm:$0xff] %vm366_vm1, %v487_v53  ;;  %394 = vst.msk [vmem:[%s796_s2 + $0xd8] sm:$0xff] %vm366_vm1, %v511_v54  ;;  %v257_v55 = vpop.f32.mrb[11].mxu0  ;;  %v337_v56 = vpop.f32.mrb[11].mxu1 }
  0xee   :  { %377 = vst.msk [vmem:[%s796_s2 + $0x50] sm:$0xff] %vm366_vm1, %v257_v55  ;;  %393 = vst.msk [vmem:[%s796_s2 + $0xd0] sm:$0xff] %vm366_vm1, %v337_v56 }
  0xf0   :  { %v490_v57 = vpop.f32.mrb[12].mxu0  ;;  %v514_v58 = vpop.f32.mrb[12].mxu1 }
  0xf1   :  { %380 = vst.msk [vmem:[%s796_s2 + $0x68] sm:$0xff] %vm366_vm1, %v490_v57  ;;  %396 = vst.msk [vmem:[%s796_s2 + $0xe8] sm:$0xff] %vm366_vm1, %v514_v58  ;;  %v267_v59 = vpop.f32.mrb[13].mxu0  ;;  %v347_v60 = vpop.f32.mrb[13].mxu1 }
  0xf2   :  { %379 = vst.msk [vmem:[%s796_s2 + $0x60] sm:$0xff] %vm366_vm1, %v267_v59  ;;  %395 = vst.msk [vmem:[%s796_s2 + $0xe0] sm:$0xff] %vm366_vm1, %v347_v60 }
  0xf4   :  { %v493_v61 = vpop.f32.mrb[14].mxu0  ;;  %v517_v62 = vpop.f32.mrb[14].mxu1 }
  0xf5   :  { %382 = vst.msk [vmem:[%s796_s2 + $0x78] sm:$0xff] %vm366_vm1, %v493_v61  ;;  %398 = vst.msk [vmem:[%s796_s2 + $0xf8] sm:$0xff] %vm366_vm1, %v517_v62  ;;  %v277_v63 = vpop.f32.mrb[15].mxu0  ;;  %v357_v0 = vpop.f32.mrb[15].mxu1 }
  0xf6   :  { %381 = vst.msk [vmem:[%s796_s2 + $0x70] sm:$0xff] %vm366_vm1, %v277_v63  ;;  %397 = vst.msk [vmem:[%s796_s2 + $0xf0] sm:$0xff] %vm366_vm1, %v357_v0 }

// kernel: spm_group_norm_forward.6
= control target key start
LH: loop header
LB: loop body
LE: loop exit
PB: predicated region body
PF: predicated region fallthrough
CT: control target
= control target key end

     0   :  { %s750_s9 = smov 0   ;;  %s909_s0 = inlined_call_operand.vmem [shape: f32[512,8], index: 0, kind: input, shape index: {}]   ;;  %s910_s1 = inlined_call_operand.vmem [shape: f32[8,16], index: 1, kind: input, shape index: {}]   ;;  %s911_s2 = inlined_call_operand.vmem [shape: f32[512,16], index: 2, kind: output, shape index: {}]  }
   0x1 LB: > { %s591_s10 = sadd.s32 4294967295, %s733_s9   ;;  %p595_p0 = scmp.ge.s32.totalorder %s733_s9, 1  ;;  %s733_s9 = sphi %s750_s9, %s12_s9  }
   0x2   : > { %p113_p1 = scmp.lt.s32.totalorder %s733_s9, 3 }
   0x4   : > { %p114_p2 = pnand %p595_p0, %p113_p1 }
   0x5   : > { %v179_v0 = vld [vmem:[%s910_s1] sm:$0xff] (!%p114_p2)  ;;  %s596_s13 = sshll.u32 (!%p114_p2), %s591_s10, 5  ;;  %vm180_vm0 = vcmask (!%p114_p2), 64512   ;;  %vm502_vm1 = vcmask (!%p114_p2), 130048  }
   0x6   : > { %117 = sbr.rel (%p114_p2) target bundleno = 261 (0x105), region = 28  ;;  %667 = vmatprep.subr.mxu0 (!%p114_p2), %v179_v0  ;;  %717 = vmatprep.subr.mxu1 (!%p114_p2), %v179_v0  ;;  %p136_p3 = scmp.lt.s32.totalorder (!%p114_p2), %s596_s13, 63 }
   0x7   : > { %668 = vmatpush3.msra.mxu0 (!%p114_p2), %v179_v0  ;;  %718 = vmatpush3.msra.mxu1 (!%p114_p2), %v179_v0 }
   0xd   : > { %s913_s13 = smov (!%p136_p3, %s596_s13), 63 }
   0xe   : > { %s597_s14 = sshll.u32 %s913_s13, 3 }
   0xf   : > { %s769_s17 = scalar_lea.vmem %s909_s0, %s597_s14  ;;  %s840_s20 = scalar_lea.vmem %s911_s2, %s597_s14 }
  0x10   : > { %v147_v1 = vld [vmem:[%s769_s17] sm:$0xff]  ;;  %v148_v3 = vld [vmem:[%s769_s17 + $0x8] sm:$0xff]  ;;  %v149_v5 = vld [vmem:[%s769_s17 + $0x10] sm:$0xff] }
  0x11   : > { %v163_v2 = vld [vmem:[%s769_s17 + $0x80] sm:$0xff]  ;;  %669 = vmatprep.mubr.msk.f32.mxu0 %vm180_vm0, %v147_v1  ;;  %v164_v4 = vld [vmem:[%s769_s17 + $0x88] sm:$0xff]  ;;  %v165_v6 = vld [vmem:[%s769_s17 + $0x90] sm:$0xff] }
  0x12   : > { %693 = vmatprep.mubr.msk.f32.mxu1 %vm180_vm0, %v163_v2  ;;  %670 = vmatmul.mubr.msk.f32.vlgmr.msra.gmra.mrb[0].mxu0 %vm180_vm0, %v148_v3  ;;  %v150_v7 = vld [vmem:[%s769_s17 + $0x18] sm:$0xff]  ;;  %v151_v9 = vld [vmem:[%s769_s17 + $0x20] sm:$0xff]  ;;  %v152_v11 = vld [vmem:[%s769_s17 + $0x28] sm:$0xff] }
  0x13   : > { %694 = vmatmul.mubr.msk.f32.vlgmr.msra.gmra.mrb[0].mxu1 %vm180_vm0, %v164_v4  ;;  %672 = vmatprep.mubr.msk.f32.mxu0 %vm180_vm0, %v149_v5  ;;  %v166_v8 = vld [vmem:[%s769_s17 + $0x98] sm:$0xff]  ;;  %v167_v10 = vld [vmem:[%s769_s17 + $0xa0] sm:$0xff]  ;;  %v168_v12 = vld [vmem:[%s769_s17 + $0xa8] sm:$0xff] }
  0x14   : > { %696 = vmatprep.mubr.msk.f32.mxu1 %vm180_vm0, %v165_v6  ;;  %v153_v13 = vld [vmem:[%s769_s17 + $0x30] sm:$0xff]  ;;  %v154_v15 = vld [vmem:[%s769_s17 + $0x38] sm:$0xff]  ;;  %v155_v17 = vld [vmem:[%s769_s17 + $0x40] sm:$0xff] }
  0x15   : > { %v169_v14 = vld [vmem:[%s769_s17 + $0xb0] sm:$0xff]  ;;  %v170_v16 = vld [vmem:[%s769_s17 + $0xb8] sm:$0xff]  ;;  %v171_v18 = vld [vmem:[%s769_s17 + $0xc0] sm:$0xff] }
  0x16   : > { %673 = vmatmul.mubr.msk.f32.gmra.mrb[2].mxu0 %vm180_vm0, %v150_v7  ;;  %v156_v19 = vld [vmem:[%s769_s17 + $0x48] sm:$0xff]  ;;  %v157_v21 = vld [vmem:[%s769_s17 + $0x50] sm:$0xff]  ;;  %v158_v23 = vld [vmem:[%s769_s17 + $0x58] sm:$0xff] }
  0x17   : > { %697 = vmatmul.mubr.msk.f32.gmra.mrb[2].mxu1 %vm180_vm0, %v166_v8  ;;  %675 = vmatprep.mubr.msk.f32.mxu0 %vm180_vm0, %v151_v9  ;;  %v172_v20 = vld [vmem:[%s769_s17 + $0xc8] sm:$0xff]  ;;  %v173_v22 = vld [vmem:[%s769_s17 + $0xd0] sm:$0xff]  ;;  %v174_v24 = vld [vmem:[%s769_s17 + $0xd8] sm:$0xff] }
  0x18   : > { %699 = vmatprep.mubr.msk.f32.mxu1 %vm180_vm0, %v167_v10  ;;  %v159_v25 = vld [vmem:[%s769_s17 + $0x60] sm:$0xff]  ;;  %v160_v27 = vld [vmem:[%s769_s17 + $0x68] sm:$0xff]  ;;  %v161_v29 = vld [vmem:[%s769_s17 + $0x70] sm:$0xff] }
  0x19   : > { %v175_v26 = vld [vmem:[%s769_s17 + $0xe0] sm:$0xff]  ;;  %v176_v28 = vld [vmem:[%s769_s17 + $0xe8] sm:$0xff]  ;;  %v177_v30 = vld [vmem:[%s769_s17 + $0xf0] sm:$0xff] }
  0x1a   : > { %676 = vmatmul.mubr.msk.f32.gmra.mrb[4].mxu0 %vm180_vm0, %v152_v11  ;;  %v162_v31 = vld [vmem:[%s769_s17 + $0x78] sm:$0xff] }
  0x1b   : > { %700 = vmatmul.mubr.msk.f32.gmra.mrb[4].mxu1 %vm180_vm0, %v168_v12  ;;  %678 = vmatprep.mubr.msk.f32.mxu0 %vm180_vm0, %v153_v13  ;;  %v178_v32 = vld [vmem:[%s769_s17 + $0xf8] sm:$0xff] }
  0x1c   : > { %702 = vmatprep.mubr.msk.f32.mxu1 %vm180_vm0, %v169_v14 }
  0x1e   : > { %679 = vmatmul.mubr.msk.f32.gmra.mrb[6].mxu0 %vm180_vm0, %v154_v15 }
  0x1f   : > { %703 = vmatmul.mubr.msk.f32.gmra.mrb[6].mxu1 %vm180_vm0, %v170_v16  ;;  %681 = vmatprep.mubr.msk.f32.mxu0 %vm180_vm0, %v155_v17 }
  0x20   : > { %705 = vmatprep.mubr.msk.f32.mxu1 %vm180_vm0, %v171_v18 }
  0x22   : > { %682 = vmatmul.mubr.msk.f32.gmra.mrb[8].mxu0 %vm180_vm0, %v156_v19 }
  0x23   : > { %706 = vmatmul.mubr.msk.f32.gmra.mrb[8].mxu1 %vm180_vm0, %v172_v20  ;;  %684 = vmatprep.mubr.msk.f32.mxu0 %vm180_vm0, %v157_v21 }
  0x24   : > { %708 = vmatprep.mubr.msk.f32.mxu1 %vm180_vm0, %v173_v22 }
  0x26   : > { %685 = vmatmul.mubr.msk.f32.gmra.mrb[10].mxu0 %vm180_vm0, %v158_v23 }
  0x27   : > { %709 = vmatmul.mubr.msk.f32.gmra.mrb[10].mxu1 %vm180_vm0, %v174_v24  ;;  %687 = vmatprep.mubr.msk.f32.mxu0 %vm180_vm0, %v159_v25 }
  0x28   : > { %711 = vmatprep.mubr.msk.f32.mxu1 %vm180_vm0, %v175_v26 }
  0x2a   : > { %688 = vmatmul.mubr.msk.f32.gmra.mrb[12].mxu0 %vm180_vm0, %v160_v27 }
  0x2b   : > { %712 = vmatmul.mubr.msk.f32.gmra.mrb[12].mxu1 %vm180_vm0, %v176_v28  ;;  %690 = vmatprep.mubr.msk.f32.mxu0 %vm180_vm0, %v161_v29 }
  0x2c   : > { %714 = vmatprep.mubr.msk.f32.mxu1 %vm180_vm0, %v177_v30 }
  0x2e   : > { %691 = vmatmul.mubr.msk.f32.gmra.mrb[14].mxu0 %vm180_vm0, %v162_v31 }
  0x2f   : > { %715 = vmatmul.mubr.msk.f32.gmra.mrb[14].mxu1 %vm180_vm0, %v178_v32 }
  0xe5   : > { %v671_v33 = vpop.f32.mrb[0].mxu0 }
  0xe6   : > { %v695_v34 = vpop.f32.mrb[0].mxu1  ;;  %504 = vst.msk [vmem:[%s840_s20 + $0x8] sm:$0xff] %vm502_vm1, %v671_v33  ;;  %v343_v35 = vpop.f32.mrb[1].mxu0 }
  0xe7   : > { %520 = vst.msk [vmem:[%s840_s20 + $0x88] sm:$0xff] %vm502_vm1, %v695_v34  ;;  %v423_v36 = vpop.f32.mrb[1].mxu1  ;;  %503 = vst.msk [vmem:[%s840_s20] sm:$0xff] %vm502_vm1, %v343_v35 }
  0xe8   : > { %519 = vst.msk [vmem:[%s840_s20 + $0x80] sm:$0xff] %vm502_vm1, %v423_v36 }
  0xe9   : > { %v674_v37 = vpop.f32.mrb[2].mxu0 }
  0xea   : > { %v698_v38 = vpop.f32.mrb[2].mxu1  ;;  %506 = vst.msk [vmem:[%s840_s20 + $0x18] sm:$0xff] %vm502_vm1, %v674_v37  ;;  %v353_v39 = vpop.f32.mrb[3].mxu0 }
  0xeb   : > { %522 = vst.msk [vmem:[%s840_s20 + $0x98] sm:$0xff] %vm502_vm1, %v698_v38  ;;  %v433_v40 = vpop.f32.mrb[3].mxu1  ;;  %505 = vst.msk [vmem:[%s840_s20 + $0x10] sm:$0xff] %vm502_vm1, %v353_v39 }
  0xec   : > { %521 = vst.msk [vmem:[%s840_s20 + $0x90] sm:$0xff] %vm502_vm1, %v433_v40 }
  0xed   : > { %v677_v41 = vpop.f32.mrb[4].mxu0 }
  0xee   : > { %v701_v42 = vpop.f32.mrb[4].mxu1  ;;  %508 = vst.msk [vmem:[%s840_s20 + $0x28] sm:$0xff] %vm502_vm1, %v677_v41  ;;  %v363_v43 = vpop.f32.mrb[5].mxu0 }
  0xef   : > { %524 = vst.msk [vmem:[%s840_s20 + $0xa8] sm:$0xff] %vm502_vm1, %v701_v42  ;;  %v443_v44 = vpop.f32.mrb[5].mxu1  ;;  %507 = vst.msk [vmem:[%s840_s20 + $0x20] sm:$0xff] %vm502_vm1, %v363_v43 }
  0xf0   : > { %523 = vst.msk [vmem:[%s840_s20 + $0xa0] sm:$0xff] %vm502_vm1, %v443_v44 }
  0xf1   : > { %v680_v45 = vpop.f32.mrb[6].mxu0 }
  0xf2   : > { %v704_v46 = vpop.f32.mrb[6].mxu1  ;;  %510 = vst.msk [vmem:[%s840_s20 + $0x38] sm:$0xff] %vm502_vm1, %v680_v45  ;;  %v373_v47 = vpop.f32.mrb[7].mxu0 }
  0xf3   : > { %526 = vst.msk [vmem:[%s840_s20 + $0xb8] sm:$0xff] %vm502_vm1, %v704_v46  ;;  %v453_v48 = vpop.f32.mrb[7].mxu1  ;;  %509 = vst.msk [vmem:[%s840_s20 + $0x30] sm:$0xff] %vm502_vm1, %v373_v47 }
  0xf4   : > { %525 = vst.msk [vmem:[%s840_s20 + $0xb0] sm:$0xff] %vm502_vm1, %v453_v48 }
  0xf5   : > { %v683_v49 = vpop.f32.mrb[8].mxu0 }
  0xf6   : > { %v707_v50 = vpop.f32.mrb[8].mxu1  ;;  %512 = vst.msk [vmem:[%s840_s20 + $0x48] sm:$0xff] %vm502_vm1, %v683_v49  ;;  %v383_v51 = vpop.f32.mrb[9].mxu0 }
  0xf7   : > { %528 = vst.msk [vmem:[%s840_s20 + $0xc8] sm:$0xff] %vm502_vm1, %v707_v50  ;;  %v463_v52 = vpop.f32.mrb[9].mxu1  ;;  %511 = vst.msk [vmem:[%s840_s20 + $0x40] sm:$0xff] %vm502_vm1, %v383_v51 }
  0xf8   : > { %527 = vst.msk [vmem:[%s840_s20 + $0xc0] sm:$0xff] %vm502_vm1, %v463_v52 }
  0xf9   : > { %v686_v53 = vpop.f32.mrb[10].mxu0 }
  0xfa   : > { %v710_v54 = vpop.f32.mrb[10].mxu1  ;;  %514 = vst.msk [vmem:[%s840_s20 + $0x58] sm:$0xff] %vm502_vm1, %v686_v53  ;;  %v393_v55 = vpop.f32.mrb[11].mxu0 }
  0xfb   : > { %530 = vst.msk [vmem:[%s840_s20 + $0xd8] sm:$0xff] %vm502_vm1, %v710_v54  ;;  %v473_v56 = vpop.f32.mrb[11].mxu1  ;;  %513 = vst.msk [vmem:[%s840_s20 + $0x50] sm:$0xff] %vm502_vm1, %v393_v55 }
  0xfc   : > { %529 = vst.msk [vmem:[%s840_s20 + $0xd0] sm:$0xff] %vm502_vm1, %v473_v56 }
  0xfd   : > { %v689_v57 = vpop.f32.mrb[12].mxu0 }
  0xfe   : > { %v713_v58 = vpop.f32.mrb[12].mxu1  ;;  %516 = vst.msk [vmem:[%s840_s20 + $0x68] sm:$0xff] %vm502_vm1, %v689_v57  ;;  %v403_v59 = vpop.f32.mrb[13].mxu0 }
  0xff   : > { %532 = vst.msk [vmem:[%s840_s20 + $0xe8] sm:$0xff] %vm502_vm1, %v713_v58  ;;  %v483_v60 = vpop.f32.mrb[13].mxu1  ;;  %515 = vst.msk [vmem:[%s840_s20 + $0x60] sm:$0xff] %vm502_vm1, %v403_v59 }
 0x100   : > { %531 = vst.msk [vmem:[%s840_s20 + $0xe0] sm:$0xff] %vm502_vm1, %v483_v60 }
 0x101   : > { %v692_v61 = vpop.f32.mrb[14].mxu0 }
 0x102   : > { %v716_v62 = vpop.f32.mrb[14].mxu1  ;;  %518 = vst.msk [vmem:[%s840_s20 + $0x78] sm:$0xff] %vm502_vm1, %v692_v61  ;;  %v413_v63 = vpop.f32.mrb[15].mxu0 }
 0x103   : > { %534 = vst.msk [vmem:[%s840_s20 + $0xf8] sm:$0xff] %vm502_vm1, %v716_v62  ;;  %v493_v0 = vpop.f32.mrb[15].mxu1  ;;  %517 = vst.msk [vmem:[%s840_s20 + $0x70] sm:$0xff] %vm502_vm1, %v413_v63 }
 0x104   : > { %533 = vst.msk [vmem:[%s840_s20 + $0xf0] sm:$0xff] %vm502_vm1, %v493_v0 }
 0x105 PF: > { %s12_s9 = sadd.s32 1, %s733_s9  }
 0x106   : > { %p9_p4 = scmp.ge.s32.totalorder %s12_s9, 4  }
 0x108   :  { %11 = sbr.rel (!%p9_p4) target bundleno = 1 (0x1), region = 58 }

// kernel: spm_group_norm_forward.7
= control target key start
LH: loop header
LB: loop body
LE: loop exit
PB: predicated region body
PF: predicated region fallthrough
CT: control target
= control target key end

     0   :  { %vm28_vm0 = vcmask 64512   ;;  %vm222_vm1 = vcmask 130048   ;;  %s450_s1 = inlined_call_operand.vmem [shape: f32[8,16], index: 1, kind: input, shape index: {}]   ;;  %s451_s0 = inlined_call_operand.vmem [shape: f32[128,8], index: 0, kind: input, shape index: {}]   ;;  %s452_s2 = inlined_call_operand.vmem [shape: f32[128,16], index: 2, kind: output, shape index: {}]  }
   0x1   :  { %v27_v0 = vld [vmem:[%s450_s1] sm:$0xff]  ;;  %v12_v3 = vld [vmem:[%s451_s0 + $0x8] sm:$0xff]  ;;  %v13_v5 = vld [vmem:[%s451_s0 + $0x10] sm:$0xff] }
   0x2   :  { %v11_v1 = vld [vmem:[%s451_s0] sm:$0xff]  ;;  %276 = vmatprep.subr.mxu0 %v27_v0  ;;  %302 = vmatprep.subr.mxu1 %v27_v0  ;;  %v20_v4 = vld [vmem:[%s451_s0 + $0x48] sm:$0xff]  ;;  %v21_v6 = vld [vmem:[%s451_s0 + $0x50] sm:$0xff] }
   0x3   :  { %v19_v2 = vld [vmem:[%s451_s0 + $0x40] sm:$0xff]  ;;  %277 = vmatpush3.msra.mxu0 %v27_v0  ;;  %303 = vmatpush3.msra.mxu1 %v27_v0  ;;  %v14_v7 = vld [vmem:[%s451_s0 + $0x18] sm:$0xff]  ;;  %v16_v11 = vld [vmem:[%s451_s0 + $0x28] sm:$0xff] }
   0x4   :  { %278 = vmatprep.mubr.msk.f32.mxu0 %vm28_vm0, %v11_v1  ;;  %290 = vmatprep.mubr.msk.f32.mxu1 %vm28_vm0, %v19_v2  ;;  %v22_v8 = vld [vmem:[%s451_s0 + $0x58] sm:$0xff]  ;;  %v15_v9 = vld [vmem:[%s451_s0 + $0x20] sm:$0xff]  ;;  %v24_v12 = vld [vmem:[%s451_s0 + $0x68] sm:$0xff] }
   0x5   :  { %279 = vmatmul.mubr.msk.f32.vlgmr.msra.gmra.mrb[0].mxu0 %vm28_vm0, %v12_v3  ;;  %291 = vmatmul.mubr.msk.f32.vlgmr.msra.gmra.mrb[0].mxu1 %vm28_vm0, %v20_v4  ;;  %v23_v10 = vld [vmem:[%s451_s0 + $0x60] sm:$0xff]  ;;  %v17_v13 = vld [vmem:[%s451_s0 + $0x30] sm:$0xff]  ;;  %v18_v15 = vld [vmem:[%s451_s0 + $0x38] sm:$0xff] }
   0x6   :  { %281 = vmatprep.mubr.msk.f32.mxu0 %vm28_vm0, %v13_v5  ;;  %293 = vmatprep.mubr.msk.f32.mxu1 %vm28_vm0, %v21_v6  ;;  %v25_v14 = vld [vmem:[%s451_s0 + $0x70] sm:$0xff]  ;;  %v26_v16 = vld [vmem:[%s451_s0 + $0x78] sm:$0xff] }
   0x9   :  { %282 = vmatmul.mubr.msk.f32.gmra.mrb[2].mxu0 %vm28_vm0, %v14_v7  ;;  %294 = vmatmul.mubr.msk.f32.gmra.mrb[2].mxu1 %vm28_vm0, %v22_v8 }
   0xa   :  { %284 = vmatprep.mubr.msk.f32.mxu0 %vm28_vm0, %v15_v9  ;;  %296 = vmatprep.mubr.msk.f32.mxu1 %vm28_vm0, %v23_v10 }
   0xd   :  { %285 = vmatmul.mubr.msk.f32.gmra.mrb[4].mxu0 %vm28_vm0, %v16_v11  ;;  %297 = vmatmul.mubr.msk.f32.gmra.mrb[4].mxu1 %vm28_vm0, %v24_v12 }
   0xe   :  { %287 = vmatprep.mubr.msk.f32.mxu0 %vm28_vm0, %v17_v13  ;;  %299 = vmatprep.mubr.msk.f32.mxu1 %vm28_vm0, %v25_v14 }
  0x11   :  { %288 = vmatmul.mubr.msk.f32.gmra.mrb[6].mxu0 %vm28_vm0, %v18_v15  ;;  %300 = vmatmul.mubr.msk.f32.gmra.mrb[6].mxu1 %vm28_vm0, %v26_v16 }
  0xd8   :  { %v280_v17 = vpop.f32.mrb[0].mxu0  ;;  %v292_v18 = vpop.f32.mrb[0].mxu1 }
  0xd9   :  { %224 = vst.msk [vmem:[%s452_s2 + $0x8] sm:$0xff] %vm222_vm1, %v280_v17  ;;  %232 = vst.msk [vmem:[%s452_s2 + $0x48] sm:$0xff] %vm222_vm1, %v292_v18  ;;  %v143_v19 = vpop.f32.mrb[1].mxu0  ;;  %v183_v20 = vpop.f32.mrb[1].mxu1 }
  0xda   :  { %223 = vst.msk [vmem:[%s452_s2] sm:$0xff] %vm222_vm1, %v143_v19  ;;  %231 = vst.msk [vmem:[%s452_s2 + $0x40] sm:$0xff] %vm222_vm1, %v183_v20 }
  0xdc   :  { %v283_v21 = vpop.f32.mrb[2].mxu0  ;;  %v295_v22 = vpop.f32.mrb[2].mxu1 }
  0xdd   :  { %226 = vst.msk [vmem:[%s452_s2 + $0x18] sm:$0xff] %vm222_vm1, %v283_v21  ;;  %234 = vst.msk [vmem:[%s452_s2 + $0x58] sm:$0xff] %vm222_vm1, %v295_v22  ;;  %v153_v23 = vpop.f32.mrb[3].mxu0  ;;  %v193_v24 = vpop.f32.mrb[3].mxu1 }
  0xde   :  { %225 = vst.msk [vmem:[%s452_s2 + $0x10] sm:$0xff] %vm222_vm1, %v153_v23  ;;  %233 = vst.msk [vmem:[%s452_s2 + $0x50] sm:$0xff] %vm222_vm1, %v193_v24 }
  0xe0   :  { %v286_v25 = vpop.f32.mrb[4].mxu0  ;;  %v298_v26 = vpop.f32.mrb[4].mxu1 }
  0xe1   :  { %228 = vst.msk [vmem:[%s452_s2 + $0x28] sm:$0xff] %vm222_vm1, %v286_v25  ;;  %236 = vst.msk [vmem:[%s452_s2 + $0x68] sm:$0xff] %vm222_vm1, %v298_v26  ;;  %v163_v27 = vpop.f32.mrb[5].mxu0  ;;  %v203_v28 = vpop.f32.mrb[5].mxu1 }
  0xe2   :  { %227 = vst.msk [vmem:[%s452_s2 + $0x20] sm:$0xff] %vm222_vm1, %v163_v27  ;;  %235 = vst.msk [vmem:[%s452_s2 + $0x60] sm:$0xff] %vm222_vm1, %v203_v28 }
  0xe4   :  { %v289_v29 = vpop.f32.mrb[6].mxu0  ;;  %v301_v30 = vpop.f32.mrb[6].mxu1 }
  0xe5   :  { %230 = vst.msk [vmem:[%s452_s2 + $0x38] sm:$0xff] %vm222_vm1, %v289_v29  ;;  %238 = vst.msk [vmem:[%s452_s2 + $0x78] sm:$0xff] %vm222_vm1, %v301_v30  ;;  %v173_v31 = vpop.f32.mrb[7].mxu0  ;;  %v213_v32 = vpop.f32.mrb[7].mxu1 }
  0xe6   :  { %229 = vst.msk [vmem:[%s452_s2 + $0x30] sm:$0xff] %vm222_vm1, %v173_v31  ;;  %237 = vst.msk [vmem:[%s452_s2 + $0x70] sm:$0xff] %vm222_vm1, %v213_v32 }

// kernel: spm_group_norm_forward.9
= control target key start
LH: loop header
LB: loop body
LE: loop exit
PB: predicated region body
PF: predicated region fallthrough
CT: control target
= control target key end

     0   :  { %s22469_s0 = inlined_call_operand.vmem [shape: f32[2,18,18,16], index: 0, kind: input, shape index: {}]   ;;  %s22470_s1 = inlined_call_operand.vmem [shape: f32[2,18,18,8], index: 1, kind: input, shape index: {}]   ;;  %s22471_s2 = inlined_call_operand.vmem [shape: f32[2,16,16,64], index: 2, kind: input, shape index: {}]   ;;  %s22472_s3 = inlined_call_operand.vmem [shape: f32[64,64], index: 3, kind: input, shape index: {}]   ;;  %s22473_s4 = inlined_call_operand.vmem [shape: f32[3,3,16,128], index: 4, kind: input, shape index: {}]   ;;  %s22474_s5 = inlined_call_operand.vmem [shape: f32[1,128], index: 5, kind: input, shape index: {}]   ;;  %s22475_s6 = inlined_call_operand.vmem [shape: f32[3,3,128,256], index: 6, kind: input, shape index: {}]   ;;  %s22476_s7 = inlined_call_operand.vmem [shape: f32[1,256], index: 7, kind: input, shape index: {}]   ;;  %s22477_s8 = inlined_call_operand.vmem [shape: f32[3,3,8,128], index: 8, kind: input, shape index: {}]   ;;  %s22478_s9 = inlined_call_operand.vmem [shape: f32[1,128], index: 9, kind: input, shape index: {}]   ;;  %s22479_s10 = inlined_call_operand.vmem [shape: f32[3,3,128,128], index: 10, kind: input, shape index: {}]   ;;  %s22480_s11 = inlined_call_operand.vmem [shape: f32[1,128], index: 11, kind: input, shape index: {}]   ;;  %s22481_s12 = inlined_call_operand.hbm [shape: f32[2,16,16,64], index: 12, kind: output, shape index: {}]  }
   0x1   :  { %22700 = sst [smem:[#allocation141_spill]] %s22469_s0 }
   0x2   :  { %22701 = sst [smem:[#allocation142_spill]] %s22473_s4 }
   0x3   :  { %17 = vsyncpa [#allocation4], 0 }
   0x4   :  { %19 = vsyncpa [#allocation4 + $0x1], 0  ;;  %s15920_s21 = smov 0   ;;  %s15922_s22 = smov 0  }
   0x5   :  { %s15924_s23 = smov 0   ;;  %s15926_s24 = smov 0  }
   0x6 LB: > { %22702 = sst [smem:[#allocation6_spill]] %s15842_s23  ;;  %s15941_s25 = sadd.s32 4294967295, %s15846_s24   ;;  %s15846_s24 = sphi %s15926_s24, %s23294_s24   ;;  %s15842_s23 = sphi %s15924_s23, %s23296_s23   ;;  %s15838_s22 = sphi %s15922_s22, %s23298_s22   ;;  %s15834_s21 = sphi %s15920_s21, %s23297_s21  }
   0x7   : > { %s11131_s26 = sadd.s32 4294967294, %s15846_s24   ;;  %s15945_s27 = sadd.s32 1, %s15846_s24  }
   0x8   : > { %22703 = sst [smem:[#allocation7_spill]] %s15945_s27  ;;  %s299_s28 = sadd.s32 1, %s15842_s23 }
   0x9   : > { %s296_s29 = ssub.s32 %s15846_s24, %s15945_s27  ;;  %p309_p0 = scmp.ne.s32.totalorder %s15842_s23, %s15838_s22 }
   0xa   : > { %p297_p1 = scmp.eq.s32.totalorder %s296_s29, 0  ;;  %p310_p2 = scmp.eq.s32.totalorder %s15941_s25, 1 }
   0xb   : > { %p315_p3 = scmp.ne.s32.totalorder %s15838_s22, %s15834_s21  ;;  %p316_p4 = scmp.eq.s32.totalorder %s11131_s26, 1 }
   0xc   : > { %s15956_s30 = scalar_select %p297_p1, %s15842_s23, %s299_s28  }
   0xd   : > { %p15958_p5 = por %p310_p2, %p309_p0  ;;  %p15962_p6 = por %p316_p4, %p315_p3 }
   0xe   : > { %22704 = sst [smem:[#allocation8_spill]] %s15956_s30  ;;  %p11134_p7 = scmp.ge.s32.totalorder %s15846_s24, 1 }
   0xf   : > { %p385_p8 = scmp.lt.s32.totalorder %s15846_s24, 3 }
  0x11   : > { %p386_p9 = pnand %p11134_p7, %p385_p8 }
  0x13   : > { %389 = sbr.rel (%p386_p9) target bundleno = 2343 (0x927), region = 68 }
  0x1a   : > { %s22707_s4 = sld [smem:[#allocation142_spill]]  ;;  %p437_p10 = scmp.lt.s32.totalorder %s15941_s25, 1  ;;  %vm637_vm0 = vcmask 130048   ;;  %vm5527_vm1 = vcmask 64512   ;;  %vm10373_vm2 = vcmask 523264   ;;  %vm15851_vm3 = vmmov 0  }
  0x1b   : > { %s22708_s0 = sld [smem:[#allocation141_spill]]  ;;  %s15850_s17 = smov 64  }
  0x1c   : > { %s15982_s29 = scalar_select %p437_p10, %s15941_s25, 1 }
  0x1d   : > { %s12039_s30 = sshll.u32 %s15941_s25, 12 }
  0x1e   : > { %s22548_s15 = smul.u32 432, %s15982_s29  ;;  %s12038_s20 = sshll.u32 %s15982_s29, 8 }
  0x1f   : > { %s20540_s23 = scalar_lea.vmem %s22471_s2, %s12038_s20  ;;  %s22417_s16 = scalar_lea.hbm %s22481_s12, %s12039_s30 }
  0x20   : > { %v11140_v0 = vld [vmem:[%s22707_s4 + $0x10] sm:$0xff]  ;;  %v11141_v1 = vld [vmem:[%s22707_s4 + $0x18] sm:$0xff]  ;;  %v632_v2 = vld [vmem:[%s22707_s4] sm:$0xff] }
  0x21   : > { %v14001_v3 = vpack.c.bf16 %v11141_v1, %v11140_v0  ;;  %v633_v4 = vld [vmem:[%s22707_s4 + $0x8] sm:$0xff]  ;;  %v11206_v6 = vld [vmem:[%s22707_s4 + $0x20] sm:$0xff]  ;;  %s15996_s28 = scalar_lea.vmem %s22708_s0, %s22548_s15  ;;  %v11240_v42 = vld [vmem:[%s22707_s4 + $0x30] sm:$0xff]  ;;  %s22805_s0 = smul.u32 432, %s15982_s29 }
  0x22   : > { %v14005_v5 = vpack.c.bf16 %v633_v4, %v632_v2  ;;  %v11207_v7 = vld [vmem:[%s22707_s4 + $0x28] sm:$0xff]  ;;  %v16001_v10 = vld [vmem:[%s15996_s28 + $0x19] sm:$0xff]  ;;  %v16013_v13 = vld [vmem:[%s15996_s28 + $0x31] sm:$0xff] }
  0x23   : > { %14002 = vmatprep.subr.bf16.mxu0 %v14001_v3  ;;  %v560_v8 = vld [vmem:[%s15996_s28 + $0x1] sm:$0xff]  ;;  %v561_v9 = vld [vmem:[%s15996_s28 + $0x9] sm:$0xff]  ;;  %v16003_v11 = vpack.c.bf16 %v11207_v7, %v11206_v6  ;;  %v16021_v14 = vld [vmem:[%s15996_s28 + $0x39] sm:$0xff]  ;;  %s16997_s19 = scalar_lea.vmem %s22470_s1, %s22805_s0 }
  0x24   : > { %14004 = vmatpush3.bf16.msra.mxu0 %v14001_v3  ;;  %12809 = vmatprep.mubr.msk.f32.mxu0 %vm637_vm0, %v560_v8  ;;  %v16010_v12 = vld [vmem:[%s15996_s28 + $0x21] sm:$0xff]  ;;  %v16024_v15 = vld [vmem:[%s15996_s28 + $0x49] sm:$0xff]  ;;  %v16031_v16 = vld [vmem:[%s15996_s28 + $0x51] sm:$0xff] }
  0x25   : > { %14006 = vmatprep.subr.bf16.mxu0 %v14005_v5  ;;  %v16034_v17 = vld [vmem:[%s15996_s28 + $0x61] sm:$0xff]  ;;  %v16041_v18 = vld [vmem:[%s15996_s28 + $0x69] sm:$0xff]  ;;  %v16044_v19 = vld [vmem:[%s15996_s28 + $0x79] sm:$0xff] }
  0x26   : > { %v16051_v20 = vld [vmem:[%s15996_s28 + $0x81] sm:$0xff]  ;;  %v16054_v21 = vld [vmem:[%s15996_s28 + $0x91] sm:$0xff]  ;;  %v16061_v22 = vld [vmem:[%s15996_s28 + $0x99] sm:$0xff] }
  0x27   : > { %12810 = vmatmul.mubr.msk.f32.vlgmr.msra.gmra.mrb[0].mxu0 %vm637_vm0, %v561_v9  ;;  %v16064_v23 = vld [vmem:[%s15996_s28 + $0xa9] sm:$0xff]  ;;  %v16071_v24 = vld [vmem:[%s15996_s28 + $0xb1] sm:$0xff]  ;;  %v16074_v25 = vld [vmem:[%s15996_s28 + $0xc1] sm:$0xff] }
  0x28   : > { %14008 = vmatpush3.bf16.msra.mxu0 %v14005_v5  ;;  %12812 = vmatprep.mubr.msk.f32.mxu0 %vm637_vm0, %v16001_v10  ;;  %v16081_v26 = vld [vmem:[%s15996_s28 + $0xc9] sm:$0xff]  ;;  %v16084_v27 = vld [vmem:[%s15996_s28 + $0xd9] sm:$0xff]  ;;  %v16091_v28 = vld [vmem:[%s15996_s28 + $0xe1] sm:$0xff] }
  0x29   : > { %14010 = vmatprep.subr.bf16.mxu0 %v16003_v11  ;;  %v16094_v29 = vld [vmem:[%s15996_s28 + $0xf1] sm:$0xff]  ;;  %v16101_v30 = vld [vmem:[%s15996_s28 + $0xf9] sm:$0xff]  ;;  %v16104_v31 = vld [vmem:[%s15996_s28 + $0x109] sm:$0xff] }
  0x2a   : > { %v16111_v32 = vld [vmem:[%s15996_s28 + $0x111] sm:$0xff]  ;;  %v16114_v33 = vld [vmem:[%s15996_s28 + $0x121] sm:$0xff]  ;;  %v16121_v34 = vld [vmem:[%s15996_s28 + $0x129] sm:$0xff] }
  0x2b   : > { %12813 = vmatmul.mubr.msk.f32.gmra.mrb[2].mxu0 %vm637_vm0, %v16010_v12  ;;  %22709 = vst [vmem:[#allocation9_spill] sm:$0xff] %v16114_v33  ;;  %22710 = vst [vmem:[#allocation10_spill] sm:$0xff] %v16121_v34  ;;  %v16124_v35 = vld [vmem:[%s15996_s28 + $0x139] sm:$0xff]  ;;  %v16131_v36 = vld [vmem:[%s15996_s28 + $0x141] sm:$0xff] }
  0x2c   : > { %12815 = vmatprep.mubr.msk.f32.mxu0 %vm637_vm0, %v16013_v13  ;;  %22711 = vst [vmem:[#allocation11_spill] sm:$0xff] %v16124_v35  ;;  %22712 = vst [vmem:[#allocation12_spill] sm:$0xff] %v16131_v36  ;;  %v16134_v37 = vld [vmem:[%s15996_s28 + $0x151] sm:$0xff]  ;;  %v16141_v38 = vld [vmem:[%s15996_s28 + $0x159] sm:$0xff] }
  0x2d   : > { %22713 = vst [vmem:[#allocation13_spill] sm:$0xff] %v16134_v37  ;;  %22714 = vst [vmem:[#allocation14_spill] sm:$0xff] %v16141_v38  ;;  %v16144_v39 = vld [vmem:[%s15996_s28 + $0x169] sm:$0xff]  ;;  %v16151_v40 = vld [vmem:[%s15996_s28 + $0x171] sm:$0xff] }
  0x2e   : > { %22715 = vst [vmem:[#allocation15_spill] sm:$0xff] %v16144_v39  ;;  %22716 = vst [vmem:[#allocation16_spill] sm:$0xff] %v16151_v40  ;;  %v524_v41 = vld [vmem:[%s15996_s28] sm:$0xff]  ;;  %v11241_v43 = vld [vmem:[%s22707_s4 + $0x38] sm:$0xff] }
  0x2f   : > { %12816 = vmatmul.mubr.msk.f32.gmra.mrb[4].mxu0 %vm637_vm0, %v16021_v14  ;;  %v525_v44 = vld [vmem:[%s15996_s28 + $0x8] sm:$0xff]  ;;  %v16165_v45 = vld [vmem:[%s15996_s28 + $0x18] sm:$0xff]  ;;  %v16167_v46 = vpack.c.bf16 %v11241_v43, %v11240_v42  ;;  %v16174_v47 = vld [vmem:[%s15996_s28 + $0x20] sm:$0xff] }
  0x30   : > { %12818 = vmatprep.mubr.msk.f32.mxu0 %vm637_vm0, %v16024_v15  ;;  %v16177_v48 = vld [vmem:[%s15996_s28 + $0x30] sm:$0xff]  ;;  %v16185_v49 = vld [vmem:[%s15996_s28 + $0x38] sm:$0xff]  ;;  %v16188_v50 = vld [vmem:[%s15996_s28 + $0x48] sm:$0xff] }
  0x31   : > { %v16195_v51 = vld [vmem:[%s15996_s28 + $0x50] sm:$0xff]  ;;  %v16198_v52 = vld [vmem:[%s15996_s28 + $0x60] sm:$0xff]  ;;  %v16205_v53 = vld [vmem:[%s15996_s28 + $0x68] sm:$0xff] }
  0x32   : > { %v16208_v54 = vld [vmem:[%s15996_s28 + $0x78] sm:$0xff]  ;;  %v16215_v55 = vld [vmem:[%s15996_s28 + $0x80] sm:$0xff]  ;;  %v16218_v56 = vld [vmem:[%s15996_s28 + $0x90] sm:$0xff] }
  0x33   : > { %12819 = vmatmul.mubr.msk.f32.gmra.mrb[6].mxu0 %vm637_vm0, %v16031_v16  ;;  %v16225_v57 = vld [vmem:[%s15996_s28 + $0x98] sm:$0xff]  ;;  %v16228_v58 = vld [vmem:[%s15996_s28 + $0xa8] sm:$0xff]  ;;  %v16235_v59 = vld [vmem:[%s15996_s28 + $0xb0] sm:$0xff] }
  0x34   : > { %12821 = vmatprep.mubr.msk.f32.mxu0 %vm637_vm0, %v16034_v17  ;;  %v16238_v60 = vld [vmem:[%s15996_s28 + $0xc0] sm:$0xff]  ;;  %v16245_v61 = vld [vmem:[%s15996_s28 + $0xc8] sm:$0xff]  ;;  %v16248_v62 = vld [vmem:[%s15996_s28 + $0xd8] sm:$0xff] }
  0x35   : > { %v16255_v63 = vld [vmem:[%s15996_s28 + $0xe0] sm:$0xff]  ;;  %v16258_v0 = vld [vmem:[%s15996_s28 + $0xf0] sm:$0xff]  ;;  %v16265_v1 = vld [vmem:[%s15996_s28 + $0xf8] sm:$0xff] }
  0x36   : > { %v16268_v2 = vld [vmem:[%s15996_s28 + $0x108] sm:$0xff]  ;;  %v16275_v3 = vld [vmem:[%s15996_s28 + $0x110] sm:$0xff]  ;;  %v16278_v4 = vld [vmem:[%s15996_s28 + $0x120] sm:$0xff] }
  0x37   : > { %12822 = vmatmul.mubr.msk.f32.gmra.mrb[8].mxu0 %vm637_vm0, %v16041_v18  ;;  %v16285_v5 = vld [vmem:[%s15996_s28 + $0x128] sm:$0xff]  ;;  %v16288_v6 = vld [vmem:[%s15996_s28 + $0x138] sm:$0xff]  ;;  %v16295_v7 = vld [vmem:[%s15996_s28 + $0x140] sm:$0xff] }
  0x38   : > { %12824 = vmatprep.mubr.msk.f32.mxu0 %vm637_vm0, %v16044_v19  ;;  %v16298_v8 = vld [vmem:[%s15996_s28 + $0x150] sm:$0xff]  ;;  %v16305_v9 = vld [vmem:[%s15996_s28 + $0x158] sm:$0xff]  ;;  %v596_v42 = vld [vmem:[%s15996_s28 + $0x2] sm:$0xff] }
  0x39   : > { %v11274_v43 = vld [vmem:[%s22707_s4 + $0x40] sm:$0xff] }
  0x3b   : > { %12825 = vmatmul.mubr.msk.f32.gmra.mrb[10].mxu0 %vm637_vm0, %v16051_v20 }
  0x3c   : > { %12827 = vmatprep.mubr.msk.f32.mxu0 %vm637_vm0, %v16054_v21 }
  0x3f   : > { %12828 = vmatmul.mubr.msk.f32.gmra.mrb[12].mxu0 %vm637_vm0, %v16061_v22 }
  0x40   : > { %12830 = vmatprep.mubr.msk.f32.mxu0 %vm637_vm0, %v16064_v23 }
  0x43   : > { %12831 = vmatmul.mubr.msk.f32.gmra.mrb[14].mxu0 %vm637_vm0, %v16071_v24 }
  0x44   : > { %12833 = vmatprep.mubr.msk.f32.mxu0 %vm637_vm0, %v16074_v25 }
  0x47   : > { %12834 = vmatmul.mubr.msk.f32.gmra.mrb[16].mxu0 %vm637_vm0, %v16081_v26 }
  0x48   : > { %12836 = vmatprep.mubr.msk.f32.mxu0 %vm637_vm0, %v16084_v27 }
  0x4b   : > { %12837 = vmatmul.mubr.msk.f32.gmra.mrb[18].mxu0 %vm637_vm0, %v16091_v28 }
  0x4c   : > { %12839 = vmatprep.mubr.msk.f32.mxu0 %vm637_vm0, %v16094_v29 }
  0x4f   : > { %12840 = vmatmul.mubr.msk.f32.gmra.mrb[20].mxu0 %vm637_vm0, %v16101_v30 }
  0x50   : > { %12842 = vmatprep.mubr.msk.f32.mxu0 %vm637_vm0, %v16104_v31 }
  0x53   : > { %12843 = vmatmul.mubr.msk.f32.gmra.mrb[22].mxu0 %vm637_vm0, %v16111_v32 }
  0x54   : > { %12845 = vmatprep.mubr.msk.f32.mxu0 %vm637_vm0, %v16114_v33 }
  0x57   : > { %12846 = vmatmul.mubr.msk.f32.gmra.mrb[24].mxu0 %vm637_vm0, %v16121_v34 }
  0x58   : > { %12848 = vmatprep.mubr.msk.f32.mxu0 %vm637_vm0, %v16124_v35 }
  0x5b   : > { %12849 = vmatmul.mubr.msk.f32.gmra.mrb[26].mxu0 %vm637_vm0, %v16131_v36  ;;  %v16341_v36 = vld [vmem:[%s15996_s28 + $0x32] sm:$0xff] }
  0x5c   : > { %12851 = vmatprep.mubr.msk.f32.mxu0 %vm637_vm0, %v16134_v37  ;;  %v16338_v37 = vld [vmem:[%s15996_s28 + $0x22] sm:$0xff]  ;;  %22717 = vst [vmem:[#allocation17_spill] sm:$0xff] %v16341_v36 }
  0x5f   : > { %12852 = vmatmul.mubr.msk.f32.gmra.mrb[28].mxu0 %vm637_vm0, %v16141_v38 }
  0x60   : > { %12854 = vmatprep.mubr.msk.f32.mxu0 %vm637_vm0, %v16144_v39  ;;  %v16329_v39 = vld [vmem:[%s15996_s28 + $0x1a] sm:$0xff] }
  0x63   : > { %12855 = vmatmul.mubr.msk.f32.gmra.mrb[30].mxu0 %vm637_vm0, %v16151_v40  ;;  %v597_v40 = vld [vmem:[%s15996_s28 + $0xa] sm:$0xff] }
  0x64   : > { %12861 = vmatprep.mubr.msk.f32.mxu0 %vm637_vm0, %v524_v41  ;;  %v16315_v41 = vld [vmem:[%s15996_s28 + $0x170] sm:$0xff] }
  0x67   : > { %12862 = vmatmul.mubr.msk.f32.vlgmr.msra.gmra.mrb[0].mxu0 %vm637_vm0, %v525_v44  ;;  %v11275_v44 = vld [vmem:[%s22707_s4 + $0x48] sm:$0xff] }
  0x68   : > { %14012 = vmatpush3.bf16.msra.mxu0 %v16003_v11  ;;  %12864 = vmatprep.mubr.msk.f32.mxu0 %vm637_vm0, %v16165_v45  ;;  %v16308_v11 = vld [vmem:[%s15996_s28 + $0x168] sm:$0xff]  ;;  %v16331_v38 = vpack.c.bf16 %v11275_v44, %v11274_v43 }
  0x69   : > { %14014 = vmatprep.subr.bf16.mxu0 %v16167_v46  ;;  %v16362_v43 = vld [vmem:[%s15996_s28 + $0x62] sm:$0xff]  ;;  %v16369_v44 = vld [vmem:[%s15996_s28 + $0x6a] sm:$0xff] }
  0x6a   : > { %22721 = vst [vmem:[#allocation21_spill] sm:$0xff] %v16362_v43  ;;  %22722 = vst [vmem:[#allocation22_spill] sm:$0xff] %v16369_v44 }
  0x6b   : > { %12865 = vmatmul.mubr.msk.f32.gmra.mrb[2].mxu0 %vm637_vm0, %v16174_v47 }
  0x6c   : > { %12867 = vmatprep.mubr.msk.f32.mxu0 %vm637_vm0, %v16177_v48 }
  0x6f   : > { %12868 = vmatmul.mubr.msk.f32.gmra.mrb[4].mxu0 %vm637_vm0, %v16185_v49 }
  0x70   : > { %12870 = vmatprep.mubr.msk.f32.mxu0 %vm637_vm0, %v16188_v50 }
  0x73   : > { %12871 = vmatmul.mubr.msk.f32.gmra.mrb[6].mxu0 %vm637_vm0, %v16195_v51 }
  0x74   : > { %12873 = vmatprep.mubr.msk.f32.mxu0 %vm637_vm0, %v16198_v52 }
  0x77   : > { %12874 = vmatmul.mubr.msk.f32.gmra.mrb[8].mxu0 %vm637_vm0, %v16205_v53 }
  0x78   : > { %12876 = vmatprep.mubr.msk.f32.mxu0 %vm637_vm0, %v16208_v54 }
  0x7b   : > { %12877 = vmatmul.mubr.msk.f32.gmra.mrb[10].mxu0 %vm637_vm0, %v16215_v55 }
  0x7c   : > { %12879 = vmatprep.mubr.msk.f32.mxu0 %vm637_vm0, %v16218_v56 }
  0x7f   : > { %12880 = vmatmul.mubr.msk.f32.gmra.mrb[12].mxu0 %vm637_vm0, %v16225_v57 }
  0x80   : > { %12882 = vmatprep.mubr.msk.f32.mxu0 %vm637_vm0, %v16228_v58 }
  0x83   : > { %12883 = vmatmul.mubr.msk.f32.gmra.mrb[14].mxu0 %vm637_vm0, %v16235_v59 }
  0x84   : > { %12885 = vmatprep.mubr.msk.f32.mxu0 %vm637_vm0, %v16238_v60 }
  0x87   : > { %12886 = vmatmul.mubr.msk.f32.gmra.mrb[16].mxu0 %vm637_vm0, %v16245_v61 }
  0x88   : > { %12888 = vmatprep.mubr.msk.f32.mxu0 %vm637_vm0, %v16248_v62 }
  0x8b   : > { %12889 = vmatmul.mubr.msk.f32.gmra.mrb[18].mxu0 %vm637_vm0, %v16255_v63 }
  0x8c   : > { %12891 = vmatprep.mubr.msk.f32.mxu0 %vm637_vm0, %v16258_v0 }
  0x8f   : > { %12892 = vmatmul.mubr.msk.f32.gmra.mrb[20].mxu0 %vm637_vm0, %v16265_v1 }
  0x90   : > { %12894 = vmatprep.mubr.msk.f32.mxu0 %vm637_vm0, %v16268_v2 }
  0x93   : > { %12895 = vmatmul.mubr.msk.f32.gmra.mrb[22].mxu0 %vm637_vm0, %v16275_v3 }
  0x94   : > { %12897 = vmatprep.mubr.msk.f32.mxu0 %vm637_vm0, %v16278_v4 }
  0x97   : > { %12898 = vmatmul.mubr.msk.f32.gmra.mrb[24].mxu0 %vm637_vm0, %v16285_v5 }
  0x98   : > { %12900 = vmatprep.mubr.msk.f32.mxu0 %vm637_vm0, %v16288_v6 }
  0x9b   : > { %12901 = vmatmul.mubr.msk.f32.gmra.mrb[26].mxu0 %vm637_vm0, %v16295_v7 }
  0x9c   : > { %12903 = vmatprep.mubr.msk.f32.mxu0 %vm637_vm0, %v16298_v8 }
  0x9f   : > { %12904 = vmatmul.mubr.msk.f32.gmra.mrb[28].mxu0 %vm637_vm0, %v16305_v9 }
  0xa0   : > { %12906 = vmatprep.mubr.msk.f32.mxu0 %vm637_vm0, %v16308_v11 }
  0xa3   : > { %12907 = vmatmul.mubr.msk.f32.gmra.mrb[30].mxu0 %vm637_vm0, %v16315_v41 }
  0xa4   : > { %12913 = vmatprep.mubr.msk.f32.mxu0 %vm637_vm0, %v596_v42  ;;  %v16359_v42 = vld [vmem:[%s15996_s28 + $0x52] sm:$0xff] }
  0xa5   : > { %22720 = vst [vmem:[#allocation20_spill] sm:$0xff] %v16359_v42 }
  0xa7   : > { %12914 = vmatmul.mubr.msk.f32.vlgmr.msra.gmra.mrb[0].mxu0 %vm637_vm0, %v597_v40  ;;  %v16349_v40 = vld [vmem:[%s15996_s28 + $0x3a] sm:$0xff] }
  0xa8   : > { %14016 = vmatpush3.bf16.msra.mxu0 %v16167_v46  ;;  %12916 = vmatprep.mubr.msk.f32.mxu0 %vm637_vm0, %v16329_v39  ;;  %22718 = vst [vmem:[#allocation18_spill] sm:$0xff] %v16349_v40  ;;  %v16352_v46 = vld [vmem:[%s15996_s28 + $0x4a] sm:$0xff] }
  0xa9   : > { %14018 = vmatprep.subr.bf16.mxu0 %v16331_v38  ;;  %22719 = vst [vmem:[#allocation19_spill] sm:$0xff] %v16352_v46 }
  0xab   : > { %12917 = vmatmul.mubr.msk.f32.gmra.mrb[2].mxu0 %vm637_vm0, %v16338_v37 }
  0xac   : > { %12919 = vmatprep.mubr.msk.f32.mxu0 %vm637_vm0, %v16341_v36  ;;  %v16372_v36 = vld [vmem:[%s15996_s28 + $0x7a] sm:$0xff] }
  0xad   : > { %22723 = vst [vmem:[#allocation23_spill] sm:$0xff] %v16372_v36 }
  0xaf   : > { %12920 = vmatmul.mubr.msk.f32.gmra.mrb[4].mxu0 %vm637_vm0, %v16349_v40  ;;  %v16382_v40 = vld [vmem:[%s15996_s28 + $0x92] sm:$0xff] }
  0xb0   : > { %12922 = vmatprep.mubr.msk.f32.mxu0 %vm637_vm0, %v16352_v46  ;;  %v16379_v46 = vld [vmem:[%s15996_s28 + $0x82] sm:$0xff]  ;;  %22725 = vst [vmem:[#allocation25_spill] sm:$0xff] %v16382_v40 }
  0xb1   : > { %22724 = vst [vmem:[#allocation24_spill] sm:$0xff] %v16379_v46 }
  0xb3   : > { %12923 = vmatmul.mubr.msk.f32.gmra.mrb[6].mxu0 %vm637_vm0, %v16359_v42  ;;  %v16392_v42 = vld [vmem:[%s15996_s28 + $0xaa] sm:$0xff] }
  0xb4   : > { %12925 = vmatprep.mubr.msk.f32.mxu0 %vm637_vm0, %v16362_v43  ;;  %v16389_v43 = vld [vmem:[%s15996_s28 + $0x9a] sm:$0xff]  ;;  %22727 = vst [vmem:[#allocation27_spill] sm:$0xff] %v16392_v42 }
  0xb5   : > { %22726 = vst [vmem:[#allocation26_spill] sm:$0xff] %v16389_v43 }
  0xb7   : > { %12926 = vmatmul.mubr.msk.f32.gmra.mrb[8].mxu0 %vm637_vm0, %v16369_v44  ;;  %v16402_v44 = vld [vmem:[%s15996_s28 + $0xc2] sm:$0xff] }
  0xb8   : > { %12928 = vmatprep.mubr.msk.f32.mxu0 %vm637_vm0, %v16372_v36  ;;  %v16399_v36 = vld [vmem:[%s15996_s28 + $0xb2] sm:$0xff]  ;;  %22729 = vst [vmem:[#allocation29_spill] sm:$0xff] %v16402_v44 }
  0xb9   : > { %22728 = vst [vmem:[#allocation28_spill] sm:$0xff] %v16399_v36 }
  0xbb   : > { %12929 = vmatmul.mubr.msk.f32.gmra.mrb[10].mxu0 %vm637_vm0, %v16379_v46  ;;  %v16412_v46 = vld [vmem:[%s15996_s28 + $0xda] sm:$0xff] }
  0xbc   : > { %12931 = vmatprep.mubr.msk.f32.mxu0 %vm637_vm0, %v16382_v40  ;;  %v16409_v40 = vld [vmem:[%s15996_s28 + $0xca] sm:$0xff]  ;;  %22731 = vst [vmem:[#allocation31_spill] sm:$0xff] %v16412_v46 }
  0xbd   : > { %22730 = vst [vmem:[#allocation30_spill] sm:$0xff] %v16409_v40 }
  0xbf   : > { %12932 = vmatmul.mubr.msk.f32.gmra.mrb[12].mxu0 %vm637_vm0, %v16389_v43  ;;  %v16422_v43 = vld [vmem:[%s15996_s28 + $0xf2] sm:$0xff] }
  0xc0   : > { %12934 = vmatprep.mubr.msk.f32.mxu0 %vm637_vm0, %v16392_v42  ;;  %v16419_v42 = vld [vmem:[%s15996_s28 + $0xe2] sm:$0xff]  ;;  %22733 = vst [vmem:[#allocation33_spill] sm:$0xff] %v16422_v43 }
  0xc1   : > { %22732 = vst [vmem:[#allocation32_spill] sm:$0xff] %v16419_v42 }
  0xc3   : > { %12935 = vmatmul.mubr.msk.f32.gmra.mrb[14].mxu0 %vm637_vm0, %v16399_v36  ;;  %v16432_v36 = vld [vmem:[%s15996_s28 + $0x10a] sm:$0xff] }
  0xc4   : > { %12937 = vmatprep.mubr.msk.f32.mxu0 %vm637_vm0, %v16402_v44  ;;  %v16429_v44 = vld [vmem:[%s15996_s28 + $0xfa] sm:$0xff]  ;;  %22735 = vst [vmem:[#allocation35_spill] sm:$0xff] %v16432_v36 }
  0xc5   : > { %22734 = vst [vmem:[#allocation34_spill] sm:$0xff] %v16429_v44 }
  0xc7   : > { %12938 = vmatmul.mubr.msk.f32.gmra.mrb[16].mxu0 %vm637_vm0, %v16409_v40  ;;  %v16442_v40 = vld [vmem:[%s15996_s28 + $0x122] sm:$0xff] }
  0xc8   : > { %12940 = vmatprep.mubr.msk.f32.mxu0 %vm637_vm0, %v16412_v46  ;;  %v16439_v46 = vld [vmem:[%s15996_s28 + $0x112] sm:$0xff]  ;;  %22737 = vst [vmem:[#allocation37_spill] sm:$0xff] %v16442_v40 }
  0xc9   : > { %22736 = vst [vmem:[#allocation36_spill] sm:$0xff] %v16439_v46 }
  0xcb   : > { %12941 = vmatmul.mubr.msk.f32.gmra.mrb[18].mxu0 %vm637_vm0, %v16419_v42  ;;  %v16452_v42 = vld [vmem:[%s15996_s28 + $0x13a] sm:$0xff] }
  0xcc   : > { %12943 = vmatprep.mubr.msk.f32.mxu0 %vm637_vm0, %v16422_v43  ;;  %v16449_v43 = vld [vmem:[%s15996_s28 + $0x12a] sm:$0xff]  ;;  %22739 = vst [vmem:[#allocation39_spill] sm:$0xff] %v16452_v42 }
  0xcd   : > { %22738 = vst [vmem:[#allocation38_spill] sm:$0xff] %v16449_v43 }
  0xcf   : > { %12944 = vmatmul.mubr.msk.f32.gmra.mrb[20].mxu0 %vm637_vm0, %v16429_v44  ;;  %v16462_v44 = vld [vmem:[%s15996_s28 + $0x152] sm:$0xff] }
  0xd0   : > { %12946 = vmatprep.mubr.msk.f32.mxu0 %vm637_vm0, %v16432_v36  ;;  %v16459_v36 = vld [vmem:[%s15996_s28 + $0x142] sm:$0xff]  ;;  %22740 = vst [vmem:[#allocation40_spill] sm:$0xff] %v16462_v44 }
  0xd3   : > { %12947 = vmatmul.mubr.msk.f32.gmra.mrb[22].mxu0 %vm637_vm0, %v16439_v46  ;;  %v16472_v46 = vld [vmem:[%s15996_s28 + $0x16a] sm:$0xff] }
  0xd4   : > { %12949 = vmatprep.mubr.msk.f32.mxu0 %vm637_vm0, %v16442_v40  ;;  %v16469_v40 = vld [vmem:[%s15996_s28 + $0x15a] sm:$0xff] }
  0xd5   : > { %22741 = vst [vmem:[#allocation41_spill] sm:$0xff] %v16469_v40 }
  0xd7   : > { %12950 = vmatmul.mubr.msk.f32.gmra.mrb[24].mxu0 %vm637_vm0, %v16449_v43  ;;  %v11308_v43 = vld [vmem:[%s22707_s4 + $0x50] sm:$0xff] }
  0xd8   : > { %12952 = vmatprep.mubr.msk.f32.mxu0 %vm637_vm0, %v16452_v42  ;;  %v16479_v42 = vld [vmem:[%s15996_s28 + $0x172] sm:$0xff] }
  0xd9   : > { %22742 = vst [vmem:[#allocation42_spill] sm:$0xff] %v16479_v42 }
  0xdb   : > { %12953 = vmatmul.mubr.msk.f32.gmra.mrb[26].mxu0 %vm637_vm0, %v16459_v36 }
  0xdc   : > { %12955 = vmatprep.mubr.msk.f32.mxu0 %vm637_vm0, %v16462_v44  ;;  %v11309_v44 = vld [vmem:[%s22707_s4 + $0x58] sm:$0xff] }
  0xdf   : > { %12956 = vmatmul.mubr.msk.f32.gmra.mrb[28].mxu0 %vm637_vm0, %v16469_v40  ;;  %v14021_v40 = vpack.c.bf16 %v11309_v44, %v11308_v43  ;;  %v11343_v43 = vld [vmem:[%s22707_s4 + $0x68] sm:$0xff] }
  0xe0   : > { %12958 = vmatprep.mubr.msk.f32.mxu0 %vm637_vm0, %v16472_v46 }
  0xe3   : > { %12959 = vmatmul.mubr.msk.f32.gmra.mrb[30].mxu0 %vm637_vm0, %v16479_v42 }
  0xe4   : > { %12965 = vmatprep.mubr.msk.f32.mxu0 %vm637_vm0, %v16165_v45  ;;  %v16556_v45 = vld [vmem:[%s15996_s28 + $0x188] sm:$0xff] }
  0xe7   : > { %12966 = vmatmul.mubr.msk.f32.vlgmr.msra.gmra.mrb[0].mxu0 %vm637_vm0, %v16174_v47  ;;  %v11342_v47 = vld [vmem:[%s22707_s4 + $0x60] sm:$0xff] }
  0xe8   : > { %14020 = vmatpush3.bf16.msra.mxu0 %v16331_v38  ;;  %12968 = vmatprep.mubr.msk.f32.mxu0 %vm637_vm0, %v16177_v48  ;;  %v16549_v38 = vld [vmem:[%s15996_s28 + $0x180] sm:$0xff]  ;;  %v14025_v44 = vpack.c.bf16 %v11343_v43, %v11342_v47  ;;  %v22746_v47 = vld [vmem:[#allocation15_spill] sm:$0xff] }
  0xe9   : > { %14022 = vmatprep.subr.bf16.mxu0 %v14021_v40  ;;  %v16625_v43 = vld [vmem:[%s15996_s28 + $0x181] sm:$0xff] }
  0xea   : > { %22747 = vst [vmem:[#allocation43_spill] sm:$0xff] %v16625_v43 }
  0xeb   : > { %12969 = vmatmul.mubr.msk.f32.gmra.mrb[2].mxu0 %vm637_vm0, %v16185_v49 }
  0xec   : > { %12971 = vmatprep.mubr.msk.f32.mxu0 %vm637_vm0, %v16188_v50 }
  0xef   : > { %12972 = vmatmul.mubr.msk.f32.gmra.mrb[4].mxu0 %vm637_vm0, %v16195_v51 }
  0xf0   : > { %12974 = vmatprep.mubr.msk.f32.mxu0 %vm637_vm0, %v16198_v52 }
  0xf3   : > { %12975 = vmatmul.mubr.msk.f32.gmra.mrb[6].mxu0 %vm637_vm0, %v16205_v53 }
  0xf4   : > { %12977 = vmatprep.mubr.msk.f32.mxu0 %vm637_vm0, %v16208_v54 }
  0xf7   : > { %12978 = vmatmul.mubr.msk.f32.gmra.mrb[8].mxu0 %vm637_vm0, %v16215_v55 }
  0xf8   : > { %12980 = vmatprep.mubr.msk.f32.mxu0 %vm637_vm0, %v16218_v56 }
  0xfb   : > { %12981 = vmatmul.mubr.msk.f32.gmra.mrb[10].mxu0 %vm637_vm0, %v16225_v57 }
  0xfc   : > { %12983 = vmatprep.mubr.msk.f32.mxu0 %vm637_vm0, %v16228_v58 }
  0xff   : > { %12984 = vmatmul.mubr.msk.f32.gmra.mrb[12].mxu0 %vm637_vm0, %v16235_v59 }
 0x100   : > { %12986 = vmatprep.mubr.msk.f32.mxu0 %vm637_vm0, %v16238_v60 }
 0x103   : > { %12987 = vmatmul.mubr.msk.f32.gmra.mrb[14].mxu0 %vm637_vm0, %v16245_v61 }
 0x104   : > { %12989 = vmatprep.mubr.msk.f32.mxu0 %vm637_vm0, %v16248_v62 }
 0x107   : > { %12990 = vmatmul.mubr.msk.f32.gmra.mrb[16].mxu0 %vm637_vm0, %v16255_v63 }
 0x108   : > { %12992 = vmatprep.mubr.msk.f32.mxu0 %vm637_vm0, %v16258_v0 }
 0x10b   : > { %12993 = vmatmul.mubr.msk.f32.gmra.mrb[18].mxu0 %vm637_vm0, %v16265_v1 }
 0x10c   : > { %12995 = vmatprep.mubr.msk.f32.mxu0 %vm637_vm0, %v16268_v2 }
 0x10f   : > { %12996 = vmatmul.mubr.msk.f32.gmra.mrb[20].mxu0 %vm637_vm0, %v16275_v3 }
 0x110   : > { %12998 = vmatprep.mubr.msk.f32.mxu0 %vm637_vm0, %v16278_v4 }
 0x113   : > { %12999 = vmatmul.mubr.msk.f32.gmra.mrb[22].mxu0 %vm637_vm0, %v16285_v5 }
 0x114   : > { %13001 = vmatprep.mubr.msk.f32.mxu0 %vm637_vm0, %v16288_v6 }
 0x117   : > { %13002 = vmatmul.mubr.msk.f32.gmra.mrb[24].mxu0 %vm637_vm0, %v16295_v7 }
 0x118   : > { %13004 = vmatprep.mubr.msk.f32.mxu0 %vm637_vm0, %v16298_v8 }
 0x11b   : > { %13005 = vmatmul.mubr.msk.f32.gmra.mrb[26].mxu0 %vm637_vm0, %v16305_v9 }
 0x11c   : > { %13007 = vmatprep.mubr.msk.f32.mxu0 %vm637_vm0, %v16308_v11 }
 0x11f   : > { %13008 = vmatmul.mubr.msk.f32.gmra.mrb[28].mxu0 %vm637_vm0, %v16315_v41 }
 0x120   : > { %13010 = vmatprep.mubr.msk.f32.mxu0 %vm637_vm0, %v16549_v38 }
 0x123   : > { %13011 = vmatmul.mubr.msk.f32.gmra.mrb[30].mxu0 %vm637_vm0, %v16556_v45 }
 0x124   : > { %13017 = vmatprep.mubr.msk.f32.mxu0 %vm637_vm0, %v16001_v10  ;;  %v22743_v10 = vld [vmem:[#allocation12_spill] sm:$0xff] }
 0x127   : > { %13018 = vmatmul.mubr.msk.f32.vlgmr.msra.gmra.mrb[0].mxu0 %vm637_vm0, %v16010_v12  ;;  %v22744_v12 = vld [vmem:[#allocation13_spill] sm:$0xff] }
 0x128   : > { %14024 = vmatpush3.bf16.msra.mxu0 %v14021_v40  ;;  %13020 = vmatprep.mubr.msk.f32.mxu0 %vm637_vm0, %v16013_v13  ;;  %v22745_v40 = vld [vmem:[#allocation14_spill] sm:$0xff] }
 0x129   : > { %14026 = vmatprep.subr.bf16.mxu0 %v14025_v44 }
 0x12b   : > { %13021 = vmatmul.mubr.msk.f32.gmra.mrb[2].mxu0 %vm637_vm0, %v16021_v14 }
 0x12c   : > { %13023 = vmatprep.mubr.msk.f32.mxu0 %vm637_vm0, %v16024_v15 }
 0x12f   : > { %13024 = vmatmul.mubr.msk.f32.gmra.mrb[4].mxu0 %vm637_vm0, %v16031_v16 }
 0x130   : > { %13026 = vmatprep.mubr.msk.f32.mxu0 %vm637_vm0, %v16034_v17 }
 0x133   : > { %13027 = vmatmul.mubr.msk.f32.gmra.mrb[6].mxu0 %vm637_vm0, %v16041_v18 }
 0x134   : > { %13029 = vmatprep.mubr.msk.f32.mxu0 %vm637_vm0, %v16044_v19 }
 0x137   : > { %13030 = vmatmul.mubr.msk.f32.gmra.mrb[8].mxu0 %vm637_vm0, %v16051_v20 }
 0x138   : > { %13032 = vmatprep.mubr.msk.f32.mxu0 %vm637_vm0, %v16054_v21 }
 0x13b   : > { %13033 = vmatmul.mubr.msk.f32.gmra.mrb[10].mxu0 %vm637_vm0, %v16061_v22 }
 0x13c   : > { %13035 = vmatprep.mubr.msk.f32.mxu0 %vm637_vm0, %v16064_v23 }
 0x13f   : > { %13036 = vmatmul.mubr.msk.f32.gmra.mrb[12].mxu0 %vm637_vm0, %v16071_v24 }
 0x140   : > { %13038 = vmatprep.mubr.msk.f32.mxu0 %vm637_vm0, %v16074_v25 }
 0x143   : > { %13039 = vmatmul.mubr.msk.f32.gmra.mrb[14].mxu0 %vm637_vm0, %v16081_v26 }
 0x144   : > { %13041 = vmatprep.mubr.msk.f32.mxu0 %vm637_vm0, %v16084_v27 }
 0x147   : > { %13042 = vmatmul.mubr.msk.f32.gmra.mrb[16].mxu0 %vm637_vm0, %v16091_v28 }
 0x148   : > { %13044 = vmatprep.mubr.msk.f32.mxu0 %vm637_vm0, %v16094_v29 }
 0x14b   : > { %13045 = vmatmul.mubr.msk.f32.gmra.mrb[18].mxu0 %vm637_vm0, %v16101_v30 }
 0x14c   : > { %13047 = vmatprep.mubr.msk.f32.mxu0 %vm637_vm0, %v16104_v31 }
 0x14f   : > { %13048 = vmatmul.mubr.msk.f32.gmra.mrb[20].mxu0 %vm637_vm0, %v16111_v32 }
 0x150   : > { %13050 = vmatprep.mubr.msk.f32.mxu0 %vm637_vm0, %v16114_v33  ;;  %v22748_v33 = vld [vmem:[#allocation16_spill] sm:$0xff] }
 0x153   : > { %13051 = vmatmul.mubr.msk.f32.gmra.mrb[22].mxu0 %vm637_vm0, %v16121_v34  ;;  %v22753_v34 = vld [vmem:[#allocation20_spill] sm:$0xff] }
 0x154   : > { %13053 = vmatprep.mubr.msk.f32.mxu0 %vm637_vm0, %v16124_v35  ;;  %v16632_v35 = vld [vmem:[%s15996_s28 + $0x189] sm:$0xff] }
 0x155   : > { %22749 = vst [vmem:[#allocation44_spill] sm:$0xff] %v16632_v35 }
 0x157   : > { %13054 = vmatmul.mubr.msk.f32.gmra.mrb[24].mxu0 %vm637_vm0, %v22743_v10  ;;  %v22752_v10 = vld [vmem:[#allocation19_spill] sm:$0xff] }
 0x158   : > { %13056 = vmatprep.mubr.msk.f32.mxu0 %vm637_vm0, %v22744_v12  ;;  %v11376_v12 = vld [vmem:[%s22707_s4 + $0x70] sm:$0xff] }
 0x15b   : > { %13057 = vmatmul.mubr.msk.f32.gmra.mrb[26].mxu0 %vm637_vm0, %v22745_v40  ;;  %v11377_v40 = vld [vmem:[%s22707_s4 + $0x78] sm:$0xff] }
 0x15c   : > { %13059 = vmatprep.mubr.msk.f32.mxu0 %vm637_vm0, %v22746_v47  ;;  %v22751_v47 = vld [vmem:[#allocation18_spill] sm:$0xff] }
 0x15f   : > { %13060 = vmatmul.mubr.msk.f32.gmra.mrb[28].mxu0 %vm637_vm0, %v22748_v33  ;;  %v14029_v33 = vpack.c.bf16 %v11377_v40, %v11376_v12  ;;  %v22758_v12 = vld [vmem:[#allocation25_spill] sm:$0xff]  ;;  %v22759_v40 = vld [vmem:[#allocation26_spill] sm:$0xff] }
 0x160   : > { %13062 = vmatprep.mubr.msk.f32.mxu0 %vm637_vm0, %v16625_v43  ;;  %v22750_v43 = vld [vmem:[#allocation17_spill] sm:$0xff] }
 0x163   : > { %13063 = vmatmul.mubr.msk.f32.gmra.mrb[30].mxu0 %vm637_vm0, %v16632_v35  ;;  %v22754_v35 = vld [vmem:[#allocation21_spill] sm:$0xff] }
 0x164   : > { %13069 = vmatprep.mubr.msk.f32.mxu0 %vm637_vm0, %v16329_v39  ;;  %v22755_v39 = vld [vmem:[#allocation22_spill] sm:$0xff] }
 0x167   : > { %13070 = vmatmul.mubr.msk.f32.vlgmr.msra.gmra.mrb[0].mxu0 %vm637_vm0, %v16338_v37  ;;  %v22756_v37 = vld [vmem:[#allocation23_spill] sm:$0xff] }
 0x168   : > { %14028 = vmatpush3.bf16.msra.mxu0 %v14025_v44  ;;  %13072 = vmatprep.mubr.msk.f32.mxu0 %vm637_vm0, %v22750_v43  ;;  %v22757_v44 = vld [vmem:[#allocation24_spill] sm:$0xff] }
 0x169   : > { %14030 = vmatprep.subr.bf16.mxu0 %v14029_v33 }
 0x16b   : > { %13073 = vmatmul.mubr.msk.f32.gmra.mrb[2].mxu0 %vm637_vm0, %v22751_v47 }
 0x16c   : > { %13075 = vmatprep.mubr.msk.f32.mxu0 %vm637_vm0, %v22752_v10  ;;  %v22760_v10 = vld [vmem:[#allocation27_spill] sm:$0xff] }
 0x16f   : > { %13076 = vmatmul.mubr.msk.f32.gmra.mrb[4].mxu0 %vm637_vm0, %v22753_v34  ;;  %v22761_v34 = vld [vmem:[#allocation28_spill] sm:$0xff] }
 0x170   : > { %13078 = vmatprep.mubr.msk.f32.mxu0 %vm637_vm0, %v22754_v35  ;;  %v22762_v35 = vld [vmem:[#allocation29_spill] sm:$0xff] }
 0x173   : > { %13079 = vmatmul.mubr.msk.f32.gmra.mrb[6].mxu0 %vm637_vm0, %v22755_v39  ;;  %v22772_v39 = vld [vmem:[#allocation39_spill] sm:$0xff] }
 0x174   : > { %13081 = vmatprep.mubr.msk.f32.mxu0 %vm637_vm0, %v22756_v37  ;;  %v22763_v37 = vld [vmem:[#allocation30_spill] sm:$0xff] }
 0x177   : > { %13082 = vmatmul.mubr.msk.f32.gmra.mrb[8].mxu0 %vm637_vm0, %v22757_v44  ;;  %v22764_v44 = vld [vmem:[#allocation31_spill] sm:$0xff] }
 0x178   : > { %13084 = vmatprep.mubr.msk.f32.mxu0 %vm637_vm0, %v22758_v12  ;;  %v22765_v12 = vld [vmem:[#allocation32_spill] sm:$0xff] }
 0x17b   : > { %13085 = vmatmul.mubr.msk.f32.gmra.mrb[10].mxu0 %vm637_vm0, %v22759_v40  ;;  %v22766_v40 = vld [vmem:[#allocation33_spill] sm:$0xff] }
 0x17c   : > { %13087 = vmatprep.mubr.msk.f32.mxu0 %vm637_vm0, %v22760_v10  ;;  %v22767_v10 = vld [vmem:[#allocation34_spill] sm:$0xff] }
 0x17f   : > { %13088 = vmatmul.mubr.msk.f32.gmra.mrb[12].mxu0 %vm637_vm0, %v22761_v34  ;;  %v22768_v34 = vld [vmem:[#allocation35_spill] sm:$0xff] }
 0x180   : > { %13090 = vmatprep.mubr.msk.f32.mxu0 %vm637_vm0, %v22762_v35  ;;  %v22769_v35 = vld [vmem:[#allocation36_spill] sm:$0xff] }
 0x183   : > { %13091 = vmatmul.mubr.msk.f32.gmra.mrb[14].mxu0 %vm637_vm0, %v22763_v37  ;;  %v22770_v37 = vld [vmem:[#allocation37_spill] sm:$0xff] }
 0x184   : > { %13093 = vmatprep.mubr.msk.f32.mxu0 %vm637_vm0, %v22764_v44  ;;  %v22771_v44 = vld [vmem:[#allocation38_spill] sm:$0xff] }
 0x187   : > { %13094 = vmatmul.mubr.msk.f32.gmra.mrb[16].mxu0 %vm637_vm0, %v22765_v12 }
 0x188   : > { %13096 = vmatprep.mubr.msk.f32.mxu0 %vm637_vm0, %v22766_v40  ;;  %v22773_v40 = vld [vmem:[#allocation40_spill] sm:$0xff] }
 0x18b   : > { %13097 = vmatmul.mubr.msk.f32.gmra.mrb[18].mxu0 %vm637_vm0, %v22767_v10  ;;  %v22774_v10 = vld [vmem:[#allocation41_spill] sm:$0xff] }
 0x18c   : > { %13099 = vmatprep.mubr.msk.f32.mxu0 %vm637_vm0, %v22768_v34 }
 0x18f   : > { %13100 = vmatmul.mubr.msk.f32.gmra.mrb[20].mxu0 %vm637_vm0, %v22769_v35  ;;  %v16701_v35 = vld [vmem:[%s15996_s28 + $0x182] sm:$0xff] }
 0x190   : > { %13102 = vmatprep.mubr.msk.f32.mxu0 %vm637_vm0, %v22770_v37 }
 0x193   : > { %13103 = vmatmul.mubr.msk.f32.gmra.mrb[22].mxu0 %vm637_vm0, %v22771_v44 }
 0x194   : > { %13105 = vmatprep.mubr.msk.f32.mxu0 %vm637_vm0, %v22772_v39  ;;  %v16708_v39 = vld [vmem:[%s15996_s28 + $0x18a] sm:$0xff] }
 0x197   : > { %13106 = vmatmul.mubr.msk.f32.gmra.mrb[24].mxu0 %vm637_vm0, %v16459_v36 }
 0x198   : > { %13108 = vmatprep.mubr.msk.f32.mxu0 %vm637_vm0, %v22773_v40  ;;  %v11410_v40 = vld [vmem:[%s22707_s4 + $0x80] sm:$0xff] }
 0x19b   : > { %13109 = vmatmul.mubr.msk.f32.gmra.mrb[26].mxu0 %vm637_vm0, %v22774_v10  ;;  %v11411_v10 = vld [vmem:[%s22707_s4 + $0x88] sm:$0xff] }
 0x19c   : > { %13111 = vmatprep.mubr.msk.f32.mxu0 %vm637_vm0, %v16472_v46 }
 0x19f   : > { %13112 = vmatmul.mubr.msk.f32.gmra.mrb[28].mxu0 %vm637_vm0, %v16479_v42  ;;  %v14033_v42 = vpack.c.bf16 %v11411_v10, %v11410_v40  ;;  %v11464_v40 = vld [vmem:[%s22475_s6 + $0x398] sm:$0xff] }
 0x1a0   : > { %13114 = vmatprep.mubr.msk.f32.mxu0 %vm637_vm0, %v16701_v35 }
 0x1a3   : > { %13115 = vmatmul.mubr.msk.f32.gmra.mrb[30].mxu0 %vm637_vm0, %v16708_v39 }
 0x1a4   : > { %13121 = vmatprep.mubr.msk.f32.mxu0 %vm637_vm0, %v16177_v48  ;;  %v559_v48 = vld [vmem:[%s15996_s28 + $0x1a0] sm:$0xff] }
 0x1a7   : > { %13122 = vmatmul.mubr.msk.f32.vlgmr.msra.gmra.mrb[0].mxu0 %vm637_vm0, %v16185_v49  ;;  %v11637_v49 = vld [vmem:[%s22477_s8 + $0x8] sm:$0xff] }
 0x1a8   : > { %14032 = vmatpush3.bf16.msra.mxu0 %v14029_v33  ;;  %13124 = vmatprep.mubr.msk.f32.mxu0 %vm637_vm0, %v16188_v50  ;;  %v558_v33 = vld [vmem:[%s15996_s28 + $0x198] sm:$0xff]  ;;  %v22792_v50 = vld [vmem:[#allocation26_spill] sm:$0xff] }
 0x1a9   : > { %14034 = vmatprep.subr.bf16.mxu0 %v14033_v42 }
 0x1ab   : > { %13125 = vmatmul.mubr.msk.f32.gmra.mrb[2].mxu0 %vm637_vm0, %v16195_v51  ;;  %v22793_v51 = vld [vmem:[#allocation27_spill] sm:$0xff] }
 0x1ac   : > { %13127 = vmatprep.mubr.msk.f32.mxu0 %vm637_vm0, %v16198_v52  ;;  %v22794_v52 = vld [vmem:[#allocation28_spill] sm:$0xff] }
 0x1af   : > { %13128 = vmatmul.mubr.msk.f32.gmra.mrb[4].mxu0 %vm637_vm0, %v16205_v53  ;;  %v22795_v53 = vld [vmem:[#allocation29_spill] sm:$0xff] }
 0x1b0   : > { %13130 = vmatprep.mubr.msk.f32.mxu0 %vm637_vm0, %v16208_v54  ;;  %v22796_v54 = vld [vmem:[#allocation30_spill] sm:$0xff] }
 0x1b3   : > { %13131 = vmatmul.mubr.msk.f32.gmra.mrb[6].mxu0 %vm637_vm0, %v16215_v55  ;;  %v22797_v55 = vld [vmem:[#allocation31_spill] sm:$0xff] }
 0x1b4   : > { %13133 = vmatprep.mubr.msk.f32.mxu0 %vm637_vm0, %v16218_v56  ;;  %v22798_v56 = vld [vmem:[#allocation33_spill] sm:$0xff] }
 0x1b7   : > { %13134 = vmatmul.mubr.msk.f32.gmra.mrb[8].mxu0 %vm637_vm0, %v16225_v57  ;;  %v11446_v57 = vld [vmem:[%s22475_s6 + $0x308] sm:$0xff] }
 0x1b8   : > { %13136 = vmatprep.mubr.msk.f32.mxu0 %vm637_vm0, %v16228_v58  ;;  %v11448_v58 = vld [vmem:[%s22475_s6 + $0x318] sm:$0xff] }
 0x1bb   : > { %13137 = vmatmul.mubr.msk.f32.gmra.mrb[10].mxu0 %vm637_vm0, %v16235_v59  ;;  %v14037_v59 = vpack.c.bf16 %v11448_v58, %v11446_v57  ;;  %v11477_v57 = vld [vmem:[%s22475_s6 + $0x400] sm:$0xff]  ;;  %v11479_v58 = vld [vmem:[%s22475_s6 + $0x410] sm:$0xff] }
 0x1bc   : > { %13139 = vmatprep.mubr.msk.f32.mxu0 %vm637_vm0, %v16238_v60  ;;  %v11445_v60 = vld [vmem:[%s22475_s6 + $0x300] sm:$0xff] }
 0x1bd   : > { %14038 = vmatprep.subr.bf16.mxu1 %v14037_v59  ;;  %v14071_v59 = vpack.c.bf16 %v11479_v58, %v11477_v57  ;;  %v5472_v57 = vld [vmem:[%s16997_s19 + $0xf1] sm:$0xff]  ;;  %v5473_v58 = vld [vmem:[%s16997_s19 + $0xf9] sm:$0xff] }
 0x1bf   : > { %13140 = vmatmul.mubr.msk.f32.gmra.mrb[12].mxu0 %vm637_vm0, %v16245_v61  ;;  %v11447_v61 = vld [vmem:[%s22475_s6 + $0x310] sm:$0xff] }
 0x1c0   : > { %13142 = vmatprep.mubr.msk.f32.mxu0 %vm637_vm0, %v16248_v62  ;;  %v22799_v62 = vld [vmem:[#allocation34_spill] sm:$0xff] }
 0x1c3   : > { %13143 = vmatmul.mubr.msk.f32.gmra.mrb[14].mxu0 %vm637_vm0, %v16255_v63  ;;  %v14039_v63 = vpack.c.bf16 %v11447_v61, %v11445_v60  ;;  %v5455_v60 = vld [vmem:[%s16997_s19 + $0x21] sm:$0xff]  ;;  %v5456_v61 = vld [vmem:[%s16997_s19 + $0x31] sm:$0xff] }
 0x1c4   : > { %13145 = vmatprep.mubr.msk.f32.mxu0 %vm637_vm0, %v16258_v0  ;;  %v11450_v0 = vld [vmem:[%s22475_s6 + $0x328] sm:$0xff] }
 0x1c5   : > { %14040 = vmatpush1.bf16.msra.mxu1 %v14039_v63  ;;  %v11484_v63 = vld [vmem:[%s22475_s6 + $0x438] sm:$0xff] }
 0x1c7   : > { %13146 = vmatmul.mubr.msk.f32.gmra.mrb[16].mxu0 %vm637_vm0, %v16265_v1  ;;  %v11452_v1 = vld [vmem:[%s22475_s6 + $0x338] sm:$0xff] }
 0x1c8   : > { %13148 = vmatprep.mubr.msk.f32.mxu0 %vm637_vm0, %v16268_v2  ;;  %v14041_v2 = vpack.c.bf16 %v11452_v1, %v11450_v0  ;;  %v11481_v1 = vld [vmem:[%s22475_s6 + $0x420] sm:$0xff] }
 0x1ca   : > { %14042 = vmatprep.subr.bf16.mxu1 %v14041_v2 }
 0x1cb   : > { %13149 = vmatmul.mubr.msk.f32.gmra.mrb[18].mxu0 %vm637_vm0, %v16275_v3  ;;  %v11449_v3 = vld [vmem:[%s22475_s6 + $0x320] sm:$0xff] }
 0x1cc   : > { %13151 = vmatprep.mubr.msk.f32.mxu0 %vm637_vm0, %v16278_v4  ;;  %v11451_v4 = vld [vmem:[%s22475_s6 + $0x330] sm:$0xff] }
 0x1cf   : > { %13152 = vmatmul.mubr.msk.f32.gmra.mrb[20].mxu0 %vm637_vm0, %v16285_v5  ;;  %v14043_v5 = vpack.c.bf16 %v11451_v4, %v11449_v3  ;;  %v5457_v3 = vld [vmem:[%s16997_s19 + $0x39] sm:$0xff]  ;;  %v5458_v4 = vld [vmem:[%s16997_s19 + $0x49] sm:$0xff] }
 0x1d0   : > { %13154 = vmatprep.mubr.msk.f32.mxu0 %vm637_vm0, %v16288_v6  ;;  %v11454_v6 = vld [vmem:[%s22475_s6 + $0x348] sm:$0xff] }
 0x1d1   : > { %14044 = vmatpush1.bf16.msra.mxu1 %v14043_v5  ;;  %v11488_v5 = vld [vmem:[%s22475_s6 + $0x458] sm:$0xff] }
 0x1d3   : > { %13155 = vmatmul.mubr.msk.f32.gmra.mrb[22].mxu0 %vm637_vm0, %v16295_v7  ;;  %v11456_v7 = vld [vmem:[%s22475_s6 + $0x358] sm:$0xff] }
 0x1d4   : > { %13157 = vmatprep.mubr.msk.f32.mxu0 %vm637_vm0, %v16298_v8  ;;  %v14045_v8 = vpack.c.bf16 %v11456_v7, %v11454_v6  ;;  %v11485_v7 = vld [vmem:[%s22475_s6 + $0x440] sm:$0xff] }
 0x1d6   : > { %14046 = vmatprep.subr.bf16.mxu1 %v14045_v8  ;;  %v11487_v8 = vld [vmem:[%s22475_s6 + $0x450] sm:$0xff] }
 0x1d7   : > { %13158 = vmatmul.mubr.msk.f32.gmra.mrb[24].mxu0 %vm637_vm0, %v16305_v9  ;;  %v11453_v9 = vld [vmem:[%s22475_s6 + $0x340] sm:$0xff] }
 0x1d8   : > { %13160 = vmatprep.mubr.msk.f32.mxu0 %vm637_vm0, %v16308_v11  ;;  %v11455_v11 = vld [vmem:[%s22475_s6 + $0x350] sm:$0xff] }
 0x1db   : > { %13161 = vmatmul.mubr.msk.f32.gmra.mrb[26].mxu0 %vm637_vm0, %v16315_v41  ;;  %v14047_v41 = vpack.c.bf16 %v11455_v11, %v11453_v9  ;;  %v14079_v9 = vpack.c.bf16 %v11487_v8, %v11485_v7  ;;  %v5459_v11 = vld [vmem:[%s16997_s19 + $0x51] sm:$0xff]  ;;  %v5417_v7 = vld [vmem:[%s16997_s19 + $0x8] sm:$0xff] }
 0x1dc   : > { %13163 = vmatprep.mubr.msk.f32.mxu0 %vm637_vm0, %v16549_v38  ;;  %v11458_v38 = vld [vmem:[%s22475_s6 + $0x368] sm:$0xff]  ;;  %v17199_v8 = vld [vmem:[%s16997_s19 + $0x18] sm:$0xff] }
 0x1dd   : > { %14048 = vmatpush1.bf16.msra.mxu1 %v14047_v41  ;;  %v5460_v41 = vld [vmem:[%s16997_s19 + $0x61] sm:$0xff] }
 0x1df   : > { %13164 = vmatmul.mubr.msk.f32.gmra.mrb[28].mxu0 %vm637_vm0, %v16556_v45  ;;  %v11460_v45 = vld [vmem:[%s22475_s6 + $0x378] sm:$0xff] }
 0x1e0   : > { %13166 = vmatprep.mubr.msk.f32.mxu0 %vm637_vm0, %v558_v33  ;;  %v14049_v10 = vpack.c.bf16 %v11460_v45, %v11458_v38  ;;  %v11492_v38 = vld [vmem:[%s22475_s6 + $0x478] sm:$0xff] }
 0x1e2   : > { %14050 = vmatprep.subr.bf16.mxu1 %v14049_v10  ;;  %v11489_v10 = vld [vmem:[%s22475_s6 + $0x460] sm:$0xff] }
 0x1e3   : > { %13167 = vmatmul.mubr.msk.f32.gmra.mrb[30].mxu0 %vm637_vm0, %v559_v48  ;;  %v11461_v48 = vld [vmem:[%s22475_s6 + $0x380] sm:$0xff] }
 0x1e4   : > { %13173 = vmatprep.mubr.msk.f32.mxu0 %vm637_vm0, %v16013_v13  ;;  %v22775_v13 = vld [vmem:[#allocation9_spill] sm:$0xff] }
 0x1e7   : > { %13174 = vmatmul.mubr.msk.f32.vlgmr.msra.gmra.mrb[0].mxu0 %vm637_vm0, %v16021_v14  ;;  %v22776_v14 = vld [vmem:[#allocation10_spill] sm:$0xff] }
 0x1e8   : > { %14036 = vmatpush3.bf16.msra.mxu0 %v14033_v42  ;;  %13176 = vmatprep.mubr.msk.f32.mxu0 %vm637_vm0, %v16024_v15  ;;  %v22777_v15 = vld [vmem:[#allocation11_spill] sm:$0xff] }
 0x1e9   : > { %13273 = vmatprep.subr.mxu0 %v11637_v49  ;;  %v22801_v42 = vld [vmem:[#allocation39_spill] sm:$0xff] }
 0x1eb   : > { %13177 = vmatmul.mubr.msk.f32.gmra.mrb[2].mxu0 %vm637_vm0, %v16031_v16  ;;  %v22778_v16 = vld [vmem:[#allocation12_spill] sm:$0xff] }
 0x1ec   : > { %13179 = vmatprep.mubr.msk.f32.mxu0 %vm637_vm0, %v16034_v17  ;;  %v22779_v17 = vld [vmem:[#allocation13_spill] sm:$0xff] }
 0x1ef   : > { %13180 = vmatmul.mubr.msk.f32.gmra.mrb[4].mxu0 %vm637_vm0, %v16041_v18  ;;  %v22780_v18 = vld [vmem:[#allocation14_spill] sm:$0xff] }
 0x1f0   : > { %13182 = vmatprep.mubr.msk.f32.mxu0 %vm637_vm0, %v16044_v19  ;;  %v22781_v19 = vld [vmem:[#allocation15_spill] sm:$0xff] }
 0x1f3   : > { %13183 = vmatmul.mubr.msk.f32.gmra.mrb[6].mxu0 %vm637_vm0, %v16051_v20  ;;  %v22782_v20 = vld [vmem:[#allocation16_spill] sm:$0xff] }
 0x1f4   : > { %13185 = vmatprep.mubr.msk.f32.mxu0 %vm637_vm0, %v16054_v21  ;;  %v22783_v21 = vld [vmem:[#allocation43_spill] sm:$0xff] }
 0x1f7   : > { %13186 = vmatmul.mubr.msk.f32.gmra.mrb[8].mxu0 %vm637_vm0, %v16061_v22  ;;  %v594_v22 = vld [vmem:[%s15996_s28 + $0x199] sm:$0xff] }
 0x1f8   : > { %13188 = vmatprep.mubr.msk.f32.mxu0 %vm637_vm0, %v16064_v23  ;;  %v22784_v23 = vld [vmem:[#allocation44_spill] sm:$0xff] }
 0x1fb   : > { %13189 = vmatmul.mubr.msk.f32.gmra.mrb[10].mxu0 %vm637_vm0, %v16071_v24  ;;  %v595_v24 = vld [vmem:[%s15996_s28 + $0x1a1] sm:$0xff] }
 0x1fc   : > { %13191 = vmatprep.mubr.msk.f32.mxu0 %vm637_vm0, %v16074_v25  ;;  %v16854_v25 = vld [vmem:[%s22477_s8] sm:$0xff] }
 0x1ff   : > { %13192 = vmatmul.mubr.msk.f32.gmra.mrb[12].mxu0 %vm637_vm0, %v16081_v26  ;;  %v22785_v26 = vld [vmem:[#allocation19_spill] sm:$0xff] }
 0x200   : > { %13194 = vmatprep.mubr.msk.f32.mxu0 %vm637_vm0, %v16084_v27  ;;  %v22786_v27 = vld [vmem:[#allocation20_spill] sm:$0xff] }
 0x203   : > { %13195 = vmatmul.mubr.msk.f32.gmra.mrb[14].mxu0 %vm637_vm0, %v16091_v28  ;;  %v22787_v28 = vld [vmem:[#allocation21_spill] sm:$0xff] }
 0x204   : > { %13197 = vmatprep.mubr.msk.f32.mxu0 %vm637_vm0, %v16094_v29  ;;  %v22788_v29 = vld [vmem:[#allocation22_spill] sm:$0xff] }
 0x207   : > { %13198 = vmatmul.mubr.msk.f32.gmra.mrb[16].mxu0 %vm637_vm0, %v16101_v30  ;;  %v22789_v30 = vld [vmem:[#allocation23_spill] sm:$0xff] }
 0x208   : > { %13200 = vmatprep.mubr.msk.f32.mxu0 %vm637_vm0, %v16104_v31  ;;  %v22790_v31 = vld [vmem:[#allocation24_spill] sm:$0xff] }
 0x20b   : > { %13201 = vmatmul.mubr.msk.f32.gmra.mrb[18].mxu0 %vm637_vm0, %v16111_v32  ;;  %v22791_v32 = vld [vmem:[#allocation25_spill] sm:$0xff] }
 0x20c   : > { %13203 = vmatprep.mubr.msk.f32.mxu0 %vm637_vm0, %v22775_v13 }
 0x20f   : > { %13204 = vmatmul.mubr.msk.f32.gmra.mrb[20].mxu0 %vm637_vm0, %v22776_v14  ;;  %v11466_v14 = vld [vmem:[%s22475_s6 + $0x3a8] sm:$0xff] }
 0x210   : > { %13206 = vmatprep.mubr.msk.f32.mxu0 %vm637_vm0, %v22777_v15  ;;  %v11468_v15 = vld [vmem:[%s22475_s6 + $0x3b8] sm:$0xff] }
 0x213   : > { %13207 = vmatmul.mubr.msk.f32.gmra.mrb[22].mxu0 %vm637_vm0, %v22778_v16  ;;  %v14057_v16 = vpack.c.bf16 %v11468_v15, %v11466_v14  ;;  %v15848_v14 = vmov 0.0   ;;  %v5464_v15 = vld [vmem:[%s16997_s19 + $0x91] sm:$0xff] }
 0x214   : > { %13209 = vmatprep.mubr.msk.f32.mxu0 %vm637_vm0, %v22779_v17  ;;  %v11465_v17 = vld [vmem:[%s22475_s6 + $0x3a0] sm:$0xff]  ;;  %452 = vst [vmem:[#allocation2] sm:$0xff] %v15848_v14  ;;  %453 = vst [vmem:[#allocation2 + $0x8] sm:$0xff] %v15848_v14 }
 0x215   : > { %454 = vst [vmem:[#allocation2 + $0x10] sm:$0xff] %v15848_v14  ;;  %455 = vst [vmem:[#allocation2 + $0x18] sm:$0xff] %v15848_v14 }
 0x216   : > { %456 = vst [vmem:[#allocation2 + $0x20] sm:$0xff] %v15848_v14  ;;  %459 = vst [vmem:[#allocation2 + $0x38] sm:$0xff] %v15848_v14 }
 0x217   : > { %13210 = vmatmul.mubr.msk.f32.gmra.mrb[24].mxu0 %vm637_vm0, %v22780_v18  ;;  %v22804_v18 = vld [vmem:[#allocation42_spill] sm:$0xff]  ;;  %460 = vst [vmem:[#allocation2 + $0x40] sm:$0xff] %v15848_v14  ;;  %463 = vst [vmem:[#allocation2 + $0x58] sm:$0xff] %v15848_v14 }
 0x218   : > { %13212 = vmatprep.mubr.msk.f32.mxu0 %vm637_vm0, %v22781_v19  ;;  %464 = vst [vmem:[#allocation2 + $0x60] sm:$0xff] %v15848_v14  ;;  %467 = vst [vmem:[#allocation2 + $0x78] sm:$0xff] %v15848_v14 }
 0x219   : > { %468 = vst [vmem:[#allocation2 + $0x80] sm:$0xff] %v15848_v14  ;;  %471 = vst [vmem:[#allocation2 + $0x98] sm:$0xff] %v15848_v14 }
 0x21a   : > { %472 = vst [vmem:[#allocation2 + $0xa0] sm:$0xff] %v15848_v14  ;;  %475 = vst [vmem:[#allocation2 + $0xb8] sm:$0xff] %v15848_v14 }
 0x21b   : > { %13213 = vmatmul.mubr.msk.f32.gmra.mrb[26].mxu0 %vm637_vm0, %v22782_v20  ;;  %v630_v20 = vld [vmem:[%s15996_s28 + $0x19a] sm:$0xff]  ;;  %476 = vst [vmem:[#allocation2 + $0xc0] sm:$0xff] %v15848_v14  ;;  %479 = vst [vmem:[#allocation2 + $0xd8] sm:$0xff] %v15848_v14 }
 0x21c   : > { %13215 = vmatprep.mubr.msk.f32.mxu0 %vm637_vm0, %v22783_v21  ;;  %v11470_v21 = vld [vmem:[%s22475_s6 + $0x3c8] sm:$0xff]  ;;  %480 = vst [vmem:[#allocation2 + $0xe0] sm:$0xff] %v15848_v14  ;;  %483 = vst [vmem:[#allocation2 + $0xf8] sm:$0xff] %v15848_v14 }
 0x21d   : > { %484 = vst [vmem:[#allocation2 + $0x100] sm:$0xff] %v15848_v14  ;;  %487 = vst [vmem:[#allocation2 + $0x118] sm:$0xff] %v15848_v14 }
 0x21e   : > { %488 = vst [vmem:[#allocation2 + $0x120] sm:$0xff] %v15848_v14  ;;  %491 = vst [vmem:[#allocation2 + $0x138] sm:$0xff] %v15848_v14 }
 0x21f   : > { %13216 = vmatmul.mubr.msk.f32.gmra.mrb[28].mxu0 %vm637_vm0, %v22784_v23  ;;  %492 = vst [vmem:[#allocation2 + $0x140] sm:$0xff] %v15848_v14  ;;  %495 = vst [vmem:[#allocation2 + $0x158] sm:$0xff] %v15848_v14 }
 0x220   : > { %13218 = vmatprep.mubr.msk.f32.mxu0 %vm637_vm0, %v594_v22  ;;  %v11472_v22 = vld [vmem:[%s22475_s6 + $0x3d8] sm:$0xff]  ;;  %496 = vst [vmem:[#allocation2 + $0x160] sm:$0xff] %v15848_v14  ;;  %499 = vst [vmem:[#allocation2 + $0x178] sm:$0xff] %v15848_v14 }
 0x221   : > { %v14061_v23 = vpack.c.bf16 %v11472_v22, %v11470_v21  ;;  %500 = vst [vmem:[#allocation2 + $0x180] sm:$0xff] %v15848_v14  ;;  %503 = vst [vmem:[#allocation2 + $0x198] sm:$0xff] %v15848_v14  ;;  %v5466_v22 = vld [vmem:[%s16997_s19 + $0xa9] sm:$0xff] }
 0x222   : > { %504 = vst [vmem:[#allocation2 + $0x1a0] sm:$0xff] %v15848_v14  ;;  %507 = vst [vmem:[#allocation2 + $0x1b8] sm:$0xff] %v15848_v14 }
 0x223   : > { %13219 = vmatmul.mubr.msk.f32.gmra.mrb[30].mxu0 %vm637_vm0, %v595_v24  ;;  %v11471_v24 = vld [vmem:[%s22475_s6 + $0x3d0] sm:$0xff]  ;;  %508 = vst [vmem:[#allocation2 + $0x1c0] sm:$0xff] %v15848_v14  ;;  %511 = vst [vmem:[#allocation2 + $0x1d8] sm:$0xff] %v15848_v14 }
 0x224   : > { %13225 = vmatprep.mubr.msk.f32.mxu0 %vm637_vm0, %v22750_v43  ;;  %v11459_v43 = vld [vmem:[%s22475_s6 + $0x370] sm:$0xff]  ;;  %512 = vst [vmem:[#allocation2 + $0x1e0] sm:$0xff] %v15848_v14  ;;  %515 = vst [vmem:[#allocation2 + $0x1f8] sm:$0xff] %v15848_v14 }
 0x225   : > { %516 = vst [vmem:[#allocation2 + $0x200] sm:$0xff] %v15848_v14  ;;  %519 = vst [vmem:[#allocation2 + $0x218] sm:$0xff] %v15848_v14 }
 0x226   : > { %520 = vst [vmem:[#allocation2 + $0x220] sm:$0xff] %v15848_v14  ;;  %521 = vst [vmem:[#allocation2 + $0x228] sm:$0xff] %v15848_v14 }
 0x227   : > { %13226 = vmatmul.mubr.msk.f32.vlgmr.msra.gmra.mrb[0].mxu0 %vm637_vm0, %v22751_v47  ;;  %v11457_v47 = vld [vmem:[%s22475_s6 + $0x360] sm:$0xff]  ;;  %522 = vst [vmem:[#allocation2 + $0x230] sm:$0xff] %v15848_v14  ;;  %523 = vst [vmem:[#allocation2 + $0x238] sm:$0xff] %v15848_v14  ;;  %v17302_v14 = vld [vmem:[%s16997_s19 + $0xf8] sm:$0xff] }
 0x228   : > { %13228 = vmatprep.mubr.msk.f32.mxu0 %vm637_vm0, %v22785_v26  ;;  %13274 = vmatpush3.msra.mxu0 %v11637_v49  ;;  %v22803_v49 = vld [vmem:[#allocation41_spill] sm:$0xff] }
 0x229   : > { %13323 = vmatprep.subr.mxu0 %v16854_v25 }
 0x22b   : > { %13229 = vmatmul.mubr.msk.f32.gmra.mrb[2].mxu0 %vm637_vm0, %v22786_v27  ;;  %v631_v27 = vld [vmem:[%s15996_s28 + $0x1a2] sm:$0xff]  ;;  %s15852_s28 = smov [#allocation3]  }
 0x22c   : > { %13231 = vmatprep.mubr.msk.f32.mxu0 %vm637_vm0, %v22787_v28  ;;  %v5452_v28 = vld [vmem:[%s16997_s19 + $0x1] sm:$0xff]  ;;  %s15788_s0 = sshll.u32 %s15852_s28, 4  ;;  %s15789_s0 = int_to_ptr.vmem [resolvable:$false] %s15788_s0 }
 0x22d   : > { %s15790_s15 = scalar_lea.vmem %s15789_s0, 8192 }
 0x22f   : > { %13232 = vmatmul.mubr.msk.f32.gmra.mrb[4].mxu0 %vm637_vm0, %v22788_v29  ;;  %v11474_v29 = vld [vmem:[%s22475_s6 + $0x3e8] sm:$0xff] }
 0x230   : > { %13234 = vmatprep.mubr.msk.f32.mxu0 %vm637_vm0, %v22789_v30  ;;  %v11476_v30 = vld [vmem:[%s22475_s6 + $0x3f8] sm:$0xff] }
 0x233   : > { %13235 = vmatmul.mubr.msk.f32.gmra.mrb[6].mxu0 %vm637_vm0, %v22790_v31  ;;  %v14065_v31 = vpack.c.bf16 %v11476_v30, %v11474_v29  ;;  %v5467_v29 = vld [vmem:[%s16997_s19 + $0xb1] sm:$0xff]  ;;  %v5468_v30 = vld [vmem:[%s16997_s19 + $0xc1] sm:$0xff] }
 0x234   : > { %13237 = vmatprep.mubr.msk.f32.mxu0 %vm637_vm0, %v22791_v32  ;;  %v11475_v32 = vld [vmem:[%s22475_s6 + $0x3f0] sm:$0xff] }
 0x237   : > { %13238 = vmatmul.mubr.msk.f32.gmra.mrb[8].mxu0 %vm637_vm0, %v22792_v50 }
 0x238   : > { %13240 = vmatprep.mubr.msk.f32.mxu0 %vm637_vm0, %v22793_v51  ;;  %v5453_v51 = vld [vmem:[%s16997_s19 + $0x9] sm:$0xff] }
 0x23b   : > { %13241 = vmatmul.mubr.msk.f32.gmra.mrb[10].mxu0 %vm637_vm0, %v22794_v52  ;;  %v5454_v52 = vld [vmem:[%s16997_s19 + $0x19] sm:$0xff] }
 0x23c   : > { %13243 = vmatprep.mubr.msk.f32.mxu0 %vm637_vm0, %v22795_v53  ;;  %v11478_v53 = vld [vmem:[%s22475_s6 + $0x408] sm:$0xff] }
 0x23f   : > { %13244 = vmatmul.mubr.msk.f32.gmra.mrb[12].mxu0 %vm637_vm0, %v22796_v54  ;;  %v11480_v54 = vld [vmem:[%s22475_s6 + $0x418] sm:$0xff] }
 0x240   : > { %13246 = vmatprep.mubr.msk.f32.mxu0 %vm637_vm0, %v22797_v55  ;;  %v17035_v55 = vld [vmem:[%s22477_s8 + $0x10] sm:$0xff] }
 0x243   : > { %13247 = vmatmul.mubr.msk.f32.gmra.mrb[14].mxu0 %vm637_vm0, %v22765_v12  ;;  %v11462_v12 = vld [vmem:[%s22475_s6 + $0x388] sm:$0xff] }
 0x244   : > { %13249 = vmatprep.mubr.msk.f32.mxu0 %vm637_vm0, %v22798_v56  ;;  %v14053_v33 = vpack.c.bf16 %v11464_v40, %v11462_v12  ;;  %v14069_v56 = vpack.c.bf16 %v11480_v54, %v11478_v53  ;;  %v11494_v12 = vld [vmem:[%s22475_s6 + $0x488] sm:$0xff]  ;;  %v11496_v40 = vld [vmem:[%s22475_s6 + $0x498] sm:$0xff] }
 0x245   : > { %v5469_v53 = vld [vmem:[%s16997_s19 + $0xc9] sm:$0xff]  ;;  %v5470_v54 = vld [vmem:[%s16997_s19 + $0xd9] sm:$0xff] }
 0x247   : > { %13250 = vmatmul.mubr.msk.f32.gmra.mrb[16].mxu0 %vm637_vm0, %v22799_v62  ;;  %v11482_v62 = vld [vmem:[%s22475_s6 + $0x428] sm:$0xff] }
 0x248   : > { %13252 = vmatprep.mubr.msk.f32.mxu0 %vm637_vm0, %v22768_v34  ;;  %v22800_v34 = vld [vmem:[#allocation36_spill] sm:$0xff]  ;;  %v14073_v0 = vpack.c.bf16 %v11484_v63, %v11482_v62 }
 0x249   : > { %v5475_v63 = vld [vmem:[%s16997_s19 + $0x111] sm:$0xff] }
 0x24b   : > { %13253 = vmatmul.mubr.msk.f32.gmra.mrb[18].mxu0 %vm637_vm0, %v22800_v34  ;;  %v11486_v34 = vld [vmem:[%s22475_s6 + $0x448] sm:$0xff] }
 0x24c   : > { %13255 = vmatprep.mubr.msk.f32.mxu0 %vm637_vm0, %v22770_v37  ;;  %v14051_v37 = vpack.c.bf16 %v11459_v43, %v11457_v47  ;;  %v14077_v6 = vpack.c.bf16 %v11488_v5, %v11486_v34  ;;  %v11491_v47 = vld [vmem:[%s22475_s6 + $0x470] sm:$0xff] }
 0x24d   : > { %v14083_v43 = vpack.c.bf16 %v11491_v47, %v11489_v10  ;;  %v5482_v34 = vld [vmem:[%s16997_s19 + $0x169] sm:$0xff]  ;;  %v5483_v5 = vld [vmem:[%s16997_s19 + $0x171] sm:$0xff] }
 0x24e   : > { %14052 = vmatpush1.bf16.msra.mxu1 %v14051_v37  ;;  %v5461_v37 = vld [vmem:[%s16997_s19 + $0x69] sm:$0xff]  ;;  %v17245_v47 = vld [vmem:[%s16997_s19 + $0x78] sm:$0xff] }
 0x24f   : > { %13256 = vmatmul.mubr.msk.f32.gmra.mrb[20].mxu0 %vm637_vm0, %v22771_v44  ;;  %v22802_v44 = vld [vmem:[#allocation40_spill] sm:$0xff]  ;;  %14054 = vmatprep.subr.bf16.mxu1 %v14053_v33  ;;  %v14085_v33 = vpack.c.bf16 %v11496_v40, %v11494_v12  ;;  %v17242_v10 = vld [vmem:[%s16997_s19 + $0x68] sm:$0xff]  ;;  %v17272_v40 = vld [vmem:[%s16997_s19 + $0xb0] sm:$0xff] }
 0x250   : > { %13258 = vmatprep.mubr.msk.f32.mxu0 %vm637_vm0, %v22801_v42  ;;  %v11490_v42 = vld [vmem:[%s22475_s6 + $0x468] sm:$0xff] }
 0x251   : > { %v14081_v45 = vpack.c.bf16 %v11492_v38, %v11490_v42  ;;  %v17222_v42 = vld [vmem:[%s16997_s19 + $0x38] sm:$0xff]  ;;  %v17225_v38 = vld [vmem:[%s16997_s19 + $0x48] sm:$0xff] }
 0x252   : > { %v17265_v12 = vld [vmem:[%s16997_s19 + $0xa8] sm:$0xff] }
 0x253   : > { %13259 = vmatmul.mubr.msk.f32.gmra.mrb[22].mxu0 %vm637_vm0, %v16459_v36  ;;  %v11463_v36 = vld [vmem:[%s22475_s6 + $0x390] sm:$0xff] }
 0x254   : > { %13261 = vmatprep.mubr.msk.f32.mxu0 %vm637_vm0, %v22802_v44  ;;  %v14055_v13 = vpack.c.bf16 %v11463_v36, %v11461_v48  ;;  %v5462_v44 = vld [vmem:[%s16997_s19 + $0x79] sm:$0xff]  ;;  %v11495_v36 = vld [vmem:[%s22475_s6 + $0x490] sm:$0xff] }
 0x255   : > { %v11493_v48 = vld [vmem:[%s22475_s6 + $0x480] sm:$0xff] }
 0x256   : > { %14056 = vmatpush1.bf16.msra.mxu1 %v14055_v13  ;;  %v5463_v13 = vld [vmem:[%s16997_s19 + $0x81] sm:$0xff] }
 0x257   : > { %13262 = vmatmul.mubr.msk.f32.gmra.mrb[24].mxu0 %vm637_vm0, %v22803_v49  ;;  %14058 = vmatprep.subr.bf16.mxu1 %v14057_v16  ;;  %v14087_v49 = vpack.c.bf16 %v11495_v36, %v11493_v48  ;;  %v11498_v16 = vld [vmem:[%s22475_s6 + $0x4a8] sm:$0xff]  ;;  %v17285_v36 = vld [vmem:[%s16997_s19 + $0xd8] sm:$0xff] }
 0x258   : > { %13264 = vmatprep.mubr.msk.f32.mxu0 %vm637_vm0, %v16472_v46  ;;  %v11467_v46 = vld [vmem:[%s22475_s6 + $0x3b0] sm:$0xff]  ;;  %v17282_v48 = vld [vmem:[%s16997_s19 + $0xc8] sm:$0xff] }
 0x259   : > { %v14059_v19 = vpack.c.bf16 %v11467_v46, %v11465_v17  ;;  %v11500_v17 = vld [vmem:[%s22475_s6 + $0x4b8] sm:$0xff] }
 0x25a   : > { %v14089_v46 = vpack.c.bf16 %v11500_v17, %v11498_v16  ;;  %v17312_v16 = vld [vmem:[%s16997_s19 + $0x110] sm:$0xff]  ;;  %v17315_v17 = vld [vmem:[%s16997_s19 + $0x120] sm:$0xff] }
 0x25b   : > { %13265 = vmatmul.mubr.msk.f32.gmra.mrb[26].mxu0 %vm637_vm0, %v22804_v18  ;;  %14060 = vmatpush1.bf16.msra.mxu1 %v14059_v19  ;;  %v11497_v18 = vld [vmem:[%s22475_s6 + $0x4a0] sm:$0xff]  ;;  %v11499_v19 = vld [vmem:[%s22475_s6 + $0x4b0] sm:$0xff] }
 0x25c   : > { %13267 = vmatprep.mubr.msk.f32.mxu0 %vm637_vm0, %v16701_v35  ;;  %v11469_v35 = vld [vmem:[%s22475_s6 + $0x3c0] sm:$0xff]  ;;  %14062 = vmatprep.subr.bf16.mxu1 %v14061_v23  ;;  %v14091_v21 = vpack.c.bf16 %v11499_v19, %v11497_v18  ;;  %v11502_v23 = vld [vmem:[%s22475_s6 + $0x4c8] sm:$0xff]  ;;  %v17325_v18 = vld [vmem:[%s16997_s19 + $0x138] sm:$0xff] }
 0x25d   : > { %v14063_v26 = vpack.c.bf16 %v11471_v24, %v11469_v35  ;;  %v11504_v35 = vld [vmem:[%s22475_s6 + $0x4d8] sm:$0xff]  ;;  %v17332_v19 = vld [vmem:[%s16997_s19 + $0x140] sm:$0xff] }
 0x25e   : > { %v14093_v24 = vpack.c.bf16 %v11504_v35, %v11502_v23  ;;  %v17352_v23 = vld [vmem:[%s16997_s19 + $0x170] sm:$0xff]  ;;  %v5488_v35 = vld [vmem:[%s16997_s19 + $0x2] sm:$0xff] }
 0x25f   : > { %13268 = vmatmul.mubr.msk.f32.gmra.mrb[28].mxu0 %vm637_vm0, %v16708_v39  ;;  %14064 = vmatpush1.bf16.msra.mxu1 %v14063_v26  ;;  %v11473_v39 = vld [vmem:[%s22475_s6 + $0x3e0] sm:$0xff] }
 0x260   : > { %13270 = vmatprep.mubr.msk.f32.mxu0 %vm637_vm0, %v630_v20  ;;  %v14067_v50 = vpack.c.bf16 %v11475_v32, %v11473_v39  ;;  %14066 = vmatprep.subr.bf16.mxu1 %v14065_v31  ;;  %v5465_v20 = vld [vmem:[%s16997_s19 + $0x99] sm:$0xff]  ;;  %v11506_v31 = vld [vmem:[%s22475_s6 + $0x4e8] sm:$0xff] }
 0x261   : > { %v11501_v26 = vld [vmem:[%s22475_s6 + $0x4c0] sm:$0xff]  ;;  %v11508_v39 = vld [vmem:[%s22475_s6 + $0x4f8] sm:$0xff] }
 0x262   : > { %v14097_v32 = vpack.c.bf16 %v11508_v39, %v11506_v31  ;;  %v5494_v31 = vld [vmem:[%s16997_s19 + $0x4a] sm:$0xff]  ;;  %v5495_v39 = vld [vmem:[%s16997_s19 + $0x52] sm:$0xff] }
 0x263   : > { %13271 = vmatmul.mubr.msk.f32.gmra.mrb[30].mxu0 %vm637_vm0, %v631_v27  ;;  %14068 = vmatpush1.bf16.msra.mxu1 %v14067_v50  ;;  %v11503_v27 = vld [vmem:[%s22475_s6 + $0x4d0] sm:$0xff]  ;;  %v11505_v50 = vld [vmem:[%s22475_s6 + $0x4e0] sm:$0xff] }
 0x264   : > { %13275 = vmatprep.mubr.msk.f32.mxu0 %vm5527_vm1, %v5452_v28  ;;  %14070 = vmatprep.subr.bf16.mxu1 %v14069_v56  ;;  %v14095_v28 = vpack.c.bf16 %v11503_v27, %v11501_v26  ;;  %v5471_v56 = vld [vmem:[%s16997_s19 + $0xe1] sm:$0xff] }
 0x265   : > { %v5490_v26 = vld [vmem:[%s16997_s19 + $0x1a] sm:$0xff] }
 0x266   : > { %v17363_v27 = vld [vmem:[%s22477_s8 + $0x20] sm:$0xff] }
 0x267   : > { %13276 = vmatmul.mubr.msk.f32.vlgmr.msra.gmra.mrb[32].mxu0 %vm5527_vm1, %v5453_v51  ;;  %14072 = vmatpush1.bf16.msra.mxu1 %v14071_v59  ;;  %v11507_v51 = vld [vmem:[%s22475_s6 + $0x4f0] sm:$0xff]  ;;  %v11510_v59 = vld [vmem:[%s22475_s6 + $0x508] sm:$0xff] }
 0x268   : > { %13278 = vmatprep.mubr.msk.f32.mxu0 %vm5527_vm1, %v5454_v52  ;;  %13324 = vmatpush3.msra.mxu0 %v16854_v25  ;;  %v11483_v25 = vld [vmem:[%s22475_s6 + $0x430] sm:$0xff]  ;;  %v14099_v52 = vpack.c.bf16 %v11507_v51, %v11505_v50  ;;  %v5498_v51 = vld [vmem:[%s16997_s19 + $0x7a] sm:$0xff] }
 0x269   : > { %13373 = vmatprep.subr.mxu0 %v17035_v55  ;;  %v14075_v2 = vpack.c.bf16 %v11483_v25, %v11481_v1  ;;  %14074 = vmatprep.subr.bf16.mxu1 %v14073_v0  ;;  %v5476_v0 = vld [vmem:[%s16997_s19 + $0x121] sm:$0xff]  ;;  %v5477_v1 = vld [vmem:[%s16997_s19 + $0x129] sm:$0xff]  ;;  %v5478_v25 = vld [vmem:[%s16997_s19 + $0x139] sm:$0xff] }
 0x26a   : > { %v5497_v50 = vld [vmem:[%s16997_s19 + $0x6a] sm:$0xff] }
 0x26b   : > { %13279 = vmatmul.mubr.msk.f32.gmra.mrb[34].mxu0 %vm5527_vm1, %v5455_v60  ;;  %14076 = vmatpush1.bf16.msra.mxu1 %v14075_v2  ;;  %v11512_v60 = vld [vmem:[%s22475_s6 + $0x518] sm:$0xff]  ;;  %v5479_v2 = vld [vmem:[%s16997_s19 + $0x141] sm:$0xff] }
 0x26c   : > { %13281 = vmatprep.mubr.msk.f32.mxu0 %vm5527_vm1, %v5456_v61  ;;  %14078 = vmatprep.subr.bf16.mxu1 %v14077_v6  ;;  %v5474_v61 = vld [vmem:[%s16997_s19 + $0x109] sm:$0xff]  ;;  %v14101_v62 = vpack.c.bf16 %v11512_v60, %v11510_v59  ;;  %v5416_v6 = vld [vmem:[%s16997_s19] sm:$0xff] }
 0x26d   : > { %v5501_v60 = vld [vmem:[%s16997_s19 + $0x9a] sm:$0xff] }
 0x26f   : > { %13282 = vmatmul.mubr.msk.f32.gmra.mrb[36].mxu0 %vm5527_vm1, %v5457_v3  ;;  %14080 = vmatpush1.bf16.msra.mxu1 %v14079_v9  ;;  %v5480_v3 = vld [vmem:[%s16997_s19 + $0x151] sm:$0xff] }
 0x270   : > { %13284 = vmatprep.mubr.msk.f32.mxu0 %vm5527_vm1, %v5458_v4  ;;  %14082 = vmatprep.subr.bf16.mxu1 %v14081_v45  ;;  %v5481_v4 = vld [vmem:[%s16997_s19 + $0x159] sm:$0xff] }
 0x271   : > { %v17204_v9 = vld [vmem:[%s22477_s8 + $0x18] sm:$0xff]  ;;  %v17235_v45 = vld [vmem:[%s16997_s19 + $0x60] sm:$0xff] }
 0x273   : > { %13285 = vmatmul.mubr.msk.f32.gmra.mrb[38].mxu0 %vm5527_vm1, %v5459_v11  ;;  %14084 = vmatpush1.bf16.msra.mxu1 %v14083_v43  ;;  %v17210_v11 = vld [vmem:[%s16997_s19 + $0x20] sm:$0xff] }
 0x274   : > { %13287 = vmatprep.mubr.msk.f32.mxu0 %vm5527_vm1, %v5460_v41  ;;  %14086 = vmatprep.subr.bf16.mxu1 %v14085_v33  ;;  %v17214_v41 = vld [vmem:[%s16997_s19 + $0x30] sm:$0xff]  ;;  %v17252_v43 = vld [vmem:[%s16997_s19 + $0x80] sm:$0xff] }
 0x275   : > { %v17275_v33 = vld [vmem:[%s16997_s19 + $0xc0] sm:$0xff] }
 0x277   : > { %13288 = vmatmul.mubr.msk.f32.gmra.mrb[40].mxu0 %vm5527_vm1, %v5461_v37  ;;  %14088 = vmatpush1.bf16.msra.mxu1 %v14087_v49  ;;  %v17255_v37 = vld [vmem:[%s16997_s19 + $0x90] sm:$0xff]  ;;  %v17292_v49 = vld [vmem:[%s16997_s19 + $0xe0] sm:$0xff] }
 0x278   : > { %13290 = vmatprep.mubr.msk.f32.mxu0 %vm5527_vm1, %v5462_v44  ;;  %14090 = vmatprep.subr.bf16.mxu1 %v14089_v46  ;;  %v17262_v44 = vld [vmem:[%s16997_s19 + $0x98] sm:$0xff]  ;;  %v17322_v46 = vld [vmem:[%s16997_s19 + $0x128] sm:$0xff] }
 0x27b   : > { %13291 = vmatmul.mubr.msk.f32.gmra.mrb[42].mxu0 %vm5527_vm1, %v5463_v13  ;;  %14092 = vmatpush1.bf16.msra.mxu1 %v14091_v21  ;;  %v17295_v13 = vld [vmem:[%s16997_s19 + $0xf0] sm:$0xff]  ;;  %v17342_v21 = vld [vmem:[%s16997_s19 + $0x158] sm:$0xff] }
 0x27c   : > { %13293 = vmatprep.mubr.msk.f32.mxu0 %vm5527_vm1, %v5464_v15  ;;  %14094 = vmatprep.subr.bf16.mxu1 %v14093_v24  ;;  %v17305_v15 = vld [vmem:[%s16997_s19 + $0x108] sm:$0xff] }
 0x27d   : > { %v5489_v24 = vld [vmem:[%s16997_s19 + $0xa] sm:$0xff] }
 0x27f   : > { %13294 = vmatmul.mubr.msk.f32.gmra.mrb[44].mxu0 %vm5527_vm1, %v5465_v20  ;;  %14096 = vmatpush1.bf16.msra.mxu1 %v14095_v28  ;;  %v17335_v20 = vld [vmem:[%s16997_s19 + $0x150] sm:$0xff]  ;;  %v5491_v28 = vld [vmem:[%s16997_s19 + $0x22] sm:$0xff] }
 0x280   : > { %13296 = vmatprep.mubr.msk.f32.mxu0 %vm5527_vm1, %v5466_v22  ;;  %14098 = vmatprep.subr.bf16.mxu1 %v14097_v32  ;;  %v17345_v22 = vld [vmem:[%s16997_s19 + $0x168] sm:$0xff] }
 0x281   : > { %v5496_v32 = vld [vmem:[%s16997_s19 + $0x62] sm:$0xff] }
 0x283   : > { %13297 = vmatmul.mubr.msk.f32.gmra.mrb[46].mxu0 %vm5527_vm1, %v5467_v29  ;;  %14100 = vmatpush1.bf16.msra.mxu1 %v14099_v52  ;;  %v5492_v29 = vld [vmem:[%s16997_s19 + $0x32] sm:$0xff]  ;;  %v17387_v52 = vld [vmem:[%s22474_s5] ss:$0 sm:$0xff] }
 0x284   : > { %13299 = vmatprep.mubr.msk.f32.mxu0 %vm5527_vm1, %v5468_v30  ;;  %14102 = vmatprep.subr.bf16.mxu1 %v14101_v62  ;;  %v5493_v30 = vld [vmem:[%s16997_s19 + $0x3a] sm:$0xff]  ;;  %v5502_v62 = vld [vmem:[%s16997_s19 + $0xaa] sm:$0xff] }
 0x287   : > { %13300 = vmatmul.mubr.msk.f32.gmra.mrb[48].mxu0 %vm5527_vm1, %v5469_v53  ;;  %v5499_v53 = vld [vmem:[%s16997_s19 + $0x82] sm:$0xff] }
 0x288   : > { %13302 = vmatprep.mubr.msk.f32.mxu0 %vm5527_vm1, %v5470_v54  ;;  %v5500_v54 = vld [vmem:[%s16997_s19 + $0x92] sm:$0xff] }
 0x28b   : > { %13303 = vmatmul.mubr.msk.f32.gmra.mrb[50].mxu0 %vm5527_vm1, %v5471_v56 }
 0x28c   : > { %13305 = vmatprep.mubr.msk.f32.mxu0 %vm5527_vm1, %v5472_v57 }
 0x28f   : > { %13306 = vmatmul.mubr.msk.f32.gmra.mrb[52].mxu0 %vm5527_vm1, %v5473_v58 }
 0x290   : > { %13308 = vmatprep.mubr.msk.f32.mxu0 %vm5527_vm1, %v5474_v61 }
 0x293   : > { %13309 = vmatmul.mubr.msk.f32.gmra.mrb[54].mxu0 %vm5527_vm1, %v5475_v63 }
 0x294   : > { %13311 = vmatprep.mubr.msk.f32.mxu0 %vm5527_vm1, %v5476_v0 }
 0x297   : > { %13312 = vmatmul.mubr.msk.f32.gmra.mrb[56].mxu0 %vm5527_vm1, %v5477_v1 }
 0x298   : > { %13314 = vmatprep.mubr.msk.f32.mxu0 %vm5527_vm1, %v5478_v25 }
 0x29b   : > { %13315 = vmatmul.mubr.msk.f32.gmra.mrb[58].mxu0 %vm5527_vm1, %v5479_v2 }
 0x29c   : > { %13317 = vmatprep.mubr.msk.f32.mxu0 %vm5527_vm1, %v5480_v3  ;;  %v5503_v3 = vld [vmem:[%s16997_s19 + $0xb2] sm:$0xff] }
 0x29f   : > { %13318 = vmatmul.mubr.msk.f32.gmra.mrb[60].mxu0 %vm5527_vm1, %v5481_v4 }
 0x2a0   : > { %13320 = vmatprep.mubr.msk.f32.mxu0 %vm5527_vm1, %v5482_v34  ;;  %v5504_v34 = vld [vmem:[%s16997_s19 + $0xc2] sm:$0xff] }
 0x2a3   : > { %13321 = vmatmul.mubr.msk.f32.gmra.mrb[62].mxu0 %vm5527_vm1, %v5483_v5 }
 0x2a4   : > { %13325 = vmatprep.mubr.msk.f32.mxu0 %vm5527_vm1, %v5416_v6 }
 0x2a7   : > { %13326 = vmatmul.mubr.msk.f32.vlgmr.msra.gmra.mrb[32].mxu0 %vm5527_vm1, %v5417_v7  ;;  %v11509_v7 = vld [vmem:[%s22475_s6 + $0x500] sm:$0xff] }
 0x2a8   : > { %13328 = vmatprep.mubr.msk.f32.mxu0 %vm5527_vm1, %v17199_v8  ;;  %13374 = vmatpush3.msra.mxu0 %v17035_v55  ;;  %v17232_v55 = vld [vmem:[%s16997_s19 + $0x50] sm:$0xff] }
 0x2a9   : > { %13423 = vmatprep.subr.mxu0 %v17204_v9 }
 0x2ab   : > { %13329 = vmatmul.mubr.msk.f32.gmra.mrb[34].mxu0 %vm5527_vm1, %v17210_v11 }
 0x2ac   : > { %13331 = vmatprep.mubr.msk.f32.mxu0 %vm5527_vm1, %v17214_v41 }
 0x2af   : > { %13332 = vmatmul.mubr.msk.f32.gmra.mrb[36].mxu0 %vm5527_vm1, %v17222_v42 }
 0x2b0   : > { %13334 = vmatprep.mubr.msk.f32.mxu0 %vm5527_vm1, %v17225_v38 }
 0x2b3   : > { %13335 = vmatmul.mubr.msk.f32.gmra.mrb[38].mxu0 %vm5527_vm1, %v17232_v55 }
 0x2b4   : > { %13337 = vmatprep.mubr.msk.f32.mxu0 %vm5527_vm1, %v17235_v45 }
 0x2b7   : > { %13338 = vmatmul.mubr.msk.f32.gmra.mrb[40].mxu0 %vm5527_vm1, %v17242_v10 }
 0x2b8   : > { %13340 = vmatprep.mubr.msk.f32.mxu0 %vm5527_vm1, %v17245_v47 }
 0x2bb   : > { %13341 = vmatmul.mubr.msk.f32.gmra.mrb[42].mxu0 %vm5527_vm1, %v17252_v43 }
 0x2bc   : > { %13343 = vmatprep.mubr.msk.f32.mxu0 %vm5527_vm1, %v17255_v37 }
 0x2bf   : > { %13344 = vmatmul.mubr.msk.f32.gmra.mrb[44].mxu0 %vm5527_vm1, %v17262_v44 }
 0x2c0   : > { %13346 = vmatprep.mubr.msk.f32.mxu0 %vm5527_vm1, %v17265_v12 }
 0x2c3   : > { %13347 = vmatmul.mubr.msk.f32.gmra.mrb[46].mxu0 %vm5527_vm1, %v17272_v40 }
 0x2c4   : > { %13349 = vmatprep.mubr.msk.f32.mxu0 %vm5527_vm1, %v17275_v33 }
 0x2c7   : > { %13350 = vmatmul.mubr.msk.f32.gmra.mrb[48].mxu0 %vm5527_vm1, %v17282_v48 }
 0x2c8   : > { %13352 = vmatprep.mubr.msk.f32.mxu0 %vm5527_vm1, %v17285_v36 }
 0x2cb   : > { %13353 = vmatmul.mubr.msk.f32.gmra.mrb[50].mxu0 %vm5527_vm1, %v17292_v49 }
 0x2cc   : > { %13355 = vmatprep.mubr.msk.f32.mxu0 %vm5527_vm1, %v17295_v13 }
 0x2cf   : > { %13356 = vmatmul.mubr.msk.f32.gmra.mrb[52].mxu0 %vm5527_vm1, %v17302_v14 }
 0x2d0   : > { %13358 = vmatprep.mubr.msk.f32.mxu0 %vm5527_vm1, %v17305_v15 }
 0x2d3   : > { %13359 = vmatmul.mubr.msk.f32.gmra.mrb[54].mxu0 %vm5527_vm1, %v17312_v16 }
 0x2d4   : > { %13361 = vmatprep.mubr.msk.f32.mxu0 %vm5527_vm1, %v17315_v17 }
 0x2d7   : > { %13362 = vmatmul.mubr.msk.f32.gmra.mrb[56].mxu0 %vm5527_vm1, %v17322_v46 }
 0x2d8   : > { %13364 = vmatprep.mubr.msk.f32.mxu0 %vm5527_vm1, %v17325_v18 }
 0x2db   : > { %13365 = vmatmul.mubr.msk.f32.gmra.mrb[58].mxu0 %vm5527_vm1, %v17332_v19 }
 0x2dc   : > { %13367 = vmatprep.mubr.msk.f32.mxu0 %vm5527_vm1, %v17335_v20 }
 0x2df   : > { %13368 = vmatmul.mubr.msk.f32.gmra.mrb[60].mxu0 %vm5527_vm1, %v17342_v21 }
 0x2e0   : > { %13370 = vmatprep.mubr.msk.f32.mxu0 %vm5527_vm1, %v17345_v22 }
 0x2e3   : > { %13371 = vmatmul.mubr.msk.f32.gmra.mrb[62].mxu0 %vm5527_vm1, %v17352_v23 }
 0x2e4   : > { %13375 = vmatprep.mubr.msk.f32.mxu0 %vm5527_vm1, %v5488_v35 }
 0x2e7   : > { %13376 = vmatmul.mubr.msk.f32.vlgmr.msra.gmra.mrb[32].mxu0 %vm5527_vm1, %v5489_v24 }
 0x2e8   : > { %13378 = vmatprep.mubr.msk.f32.mxu0 %vm5527_vm1, %v5490_v26  ;;  %13424 = vmatpush3.msra.mxu0 %v17204_v9  ;;  %v11511_v9 = vld [vmem:[%s22475_s6 + $0x510] sm:$0xff]  ;;  %v11514_v26 = vld [vmem:[%s22475_s6 + $0x528] sm:$0xff] }
 0x2e9   : > { %13473 = vmatprep.subr.mxu0 %v17363_v27 }
 0x2eb   : > { %13379 = vmatmul.mubr.msk.f32.gmra.mrb[34].mxu0 %vm5527_vm1, %v5491_v28  ;;  %v11516_v28 = vld [vmem:[%s22475_s6 + $0x538] sm:$0xff] }
 0x2ec   : > { %13381 = vmatprep.mubr.msk.f32.mxu0 %vm5527_vm1, %v5492_v29 }
 0x2ef   : > { %13382 = vmatmul.mubr.msk.f32.gmra.mrb[36].mxu0 %vm5527_vm1, %v5493_v30  ;;  %v5505_v30 = vld [vmem:[%s16997_s19 + $0xca] sm:$0xff] }
 0x2f0   : > { %13384 = vmatprep.mubr.msk.f32.mxu0 %vm5527_vm1, %v5494_v31 }
 0x2f3   : > { %13385 = vmatmul.mubr.msk.f32.gmra.mrb[38].mxu0 %vm5527_vm1, %v5495_v39  ;;  %v14103_v39 = vpack.c.bf16 %v11511_v9, %v11509_v7  ;;  %v11517_v9 = vld [vmem:[%s22475_s6 + $0x540] sm:$0xff] }
 0x2f4   : > { %13387 = vmatprep.mubr.msk.f32.mxu0 %vm5527_vm1, %v5496_v32  ;;  %v5506_v32 = vld [vmem:[%s16997_s19 + $0xda] sm:$0xff] }
 0x2f7   : > { %13388 = vmatmul.mubr.msk.f32.gmra.mrb[40].mxu0 %vm5527_vm1, %v5497_v50 }
 0x2f8   : > { %13390 = vmatprep.mubr.msk.f32.mxu0 %vm5527_vm1, %v5498_v51 }
 0x2fa   : > { %v13227_v56 = vpop.f32.mrb[0].mxu0 }
 0x2fb   : > { %v3240_v57 = vadd.f32 %v13227_v56, %v17387_v52  ;;  %v3041_v58 = vpop.f32.mrb[1].mxu0  ;;  %13391 = vmatmul.mubr.msk.f32.gmra.mrb[42].mxu0 %vm5527_vm1, %v5499_v53  ;;  %v14105_v53 = vpack.c.bf16 %v11516_v28, %v11514_v26  ;;  %v11515_v56 = vld [vmem:[%s22475_s6 + $0x530] sm:$0xff] }
 0x2fc   : > { %v3239_v59 = vadd.f32 %v17387_v52, %v3041_v58  ;;  %13393 = vmatprep.mubr.msk.f32.mxu0 %vm5527_vm1, %v5500_v54  ;;  %v11513_v54 = vld [vmem:[%s22475_s6 + $0x520] sm:$0xff] }
 0x2fd   : > { %v3272_v61 = vmax.f32 %v3240_v57, 0.0 }
 0x2fe   : > { %v3271_v63 = vmax.f32 %v3239_v59, 0.0  ;;  %v13230_v0 = vpop.f32.mrb[2].mxu0 }
 0x2ff   : > { %3305 = vst [vmem:[#allocation2 + $0x30] sm:$0xff] %v3272_v61  ;;  %v17399_v1 = vadd.f32 %v13230_v0, %v17387_v52  ;;  %v3051_v25 = vpop.f32.mrb[3].mxu0  ;;  %13394 = vmatmul.mubr.msk.f32.gmra.mrb[44].mxu0 %vm5527_vm1, %v5501_v60  ;;  %v11518_v60 = vld [vmem:[%s22475_s6 + $0x548] sm:$0xff] }
 0x300   : > { %3304 = vst [vmem:[#allocation2 + $0x28] sm:$0xff] %v3271_v63  ;;  %v17403_v2 = vadd.f32 %v17387_v52, %v3051_v25  ;;  %13396 = vmatprep.mubr.msk.f32.mxu0 %vm5527_vm1, %v5502_v62  ;;  %3701 = vmatprep.mubr.f32.mxu1 %v3271_v63  ;;  %v11520_v62 = vld [vmem:[%s22475_s6 + $0x558] sm:$0xff]  ;;  %v5507_v0 = vld [vmem:[%s16997_s19 + $0xe2] sm:$0xff] }
 0x301   : > { %v3274_v4 = vmax.f32 %v17399_v1, 0.0  ;;  %v14109_v7 = vpack.c.bf16 %v11520_v62, %v11518_v60  ;;  %v11521_v62 = vld [vmem:[%s22475_s6 + $0x560] sm:$0xff]  ;;  %v11527_v1 = vld [vmem:[%s22475_s6 + $0x590] sm:$0xff] }
 0x302   : > { %v3273_v5 = vmax.f32 %v17403_v2, 0.0  ;;  %v13233_v6 = vpop.f32.mrb[4].mxu0  ;;  %v5508_v2 = vld [vmem:[%s16997_s19 + $0xf2] sm:$0xff] }
 0x303   : > { %3307 = vst [vmem:[#allocation2 + $0x50] sm:$0xff] %v3274_v4  ;;  %v17419_v35 = vadd.f32 %v13233_v6, %v17387_v52  ;;  %v3061_v24 = vpop.f32.mrb[5].mxu0  ;;  %13397 = vmatmul.mubr.msk.f32.gmra.mrb[46].mxu0 %vm5527_vm1, %v5503_v3  ;;  %v14107_v3 = vpack.c.bf16 %v11515_v56, %v11513_v54  ;;  %v5510_v54 = vld [vmem:[%s16997_s19 + $0x10a] sm:$0xff] }
 0x304   : > { %3306 = vst [vmem:[#allocation2 + $0x48] sm:$0xff] %v3273_v5  ;;  %v17429_v29 = vadd.f32 %v17387_v52, %v3061_v24  ;;  %13399 = vmatprep.mubr.msk.f32.mxu0 %vm5527_vm1, %v5504_v34  ;;  %v11519_v24 = vld [vmem:[%s22475_s6 + $0x550] sm:$0xff] }
 0x305   : > { %v3276_v31 = vmax.f32 %v17419_v35, 0.0  ;;  %v14111_v56 = vpack.c.bf16 %v11519_v24, %v11517_v9  ;;  %v17517_v24 = vld [vmem:[%s16997_s19 + $0x112] sm:$0xff] }
 0x306   : > { %v3275_v50 = vmax.f32 %v17429_v29, 0.0  ;;  %v13236_v51 = vpop.f32.mrb[6].mxu0  ;;  %v11531_v29 = vld [vmem:[%s22475_s6 + $0x5b0] sm:$0xff] }
 0x307   : > { %3309 = vst [vmem:[#allocation2 + $0x70] sm:$0xff] %v3276_v31  ;;  %v17445_v57 = vadd.f32 %v13236_v51, %v17387_v52  ;;  %v3071_v58 = vpop.f32.mrb[7].mxu0  ;;  %13400 = vmatmul.mubr.msk.f32.gmra.mrb[48].mxu0 %vm5527_vm1, %v5505_v30  ;;  %v3338_v59 = vld [vmem:[#allocation2 + $0x27] sm:$0xff]  ;;  %v3339_v28 = vld [vmem:[#allocation2 + $0x2f] sm:$0xff]  ;;  %v5509_v51 = vld [vmem:[%s16997_s19 + $0xfa] sm:$0xff] }
 0x308   : > { %3308 = vst [vmem:[#allocation2 + $0x68] sm:$0xff] %v3275_v50  ;;  %v17457_v63 = vadd.f32 %v17387_v52, %v3071_v58  ;;  %3702 = vmatmul.mubr.f32.vlgmr.msra.gmra.mrb[0].mxu1 %v3338_v59  ;;  %13402 = vmatprep.mubr.msk.f32.mxu0 %vm5527_vm1, %v5506_v32  ;;  %v11522_v30 = vld [vmem:[%s22475_s6 + $0x568] sm:$0xff]  ;;  %v11535_v35 = vld [vmem:[%s22475_s6 + $0x5d0] sm:$0xff] }
 0x309   : > { %v22559_v25 = vmax.f32 %v17445_v57, 0.0  ;;  %14104 = vmatpush1.bf16.msra.mxu1 %v14103_v39  ;;  %3707 = vmatprep.mubr.f32.mxu1 %v3272_v61  ;;  %v11524_v39 = vld [vmem:[%s22475_s6 + $0x578] sm:$0xff] }
 0x30a   : > { %v3277_v34 = vmax.f32 %v17457_v63, 0.0  ;;  %v13239_v6 = vpop.f32.mrb[8].mxu0  ;;  %14106 = vmatprep.subr.bf16.mxu1 %v14105_v53  ;;  %v14113_v60 = vpack.c.bf16 %v11524_v39, %v11522_v30 }
 0x30b   : > { %3311 = vst [vmem:[#allocation2 + $0x90] sm:$0xff] %v22559_v25  ;;  %v17473_v61 = vadd.f32 %v13239_v6, %v17387_v52  ;;  %v3081_v26 = vpop.f32.mrb[9].mxu0  ;;  %13403 = vmatmul.mubr.msk.f32.gmra.mrb[50].mxu0 %vm5527_vm1, %v5507_v0  ;;  %v11523_v0 = vld [vmem:[%s22475_s6 + $0x570] sm:$0xff]  ;;  %v11526_v6 = vld [vmem:[%s22475_s6 + $0x588] sm:$0xff] }
 0x30c   : > { %3310 = vst [vmem:[#allocation2 + $0x88] sm:$0xff] %v3277_v34  ;;  %v17485_v32 = vadd.f32 %v17387_v52, %v3081_v26  ;;  %3708 = vmatmul.mubr.f32.gmra.mrb[2].mxu1 %v3339_v28  ;;  %13405 = vmatprep.mubr.msk.f32.mxu0 %vm5527_vm1, %v5508_v2  ;;  %v17523_v28 = vld [vmem:[%s16997_s19 + $0x122] sm:$0xff]  ;;  %v14115_v30 = vpack.c.bf16 %v11523_v0, %v11521_v62  ;;  %v11532_v0 = vld [vmem:[%s22475_s6 + $0x5b8] sm:$0xff] }
 0x30d   : > { %v22555_v53 = vmax.f32 %v17473_v61, 0.0  ;;  %3713 = vmatprep.mubr.f32.mxu1 %v3273_v5  ;;  %14108 = vmatpush1.bf16.msra.mxu1 %v14107_v3  ;;  %v3340_v3 = vld [vmem:[#allocation2 + $0x47] sm:$0xff] }
 0x30e   : > { %v22557_v58 = vmax.f32 %v17485_v32, 0.0  ;;  %v13242_v59 = vpop.f32.mrb[10].mxu0  ;;  %14110 = vmatprep.subr.bf16.mxu1 %v14109_v7  ;;  %v11528_v7 = vld [vmem:[%s22475_s6 + $0x598] sm:$0xff]  ;;  %v11530_v62 = vld [vmem:[%s22475_s6 + $0x5a8] sm:$0xff] }
 0x30f   : > { %3313 = vst [vmem:[#allocation2 + $0xb0] sm:$0xff] %v22555_v53  ;;  %v17501_v5 = vadd.f32 %v13242_v59, %v17387_v52  ;;  %v3091_v2 = vpop.f32.mrb[11].mxu0  ;;  %13406 = vmatmul.mubr.msk.f32.gmra.mrb[52].mxu0 %vm5527_vm1, %v5509_v51  ;;  %v14117_v59 = vpack.c.bf16 %v11528_v7, %v11526_v6  ;;  %v17559_v7 = vld [vmem:[%s16997_s19 + $0x13a] sm:$0xff] }
 0x310   : > { %3312 = vst [vmem:[#allocation2 + $0xa8] sm:$0xff] %v22557_v58  ;;  %v17513_v9 = vadd.f32 %v17387_v52, %v3091_v2  ;;  %3714 = vmatmul.mubr.f32.gmra.mrb[4].mxu1 %v3340_v3  ;;  %13408 = vmatprep.mubr.msk.f32.mxu0 %vm5527_vm1, %v5510_v54  ;;  %v11525_v54 = vld [vmem:[%s22475_s6 + $0x580] sm:$0xff]  ;;  %v17553_v3 = vld [vmem:[%s16997_s19 + $0x12a] sm:$0xff]  ;;  %22806 = vst [vmem:[#allocation17_spill] sm:$0xff] %v17559_v7 }
 0x311   : > { %v22552_v26 = vmax.f32 %v17501_v5, 0.0  ;;  %3719 = vmatprep.mubr.f32.mxu1 %v3274_v4  ;;  %14112 = vmatpush1.bf16.msra.mxu1 %v14111_v56 }
 0x312   : > { %v22553_v39 = vmax.f32 %v17513_v9, 0.0  ;;  %v13245_v51 = vpop.f32.mrb[12].mxu0  ;;  %14114 = vmatprep.subr.bf16.mxu1 %v14113_v60  ;;  %v3341_v60 = vld [vmem:[#allocation2 + $0x4f] sm:$0xff] }
 0x313   : > { %3315 = vst [vmem:[#allocation2 + $0xd0] sm:$0xff] %v22552_v26  ;;  %v17535_v4 = vadd.f32 %v13245_v51, %v17387_v52  ;;  %v3101_v56 = vpop.f32.mrb[13].mxu0  ;;  %13409 = vmatmul.mubr.msk.f32.gmra.mrb[54].mxu0 %vm5527_vm1, %v17517_v24  ;;  %v14119_v51 = vpack.c.bf16 %v11527_v1, %v11525_v54  ;;  %v11534_v54 = vld [vmem:[%s22475_s6 + $0x5c8] sm:$0xff]  ;;  %v11536_v1 = vld [vmem:[%s22475_s6 + $0x5d8] sm:$0xff] }
 0x314   : > { %3314 = vst [vmem:[#allocation2 + $0xc8] sm:$0xff] %v22553_v39  ;;  %v17548_v2 = vadd.f32 %v17387_v52, %v3101_v56  ;;  %3720 = vmatmul.mubr.f32.gmra.mrb[6].mxu1 %v3341_v60  ;;  %13411 = vmatprep.mubr.msk.f32.mxu0 %vm5527_vm1, %v17523_v28  ;;  %v14121_v56 = vpack.c.bf16 %v11532_v0, %v11530_v62  ;;  %v11529_v60 = vld [vmem:[%s22475_s6 + $0x5a0] sm:$0xff] }
 0x315   : > { %v22554_v6 = vmax.f32 %v17535_v4, 0.0  ;;  %3725 = vmatprep.mubr.f32.mxu1 %v3275_v50  ;;  %14116 = vmatpush1.bf16.msra.mxu1 %v14115_v30  ;;  %v14123_v53 = vpack.c.bf16 %v11531_v29, %v11529_v60  ;;  %v11538_v60 = vld [vmem:[%s22475_s6 + $0x5e8] sm:$0xff]  ;;  %v11540_v29 = vld [vmem:[%s22475_s6 + $0x5f8] sm:$0xff] }
 0x316   : > { %v22556_v26 = vmax.f32 %v17548_v2, 0.0  ;;  %v13248_v39 = vpop.f32.mrb[14].mxu0  ;;  %14118 = vmatprep.subr.bf16.mxu1 %v14117_v59  ;;  %v3342_v59 = vld [vmem:[#allocation2 + $0x67] sm:$0xff] }
 0x317   : > { %3317 = vst [vmem:[#allocation2 + $0xf0] sm:$0xff] %v22554_v6  ;;  %v17571_v50 = vadd.f32 %v13248_v39, %v17387_v52  ;;  %v3111_v30 = vpop.f32.mrb[15].mxu0  ;;  %13412 = vmatmul.mubr.msk.f32.gmra.mrb[56].mxu0 %vm5527_vm1, %v17553_v3  ;;  %v17589_v39 = vld [vmem:[%s16997_s19 + $0x142] sm:$0xff]  ;;  %v17595_v6 = vld [vmem:[%s16997_s19 + $0x152] sm:$0xff] }
 0x318   : > { %3316 = vst [vmem:[#allocation2 + $0xe8] sm:$0xff] %v22556_v26  ;;  %v17584_v62 = vadd.f32 %v17387_v52, %v3111_v30  ;;  %3726 = vmatmul.mubr.f32.gmra.mrb[8].mxu1 %v3342_v59  ;;  %13414 = vmatprep.mubr.msk.f32.mxu0 %vm5527_vm1, %v17559_v7  ;;  %22807 = vst [vmem:[#allocation18_spill] sm:$0xff] %v17589_v39  ;;  %v14125_v30 = vpack.c.bf16 %v11536_v1, %v11534_v54  ;;  %v11533_v59 = vld [vmem:[%s22475_s6 + $0x5c0] sm:$0xff]  ;;  %v11539_v1 = vld [vmem:[%s22475_s6 + $0x5f0] sm:$0xff] }
 0x319   : > { %v22558_v0 = vmax.f32 %v17571_v50, 0.0  ;;  %3731 = vmatprep.mubr.f32.mxu1 %v3276_v31  ;;  %22808 = vst [vmem:[#allocation32_spill] sm:$0xff] %v17595_v6  ;;  %14120 = vmatpush1.bf16.msra.mxu1 %v14119_v51  ;;  %v14127_v25 = vpack.c.bf16 %v11535_v35, %v11533_v59  ;;  %v3445_v59 = vld [vmem:[%s22475_s6 + $0x8] sm:$0xff]  ;;  %v3447_v35 = vld [vmem:[%s22475_s6 + $0x18] sm:$0xff] }
 0x31a   : > { %v22560_v26 = vmax.f32 %v17584_v62, 0.0  ;;  %v13251_v58 = vpop.f32.mrb[16].mxu0  ;;  %14122 = vmatprep.subr.bf16.mxu1 %v14121_v56  ;;  %v3343_v56 = vld [vmem:[#allocation2 + $0x6f] sm:$0xff] }
 0x31b   : > { %3319 = vst [vmem:[#allocation2 + $0x110] sm:$0xff] %v22558_v0  ;;  %v17607_v31 = vadd.f32 %v13251_v58, %v17387_v52  ;;  %v3121_v51 = vpop.f32.mrb[17].mxu0  ;;  %13415 = vmatmul.mubr.msk.f32.gmra.mrb[58].mxu0 %vm5527_vm1, %v17589_v39  ;;  %v17625_v58 = vld [vmem:[%s16997_s19 + $0x15a] sm:$0xff]  ;;  %v17631_v0 = vld [vmem:[%s16997_s19 + $0x16a] sm:$0xff] }
 0x31c   : > { %3318 = vst [vmem:[#allocation2 + $0x108] sm:$0xff] %v22560_v26  ;;  %v17620_v54 = vadd.f32 %v17387_v52, %v3121_v51  ;;  %3732 = vmatmul.mubr.f32.gmra.mrb[10].mxu1 %v3343_v56  ;;  %13417 = vmatprep.mubr.msk.f32.mxu0 %vm5527_vm1, %v17595_v6  ;;  %22809 = vst [vmem:[#allocation35_spill] sm:$0xff] %v17625_v58  ;;  %v14129_v51 = vpack.c.bf16 %v11540_v29, %v11538_v60  ;;  %v11537_v56 = vld [vmem:[%s22475_s6 + $0x5e0] sm:$0xff] }
 0x31d   : > { %3737 = vmatprep.mubr.f32.mxu1 %v3277_v34  ;;  %22810 = vst [vmem:[#allocation37_spill] sm:$0xff] %v17631_v0  ;;  %14124 = vmatpush1.bf16.msra.mxu1 %v14123_v53  ;;  %v22811_v63 = vmax.f32 %v17607_v31, 0.0 }
 0x31e   : > { %v22565_v26 = vmax.f32 %v17620_v54, 0.0  ;;  %v13254_v39 = vpop.f32.mrb[18].mxu0  ;;  %14126 = vmatprep.subr.bf16.mxu1 %v14125_v30  ;;  %v3344_v30 = vld [vmem:[#allocation2 + $0x87] sm:$0xff] }
 0x31f   : > { %3321 = vst [vmem:[#allocation2 + $0x130] sm:$0xff] %v22811_v63  ;;  %v17643_v34 = vadd.f32 %v13254_v39, %v17387_v52  ;;  %v3131_v53 = vpop.f32.mrb[19].mxu0  ;;  %13418 = vmatmul.mubr.msk.f32.gmra.mrb[60].mxu0 %vm5527_vm1, %v17625_v58  ;;  %v17661_v39 = vld [vmem:[%s16997_s19 + $0x172] sm:$0xff]  ;;  %v22812_v63 = vmax.f32 %v17445_v57, 0.0  ;;  %v14131_v58 = vpack.c.bf16 %v11539_v1, %v11537_v56 }
 0x320   : > { %3320 = vst [vmem:[#allocation2 + $0x128] sm:$0xff] %v22565_v26  ;;  %v17656_v60 = vadd.f32 %v17387_v52, %v3131_v53  ;;  %3738 = vmatmul.mubr.f32.gmra.mrb[12].mxu1 %v3344_v30  ;;  %13420 = vmatprep.mubr.msk.f32.mxu0 %vm5527_vm1, %v17631_v0  ;;  %v14133_v26 = vpack.c.bf16 %v3447_v35, %v3445_v59  ;;  %v3345_v0 = vld [vmem:[#allocation2 + $0x8f] sm:$0xff] }
 0x321   : > { %v3290_v29 = vmax.f32 %v17643_v34, 0.0  ;;  %3743 = vmatprep.mubr.f32.mxu1 %v22812_v63  ;;  %14128 = vmatpush1.bf16.msra.mxu1 %v14127_v25  ;;  %v17902_v34 = vld [vmem:[%s16997_s19 + $0x69] sm:$0xff] }
 0x322   : > { %v3289_v6 = vmax.f32 %v17656_v60, 0.0  ;;  %v13257_v7 = vpop.f32.mrb[20].mxu0  ;;  %14130 = vmatprep.subr.bf16.mxu1 %v14129_v51 }
 0x323   : > { %3323 = vst [vmem:[#allocation2 + $0x150] sm:$0xff] %v3290_v29  ;;  %v17670_v53 = vadd.f32 %v13257_v7, %v17387_v52  ;;  %v3141_v30 = vpop.f32.mrb[21].mxu0  ;;  %13421 = vmatmul.mubr.msk.f32.gmra.mrb[62].mxu0 %vm5527_vm1, %v17661_v39  ;;  %v22813_v7 = vmax.f32 %v17485_v32, 0.0  ;;  %v17695_v32 = vld [vmem:[%s22477_s8 + $0x28] sm:$0xff] }
 0x324   : > { %3322 = vst [vmem:[#allocation2 + $0x148] sm:$0xff] %v3289_v6  ;;  %v17677_v57 = vadd.f32 %v17387_v52, %v3141_v30  ;;  %3744 = vmatmul.mubr.f32.gmra.mrb[14].mxu1 %v3345_v0  ;;  %13425 = vmatprep.mubr.msk.f32.mxu0 %vm5527_vm1, %v17199_v8  ;;  %v3346_v8 = vld [vmem:[#allocation2 + $0xa7] sm:$0xff] }
 0x325   : > { %v3292_v25 = vmax.f32 %v17670_v53, 0.0  ;;  %3749 = vmatprep.mubr.f32.mxu1 %v22813_v7  ;;  %14132 = vmatpush1.bf16.msra.mxu1 %v14131_v58  ;;  %v22815_v7 = vmax.f32 %v17513_v9, 0.0  ;;  %v17917_v53 = vld [vmem:[%s16997_s19 + $0x81] sm:$0xff] }
 0x326   : > { %v3291_v1 = vmax.f32 %v17677_v57, 0.0  ;;  %v13260_v51 = vpop.f32.mrb[22].mxu0  ;;  %14134 = vmatprep.subr.bf16.mxu1 %v14133_v26 }
 0x327   : > { %3325 = vst [vmem:[#allocation2 + $0x170] sm:$0xff] %v3292_v25  ;;  %v17688_v56 = vadd.f32 %v13260_v51, %v17387_v52  ;;  %v3151_v0 = vpop.f32.mrb[23].mxu0  ;;  %13426 = vmatmul.mubr.msk.f32.vlgmr.msra.gmra.mrb[32].mxu0 %vm5527_vm1, %v17210_v11  ;;  %v22814_v11 = vmax.f32 %v17473_v61, 0.0 }
 0x328   : > { %3324 = vst [vmem:[#allocation2 + $0x168] sm:$0xff] %v3291_v1  ;;  %v17700_v26 = vadd.f32 %v17387_v52, %v3151_v0  ;;  %3750 = vmatmul.mubr.f32.gmra.mrb[16].mxu1 %v3346_v8  ;;  %13428 = vmatprep.mubr.msk.f32.mxu0 %vm5527_vm1, %v17214_v41  ;;  %v3347_v41 = vld [vmem:[#allocation2 + $0xaf] sm:$0xff] }
 0x329   : > { %v3294_v58 = vmax.f32 %v17688_v56, 0.0  ;;  %3755 = vmatprep.mubr.f32.mxu1 %v22814_v11  ;;  %13474 = vmatpush3.msra.mxu0 %v17363_v27  ;;  %v3348_v11 = vld [vmem:[#allocation2 + $0xc7] sm:$0xff] }
 0x32a   : > { %v3293_v59 = vmax.f32 %v17700_v26, 0.0  ;;  %v13263_v35 = vpop.f32.mrb[24].mxu0  ;;  %13523 = vmatprep.subr.mxu0 %v17695_v32  ;;  %v17944_v26 = vld [vmem:[%s16997_s19 + $0xb1] sm:$0xff] }
 0x32b   : > { %3327 = vst [vmem:[#allocation2 + $0x190] sm:$0xff] %v3294_v58  ;;  %v17713_v63 = vadd.f32 %v13263_v35, %v17387_v52  ;;  %v3161_v30 = vpop.f32.mrb[25].mxu0  ;;  %13429 = vmatmul.mubr.msk.f32.gmra.mrb[34].mxu0 %vm5527_vm1, %v17222_v42  ;;  %v22816_v35 = vmax.f32 %v17501_v5, 0.0 }
 0x32c   : > { %3326 = vst [vmem:[#allocation2 + $0x188] sm:$0xff] %v3293_v59  ;;  %v17720_v27 = vadd.f32 %v17387_v52, %v3161_v30  ;;  %3756 = vmatmul.mubr.f32.gmra.mrb[18].mxu1 %v3347_v41  ;;  %13431 = vmatprep.mubr.msk.f32.mxu0 %vm5527_vm1, %v17225_v38 }
 0x32d   : > { %v3296_v61 = vmax.f32 %v17713_v63, 0.0  ;;  %3761 = vmatprep.mubr.f32.mxu1 %v22815_v7  ;;  %v3444_v63 = vld [vmem:[%s22475_s6] sm:$0xff] }
 0x32e   : > { %v3295_v51 = vmax.f32 %v17720_v27, 0.0  ;;  %v13266_v0 = vpop.f32.mrb[26].mxu0  ;;  %v3446_v27 = vld [vmem:[%s22475_s6 + $0x10] sm:$0xff] }
 0x32f   : > { %3329 = vst [vmem:[#allocation2 + $0x1b0] sm:$0xff] %v3296_v61  ;;  %v17731_v42 = vadd.f32 %v13266_v0, %v17387_v52  ;;  %v3171_v8 = vpop.f32.mrb[27].mxu0  ;;  %13432 = vmatmul.mubr.msk.f32.gmra.mrb[36].mxu0 %vm5527_vm1, %v17232_v55  ;;  %v3349_v0 = vld [vmem:[#allocation2 + $0xcf] sm:$0xff] }
 0x330   : > { %3328 = vst [vmem:[#allocation2 + $0x1a8] sm:$0xff] %v3295_v51  ;;  %v17738_v38 = vadd.f32 %v17387_v52, %v3171_v8  ;;  %3762 = vmatmul.mubr.f32.gmra.mrb[20].mxu1 %v3348_v11  ;;  %13434 = vmatprep.mubr.msk.f32.mxu0 %vm5527_vm1, %v17235_v45  ;;  %v22817_v8 = vmax.f32 %v17548_v2, 0.0 }
 0x331   : > { %v3298_v9 = vmax.f32 %v17731_v42, 0.0  ;;  %3767 = vmatprep.mubr.f32.mxu1 %v22816_v35  ;;  %v3449_v42 = vld [vmem:[%s22475_s6 + $0x28] sm:$0xff] }
 0x332   : > { %v3297_v30 = vmax.f32 %v17738_v38, 0.0  ;;  %v13269_v41 = vpop.f32.mrb[28].mxu0  ;;  %v3451_v38 = vld [vmem:[%s22475_s6 + $0x38] sm:$0xff] }
 0x333   : > { %3331 = vst [vmem:[#allocation2 + $0x1d0] sm:$0xff] %v3298_v9  ;;  %v17749_v55 = vadd.f32 %v13269_v41, %v17387_v52  ;;  %v3181_v7 = vpop.f32.mrb[29].mxu0  ;;  %13435 = vmatmul.mubr.msk.f32.gmra.mrb[38].mxu0 %vm5527_vm1, %v17242_v10 }
 0x334   : > { %3330 = vst [vmem:[#allocation2 + $0x1c8] sm:$0xff] %v3297_v30  ;;  %v17756_v45 = vadd.f32 %v17387_v52, %v3181_v7  ;;  %3768 = vmatmul.mubr.f32.gmra.mrb[22].mxu1 %v3349_v0  ;;  %13437 = vmatprep.mubr.msk.f32.mxu0 %vm5527_vm1, %v17245_v47  ;;  %v3350_v7 = vld [vmem:[#allocation2 + $0xe7] sm:$0xff]  ;;  %v22818_v0 = vmax.f32 %v17535_v4, 0.0  ;;  %v3353_v4 = vld [vmem:[#allocation2 + $0x10f] sm:$0xff] }
 0x335   : > { %v3300_v5 = vmax.f32 %v17749_v55, 0.0  ;;  %3773 = vmatprep.mubr.f32.mxu1 %v22817_v8  ;;  %v14135_v55 = vpack.c.bf16 %v3446_v27, %v3444_v63  ;;  %v3465_v63 = vld [vmem:[%s22475_s6 + $0xa8] sm:$0xff]  ;;  %v3467_v27 = vld [vmem:[%s22475_s6 + $0xb8] sm:$0xff] }
 0x336   : > { %v3299_v11 = vmax.f32 %v17756_v45, 0.0  ;;  %v13272_v35 = vpop.f32.mrb[30].mxu0  ;;  %v14137_v45 = vpack.c.bf16 %v3451_v38, %v3449_v42  ;;  %v18070_v42 = vld [vmem:[%s16997_s19 + $0x139] sm:$0xff] }
 0x337   : > { %3333 = vst [vmem:[#allocation2 + $0x1f0] sm:$0xff] %v3300_v5  ;;  %v17767_v10 = vadd.f32 %v13272_v35, %v17387_v52  ;;  %v3191_v41 = vpop.f32.mrb[31].mxu0  ;;  %13438 = vmatmul.mubr.msk.f32.gmra.mrb[40].mxu0 %vm5527_vm1, %v17252_v43  ;;  %v3351_v43 = vld [vmem:[#allocation2 + $0xef] sm:$0xff]  ;;  %v17990_v35 = vld [vmem:[%s16997_s19 + $0xe1] sm:$0xff] }
 0x338   : > { %3332 = vst [vmem:[#allocation2 + $0x1e8] sm:$0xff] %v3299_v11  ;;  %v17774_v47 = vadd.f32 %v17387_v52, %v3191_v41  ;;  %3774 = vmatmul.mubr.f32.gmra.mrb[24].mxu1 %v3350_v7  ;;  %13440 = vmatprep.mubr.msk.f32.mxu0 %vm5527_vm1, %v17255_v37  ;;  %v22819_v37 = vmax.f32 %v17584_v62, 0.0  ;;  %v3352_v52 = vld [vmem:[#allocation2 + $0x107] sm:$0xff]  ;;  %v17887_v62 = vld [vmem:[%s16997_s19 + $0x51] sm:$0xff] }
 0x339   : > { %v3302_v2 = vmax.f32 %v17767_v10, 0.0  ;;  %3779 = vmatprep.mubr.f32.mxu1 %v22818_v0  ;;  %v3410_v10 = vld [vmem:[#allocation2 + $0x29] sm:$0xff]  ;;  %v3455_v7 = vld [vmem:[%s22475_s6 + $0x58] sm:$0xff] }
 0x33a   : > { %v3301_v8 = vmax.f32 %v17774_v47, 0.0  ;;  %v3453_v41 = vld [vmem:[%s22475_s6 + $0x48] sm:$0xff]  ;;  %v18001_v47 = vld [vmem:[%s16997_s19 + $0xf1] sm:$0xff] }
 0x33b   : > { %3335 = vst [vmem:[#allocation2 + $0x210] sm:$0xff] %v3302_v2  ;;  %13441 = vmatmul.mubr.msk.f32.gmra.mrb[42].mxu0 %vm5527_vm1, %v17262_v44  ;;  %v22820_v44 = vmax.f32 %v17571_v50, 0.0  ;;  %v17880_v50 = vld [vmem:[%s16997_s19 + $0x49] sm:$0xff]  ;;  %v14141_v0 = vpack.c.bf16 %v3455_v7, %v3453_v41  ;;  %v3471_v7 = vld [vmem:[%s22475_s6 + $0xd8] sm:$0xff] }
 0x33c   : > { %3334 = vst [vmem:[#allocation2 + $0x208] sm:$0xff] %v3301_v8  ;;  %3780 = vmatmul.mubr.f32.gmra.mrb[26].mxu1 %v3351_v43  ;;  %13443 = vmatprep.mubr.msk.f32.mxu0 %vm5527_vm1, %v17265_v12  ;;  %v22821_v12 = vmax.f32 %v17620_v54, 0.0  ;;  %v17895_v54 = vld [vmem:[%s16997_s19 + $0x61] sm:$0xff]  ;;  %v17906_v60 = vld [vmem:[#allocation2 + $0x1cf] sm:$0xff] }
 0x33d   : > { %3785 = vmatprep.mubr.f32.mxu1 %v22819_v37  ;;  %v3454_v43 = vld [vmem:[%s22475_s6 + $0x50] sm:$0xff]  ;;  %v18013_v37 = vld [vmem:[%s16997_s19 + $0xf9] sm:$0xff]  ;;  %v3469_v41 = vld [vmem:[%s22475_s6 + $0xc8] sm:$0xff] }
 0x33f   : > { %13444 = vmatmul.mubr.msk.f32.gmra.mrb[44].mxu0 %vm5527_vm1, %v17272_v40  ;;  %v3354_v40 = vld [vmem:[#allocation2 + $0x127] sm:$0xff]  ;;  %v3367_v56 = vld [vmem:[#allocation2 + $0x1ef] sm:$0xff] }
 0x340   : > { %3786 = vmatmul.mubr.f32.gmra.mrb[28].mxu1 %v3352_v52  ;;  %13446 = vmatprep.mubr.msk.f32.mxu0 %vm5527_vm1, %v17275_v33  ;;  %v22822_v33 = vmax.f32 %v17607_v31, 0.0  ;;  %v17891_v31 = vld [vmem:[#allocation2 + $0x1c7] sm:$0xff]  ;;  %v3411_v52 = vld [vmem:[#allocation2 + $0x31] sm:$0xff] }
 0x341   : > { %3791 = vmatprep.mubr.f32.mxu1 %v22820_v44  ;;  %v17921_v57 = vld [vmem:[#allocation2 + $0x1e7] sm:$0xff] }
 0x342   : > { %22823 = vst [vmem:[#allocation38_spill] sm:$0xff] %v17921_v57  ;;  %v3457_v44 = vld [vmem:[%s22475_s6 + $0x68] sm:$0xff] }
 0x343   : > { %13447 = vmatmul.mubr.msk.f32.gmra.mrb[46].mxu0 %vm5527_vm1, %v17282_v48  ;;  %v3355_v48 = vld [vmem:[#allocation2 + $0x12f] sm:$0xff] }
 0x344   : > { %3792 = vmatmul.mubr.f32.gmra.mrb[30].mxu1 %v3353_v4  ;;  %13449 = vmatprep.mubr.msk.f32.mxu0 %vm5527_vm1, %v17285_v36  ;;  %v3356_v36 = vld [vmem:[#allocation2 + $0x147] sm:$0xff]  ;;  %v3459_v4 = vld [vmem:[%s22475_s6 + $0x78] sm:$0xff] }
 0x345   : > { %3797 = vmatprep.mubr.f32.mxu1 %v22821_v12  ;;  %v18024_v12 = vld [vmem:[%s16997_s19 + $0x109] sm:$0xff] }
 0x347   : > { %13450 = vmatmul.mubr.msk.f32.gmra.mrb[48].mxu0 %vm5527_vm1, %v17292_v49  ;;  %v3357_v49 = vld [vmem:[#allocation2 + $0x14f] sm:$0xff] }
 0x348   : > { %3798 = vmatmul.mubr.f32.gmra.mrb[32].mxu1 %v3354_v40  ;;  %13452 = vmatprep.mubr.msk.f32.mxu0 %vm5527_vm1, %v17295_v13  ;;  %v3358_v13 = vld [vmem:[#allocation2 + $0x167] sm:$0xff] }
 0x349   : > { %3803 = vmatprep.mubr.f32.mxu1 %v22822_v33  ;;  %v14145_v33 = vpack.c.bf16 %v3459_v4, %v3457_v44  ;;  %v18105_v44 = vld [vmem:[%s16997_s19 + $0x159] sm:$0xff]  ;;  %v3415_v4 = vld [vmem:[#allocation2 + $0x71] sm:$0xff] }
 0x34b   : > { %13453 = vmatmul.mubr.msk.f32.gmra.mrb[50].mxu0 %vm5527_vm1, %v17302_v14  ;;  %v3359_v14 = vld [vmem:[#allocation2 + $0x16f] sm:$0xff] }
 0x34c   : > { %3804 = vmatmul.mubr.f32.gmra.mrb[34].mxu1 %v3355_v48  ;;  %13455 = vmatprep.mubr.msk.f32.mxu0 %vm5527_vm1, %v17305_v15  ;;  %v17841_v15 = vld [vmem:[%s16997_s19 + $0x180] sm:$0xff] }
 0x34d   : > { %3809 = vmatprep.mubr.f32.mxu1 %v3289_v6  ;;  %v3363_v6 = vld [vmem:[#allocation2 + $0x1af] sm:$0xff]  ;;  %v3456_v48 = vld [vmem:[%s22475_s6 + $0x60] sm:$0xff] }
 0x34f   : > { %13456 = vmatmul.mubr.msk.f32.gmra.mrb[52].mxu0 %vm5527_vm1, %v17312_v16  ;;  %v3360_v16 = vld [vmem:[#allocation2 + $0x187] sm:$0xff] }
 0x350   : > { %3810 = vmatmul.mubr.f32.gmra.mrb[36].mxu1 %v3356_v36  ;;  %13458 = vmatprep.mubr.msk.f32.mxu0 %vm5527_vm1, %v17315_v17  ;;  %v17848_v17 = vld [vmem:[%s16997_s19 + $0x188] sm:$0xff]  ;;  %v3458_v36 = vld [vmem:[%s22475_s6 + $0x70] sm:$0xff] }
 0x351   : > { %3815 = vmatprep.mubr.f32.mxu1 %v3290_v29  ;;  %v17910_v29 = vld [vmem:[%s16997_s19 + $0x79] sm:$0xff] }
 0x353   : > { %13459 = vmatmul.mubr.msk.f32.gmra.mrb[54].mxu0 %vm5527_vm1, %v17322_v46  ;;  %v3361_v46 = vld [vmem:[#allocation2 + $0x18f] sm:$0xff] }
 0x354   : > { %3816 = vmatmul.mubr.f32.gmra.mrb[38].mxu1 %v3357_v49  ;;  %13461 = vmatprep.mubr.msk.f32.mxu0 %vm5527_vm1, %v17325_v18  ;;  %v15469_v18 = vld [vmem:[%s16997_s19 + $0x19] sm:$0xff]  ;;  %v18036_v49 = vld [vmem:[%s16997_s19 + $0x111] sm:$0xff] }
 0x355   : > { %3821 = vmatprep.mubr.f32.mxu1 %v3291_v1  ;;  %v17932_v1 = vld [vmem:[%s16997_s19 + $0x99] sm:$0xff] }
 0x357   : > { %13462 = vmatmul.mubr.msk.f32.gmra.mrb[56].mxu0 %vm5527_vm1, %v17332_v19  ;;  %v15470_v19 = vld [vmem:[%s16997_s19 + $0x21] sm:$0xff] }
 0x358   : > { %3822 = vmatmul.mubr.f32.gmra.mrb[40].mxu1 %v3358_v13  ;;  %13464 = vmatprep.mubr.msk.f32.mxu0 %vm5527_vm1, %v17335_v20  ;;  %v3362_v20 = vld [vmem:[#allocation2 + $0x1a7] sm:$0xff] }
 0x359   : > { %3827 = vmatprep.mubr.f32.mxu1 %v3292_v25  ;;  %v17925_v25 = vld [vmem:[%s16997_s19 + $0x91] sm:$0xff]  ;;  %v3412_v13 = vld [vmem:[#allocation2 + $0x49] sm:$0xff] }
 0x35b   : > { %13465 = vmatmul.mubr.msk.f32.gmra.mrb[58].mxu0 %vm5527_vm1, %v17342_v21  ;;  %v17863_v21 = vld [vmem:[%s22477_s8 + $0x30] sm:$0xff] }
 0x35c   : > { %3828 = vmatmul.mubr.f32.gmra.mrb[42].mxu1 %v3359_v14  ;;  %13467 = vmatprep.mubr.msk.f32.mxu0 %vm5527_vm1, %v17345_v22  ;;  %v17866_v22 = vld [vmem:[%s16997_s19 + $0x31] sm:$0xff]  ;;  %v3461_v14 = vld [vmem:[%s22475_s6 + $0x88] sm:$0xff] }
 0x35d   : > { %3833 = vmatprep.mubr.f32.mxu1 %v3293_v59  ;;  %v17949_v59 = vld [vmem:[%s16997_s19 + $0xc1] sm:$0xff] }
 0x35f   : > { %13468 = vmatmul.mubr.msk.f32.gmra.mrb[60].mxu0 %vm5527_vm1, %v17352_v23  ;;  %v17875_v23 = vld [vmem:[%s16997_s19 + $0x39] sm:$0xff] }
 0x360   : > { %3834 = vmatmul.mubr.f32.gmra.mrb[44].mxu1 %v3360_v16  ;;  %13470 = vmatprep.mubr.msk.f32.mxu0 %vm5527_vm1, %v17841_v15  ;;  %v3463_v16 = vld [vmem:[%s22475_s6 + $0x98] sm:$0xff] }
 0x361   : > { %3839 = vmatprep.mubr.f32.mxu1 %v3294_v58  ;;  %v3368_v58 = vld [vmem:[#allocation2 + $0x207] sm:$0xff] }
 0x363   : > { %13471 = vmatmul.mubr.msk.f32.gmra.mrb[62].mxu0 %vm5527_vm1, %v17848_v17 }
 0x364   : > { %3840 = vmatmul.mubr.f32.gmra.mrb[46].mxu1 %v3361_v46  ;;  %13475 = vmatprep.mubr.msk.f32.mxu0 %vm5527_vm1, %v15469_v18  ;;  %v18047_v46 = vld [vmem:[%s16997_s19 + $0x121] sm:$0xff]  ;;  %v14147_v18 = vpack.c.bf16 %v3458_v36, %v3456_v48  ;;  %v18116_v48 = vld [vmem:[%s16997_s19 + $0x169] sm:$0xff] }
 0x365   : > { %3845 = vmatprep.mubr.f32.mxu1 %v3295_v51  ;;  %v17966_v51 = vld [vmem:[#allocation2 + $0x20f] sm:$0xff]  ;;  %v18122_v36 = vld [vmem:[%s16997_s19 + $0x181] sm:$0xff] }
 0x366   : > { %22824 = vst [vmem:[#allocation9_spill] sm:$0xff] %v17966_v51 }
 0x367   : > { %13476 = vmatmul.mubr.msk.f32.vlgmr.msra.gmra.mrb[32].mxu0 %vm5527_vm1, %v15470_v19  ;;  %v14149_v19 = vpack.c.bf16 %v3463_v16, %v3461_v14  ;;  %v3472_v16 = vld [vmem:[%s22475_s6 + $0xe0] sm:$0xff] }
 0x368   : > { %3846 = vmatmul.mubr.f32.gmra.mrb[48].mxu1 %v3362_v20  ;;  %13478 = vmatprep.mubr.msk.f32.mxu0 %vm5527_vm1, %v17866_v22  ;;  %v3460_v20 = vld [vmem:[%s22475_s6 + $0x80] sm:$0xff] }
 0x369   : > { %3851 = vmatprep.mubr.f32.mxu1 %v3296_v61  ;;  %13524 = vmatpush3.msra.mxu0 %v17695_v32  ;;  %v17937_v32 = vld [vmem:[%s16997_s19 + $0xa9] sm:$0xff] }
 0x36a   : > { %13573 = vmatprep.subr.mxu0 %v17863_v21  ;;  %v17962_v61 = vld [vmem:[%s16997_s19 + $0xc9] sm:$0xff] }
 0x36b   : > { %13479 = vmatmul.mubr.msk.f32.gmra.mrb[34].mxu0 %vm5527_vm1, %v17875_v23 }
 0x36c   : > { %3852 = vmatmul.mubr.f32.gmra.mrb[50].mxu1 %v3363_v6  ;;  %13481 = vmatprep.mubr.msk.f32.mxu0 %vm5527_vm1, %v17880_v50  ;;  %v3462_v6 = vld [vmem:[%s22475_s6 + $0x90] sm:$0xff] }
 0x36d   : > { %3857 = vmatprep.mubr.f32.mxu1 %v3297_v30  ;;  %v17980_v30 = vld [vmem:[#allocation2] sm:$0xff]  ;;  %v14151_v38 = vpack.c.bf16 %v3462_v6, %v3460_v20  ;;  %v3416_v20 = vld [vmem:[#allocation2 + $0x89] sm:$0xff] }
 0x36e   : > { %22825 = vst [vmem:[#allocation10_spill] sm:$0xff] %v17980_v30  ;;  %v3477_v6 = vld [vmem:[%s22475_s6 + $0x108] sm:$0xff] }
 0x36f   : > { %13482 = vmatmul.mubr.msk.f32.gmra.mrb[36].mxu0 %vm5527_vm1, %v17887_v62 }
 0x370   : > { %3858 = vmatmul.mubr.f32.gmra.mrb[52].mxu1 %v17891_v31  ;;  %13484 = vmatprep.mubr.msk.f32.mxu0 %vm5527_vm1, %v17895_v54 }
 0x371   : > { %3863 = vmatprep.mubr.f32.mxu1 %v3298_v9  ;;  %v17976_v9 = vld [vmem:[%s16997_s19 + $0xd9] sm:$0xff] }
 0x373   : > { %13485 = vmatmul.mubr.msk.f32.gmra.mrb[38].mxu0 %vm5527_vm1, %v17902_v34 }
 0x374   : > { %3864 = vmatmul.mubr.f32.gmra.mrb[54].mxu1 %v17906_v60  ;;  %13487 = vmatprep.mubr.msk.f32.mxu0 %vm5527_vm1, %v17910_v29 }
 0x375   : > { %3869 = vmatprep.mubr.f32.mxu1 %v3299_v11  ;;  %v3450_v11 = vld [vmem:[%s22475_s6 + $0x30] sm:$0xff] }
 0x377   : > { %13488 = vmatmul.mubr.msk.f32.gmra.mrb[40].mxu0 %vm5527_vm1, %v17917_v53 }
 0x378   : > { %3870 = vmatmul.mubr.f32.gmra.mrb[56].mxu1 %v17921_v57  ;;  %13490 = vmatprep.mubr.msk.f32.mxu0 %vm5527_vm1, %v17925_v25  ;;  %v18335_v57 = vld [vmem:[%s16997_s19 + $0xda] sm:$0xff] }
 0x379   : > { %3875 = vmatprep.mubr.f32.mxu1 %v3300_v5  ;;  %v3448_v5 = vld [vmem:[%s22475_s6 + $0x20] sm:$0xff] }
 0x37b   : > { %13491 = vmatmul.mubr.msk.f32.gmra.mrb[42].mxu0 %vm5527_vm1, %v17932_v1 }
 0x37c   : > { %3876 = vmatmul.mubr.f32.gmra.mrb[58].mxu1 %v3367_v56  ;;  %13493 = vmatprep.mubr.msk.f32.mxu0 %vm5527_vm1, %v17937_v32  ;;  %v18059_v56 = vld [vmem:[%s16997_s19 + $0x129] sm:$0xff] }
 0x37d   : > { %3881 = vmatprep.mubr.f32.mxu1 %v3301_v8  ;;  %v3452_v8 = vld [vmem:[%s22475_s6 + $0x40] sm:$0xff] }
 0x37e   : > { %v14143_v40 = vpack.c.bf16 %v3454_v43, %v3452_v8  ;;  %v14157_v8 = vpack.c.bf16 %v3471_v7, %v3469_v41  ;;  %v3468_v43 = vld [vmem:[%s22475_s6 + $0xc0] sm:$0xff]  ;;  %v3483_v41 = vld [vmem:[%s22475_s6 + $0x138] sm:$0xff] }
 0x37f   : > { %13494 = vmatmul.mubr.msk.f32.gmra.mrb[44].mxu0 %vm5527_vm1, %v17944_v26  ;;  %v15500_v7 = vld [vmem:[%s16997_s19 + $0x1a] sm:$0xff] }
 0x380   : > { %3882 = vmatmul.mubr.f32.gmra.mrb[60].mxu1 %v3368_v58  ;;  %13496 = vmatprep.mubr.msk.f32.mxu0 %vm5527_vm1, %v17949_v59  ;;  %v3413_v58 = vld [vmem:[#allocation2 + $0x51] sm:$0xff] }
 0x381   : > { %3887 = vmatprep.mubr.f32.mxu1 %v3302_v2  ;;  %v14139_v2 = vpack.c.bf16 %v3450_v11, %v3448_v5  ;;  %v3466_v5 = vld [vmem:[%s22475_s6 + $0xb0] sm:$0xff]  ;;  %v18082_v11 = vld [vmem:[%s16997_s19 + $0x141] sm:$0xff] }
 0x383   : > { %13497 = vmatmul.mubr.msk.f32.gmra.mrb[46].mxu0 %vm5527_vm1, %v17962_v61 }
 0x384   : > { %3888 = vmatmul.mubr.f32.gmra.mrb[62].mxu1 %v17966_v51  ;;  %13499 = vmatprep.mubr.msk.f32.mxu0 %vm5527_vm1, %v17976_v9  ;;  %v3424_v51 = vld [vmem:[#allocation2 + $0x109] sm:$0xff] }
 0x385   : > { %3958 = vmatprep.mubr.f32.mxu1 %v17980_v30 }
 0x387   : > { %13500 = vmatmul.mubr.msk.f32.gmra.mrb[48].mxu0 %vm5527_vm1, %v17990_v35 }
 0x388   : > { %3959 = vmatmul.mubr.f32.vlgmr.msra.gmra.mrb[0].mxu1 %v3410_v10  ;;  %13502 = vmatprep.mubr.msk.f32.mxu0 %vm5527_vm1, %v18001_v47  ;;  %v3414_v10 = vld [vmem:[#allocation2 + $0x69] sm:$0xff] }
 0x389   : > { %14136 = vmatpush1.bf16.msra.mxu1 %v14135_v55  ;;  %3964 = vmatprep.mubr.f32.mxu1 %v17980_v30  ;;  %v14153_v55 = vpack.c.bf16 %v3467_v27, %v3465_v63  ;;  %v18144_v63 = vld [vmem:[%s16997_s19 + $0x189] sm:$0xff] }
 0x38a   : > { %14138 = vmatprep.subr.bf16.mxu1 %v14137_v45  ;;  %v3464_v45 = vld [vmem:[%s22475_s6 + $0xa0] sm:$0xff] }
 0x38b   : > { %13503 = vmatmul.mubr.msk.f32.gmra.mrb[50].mxu0 %vm5527_vm1, %v18013_v37 }
 0x38c   : > { %3965 = vmatmul.mubr.f32.gmra.mrb[2].mxu1 %v3411_v52  ;;  %13505 = vmatprep.mubr.msk.f32.mxu0 %vm5527_vm1, %v18024_v12  ;;  %v3470_v52 = vld [vmem:[%s22475_s6 + $0xd0] sm:$0xff] }
 0x38d   : > { %3970 = vmatprep.mubr.f32.mxu1 %v17980_v30  ;;  %14140 = vmatpush1.bf16.msra.mxu1 %v14139_v2  ;;  %v18093_v2 = vld [vmem:[%s16997_s19 + $0x151] sm:$0xff] }
 0x38e   : > { %14142 = vmatprep.subr.bf16.mxu1 %v14141_v0  ;;  %v14155_v0 = vpack.c.bf16 %v3466_v5, %v3464_v45  ;;  %v3478_v45 = vld [vmem:[%s22475_s6 + $0x110] sm:$0xff] }
 0x38f   : > { %13506 = vmatmul.mubr.msk.f32.gmra.mrb[52].mxu0 %vm5527_vm1, %v18036_v49  ;;  %v3417_v5 = vld [vmem:[#allocation2 + $0x91] sm:$0xff] }
 0x390   : > { %3971 = vmatmul.mubr.f32.gmra.mrb[4].mxu1 %v3412_v13  ;;  %13508 = vmatprep.mubr.msk.f32.mxu0 %vm5527_vm1, %v18047_v46  ;;  %v14159_v13 = vpack.c.bf16 %v3470_v52, %v3468_v43  ;;  %v3480_v43 = vld [vmem:[%s22475_s6 + $0x120] sm:$0xff]  ;;  %v3482_v52 = vld [vmem:[%s22475_s6 + $0x130] sm:$0xff] }
 0x391   : > { %3976 = vmatprep.mubr.f32.mxu1 %v17980_v30  ;;  %14144 = vmatpush1.bf16.msra.mxu1 %v14143_v40  ;;  %v3473_v40 = vld [vmem:[%s22475_s6 + $0xe8] sm:$0xff] }
 0x392   : > { %14146 = vmatprep.subr.bf16.mxu1 %v14145_v33  ;;  %v3475_v33 = vld [vmem:[%s22475_s6 + $0xf8] sm:$0xff] }
 0x393   : > { %13509 = vmatmul.mubr.msk.f32.gmra.mrb[54].mxu0 %vm5527_vm1, %v18059_v56  ;;  %v14161_v14 = vpack.c.bf16 %v3475_v33, %v3473_v40  ;;  %v3418_v40 = vld [vmem:[#allocation2 + $0xa9] sm:$0xff] }
 0x394   : > { %3977 = vmatmul.mubr.f32.gmra.mrb[6].mxu1 %v3413_v58  ;;  %13511 = vmatprep.mubr.msk.f32.mxu0 %vm5527_vm1, %v18070_v42  ;;  %v3479_v58 = vld [vmem:[%s22475_s6 + $0x118] sm:$0xff]  ;;  %v3485_v33 = vld [vmem:[%s22475_s6 + $0x148] sm:$0xff] }
 0x395   : > { %3982 = vmatprep.mubr.f32.mxu1 %v17980_v30  ;;  %14148 = vmatpush1.bf16.msra.mxu1 %v14147_v18  ;;  %v3474_v18 = vld [vmem:[%s22475_s6 + $0xf0] sm:$0xff] }
 0x396   : > { %14150 = vmatprep.subr.bf16.mxu1 %v14149_v19  ;;  %v18131_v19 = vld [vmem:[%s16997_s19 + $0x171] sm:$0xff]  ;;  %v14163_v27 = vpack.c.bf16 %v3474_v18, %v3472_v16  ;;  %v14171_v18 = vpack.c.bf16 %v3482_v52, %v3480_v43  ;;  %v3493_v43 = vld [vmem:[%s22475_s6 + $0x188] sm:$0xff] }
 0x397   : > { %13512 = vmatmul.mubr.msk.f32.gmra.mrb[56].mxu0 %vm5527_vm1, %v18082_v11  ;;  %v18186_v16 = vld [vmem:[%s22477_s8 + $0x38] sm:$0xff] }
 0x398   : > { %3983 = vmatmul.mubr.f32.gmra.mrb[8].mxu1 %v3414_v10  ;;  %13514 = vmatprep.mubr.msk.f32.mxu0 %vm5527_vm1, %v18093_v2  ;;  %v3481_v10 = vld [vmem:[%s22475_s6 + $0x128] sm:$0xff]  ;;  %v3495_v52 = vld [vmem:[%s22475_s6 + $0x198] sm:$0xff] }
 0x399   : > { %3988 = vmatprep.mubr.f32.mxu1 %v17980_v30  ;;  %14152 = vmatpush1.bf16.msra.mxu1 %v14151_v38  ;;  %v14165_v38 = vpack.c.bf16 %v3479_v58, %v3477_v6  ;;  %v3484_v6 = vld [vmem:[%s22475_s6 + $0x140] sm:$0xff]  ;;  %v3486_v58 = vld [vmem:[%s22475_s6 + $0x150] sm:$0xff] }
 0x39a   : > { %14154 = vmatprep.subr.bf16.mxu1 %v14153_v55  ;;  %v3476_v55 = vld [vmem:[%s22475_s6 + $0x100] sm:$0xff] }
 0x39b   : > { %13515 = vmatmul.mubr.msk.f32.gmra.mrb[58].mxu0 %vm5527_vm1, %v18105_v44 }
 0x39c   : > { %3989 = vmatmul.mubr.f32.gmra.mrb[10].mxu1 %v3415_v4  ;;  %13517 = vmatprep.mubr.msk.f32.mxu0 %vm5527_vm1, %v18116_v48  ;;  %v15501_v4 = vld [vmem:[%s16997_s19 + $0x22] sm:$0xff] }
 0x39d   : > { %3994 = vmatprep.mubr.f32.mxu1 %v17980_v30  ;;  %14156 = vmatpush1.bf16.msra.mxu1 %v14155_v0  ;;  %v14167_v0 = vpack.c.bf16 %v3478_v45, %v3476_v55  ;;  %v3489_v55 = vld [vmem:[%s22475_s6 + $0x168] sm:$0xff]  ;;  %v3491_v45 = vld [vmem:[%s22475_s6 + $0x178] sm:$0xff] }
 0x39e   : > { %14158 = vmatprep.subr.bf16.mxu1 %v14157_v8  ;;  %v14169_v8 = vpack.c.bf16 %v3483_v41, %v3481_v10  ;;  %v14177_v10 = vpack.c.bf16 %v3491_v45, %v3489_v55  ;;  %v3488_v41 = vld [vmem:[%s22475_s6 + $0x160] sm:$0xff] }
 0x39f   : > { %13518 = vmatmul.mubr.msk.f32.gmra.mrb[60].mxu0 %vm5527_vm1, %v18131_v19  ;;  %v18255_v55 = vld [vmem:[%s16997_s19 + $0x7a] sm:$0xff] }
 0x3a0   : > { %3995 = vmatmul.mubr.f32.gmra.mrb[12].mxu1 %v3416_v20  ;;  %13520 = vmatprep.mubr.msk.f32.mxu0 %vm5527_vm1, %v18122_v36 }
 0x3a1   : > { %4000 = vmatprep.mubr.f32.mxu1 %v17980_v30  ;;  %14160 = vmatpush1.bf16.msra.mxu1 %v14159_v13  ;;  %v3487_v13 = vld [vmem:[%s22475_s6 + $0x158] sm:$0xff] }
 0x3a2   : > { %14162 = vmatprep.subr.bf16.mxu1 %v14161_v14  ;;  %v18179_v14 = vld [vmem:[%s16997_s19 + $0x32] sm:$0xff]  ;;  %v14173_v20 = vpack.c.bf16 %v3487_v13, %v3485_v33  ;;  %v14181_v33 = vpack.c.bf16 %v3495_v52, %v3493_v43  ;;  %v3492_v13 = vld [vmem:[%s22475_s6 + $0x180] sm:$0xff]  ;;  %v3501_v43 = vld [vmem:[%s22475_s6 + $0x1c8] sm:$0xff] }
 0x3a3   : > { %13521 = vmatmul.mubr.msk.f32.gmra.mrb[62].mxu0 %vm5527_vm1, %v18144_v63  ;;  %v3503_v52 = vld [vmem:[%s22475_s6 + $0x1d8] sm:$0xff] }
 0x3a4   : > { %4001 = vmatmul.mubr.f32.gmra.mrb[14].mxu1 %v3417_v5  ;;  %13525 = vmatprep.mubr.msk.f32.mxu0 %vm5527_vm1, %v15500_v7  ;;  %v14175_v5 = vpack.c.bf16 %v3486_v58, %v3484_v6  ;;  %v3490_v7 = vld [vmem:[%s22475_s6 + $0x170] sm:$0xff]  ;;  %v3497_v58 = vld [vmem:[%s22475_s6 + $0x1a8] sm:$0xff] }
 0x3a5   : > { %4006 = vmatprep.mubr.f32.mxu1 %v17980_v30  ;;  %14164 = vmatpush1.bf16.msra.mxu1 %v14163_v27  ;;  %v18197_v27 = vld [vmem:[%s16997_s19 + $0x3a] sm:$0xff]  ;;  %v3421_v6 = vld [vmem:[#allocation2 + $0xd1] sm:$0xff] }
 0x3a6   : > { %14166 = vmatprep.subr.bf16.mxu1 %v14165_v38  ;;  %v3419_v38 = vld [vmem:[#allocation2 + $0xb1] sm:$0xff] }
 0x3a7   : > { %13526 = vmatmul.mubr.msk.f32.vlgmr.msra.gmra.mrb[32].mxu0 %vm5527_vm1, %v15501_v4  ;;  %v18232_v4 = vld [vmem:[%s16997_s19 + $0x62] sm:$0xff] }
 0x3a8   : > { %4007 = vmatmul.mubr.f32.gmra.mrb[16].mxu1 %v3418_v40  ;;  %13528 = vmatprep.mubr.msk.f32.mxu0 %vm5527_vm1, %v18179_v14  ;;  %v14179_v40 = vpack.c.bf16 %v3490_v7, %v3488_v41  ;;  %v3498_v41 = vld [vmem:[%s22475_s6 + $0x1b0] sm:$0xff]  ;;  %v18267_v7 = vld [vmem:[%s16997_s19 + $0x82] sm:$0xff] }
 0x3a9   : > { %4012 = vmatprep.mubr.f32.mxu1 %v17980_v30  ;;  %14168 = vmatpush1.bf16.msra.mxu1 %v14167_v0  ;;  %v18221_v0 = vld [vmem:[%s16997_s19 + $0x52] sm:$0xff] }
 0x3aa   : > { %14170 = vmatprep.subr.bf16.mxu1 %v14169_v8  ;;  %13574 = vmatpush3.msra.mxu0 %v17863_v21  ;;  %v18209_v21 = vld [vmem:[%s16997_s19 + $0x4a] sm:$0xff] }
 0x3ab   : > { %13529 = vmatmul.mubr.msk.f32.gmra.mrb[34].mxu0 %vm5527_vm1, %v18197_v27  ;;  %13623 = vmatprep.subr.mxu0 %v18186_v16  ;;  %v3420_v8 = vld [vmem:[#allocation2 + $0xc9] sm:$0xff] }
 0x3ac   : > { %4013 = vmatmul.mubr.f32.gmra.mrb[18].mxu1 %v3419_v38  ;;  %13531 = vmatprep.mubr.msk.f32.mxu0 %vm5527_vm1, %v18209_v21  ;;  %v3499_v38 = vld [vmem:[%s22475_s6 + $0x1b8] sm:$0xff] }
 0x3ad   : > { %4018 = vmatprep.mubr.f32.mxu1 %v17980_v30  ;;  %14172 = vmatpush1.bf16.msra.mxu1 %v14171_v18  ;;  %v3494_v18 = vld [vmem:[%s22475_s6 + $0x190] sm:$0xff] }
 0x3ae   : > { %14174 = vmatprep.subr.bf16.mxu1 %v14173_v20  ;;  %v18244_v20 = vld [vmem:[%s16997_s19 + $0x6a] sm:$0xff]  ;;  %v14183_v45 = vpack.c.bf16 %v3494_v18, %v3492_v13  ;;  %v14189_v13 = vpack.c.bf16 %v3503_v52, %v3501_v43  ;;  %v3500_v18 = vld [vmem:[%s22475_s6 + $0x1c0] sm:$0xff] }
 0x3af   : > { %13532 = vmatmul.mubr.msk.f32.gmra.mrb[36].mxu0 %vm5527_vm1, %v18221_v0  ;;  %v3504_v43 = vld [vmem:[%s22475_s6 + $0x1e0] sm:$0xff]  ;;  %v3506_v52 = vld [vmem:[%s22475_s6 + $0x1f0] sm:$0xff] }
 0x3b0   : > { %4019 = vmatmul.mubr.f32.gmra.mrb[20].mxu1 %v3420_v8  ;;  %13534 = vmatprep.mubr.msk.f32.mxu0 %vm5527_vm1, %v18232_v4  ;;  %v3422_v8 = vld [vmem:[#allocation2 + $0xe9] sm:$0xff] }
 0x3b1   : > { %4024 = vmatprep.mubr.f32.mxu1 %v17980_v30  ;;  %14176 = vmatpush1.bf16.msra.mxu1 %v14175_v5  ;;  %v14185_v5 = vpack.c.bf16 %v3499_v38, %v3497_v58  ;;  %v18290_v58 = vld [vmem:[%s16997_s19 + $0x9a] sm:$0xff]  ;;  %v3423_v38 = vld [vmem:[#allocation2 + $0xf1] sm:$0xff] }
 0x3b2   : > { %14178 = vmatprep.subr.bf16.mxu1 %v14177_v10  ;;  %v3496_v10 = vld [vmem:[%s22475_s6 + $0x1a0] sm:$0xff] }
 0x3b3   : > { %13535 = vmatmul.mubr.msk.f32.gmra.mrb[38].mxu0 %vm5527_vm1, %v18244_v20 }
 0x3b4   : > { %4025 = vmatmul.mubr.f32.gmra.mrb[22].mxu1 %v3421_v6  ;;  %13537 = vmatprep.mubr.msk.f32.mxu0 %vm5527_vm1, %v18255_v55  ;;  %v3502_v6 = vld [vmem:[%s22475_s6 + $0x1d0] sm:$0xff] }
 0x3b5   : > { %4030 = vmatprep.mubr.f32.mxu1 %v17980_v30  ;;  %14180 = vmatpush1.bf16.msra.mxu1 %v14179_v40  ;;  %v18278_v40 = vld [vmem:[%s16997_s19 + $0x92] sm:$0xff] }
 0x3b6   : > { %14182 = vmatprep.subr.bf16.mxu1 %v14181_v33  ;;  %v14187_v33 = vpack.c.bf16 %v3498_v41, %v3496_v10  ;;  %v18301_v10 = vld [vmem:[%s16997_s19 + $0xaa] sm:$0xff]  ;;  %v14191_v41 = vpack.c.bf16 %v3502_v6, %v3500_v18  ;;  %v18324_v18 = vld [vmem:[%s16997_s19 + $0xc2] sm:$0xff]  ;;  %v14195_v6 = vpack.c.bf16 %v3506_v52, %v3504_v43  ;;  %v18346_v43 = vld [vmem:[%s16997_s19 + $0xf2] sm:$0xff] }
 0x3b7   : > { %13538 = vmatmul.mubr.msk.f32.gmra.mrb[40].mxu0 %vm5527_vm1, %v18267_v7  ;;  %22827 = vst [vmem:[#allocation12_spill] sm:$0xff] %v18346_v43  ;;  %v18352_v52 = vld [vmem:[%s16997_s19 + $0xfa] sm:$0xff] }
 0x3b8   : > { %4031 = vmatmul.mubr.f32.gmra.mrb[24].mxu1 %v3422_v8  ;;  %13540 = vmatprep.mubr.msk.f32.mxu0 %vm5527_vm1, %v18278_v40  ;;  %22828 = vst [vmem:[#allocation13_spill] sm:$0xff] %v18352_v52 }
 0x3b9   : > { %4036 = vmatprep.mubr.f32.mxu1 %v17980_v30  ;;  %14184 = vmatpush1.bf16.msra.mxu1 %v14183_v45  ;;  %v3505_v45 = vld [vmem:[%s22475_s6 + $0x1e8] sm:$0xff] }
 0x3ba   : > { %14186 = vmatprep.subr.bf16.mxu1 %v14185_v5  ;;  %v3507_v5 = vld [vmem:[%s22475_s6 + $0x1f8] sm:$0xff] }
 0x3bb   : > { %13541 = vmatmul.mubr.msk.f32.gmra.mrb[42].mxu0 %vm5527_vm1, %v18290_v58  ;;  %v14193_v8 = vpack.c.bf16 %v3507_v5, %v3505_v45  ;;  %v18330_v5 = vld [vmem:[%s16997_s19 + $0xca] sm:$0xff] }
 0x3bc   : > { %4037 = vmatmul.mubr.f32.gmra.mrb[26].mxu1 %v3423_v38  ;;  %13543 = vmatprep.mubr.msk.f32.mxu0 %vm5527_vm1, %v18301_v10  ;;  %v18313_v38 = vld [vmem:[%s16997_s19 + $0xb2] sm:$0xff] }
 0x3bd   : > { %4042 = vmatprep.mubr.f32.mxu1 %v17980_v30  ;;  %14188 = vmatpush1.bf16.msra.mxu1 %v14187_v33  ;;  %v3509_v33 = vld [vmem:[%s22475_s6 + $0x208] sm:$0xff] }
 0x3be   : > { %14190 = vmatprep.subr.bf16.mxu1 %v14189_v13  ;;  %v3511_v13 = vld [vmem:[%s22475_s6 + $0x218] sm:$0xff] }
 0x3bf   : > { %13544 = vmatmul.mubr.msk.f32.gmra.mrb[44].mxu0 %vm5527_vm1, %v18313_v38  ;;  %v14197_v45 = vpack.c.bf16 %v3511_v13, %v3509_v33  ;;  %v3427_v33 = vld [vmem:[#allocation2 + $0x131] sm:$0xff] }
 0x3c0   : > { %4043 = vmatmul.mubr.f32.gmra.mrb[28].mxu1 %v3424_v51  ;;  %13546 = vmatprep.mubr.msk.f32.mxu0 %vm5527_vm1, %v18324_v18  ;;  %v3425_v51 = vld [vmem:[#allocation2 + $0x111] sm:$0xff] }
 0x3c1   : > { %4048 = vmatprep.mubr.f32.mxu1 %v17980_v30  ;;  %14192 = vmatpush1.bf16.msra.mxu1 %v14191_v41  ;;  %v18341_v41 = vld [vmem:[%s16997_s19 + $0xe2] sm:$0xff]  ;;  %v18357_v13 = vld [vmem:[%s16997_s19 + $0x10a] sm:$0xff] }
 0x3c2   : > { %14194 = vmatprep.subr.bf16.mxu1 %v14193_v8  ;;  %22826 = vst [vmem:[#allocation11_spill] sm:$0xff] %v18341_v41  ;;  %v3426_v8 = vld [vmem:[#allocation2 + $0x129] sm:$0xff]  ;;  %22829 = vst [vmem:[#allocation14_spill] sm:$0xff] %v18357_v13 }
 0x3c3   : > { %13547 = vmatmul.mubr.msk.f32.gmra.mrb[46].mxu0 %vm5527_vm1, %v18330_v5 }
 0x3c4   : > { %4049 = vmatmul.mubr.f32.gmra.mrb[30].mxu1 %v3425_v51  ;;  %13549 = vmatprep.mubr.msk.f32.mxu0 %vm5527_vm1, %v18335_v57  ;;  %v22830_v51 = vld [vmem:[#allocation17_spill] sm:$0xff] }
 0x3c5   : > { %4054 = vmatprep.mubr.f32.mxu1 %v17980_v30  ;;  %14196 = vmatpush1.bf16.msra.mxu1 %v14195_v6  ;;  %v3428_v6 = vld [vmem:[#allocation2 + $0x149] sm:$0xff] }
 0x3c6   : > { %14198 = vmatprep.subr.bf16.mxu1 %v14197_v45  ;;  %v3429_v45 = vld [vmem:[#allocation2 + $0x151] sm:$0xff] }
 0x3c7   : > { %13550 = vmatmul.mubr.msk.f32.gmra.mrb[48].mxu0 %vm5527_vm1, %v18341_v41  ;;  %v3518_v41 = vld [vmem:[%s22475_s6 + $0x250] sm:$0xff] }
 0x3c8   : > { %4055 = vmatmul.mubr.f32.gmra.mrb[32].mxu1 %v3426_v8  ;;  %13552 = vmatprep.mubr.msk.f32.mxu0 %vm5527_vm1, %v18346_v43  ;;  %v22831_v8 = vld [vmem:[#allocation18_spill] sm:$0xff]  ;;  %v15538_v43 = vld [vmem:[%s16997_s19 + $0xf8] sm:$0xff] }
 0x3c9   : > { %4060 = vmatprep.mubr.f32.mxu1 %v17980_v30 }
 0x3cb   : > { %13553 = vmatmul.mubr.msk.f32.gmra.mrb[50].mxu0 %vm5527_vm1, %v18352_v52  ;;  %v3514_v52 = vld [vmem:[%s22475_s6 + $0x230] sm:$0xff] }
 0x3cc   : > { %4061 = vmatmul.mubr.f32.gmra.mrb[34].mxu1 %v3427_v33  ;;  %13555 = vmatprep.mubr.msk.f32.mxu0 %vm5527_vm1, %v18357_v13  ;;  %v22833_v33 = vld [vmem:[#allocation35_spill] sm:$0xff]  ;;  %v3512_v13 = vld [vmem:[%s22475_s6 + $0x220] sm:$0xff] }
 0x3cd   : > { %4066 = vmatprep.mubr.f32.mxu1 %v17980_v30 }
 0x3cf   : > { %13556 = vmatmul.mubr.msk.f32.gmra.mrb[52].mxu0 %vm5527_vm1, %v17517_v24  ;;  %v3430_v24 = vld [vmem:[#allocation2 + $0x169] sm:$0xff] }
 0x3d0   : > { %4067 = vmatmul.mubr.f32.gmra.mrb[36].mxu1 %v3428_v6  ;;  %13558 = vmatprep.mubr.msk.f32.mxu0 %vm5527_vm1, %v17523_v28  ;;  %v22832_v28 = vld [vmem:[#allocation32_spill] sm:$0xff]  ;;  %v22834_v6 = vld [vmem:[#allocation37_spill] sm:$0xff] }
 0x3d1   : > { %4072 = vmatprep.mubr.f32.mxu1 %v17980_v30 }
 0x3d3   : > { %13559 = vmatmul.mubr.msk.f32.gmra.mrb[54].mxu0 %vm5527_vm1, %v17553_v3  ;;  %v3431_v3 = vld [vmem:[#allocation2 + $0x171] sm:$0xff] }
 0x3d4   : > { %4073 = vmatmul.mubr.f32.gmra.mrb[38].mxu1 %v3429_v45  ;;  %13561 = vmatprep.mubr.msk.f32.mxu0 %vm5527_vm1, %v22830_v51  ;;  %v18383_v45 = vld [vmem:[%s16997_s19 + $0x182] sm:$0xff] }
 0x3d5   : > { %4078 = vmatprep.mubr.f32.mxu1 %v17980_v30  ;;  %22835 = vst [vmem:[#allocation15_spill] sm:$0xff] %v18383_v45  ;;  %v3432_v51 = vld [vmem:[#allocation2 + $0x189] sm:$0xff] }
 0x3d7   : > { %13562 = vmatmul.mubr.msk.f32.gmra.mrb[56].mxu0 %vm5527_vm1, %v22831_v8  ;;  %v18390_v8 = vld [vmem:[%s16997_s19 + $0x18a] sm:$0xff] }
 0x3d8   : > { %4079 = vmatmul.mubr.f32.gmra.mrb[40].mxu1 %v3430_v24  ;;  %13564 = vmatprep.mubr.msk.f32.mxu0 %vm5527_vm1, %v22832_v28  ;;  %22836 = vst [vmem:[#allocation16_spill] sm:$0xff] %v18390_v8  ;;  %v3433_v24 = vld [vmem:[#allocation2 + $0x191] sm:$0xff] }
 0x3d9   : > { %4084 = vmatprep.mubr.f32.mxu1 %v17980_v30  ;;  %v15521_v28 = vld [vmem:[%s16997_s19 + $0x30] sm:$0xff] }
 0x3db   : > { %13565 = vmatmul.mubr.msk.f32.gmra.mrb[58].mxu0 %vm5527_vm1, %v22833_v33  ;;  %v3434_v33 = vld [vmem:[#allocation2 + $0x1a9] sm:$0xff] }
 0x3dc   : > { %4085 = vmatmul.mubr.f32.gmra.mrb[42].mxu1 %v3431_v3  ;;  %13567 = vmatprep.mubr.msk.f32.mxu0 %vm5527_vm1, %v22834_v6  ;;  %v18403_v3 = vld [vmem:[%s22477_s8 + $0x40] sm:$0xff]  ;;  %v15523_v6 = vld [vmem:[%s16997_s19 + $0x48] sm:$0xff] }
 0x3dd   : > { %4090 = vmatprep.mubr.f32.mxu1 %v17980_v30 }
 0x3df   : > { %13568 = vmatmul.mubr.msk.f32.gmra.mrb[60].mxu0 %vm5527_vm1, %v17661_v39  ;;  %v15522_v39 = vld [vmem:[%s16997_s19 + $0x38] sm:$0xff] }
 0x3e0   : > { %4091 = vmatmul.mubr.f32.gmra.mrb[44].mxu1 %v3432_v51  ;;  %13570 = vmatprep.mubr.msk.f32.mxu0 %vm5527_vm1, %v18383_v45  ;;  %v15524_v51 = vld [vmem:[%s16997_s19 + $0x50] sm:$0xff] }
 0x3e1   : > { %4096 = vmatprep.mubr.f32.mxu1 %v17980_v30 }
 0x3e3   : > { %13571 = vmatmul.mubr.msk.f32.gmra.mrb[62].mxu0 %vm5527_vm1, %v18390_v8  ;;  %v3336_v8 = vld [vmem:[#allocation2 + $0x7] sm:$0xff] }
 0x3e4   : > { %4097 = vmatmul.mubr.f32.gmra.mrb[46].mxu1 %v3433_v24  ;;  %13575 = vmatprep.mubr.msk.f32.mxu0 %vm5527_vm1, %v15521_v28  ;;  %v3435_v24 = vld [vmem:[#allocation2 + $0x1b1] sm:$0xff]  ;;  %v15525_v28 = vld [vmem:[%s16997_s19 + $0x60] sm:$0xff] }
 0x3e5   : > { %4102 = vmatprep.mubr.f32.mxu1 %v17980_v30 }
 0x3e7   : > { %13576 = vmatmul.mubr.msk.f32.vlgmr.msra.gmra.mrb[32].mxu0 %vm5527_vm1, %v15522_v39  ;;  %v15526_v39 = vld [vmem:[%s16997_s19 + $0x68] sm:$0xff] }
 0x3e8   : > { %4103 = vmatmul.mubr.f32.gmra.mrb[48].mxu1 %v3434_v33  ;;  %13578 = vmatprep.mubr.msk.f32.mxu0 %vm5527_vm1, %v15523_v6  ;;  %v3436_v33 = vld [vmem:[#allocation2 + $0x1c9] sm:$0xff]  ;;  %v15528_v6 = vld [vmem:[%s16997_s19 + $0x80] sm:$0xff] }
 0x3e9   : > { %4108 = vmatprep.mubr.f32.mxu1 %v17980_v30  ;;  %13624 = vmatpush3.msra.mxu0 %v18186_v16  ;;  %v15527_v16 = vld [vmem:[%s16997_s19 + $0x78] sm:$0xff] }
 0x3ea   : > { %13673 = vmatprep.subr.mxu0 %v18403_v3 }
 0x3eb   : > { %13579 = vmatmul.mubr.msk.f32.gmra.mrb[34].mxu0 %vm5527_vm1, %v15524_v51  ;;  %v18422_v51 = vld [vmem:[#allocation2 + $0x1d1] sm:$0xff] }
 0x3ec   : > { %4109 = vmatmul.mubr.f32.gmra.mrb[50].mxu1 %v3435_v24  ;;  %13581 = vmatprep.mubr.msk.f32.mxu0 %vm5527_vm1, %v15525_v28  ;;  %22837 = vst [vmem:[#allocation43_spill] sm:$0xff] %v18422_v51  ;;  %v15529_v24 = vld [vmem:[%s16997_s19 + $0x90] sm:$0xff]  ;;  %v15530_v28 = vld [vmem:[%s16997_s19 + $0x98] sm:$0xff] }
 0x3ed   : > { %4114 = vmatprep.mubr.f32.mxu1 %v17980_v30 }
 0x3ef   : > { %13582 = vmatmul.mubr.msk.f32.gmra.mrb[36].mxu0 %vm5527_vm1, %v15526_v39  ;;  %v18430_v39 = vld [vmem:[#allocation2 + $0x1e9] sm:$0xff] }
 0x3f0   : > { %4115 = vmatmul.mubr.f32.gmra.mrb[52].mxu1 %v3436_v33  ;;  %13584 = vmatprep.mubr.msk.f32.mxu0 %vm5527_vm1, %v15527_v16  ;;  %22838 = vst [vmem:[#allocation44_spill] sm:$0xff] %v18430_v39  ;;  %v15531_v33 = vld [vmem:[%s16997_s19 + $0xa8] sm:$0xff]  ;;  %v15532_v16 = vld [vmem:[%s16997_s19 + $0xb0] sm:$0xff] }
 0x3f1   : > { %4120 = vmatprep.mubr.f32.mxu1 %v17980_v30 }
 0x3f3   : > { %13585 = vmatmul.mubr.msk.f32.gmra.mrb[38].mxu0 %vm5527_vm1, %v15528_v6  ;;  %v18438_v6 = vld [vmem:[#allocation2 + $0x1f1] sm:$0xff] }
 0x3f4   : > { %4121 = vmatmul.mubr.f32.gmra.mrb[54].mxu1 %v18422_v51  ;;  %13587 = vmatprep.mubr.msk.f32.mxu0 %vm5527_vm1, %v15529_v24  ;;  %22839 = vst [vmem:[#allocation19_spill] sm:$0xff] %v18438_v6  ;;  %v15533_v24 = vld [vmem:[%s16997_s19 + $0xc0] sm:$0xff]  ;;  %v15537_v51 = vld [vmem:[%s16997_s19 + $0xf0] sm:$0xff] }
 0x3f5   : > { %4126 = vmatprep.mubr.f32.mxu1 %v17980_v30 }
 0x3f7   : > { %13588 = vmatmul.mubr.msk.f32.gmra.mrb[40].mxu0 %vm5527_vm1, %v15530_v28  ;;  %v15534_v28 = vld [vmem:[%s16997_s19 + $0xc8] sm:$0xff] }
 0x3f8   : > { %4127 = vmatmul.mubr.f32.gmra.mrb[56].mxu1 %v18430_v39  ;;  %13590 = vmatprep.mubr.msk.f32.mxu0 %vm5527_vm1, %v15531_v33  ;;  %v18446_v33 = vld [vmem:[#allocation2 + $0x209] sm:$0xff]  ;;  %v15535_v39 = vld [vmem:[%s16997_s19 + $0xd8] sm:$0xff] }
 0x3f9   : > { %4132 = vmatprep.mubr.f32.mxu1 %v17980_v30  ;;  %22840 = vst [vmem:[#allocation20_spill] sm:$0xff] %v18446_v33 }
 0x3fb   : > { %13591 = vmatmul.mubr.msk.f32.gmra.mrb[42].mxu0 %vm5527_vm1, %v15532_v16  ;;  %v3508_v16 = vld [vmem:[%s22475_s6 + $0x200] sm:$0xff] }
 0x3fc   : > { %4133 = vmatmul.mubr.f32.gmra.mrb[58].mxu1 %v18438_v6  ;;  %13593 = vmatprep.mubr.msk.f32.mxu0 %vm5527_vm1, %v15533_v24  ;;  %v3510_v24 = vld [vmem:[%s22475_s6 + $0x210] sm:$0xff]  ;;  %v15536_v6 = vld [vmem:[%s16997_s19 + $0xe0] sm:$0xff] }
 0x3fd   : > { %4138 = vmatprep.mubr.f32.mxu1 %v17980_v30 }
 0x3ff   : > { %13594 = vmatmul.mubr.msk.f32.gmra.mrb[44].mxu0 %vm5527_vm1, %v15534_v28  ;;  %v18460_v28 = vld [vmem:[#allocation2 + $0x211] sm:$0xff] }
 0x400   : > { %4139 = vmatmul.mubr.f32.gmra.mrb[60].mxu1 %v18446_v33  ;;  %13596 = vmatprep.mubr.msk.f32.mxu0 %vm5527_vm1, %v15535_v39  ;;  %22841 = vst [vmem:[#allocation21_spill] sm:$0xff] %v18460_v28  ;;  %v3513_v39 = vld [vmem:[%s22475_s6 + $0x228] sm:$0xff]  ;;  %v3515_v33 = vld [vmem:[%s22475_s6 + $0x238] sm:$0xff] }
 0x401   : > { %4144 = vmatprep.mubr.f32.mxu1 %v17980_v30  ;;  %v14201_v45 = vpack.c.bf16 %v3515_v33, %v3513_v39  ;;  %v3519_v33 = vld [vmem:[%s22475_s6 + $0x258] sm:$0xff]  ;;  %v14203_v39 = vpack.c.bf16 %v3514_v52, %v3512_v13  ;;  %v15541_v13 = vld [vmem:[%s16997_s19 + $0x120] sm:$0xff] }
 0x402   : > { %v3523_v52 = vld [vmem:[%s22475_s6 + $0x278] sm:$0xff] }
 0x403   : > { %13597 = vmatmul.mubr.msk.f32.gmra.mrb[46].mxu0 %vm5527_vm1, %v15536_v6  ;;  %v14199_v6 = vpack.c.bf16 %v3510_v24, %v3508_v16  ;;  %v15539_v16 = vld [vmem:[%s16997_s19 + $0x108] sm:$0xff] }
 0x404   : > { %4145 = vmatmul.mubr.f32.gmra.mrb[62].mxu1 %v18460_v28  ;;  %13599 = vmatprep.mubr.msk.f32.mxu0 %vm5527_vm1, %v15537_v51  ;;  %v3517_v51 = vld [vmem:[%s22475_s6 + $0x248] sm:$0xff]  ;;  %v3516_v28 = vld [vmem:[%s22475_s6 + $0x240] sm:$0xff] }
 0x405   : > { %4215 = vmatprep.mubr.f32.mxu1 %v17980_v30  ;;  %v3337_v24 = vld [vmem:[#allocation2 + $0xf] sm:$0xff] }
 0x407   : > { %13600 = vmatmul.mubr.msk.f32.gmra.mrb[48].mxu0 %vm5527_vm1, %v15538_v43  ;;  %v14205_v43 = vpack.c.bf16 %v3519_v33, %v3517_v51  ;;  %v14207_v51 = vpack.c.bf16 %v3518_v41, %v3516_v28  ;;  %v3527_v41 = vld [vmem:[%s22475_s6 + $0x298] sm:$0xff]  ;;  %v15544_v28 = vld [vmem:[#allocation2 + $0x27] sm:$0xff] }
 0x408   : > { %4216 = vmatmul.mubr.f32.vlgmr.msra.gmra.mrb[0].mxu1 %v3336_v8  ;;  %13602 = vmatprep.mubr.msk.f32.mxu0 %vm5527_vm1, %v15539_v16  ;;  %v15540_v8 = vld [vmem:[%s16997_s19 + $0x110] sm:$0xff]  ;;  %v3520_v16 = vld [vmem:[%s22475_s6 + $0x260] sm:$0xff] }
 0x409   : > { %14200 = vmatpush1.bf16.msra.mxu1 %v14199_v6  ;;  %4221 = vmatprep.mubr.f32.mxu1 %v17980_v30  ;;  %v3521_v6 = vld [vmem:[%s22475_s6 + $0x268] sm:$0xff] }
 0x40a   : > { %14202 = vmatprep.subr.bf16.mxu1 %v14201_v45  ;;  %v15542_v45 = vld [vmem:[#allocation2 + $0x28] sm:$0xff]  ;;  %v14209_v33 = vpack.c.bf16 %v3523_v52, %v3521_v6  ;;  %v3524_v52 = vld [vmem:[%s22475_s6 + $0x280] sm:$0xff] }
 0x40b   : > { %13603 = vmatmul.mubr.msk.f32.gmra.mrb[50].mxu0 %vm5527_vm1, %v15540_v8  ;;  %v3522_v8 = vld [vmem:[%s22475_s6 + $0x270] sm:$0xff]  ;;  %v15543_v30 = vld [vmem:[%s16997_s19 + $0x128] sm:$0xff] }
 0x40c   : > { %4222 = vmatmul.mubr.f32.gmra.mrb[2].mxu1 %v3337_v24  ;;  %13605 = vmatprep.mubr.msk.f32.mxu0 %vm5527_vm1, %v15541_v13  ;;  %v3525_v24 = vld [vmem:[%s22475_s6 + $0x288] sm:$0xff]  ;;  %v14211_v6 = vpack.c.bf16 %v3522_v8, %v3520_v16  ;;  %v3526_v13 = vld [vmem:[%s22475_s6 + $0x290] sm:$0xff] }
 0x40d   : > { %4227 = vmatprep.mubr.f32.mxu1 %v15542_v45  ;;  %14204 = vmatpush1.bf16.msra.mxu1 %v14203_v39  ;;  %v15545_v39 = vld [vmem:[%s16997_s19 + $0x138] sm:$0xff]  ;;  %v15547_v45 = vld [vmem:[%s16997_s19 + $0x140] sm:$0xff]  ;;  %v15549_v16 = vld [vmem:[%s16997_s19 + $0x150] sm:$0xff] }
 0x40e   : > { %14206 = vmatprep.subr.bf16.mxu1 %v14205_v43  ;;  %v15546_v43 = vld [vmem:[#allocation2 + $0x30] sm:$0xff]  ;;  %v18537_v8 = vld [vmem:[#allocation2 + $0x48] sm:$0xff] }
 0x40f   : > { %13606 = vmatmul.mubr.msk.f32.gmra.mrb[52].mxu0 %vm5527_vm1, %v15543_v30  ;;  %v14213_v30 = vpack.c.bf16 %v3527_v41, %v3525_v24  ;;  %v14215_v24 = vpack.c.bf16 %v3526_v13, %v3524_v52  ;;  %v15553_v52 = vld [vmem:[%s16997_s19 + $0x168] sm:$0xff]  ;;  %v18559_v13 = vld [vmem:[#allocation2 + $0x50] sm:$0xff] }
 0x410   : > { %4228 = vmatmul.mubr.f32.gmra.mrb[4].mxu1 %v15544_v28  ;;  %13608 = vmatprep.mubr.msk.f32.mxu0 %vm5527_vm1, %v15545_v39  ;;  %v3529_v28 = vld [vmem:[%s22475_s6 + $0x2a8] sm:$0xff]  ;;  %v3528_v39 = vld [vmem:[%s22475_s6 + $0x2a0] sm:$0xff] }
 0x411   : > { %4233 = vmatprep.mubr.f32.mxu1 %v15546_v43  ;;  %14208 = vmatpush1.bf16.msra.mxu1 %v14207_v51  ;;  %v3531_v51 = vld [vmem:[%s22475_s6 + $0x2b8] sm:$0xff]  ;;  %v3530_v43 = vld [vmem:[%s22475_s6 + $0x2b0] sm:$0xff] }
 0x412   : > { %14210 = vmatprep.subr.bf16.mxu1 %v14209_v33  ;;  %v15548_v33 = vld [vmem:[#allocation2 + $0x2f] sm:$0xff]  ;;  %v14217_v41 = vpack.c.bf16 %v3531_v51, %v3529_v28  ;;  %v14219_v28 = vpack.c.bf16 %v3530_v43, %v3528_v39  ;;  %v5450_v43 = vld [vmem:[%s16997_s19 + $0x198] sm:$0xff] }
 0x413   : > { %13609 = vmatmul.mubr.msk.f32.gmra.mrb[54].mxu0 %vm5527_vm1, %v15547_v45  ;;  %v15551_v45 = vld [vmem:[%s16997_s19 + $0x158] sm:$0xff]  ;;  %v18581_v39 = vld [vmem:[#allocation2 + $0x68] sm:$0xff] }
 0x414   : > { %4234 = vmatmul.mubr.f32.gmra.mrb[6].mxu1 %v15548_v33  ;;  %13611 = vmatprep.mubr.msk.f32.mxu0 %vm5527_vm1, %v15549_v16  ;;  %v3533_v33 = vld [vmem:[%s22475_s6 + $0x2c8] sm:$0xff]  ;;  %v3532_v16 = vld [vmem:[%s22475_s6 + $0x2c0] sm:$0xff] }
 0x415   : > { %4239 = vmatprep.mubr.f32.mxu1 %v18537_v8  ;;  %14212 = vmatpush1.bf16.msra.mxu1 %v14211_v6  ;;  %v3535_v6 = vld [vmem:[%s22475_s6 + $0x2d8] sm:$0xff] }
 0x416   : > { %14214 = vmatprep.subr.bf16.mxu1 %v14213_v30  ;;  %v18554_v30 = vld [vmem:[#allocation2 + $0x47] sm:$0xff]  ;;  %v14221_v51 = vpack.c.bf16 %v3535_v6, %v3533_v33 }
 0x417   : > { %13612 = vmatmul.mubr.msk.f32.gmra.mrb[56].mxu0 %vm5527_vm1, %v15551_v45  ;;  %22842 = vst [vmem:[#allocation22_spill] sm:$0xff] %v18554_v30  ;;  %v3534_v45 = vld [vmem:[%s22475_s6 + $0x2d0] sm:$0xff] }
 0x418   : > { %4240 = vmatmul.mubr.f32.gmra.mrb[8].mxu1 %v18554_v30  ;;  %13614 = vmatprep.mubr.msk.f32.mxu0 %vm5527_vm1, %v15553_v52  ;;  %v15555_v30 = vld [vmem:[%s16997_s19 + $0x170] sm:$0xff]  ;;  %v3537_v52 = vld [vmem:[%s22475_s6 + $0x2e8] sm:$0xff]  ;;  %v14223_v33 = vpack.c.bf16 %v3534_v45, %v3532_v16  ;;  %v5451_v16 = vld [vmem:[%s16997_s19 + $0x1a0] sm:$0xff] }
 0x419   : > { %4245 = vmatprep.mubr.f32.mxu1 %v18559_v13  ;;  %14216 = vmatpush1.bf16.msra.mxu1 %v14215_v24  ;;  %v3539_v24 = vld [vmem:[%s22475_s6 + $0x2f8] sm:$0xff]  ;;  %v18604_v45 = vld [vmem:[#allocation2 + $0x70] sm:$0xff] }
 0x41a   : > { %14218 = vmatprep.subr.bf16.mxu1 %v14217_v41  ;;  %v18576_v41 = vld [vmem:[#allocation2 + $0x4f] sm:$0xff]  ;;  %v14225_v6 = vpack.c.bf16 %v3539_v24, %v3537_v52 }
 0x41b   : > { %13615 = vmatmul.mubr.msk.f32.gmra.mrb[58].mxu0 %vm5527_vm1, %v15555_v30  ;;  %22843 = vst [vmem:[#allocation23_spill] sm:$0xff] %v18576_v41  ;;  %v3536_v30 = vld [vmem:[%s22475_s6 + $0x2e0] sm:$0xff]  ;;  %v18608_v24 = vld [vmem:[#allocation2 + $0x6f] sm:$0xff] }
 0x41c   : > { %4246 = vmatmul.mubr.f32.gmra.mrb[10].mxu1 %v18576_v41  ;;  %13617 = vmatprep.mubr.msk.f32.mxu0 %vm5527_vm1, %v17841_v15  ;;  %v3538_v41 = vld [vmem:[%s22475_s6 + $0x2f0] sm:$0xff]  ;;  %v11542_v15 = vld [vmem:[%s22475_s6 + $0x608] sm:$0xff] }
 0x41d   : > { %4251 = vmatprep.mubr.f32.mxu1 %v18581_v39  ;;  %14220 = vmatpush1.bf16.msra.mxu1 %v14219_v28  ;;  %v11544_v28 = vld [vmem:[%s22475_s6 + $0x618] sm:$0xff] }
 0x41e   : > { %14222 = vmatprep.subr.bf16.mxu1 %v14221_v51  ;;  %v18599_v51 = vld [vmem:[#allocation2 + $0x67] sm:$0xff]  ;;  %v14229_v52 = vpack.c.bf16 %v11544_v28, %v11542_v15  ;;  %v15600_v15 = vld [vmem:[#allocation2 + $0x1af] sm:$0xff] }
 0x41f   : > { %13618 = vmatmul.mubr.msk.f32.gmra.mrb[60].mxu0 %vm5527_vm1, %v17848_v17  ;;  %22844 = vst [vmem:[#allocation24_spill] sm:$0xff] %v18599_v51  ;;  %v14227_v17 = vpack.c.bf16 %v3538_v41, %v3536_v30  ;;  %v18618_v41 = vld [vmem:[#allocation2 + $0x87] sm:$0xff]  ;;  %v18784_v30 = vld [vmem:[#allocation2 + $0x190] sm:$0xff] }
 0x420   : > { %4252 = vmatmul.mubr.f32.gmra.mrb[12].mxu1 %v18599_v51  ;;  %13620 = vmatprep.mubr.msk.f32.mxu0 %vm5527_vm1, %v5450_v43  ;;  %v18613_v51 = vld [vmem:[#allocation2 + $0x88] sm:$0xff]  ;;  %v18623_v43 = vld [vmem:[#allocation2 + $0x90] sm:$0xff] }
 0x421   : > { %4257 = vmatprep.mubr.f32.mxu1 %v18604_v45  ;;  %14224 = vmatpush1.bf16.msra.mxu1 %v14223_v33  ;;  %v18765_v33 = vld [vmem:[#allocation2 + $0x170] sm:$0xff] }
 0x422   : > { %14226 = vmatprep.subr.bf16.mxu1 %v14225_v6  ;;  %v18779_v6 = vld [vmem:[#allocation2 + $0x187] sm:$0xff] }
 0x423   : > { %13621 = vmatmul.mubr.msk.f32.gmra.mrb[62].mxu0 %vm5527_vm1, %v5451_v16  ;;  %v3408_v28 = vld [vmem:[#allocation2 + $0x9] sm:$0xff] }
 0x424   : > { %4258 = vmatmul.mubr.f32.gmra.mrb[14].mxu1 %v18608_v24  ;;  %13625 = vmatprep.mubr.msk.f32.mxu0 %vm5527_vm1, %v17866_v22  ;;  %v18629_v22 = vld [vmem:[#allocation2 + $0x8f] sm:$0xff] }
 0x425   : > { %4263 = vmatprep.mubr.f32.mxu1 %v18613_v51  ;;  %14228 = vmatpush1.bf16.msra.mxu1 %v14227_v17 }
 0x426   : > { %14230 = vmatprep.subr.bf16.mxu1 %v14229_v52  ;;  %v11545_v52 = vld [vmem:[%s22475_s6 + $0x620] sm:$0xff] }
 0x427   : > { %13626 = vmatmul.mubr.msk.f32.vlgmr.msra.gmra.mrb[32].mxu0 %vm5527_vm1, %v17875_v23  ;;  %v18634_v23 = vld [vmem:[#allocation2 + $0xa8] sm:$0xff] }
 0x428   : > { %4264 = vmatmul.mubr.f32.gmra.mrb[16].mxu1 %v18618_v41  ;;  %13628 = vmatprep.mubr.msk.f32.mxu0 %vm5527_vm1, %v17880_v50  ;;  %v18639_v50 = vld [vmem:[#allocation2 + $0xa7] sm:$0xff] }
 0x429   : > { %4269 = vmatprep.mubr.f32.mxu1 %v18623_v43  ;;  %13674 = vmatpush3.msra.mxu0 %v18403_v3  ;;  %v5486_v3 = vld [vmem:[%s16997_s19 + $0x199] sm:$0xff] }
 0x42b   : > { %13629 = vmatmul.mubr.msk.f32.gmra.mrb[34].mxu0 %vm5527_vm1, %v17887_v62  ;;  %v18644_v62 = vld [vmem:[#allocation2 + $0xb0] sm:$0xff] }
 0x42c   : > { %4270 = vmatmul.mubr.f32.gmra.mrb[18].mxu1 %v18629_v22  ;;  %13631 = vmatprep.mubr.msk.f32.mxu0 %vm5527_vm1, %v17895_v54  ;;  %v18649_v54 = vld [vmem:[#allocation2 + $0xaf] sm:$0xff] }
 0x42d   : > { %4275 = vmatprep.mubr.f32.mxu1 %v18634_v23 }
 0x42f   : > { %13632 = vmatmul.mubr.msk.f32.gmra.mrb[36].mxu0 %vm5527_vm1, %v17902_v34  ;;  %v18654_v34 = vld [vmem:[#allocation2 + $0xc8] sm:$0xff] }
 0x430   : > { %4276 = vmatmul.mubr.f32.gmra.mrb[20].mxu1 %v18639_v50  ;;  %13634 = vmatprep.mubr.msk.f32.mxu0 %vm5527_vm1, %v17910_v29  ;;  %v18659_v29 = vld [vmem:[#allocation2 + $0xc7] sm:$0xff] }
 0x431   : > { %4281 = vmatprep.mubr.f32.mxu1 %v18644_v62 }
 0x433   : > { %13635 = vmatmul.mubr.msk.f32.gmra.mrb[38].mxu0 %vm5527_vm1, %v17917_v53  ;;  %v18664_v53 = vld [vmem:[#allocation2 + $0xd0] sm:$0xff] }
 0x434   : > { %4282 = vmatmul.mubr.f32.gmra.mrb[22].mxu1 %v18649_v54  ;;  %13637 = vmatprep.mubr.msk.f32.mxu0 %vm5527_vm1, %v17925_v25  ;;  %v18669_v25 = vld [vmem:[#allocation2 + $0xcf] sm:$0xff] }
 0x435   : > { %4287 = vmatprep.mubr.f32.mxu1 %v18654_v34 }
 0x437   : > { %13638 = vmatmul.mubr.msk.f32.gmra.mrb[40].mxu0 %vm5527_vm1, %v17932_v1  ;;  %v18674_v1 = vld [vmem:[#allocation2 + $0xe8] sm:$0xff] }
 0x438   : > { %4288 = vmatmul.mubr.f32.gmra.mrb[24].mxu1 %v18659_v29  ;;  %13640 = vmatprep.mubr.msk.f32.mxu0 %vm5527_vm1, %v17937_v32  ;;  %v18679_v32 = vld [vmem:[#allocation2 + $0xe7] sm:$0xff] }
 0x439   : > { %4293 = vmatprep.mubr.f32.mxu1 %v18664_v53 }
 0x43b   : > { %13641 = vmatmul.mubr.msk.f32.gmra.mrb[42].mxu0 %vm5527_vm1, %v17944_v26  ;;  %v18684_v26 = vld [vmem:[#allocation2 + $0xf0] sm:$0xff] }
 0x43c   : > { %4294 = vmatmul.mubr.f32.gmra.mrb[26].mxu1 %v18669_v25  ;;  %13643 = vmatprep.mubr.msk.f32.mxu0 %vm5527_vm1, %v17949_v59  ;;  %v18689_v59 = vld [vmem:[#allocation2 + $0xef] sm:$0xff] }
 0x43d   : > { %4299 = vmatprep.mubr.f32.mxu1 %v18674_v1 }
 0x43f   : > { %13644 = vmatmul.mubr.msk.f32.gmra.mrb[44].mxu0 %vm5527_vm1, %v17962_v61  ;;  %v18694_v61 = vld [vmem:[#allocation2 + $0x108] sm:$0xff] }
 0x440   : > { %4300 = vmatmul.mubr.f32.gmra.mrb[28].mxu1 %v18679_v32  ;;  %13646 = vmatprep.mubr.msk.f32.mxu0 %vm5527_vm1, %v17976_v9  ;;  %v18699_v9 = vld [vmem:[#allocation2 + $0x107] sm:$0xff] }
 0x441   : > { %4305 = vmatprep.mubr.f32.mxu1 %v18684_v26 }
 0x443   : > { %13647 = vmatmul.mubr.msk.f32.gmra.mrb[46].mxu0 %vm5527_vm1, %v17990_v35  ;;  %v18704_v35 = vld [vmem:[#allocation2 + $0x110] sm:$0xff] }
 0x444   : > { %4306 = vmatmul.mubr.f32.gmra.mrb[30].mxu1 %v18689_v59  ;;  %13649 = vmatprep.mubr.msk.f32.mxu0 %vm5527_vm1, %v18001_v47  ;;  %v18709_v47 = vld [vmem:[#allocation2 + $0x10f] sm:$0xff] }
 0x445   : > { %4311 = vmatprep.mubr.f32.mxu1 %v18694_v61 }
 0x447   : > { %13650 = vmatmul.mubr.msk.f32.gmra.mrb[48].mxu0 %vm5527_vm1, %v18013_v37  ;;  %v18714_v37 = vld [vmem:[#allocation2 + $0x128] sm:$0xff] }
 0x448   : > { %4312 = vmatmul.mubr.f32.gmra.mrb[32].mxu1 %v18699_v9  ;;  %13652 = vmatprep.mubr.msk.f32.mxu0 %vm5527_vm1, %v18024_v12  ;;  %v18719_v12 = vld [vmem:[#allocation2 + $0x127] sm:$0xff] }
 0x449   : > { %4317 = vmatprep.mubr.f32.mxu1 %v18704_v35 }
 0x44b   : > { %13653 = vmatmul.mubr.msk.f32.gmra.mrb[50].mxu0 %vm5527_vm1, %v18036_v49  ;;  %v18724_v49 = vld [vmem:[#allocation2 + $0x130] sm:$0xff] }
 0x44c   : > { %4318 = vmatmul.mubr.f32.gmra.mrb[34].mxu1 %v18709_v47  ;;  %13655 = vmatprep.mubr.msk.f32.mxu0 %vm5527_vm1, %v18047_v46  ;;  %v18729_v46 = vld [vmem:[#allocation2 + $0x12f] sm:$0xff] }
 0x44d   : > { %4323 = vmatprep.mubr.f32.mxu1 %v18714_v37 }
 0x44f   : > { %13656 = vmatmul.mubr.msk.f32.gmra.mrb[52].mxu0 %vm5527_vm1, %v18059_v56  ;;  %v18734_v56 = vld [vmem:[#allocation2 + $0x148] sm:$0xff] }
 0x450   : > { %4324 = vmatmul.mubr.f32.gmra.mrb[36].mxu1 %v18719_v12  ;;  %13658 = vmatprep.mubr.msk.f32.mxu0 %vm5527_vm1, %v18070_v42  ;;  %v18739_v42 = vld [vmem:[#allocation2 + $0x147] sm:$0xff] }
 0x451   : > { %4329 = vmatprep.mubr.f32.mxu1 %v18724_v49 }
 0x453   : > { %13659 = vmatmul.mubr.msk.f32.gmra.mrb[54].mxu0 %vm5527_vm1, %v18082_v11  ;;  %v18744_v11 = vld [vmem:[#allocation2 + $0x150] sm:$0xff] }
 0x454   : > { %4330 = vmatmul.mubr.f32.gmra.mrb[38].mxu1 %v18729_v46  ;;  %13661 = vmatprep.mubr.msk.f32.mxu0 %vm5527_vm1, %v18093_v2  ;;  %v18749_v2 = vld [vmem:[#allocation2 + $0x14f] sm:$0xff] }
 0x455   : > { %4335 = vmatprep.mubr.f32.mxu1 %v18734_v56 }
 0x457   : > { %13662 = vmatmul.mubr.msk.f32.gmra.mrb[56].mxu0 %vm5527_vm1, %v18105_v44  ;;  %v18754_v44 = vld [vmem:[#allocation2 + $0x168] sm:$0xff] }
 0x458   : > { %4336 = vmatmul.mubr.f32.gmra.mrb[40].mxu1 %v18739_v42  ;;  %13664 = vmatprep.mubr.msk.f32.mxu0 %vm5527_vm1, %v18116_v48  ;;  %v18760_v48 = vld [vmem:[#allocation2 + $0x167] sm:$0xff] }
 0x459   : > { %4341 = vmatprep.mubr.f32.mxu1 %v18744_v11 }
 0x45b   : > { %13665 = vmatmul.mubr.msk.f32.gmra.mrb[58].mxu0 %vm5527_vm1, %v18131_v19  ;;  %v5487_v19 = vld [vmem:[%s16997_s19 + $0x1a1] sm:$0xff] }
 0x45c   : > { %4342 = vmatmul.mubr.f32.gmra.mrb[42].mxu1 %v18749_v2  ;;  %13667 = vmatprep.mubr.msk.f32.mxu0 %vm5527_vm1, %v18122_v36  ;;  %v18769_v36 = vld [vmem:[#allocation2 + $0x16f] sm:$0xff] }
 0x45d   : > { %4347 = vmatprep.mubr.f32.mxu1 %v18754_v44 }
 0x45f   : > { %13668 = vmatmul.mubr.msk.f32.gmra.mrb[60].mxu0 %vm5527_vm1, %v18144_v63  ;;  %v18774_v63 = vld [vmem:[#allocation2 + $0x188] sm:$0xff] }
 0x460   : > { %4348 = vmatmul.mubr.f32.gmra.mrb[44].mxu1 %v18760_v48  ;;  %13670 = vmatprep.mubr.msk.f32.mxu0 %vm5527_vm1, %v5486_v3  ;;  %v11547_v3 = vld [vmem:[%s22475_s6 + $0x630] sm:$0xff] }
 0x461   : > { %4353 = vmatprep.mubr.f32.mxu1 %v18765_v33 }
 0x463   : > { %13671 = vmatmul.mubr.msk.f32.gmra.mrb[62].mxu0 %vm5527_vm1, %v5487_v19  ;;  %v22849_v19 = vld [vmem:[#allocation13_spill] sm:$0xff] }
 0x464   : > { %4354 = vmatmul.mubr.f32.gmra.mrb[46].mxu1 %v18769_v36  ;;  %13675 = vmatprep.mubr.msk.f32.mxu0 %vm5527_vm1, %v18179_v14  ;;  %v18789_v14 = vld [vmem:[#allocation2 + $0x18f] sm:$0xff] }
 0x465   : > { %4359 = vmatprep.mubr.f32.mxu1 %v18774_v63 }
 0x467   : > { %13676 = vmatmul.mubr.msk.f32.vlgmr.msra.gmra.mrb[32].mxu0 %vm5527_vm1, %v18197_v27  ;;  %v18794_v27 = vld [vmem:[#allocation2 + $0x1a8] sm:$0xff] }
 0x468   : > { %4360 = vmatmul.mubr.f32.gmra.mrb[48].mxu1 %v18779_v6  ;;  %13678 = vmatprep.mubr.msk.f32.mxu0 %vm5527_vm1, %v18209_v21  ;;  %v15598_v21 = vld [vmem:[#allocation2 + $0x1a7] sm:$0xff] }
 0x469   : > { %4365 = vmatprep.mubr.f32.mxu1 %v18784_v30 }
 0x46b   : > { %13679 = vmatmul.mubr.msk.f32.gmra.mrb[34].mxu0 %vm5527_vm1, %v18221_v0  ;;  %v15599_v0 = vld [vmem:[#allocation2 + $0x1b0] sm:$0xff] }
 0x46c   : > { %4366 = vmatmul.mubr.f32.gmra.mrb[50].mxu1 %v18789_v14  ;;  %13681 = vmatprep.mubr.msk.f32.mxu0 %vm5527_vm1, %v18232_v4  ;;  %v15601_v4 = vld [vmem:[#allocation2 + $0x1c8] sm:$0xff] }
 0x46d   : > { %4371 = vmatprep.mubr.f32.mxu1 %v18794_v27 }
 0x46f   : > { %13682 = vmatmul.mubr.msk.f32.gmra.mrb[36].mxu0 %vm5527_vm1, %v18244_v20  ;;  %v15602_v20 = vld [vmem:[#allocation2 + $0x1d0] sm:$0xff] }
 0x470   : > { %4372 = vmatmul.mubr.f32.gmra.mrb[52].mxu1 %v15598_v21  ;;  %13684 = vmatprep.mubr.msk.f32.mxu0 %vm5527_vm1, %v18255_v55  ;;  %v15603_v55 = vld [vmem:[#allocation2 + $0x1e8] sm:$0xff] }
 0x471   : > { %4377 = vmatprep.mubr.f32.mxu1 %v15599_v0  ;;  %v11550_v21 = vld [vmem:[%s22475_s6 + $0x648] sm:$0xff]  ;;  %v11552_v0 = vld [vmem:[%s22475_s6 + $0x658] sm:$0xff] }
 0x473   : > { %13685 = vmatmul.mubr.msk.f32.gmra.mrb[38].mxu0 %vm5527_vm1, %v18267_v7  ;;  %v22845_v7 = vld [vmem:[#allocation38_spill] sm:$0xff] }
 0x474   : > { %4378 = vmatmul.mubr.f32.gmra.mrb[54].mxu1 %v15600_v15  ;;  %13687 = vmatprep.mubr.msk.f32.mxu0 %vm5527_vm1, %v18278_v40  ;;  %v11541_v40 = vld [vmem:[%s22475_s6 + $0x600] sm:$0xff]  ;;  %v22850_v15 = vld [vmem:[#allocation14_spill] sm:$0xff] }
 0x475   : > { %4383 = vmatprep.mubr.f32.mxu1 %v15601_v4  ;;  %v3409_v4 = vld [vmem:[#allocation2 + $0x11] sm:$0xff] }
 0x477   : > { %13688 = vmatmul.mubr.msk.f32.gmra.mrb[40].mxu0 %vm5527_vm1, %v18290_v58  ;;  %v22846_v58 = vld [vmem:[#allocation11_spill] sm:$0xff] }
 0x478   : > { %4384 = vmatmul.mubr.f32.gmra.mrb[56].mxu1 %v17891_v31  ;;  %13690 = vmatprep.mubr.msk.f32.mxu0 %vm5527_vm1, %v18301_v10  ;;  %v15604_v31 = vld [vmem:[#allocation2 + $0x1f0] sm:$0xff]  ;;  %v11546_v10 = vld [vmem:[%s22475_s6 + $0x628] sm:$0xff] }
 0x479   : > { %4389 = vmatprep.mubr.f32.mxu1 %v15602_v20  ;;  %v14235_v20 = vpack.c.bf16 %v11547_v3, %v11545_v52  ;;  %v22588_v52 = vmov 0.0|0.0  }
 0x47a   : > { %14485 = vmatprep.subr.bf16.mxu0 %v22588_v52 }
 0x47b   : > { %13691 = vmatmul.mubr.msk.f32.gmra.mrb[42].mxu0 %vm5527_vm1, %v18313_v38  ;;  %v15605_v38 = vld [vmem:[#allocation2 + $0x1ef] sm:$0xff] }
 0x47c   : > { %4390 = vmatmul.mubr.f32.gmra.mrb[58].mxu1 %v17906_v60  ;;  %13693 = vmatprep.mubr.msk.f32.mxu0 %vm5527_vm1, %v18324_v18  ;;  %v11543_v60 = vld [vmem:[%s22475_s6 + $0x610] sm:$0xff]  ;;  %v22847_v18 = vld [vmem:[#allocation12_spill] sm:$0xff] }
 0x47d   : > { %4395 = vmatprep.mubr.f32.mxu1 %v15603_v55  ;;  %v14231_v16 = vpack.c.bf16 %v11543_v60, %v11541_v40  ;;  %v14237_v55 = vpack.c.bf16 %v11552_v0, %v11550_v21  ;;  %v15606_v40 = vld [vmem:[%s16997_s19 + $0x112] sm:$0xff]  ;;  %v11554_v60 = vld [vmem:[%s22475_s6 + $0x668] sm:$0xff] }
 0x47e   : > { %v11558_v21 = vld [vmem:[%s22475_s6 + $0x688] sm:$0xff]  ;;  %v11560_v0 = vld [vmem:[%s22475_s6 + $0x698] sm:$0xff] }
 0x47f   : > { %13694 = vmatmul.mubr.msk.f32.gmra.mrb[44].mxu0 %vm5527_vm1, %v18330_v5  ;;  %v22848_v5 = vld [vmem:[#allocation10_spill] sm:$0xff] }
 0x480   : > { %4396 = vmatmul.mubr.f32.gmra.mrb[60].mxu1 %v22845_v7  ;;  %13696 = vmatprep.mubr.msk.f32.mxu0 %vm5527_vm1, %v18335_v57  ;;  %v11548_v57 = vld [vmem:[%s22475_s6 + $0x638] sm:$0xff]  ;;  %v11549_v7 = vld [vmem:[%s22475_s6 + $0x640] sm:$0xff] }
 0x481   : > { %4401 = vmatprep.mubr.f32.mxu1 %v15604_v31  ;;  %v14233_v17 = vpack.c.bf16 %v11548_v57, %v11546_v10  ;;  %v11551_v31 = vld [vmem:[%s22475_s6 + $0x650] sm:$0xff]  ;;  %v15607_v10 = vld [vmem:[%s16997_s19 + $0x122] sm:$0xff] }
 0x482   : > { %v11982_v57 = vld [vmem:[%s22479_s10 + $0x300] sm:$0xff] }
 0x483   : > { %13697 = vmatmul.mubr.msk.f32.gmra.mrb[46].mxu0 %vm5527_vm1, %v22846_v58  ;;  %v11556_v58 = vld [vmem:[%s22475_s6 + $0x678] sm:$0xff] }
 0x484   : > { %4402 = vmatmul.mubr.f32.gmra.mrb[62].mxu1 %v15605_v38  ;;  %13699 = vmatprep.mubr.msk.f32.mxu0 %vm5527_vm1, %v22847_v18  ;;  %v11983_v38 = vld [vmem:[%s22479_s10 + $0x308] sm:$0xff]  ;;  %v18876_v18 = vld [vmem:[#allocation2] sm:$0xff] }
 0x485   : > { %4472 = vmatprep.mubr.f32.mxu1 %v22848_v5  ;;  %v14486_v3 = vpack.c.bf16 %v11983_v38, %v11982_v57  ;;  %v11562_v57 = vld [vmem:[%s22475_s6 + $0x6a8] sm:$0xff]  ;;  %v11564_v38 = vld [vmem:[%s22475_s6 + $0x6b8] sm:$0xff] }
 0x487   : > { %13700 = vmatmul.mubr.msk.f32.gmra.mrb[48].mxu0 %vm5527_vm1, %v22849_v19  ;;  %v15609_v19 = vld [vmem:[%s16997_s19 + $0x12a] sm:$0xff] }
 0x488   : > { %4473 = vmatmul.mubr.f32.vlgmr.msra.gmra.mrb[0].mxu1 %v3408_v28  ;;  %13702 = vmatprep.mubr.msk.f32.mxu0 %vm5527_vm1, %v22850_v15  ;;  %v14241_v28 = vpack.c.bf16 %v11556_v58, %v11554_v60  ;;  %v15610_v15 = vld [vmem:[#allocation2 + $0x29] sm:$0xff] }
 0x489   : > { %14232 = vmatpush1.bf16.msra.mxu1 %v14231_v16  ;;  %4478 = vmatprep.mubr.f32.mxu1 %v22848_v5  ;;  %v14239_v5 = vpack.c.bf16 %v11551_v31, %v11549_v7  ;;  %v11553_v16 = vld [vmem:[%s22475_s6 + $0x660] sm:$0xff]  ;;  %v14245_v31 = vpack.c.bf16 %v11560_v0, %v11558_v21  ;;  %v11559_v60 = vld [vmem:[%s22475_s6 + $0x690] sm:$0xff] }
 0x48a   : > { %14234 = vmatprep.subr.bf16.mxu1 %v14233_v17  ;;  %v11555_v17 = vld [vmem:[%s22475_s6 + $0x670] sm:$0xff]  ;;  %14487 = vmatpush1.bf16.msra.mxu0 %v14486_v3  ;;  %v11561_v21 = vld [vmem:[%s22475_s6 + $0x6a0] sm:$0xff] }
 0x48b   : > { %13703 = vmatmul.mubr.msk.f32.gmra.mrb[50].mxu0 %vm5527_vm1, %v15606_v40  ;;  %v14243_v7 = vpack.c.bf16 %v11555_v17, %v11553_v16  ;;  %v11557_v40 = vld [vmem:[%s22475_s6 + $0x680] sm:$0xff]  ;;  %14488 = vmatprep.subr.bf16.mxu0 %v22588_v52  ;;  %v11987_v17 = vld [vmem:[%s22479_s10 + $0x328] sm:$0xff]  ;;  %v11563_v0 = vld [vmem:[%s22475_s6 + $0x6b0] sm:$0xff] }
 0x48c   : > { %4479 = vmatmul.mubr.f32.gmra.mrb[2].mxu1 %v3409_v4  ;;  %13705 = vmatprep.mubr.msk.f32.mxu0 %vm5527_vm1, %v15607_v10  ;;  %v15611_v4 = vld [vmem:[%s16997_s19 + $0x13a] sm:$0xff]  ;;  %v15612_v10 = vld [vmem:[%s16997_s19 + $0x142] sm:$0xff]  ;;  %v14247_v3 = vpack.c.bf16 %v11559_v60, %v11557_v40  ;;  %v11988_v40 = vld [vmem:[%s22479_s10 + $0x330] sm:$0xff]  ;;  %v14251_v60 = vpack.c.bf16 %v11563_v0, %v11561_v21 }
 0x48d   : > { %4484 = vmatprep.mubr.f32.mxu1 %v18876_v18  ;;  %14236 = vmatpush1.bf16.msra.mxu1 %v14235_v20  ;;  %v11984_v20 = vld [vmem:[%s22479_s10 + $0x310] sm:$0xff]  ;;  %v11986_v16 = vld [vmem:[%s22479_s10 + $0x320] sm:$0xff]  ;;  %v11991_v0 = vld [vmem:[%s22479_s10 + $0x348] sm:$0xff] }
 0x48e   : > { %14238 = vmatprep.subr.bf16.mxu1 %v14237_v55  ;;  %v11985_v55 = vld [vmem:[%s22479_s10 + $0x318] sm:$0xff]  ;;  %v11990_v21 = vld [vmem:[%s22479_s10 + $0x340] sm:$0xff] }
 0x48f   : > { %13706 = vmatmul.mubr.msk.f32.gmra.mrb[52].mxu0 %vm5527_vm1, %v15609_v19  ;;  %v14489_v58 = vpack.c.bf16 %v11985_v55, %v11984_v20  ;;  %v14249_v19 = vpack.c.bf16 %v11564_v38, %v11562_v57  ;;  %v11566_v20 = vld [vmem:[%s22475_s6 + $0x6c8] sm:$0xff]  ;;  %v11568_v55 = vld [vmem:[%s22475_s6 + $0x6d8] sm:$0xff]  ;;  %v11565_v57 = vld [vmem:[%s22475_s6 + $0x6c0] sm:$0xff] }
 0x490   : > { %4485 = vmatmul.mubr.f32.gmra.mrb[4].mxu1 %v15610_v15  ;;  %13708 = vmatprep.mubr.msk.f32.mxu0 %vm5527_vm1, %v15611_v4  ;;  %v14492_v15 = vpack.c.bf16 %v11987_v17, %v11986_v16  ;;  %v15615_v4 = vld [vmem:[%s16997_s19 + $0x15a] sm:$0xff]  ;;  %v11567_v38 = vld [vmem:[%s22475_s6 + $0x6d0] sm:$0xff]  ;;  %v11570_v16 = vld [vmem:[%s22475_s6 + $0x6e8] sm:$0xff] }
 0x491   : > { %4490 = vmatprep.mubr.f32.mxu1 %v18876_v18  ;;  %14240 = vmatpush1.bf16.msra.mxu1 %v14239_v5  ;;  %v15613_v5 = vld [vmem:[#allocation2 + $0x31] sm:$0xff] }
 0x492   : > { %14242 = vmatprep.subr.bf16.mxu1 %v14241_v28  ;;  %v15614_v28 = vld [vmem:[%s16997_s19 + $0x152] sm:$0xff]  ;;  %14490 = vmatpush1.bf16.msra.mxu0 %v14489_v58 }
 0x493   : > { %13709 = vmatmul.mubr.msk.f32.gmra.mrb[54].mxu0 %vm5527_vm1, %v15612_v10  ;;  %14491 = vmatprep.subr.bf16.mxu0 %v22588_v52  ;;  %v11989_v58 = vld [vmem:[%s22479_s10 + $0x338] sm:$0xff]  ;;  %v14253_v10 = vpack.c.bf16 %v11568_v55, %v11566_v20  ;;  %v11569_v55 = vld [vmem:[%s22475_s6 + $0x6e0] sm:$0xff] }
 0x494   : > { %4491 = vmatmul.mubr.f32.gmra.mrb[6].mxu1 %v15613_v5  ;;  %13711 = vmatprep.mubr.msk.f32.mxu0 %vm5527_vm1, %v15614_v28  ;;  %v14495_v5 = vpack.c.bf16 %v11989_v58, %v11988_v40  ;;  %v15618_v28 = vld [vmem:[%s16997_s19 + $0x172] sm:$0xff]  ;;  %v14498_v40 = vpack.c.bf16 %v11991_v0, %v11990_v21 }
 0x495   : > { %4496 = vmatprep.mubr.f32.mxu1 %v18876_v18  ;;  %14244 = vmatpush1.bf16.msra.mxu1 %v14243_v7  ;;  %v18942_v7 = vld [vmem:[#allocation2 + $0x49] sm:$0xff]  ;;  %v11572_v17 = vld [vmem:[%s22475_s6 + $0x6f8] sm:$0xff] }
 0x496   : > { %14246 = vmatprep.subr.bf16.mxu1 %v14245_v31  ;;  %v15617_v31 = vld [vmem:[%s16997_s19 + $0x16a] sm:$0xff]  ;;  %14493 = vmatpush1.bf16.msra.mxu0 %v14492_v15  ;;  %v5522_v15 = vld [vmem:[%s16997_s19 + $0x19a] sm:$0xff]  ;;  %v14257_v20 = vpack.c.bf16 %v11572_v17, %v11570_v16 }
 0x497   : > { %13712 = vmatmul.mubr.msk.f32.gmra.mrb[56].mxu0 %vm5527_vm1, %v15615_v4  ;;  %14494 = vmatprep.subr.bf16.mxu0 %v22588_v52  ;;  %v14255_v4 = vpack.c.bf16 %v11567_v38, %v11565_v57  ;;  %v22852_v58 = vld [vmem:[#allocation16_spill] sm:$0xff]  ;;  %v18997_v57 = vld [vmem:[#allocation2 + $0x69] sm:$0xff] }
 0x498   : > { %4497 = vmatmul.mubr.f32.gmra.mrb[8].mxu1 %v18942_v7  ;;  %13714 = vmatprep.mubr.msk.f32.mxu0 %vm5527_vm1, %v15617_v31  ;;  %v11571_v31 = vld [vmem:[%s22475_s6 + $0x6f0] sm:$0xff]  ;;  %v5523_v38 = vld [vmem:[%s16997_s19 + $0x1a2] sm:$0xff] }
 0x499   : > { %4502 = vmatprep.mubr.f32.mxu1 %v18876_v18  ;;  %14248 = vmatpush1.bf16.msra.mxu1 %v14247_v3  ;;  %v18969_v3 = vld [vmem:[#allocation2 + $0x51] sm:$0xff]  ;;  %v14259_v16 = vpack.c.bf16 %v11571_v31, %v11569_v55  ;;  %v11994_v55 = vld [vmem:[%s22479_s10 + $0x360] sm:$0xff]  ;;  %v11995_v31 = vld [vmem:[%s22479_s10 + $0x368] sm:$0xff] }
 0x49a   : > { %14250 = vmatprep.subr.bf16.mxu1 %v14249_v19  ;;  %v22851_v19 = vld [vmem:[#allocation15_spill] sm:$0xff]  ;;  %14496 = vmatpush1.bf16.msra.mxu0 %v14495_v5 }
 0x49b   : > { %13715 = vmatmul.mubr.msk.f32.gmra.mrb[58].mxu0 %vm5527_vm1, %v15618_v28  ;;  %14497 = vmatprep.subr.bf16.mxu0 %v22588_v52  ;;  %v11992_v5 = vld [vmem:[%s22479_s10 + $0x350] sm:$0xff]  ;;  %v11993_v28 = vld [vmem:[%s22479_s10 + $0x358] sm:$0xff] }
 0x49c   : > { %4503 = vmatmul.mubr.f32.gmra.mrb[10].mxu1 %v18969_v3  ;;  %13717 = vmatprep.mubr.msk.f32.mxu0 %vm5527_vm1, %v22851_v19  ;;  %v11573_v19 = vld [vmem:[%s22475_s6 + $0x700] sm:$0xff]  ;;  %v11575_v21 = vld [vmem:[%s22475_s6 + $0x710] sm:$0xff]  ;;  %v14501_v0 = vpack.c.bf16 %v11993_v28, %v11992_v5  ;;  %v11582_v5 = vld [vmem:[%s22475_s6 + $0x748] sm:$0xff] }
 0x49d   : > { %4508 = vmatprep.mubr.f32.mxu1 %v18876_v18  ;;  %14252 = vmatpush1.bf16.msra.mxu1 %v14251_v60  ;;  %v11574_v60 = vld [vmem:[%s22475_s6 + $0x708] sm:$0xff]  ;;  %v11584_v28 = vld [vmem:[%s22475_s6 + $0x758] sm:$0xff] }
 0x49e   : > { %14254 = vmatprep.subr.bf16.mxu1 %v14253_v10  ;;  %v11576_v10 = vld [vmem:[%s22475_s6 + $0x718] sm:$0xff]  ;;  %14499 = vmatpush1.bf16.msra.mxu0 %v14498_v40  ;;  %v14263_v40 = vpack.c.bf16 %v11575_v21, %v11573_v19 }
 0x49f   : > { %13718 = vmatmul.mubr.msk.f32.gmra.mrb[60].mxu0 %vm5527_vm1, %v22852_v58  ;;  %v14261_v17 = vpack.c.bf16 %v11576_v10, %v11574_v60  ;;  %14500 = vmatprep.subr.bf16.mxu0 %v22588_v52  ;;  %v11577_v60 = vld [vmem:[%s22475_s6 + $0x720] sm:$0xff]  ;;  %v11579_v10 = vld [vmem:[%s22475_s6 + $0x730] sm:$0xff]  ;;  %v11997_v21 = vld [vmem:[%s22479_s10 + $0x378] sm:$0xff] }
 0x4a0   : > { %4509 = vmatmul.mubr.f32.gmra.mrb[12].mxu1 %v18997_v57  ;;  %13720 = vmatprep.mubr.msk.f32.mxu0 %vm5527_vm1, %v5522_v15  ;;  %v11578_v15 = vld [vmem:[%s22475_s6 + $0x728] sm:$0xff]  ;;  %v14267_v19 = vpack.c.bf16 %v11579_v10, %v11577_v60  ;;  %v11998_v60 = vld [vmem:[%s22479_s10 + $0x380] sm:$0xff] }
 0x4a1   : > { %4514 = vmatprep.mubr.f32.mxu1 %v18876_v18  ;;  %14256 = vmatpush1.bf16.msra.mxu1 %v14255_v4  ;;  %v11580_v4 = vld [vmem:[%s22475_s6 + $0x738] sm:$0xff]  ;;  %v11999_v10 = vld [vmem:[%s22479_s10 + $0x388] sm:$0xff] }
 0x4a2   : > { %14258 = vmatprep.subr.bf16.mxu1 %v14257_v20  ;;  %v19023_v20 = vld [vmem:[#allocation2 + $0x71] sm:$0xff]  ;;  %v14265_v58 = vpack.c.bf16 %v11580_v4, %v11578_v15  ;;  %14502 = vmatpush1.bf16.msra.mxu0 %v14501_v0  ;;  %v14269_v0 = vpack.c.bf16 %v11584_v28, %v11582_v5  ;;  %v11581_v15 = vld [vmem:[%s22475_s6 + $0x740] sm:$0xff] }
 0x4a3   : > { %13721 = vmatmul.mubr.msk.f32.gmra.mrb[62].mxu0 %vm5527_vm1, %v5523_v38  ;;  %v14504_v38 = vpack.c.bf16 %v11995_v31, %v11994_v55  ;;  %14503 = vmatprep.subr.bf16.mxu0 %v22588_v52  ;;  %v11583_v4 = vld [vmem:[%s22475_s6 + $0x750] sm:$0xff]  ;;  %v11586_v31 = vld [vmem:[%s22475_s6 + $0x768] sm:$0xff]  ;;  %v11585_v28 = vld [vmem:[%s22475_s6 + $0x760] sm:$0xff] }
 0x4a4   : > { %4515 = vmatmul.mubr.f32.gmra.mrb[14].mxu1 %v19023_v20 }
 0x4a5   : > { %4520 = vmatprep.mubr.f32.mxu1 %v18876_v18  ;;  %14260 = vmatpush1.bf16.msra.mxu1 %v14259_v16  ;;  %v19046_v16 = vld [vmem:[#allocation2 + $0x89] sm:$0xff] }
 0x4a6   : > { %14262 = vmatprep.subr.bf16.mxu1 %v14261_v17  ;;  %v11996_v17 = vld [vmem:[%s22479_s10 + $0x370] sm:$0xff]  ;;  %14505 = vmatpush1.bf16.msra.mxu0 %v14504_v38  ;;  %v14271_v38 = vpack.c.bf16 %v11583_v4, %v11581_v15 }
 0x4a7   : > { %v14507_v55 = vpack.c.bf16 %v11997_v21, %v11996_v17  ;;  %14506 = vmatprep.subr.bf16.mxu0 %v22588_v52  ;;  %v11587_v17 = vld [vmem:[%s22475_s6 + $0x770] sm:$0xff]  ;;  %v14510_v21 = vpack.c.bf16 %v11999_v10, %v11998_v60  ;;  %v11590_v52 = vld [vmem:[%s22475_s6 + $0x788] sm:$0xff]  ;;  %v11589_v60 = vld [vmem:[%s22475_s6 + $0x780] sm:$0xff] }
 0x4a8   : > { %4521 = vmatmul.mubr.f32.gmra.mrb[16].mxu1 %v19046_v16  ;;  %v19092_v15 = vld [vmem:[#allocation2 + $0xa9] sm:$0xff] }
 0x4a9   : > { %4526 = vmatprep.mubr.f32.mxu1 %v18876_v18  ;;  %14264 = vmatpush1.bf16.msra.mxu1 %v14263_v40  ;;  %v11588_v40 = vld [vmem:[%s22475_s6 + $0x778] sm:$0xff]  ;;  %22855 = vst [vmem:[#allocation26_spill] sm:$0xff] %v19092_v15  ;;  %v12000_v4 = vld [vmem:[%s22479_s10 + $0x390] sm:$0xff] }
 0x4aa   : > { %14266 = vmatprep.subr.bf16.mxu1 %v14265_v58  ;;  %v19069_v58 = vld [vmem:[#allocation2 + $0x91] sm:$0xff]  ;;  %v14273_v5 = vpack.c.bf16 %v11588_v40, %v11586_v31  ;;  %14508 = vmatpush1.bf16.msra.mxu0 %v14507_v55  ;;  %v14275_v31 = vpack.c.bf16 %v11587_v17, %v11585_v28  ;;  %v12003_v28 = vld [vmem:[%s22479_s10 + $0x3a8] sm:$0xff] }
 0x4ab   : > { %22853 = vst [vmem:[#allocation25_spill] sm:$0xff] %v19069_v58  ;;  %v12001_v55 = vld [vmem:[%s22479_s10 + $0x398] sm:$0xff]  ;;  %v11591_v10 = vld [vmem:[%s22475_s6 + $0x790] sm:$0xff] }
 0x4ac   : > { %4527 = vmatmul.mubr.f32.gmra.mrb[18].mxu1 %v19069_v58  ;;  %v11594_v58 = vld [vmem:[%s22475_s6 + $0x7a8] sm:$0xff]  ;;  %v14279_v17 = vpack.c.bf16 %v11591_v10, %v11589_v60  ;;  %v12005_v60 = vld [vmem:[%s22479_s10 + $0x3b8] sm:$0xff] }
 0x4ad   : > { %4532 = vmatprep.mubr.f32.mxu1 %v18876_v18  ;;  %14268 = vmatpush1.bf16.msra.mxu1 %v14267_v19  ;;  %v11592_v19 = vld [vmem:[%s22475_s6 + $0x798] sm:$0xff] }
 0x4ae   : > { %14270 = vmatprep.subr.bf16.mxu1 %v14269_v0  ;;  %v22854_v0 = vmov 0.0|0.0   ;;  %v14277_v40 = vpack.c.bf16 %v11592_v19, %v11590_v52  ;;  %v19115_v52 = vld [vmem:[#allocation2 + $0xb1] sm:$0xff]  ;;  %v11593_v19 = vld [vmem:[%s22475_s6 + $0x7a0] sm:$0xff] }
 0x4af   : > { %14509 = vmatprep.subr.bf16.mxu0 %v22854_v0  ;;  %22856 = vst [vmem:[#allocation27_spill] sm:$0xff] %v19115_v52 }
 0x4b0   : > { %4533 = vmatmul.mubr.f32.gmra.mrb[20].mxu1 %v19092_v15  ;;  %14511 = vmatpush1.bf16.msra.mxu0 %v14510_v21  ;;  %v14513_v15 = vpack.c.bf16 %v12001_v55, %v12000_v4  ;;  %v11595_v4 = vld [vmem:[%s22475_s6 + $0x7b0] sm:$0xff] }
 0x4b1   : > { %4538 = vmatprep.mubr.f32.mxu1 %v18876_v18  ;;  %14272 = vmatpush1.bf16.msra.mxu1 %v14271_v38  ;;  %v11596_v38 = vld [vmem:[%s22475_s6 + $0x7b8] sm:$0xff] }
 0x4b2   : > { %14274 = vmatprep.subr.bf16.mxu1 %v14273_v5  ;;  %14512 = vmatprep.subr.bf16.mxu0 %v22854_v0  ;;  %v12002_v5 = vld [vmem:[%s22479_s10 + $0x3a0] sm:$0xff]  ;;  %v14281_v21 = vpack.c.bf16 %v11596_v38, %v11594_v58  ;;  %v19138_v58 = vld [vmem:[#allocation2 + $0xc9] sm:$0xff] }
 0x4b3   : > { %v14516_v55 = vpack.c.bf16 %v12003_v28, %v12002_v5  ;;  %22857 = vst [vmem:[#allocation28_spill] sm:$0xff] %v19138_v58  ;;  %v11597_v38 = vld [vmem:[%s22475_s6 + $0x7c0] sm:$0xff]  ;;  %v11599_v5 = vld [vmem:[%s22475_s6 + $0x7d0] sm:$0xff] }
 0x4b4   : > { %4539 = vmatmul.mubr.f32.gmra.mrb[22].mxu1 %v19115_v52  ;;  %14514 = vmatpush1.bf16.msra.mxu0 %v14513_v15  ;;  %v11598_v52 = vld [vmem:[%s22475_s6 + $0x7c8] sm:$0xff]  ;;  %v14283_v15 = vpack.c.bf16 %v11595_v4, %v11593_v19  ;;  %v11604_v19 = vld [vmem:[%s22475_s6 + $0x7f8] sm:$0xff] }
 0x4b5   : > { %4544 = vmatprep.mubr.f32.mxu1 %v18876_v18  ;;  %14276 = vmatpush1.bf16.msra.mxu1 %v14275_v31  ;;  %v11600_v31 = vld [vmem:[%s22475_s6 + $0x7d8] sm:$0xff]  ;;  %v12007_v4 = vld [vmem:[%s22479_s10 + $0x3c8] sm:$0xff] }
 0x4b6   : > { %14278 = vmatprep.subr.bf16.mxu1 %v14277_v40  ;;  %14515 = vmatprep.subr.bf16.mxu0 %v22854_v0  ;;  %v12004_v40 = vld [vmem:[%s22479_s10 + $0x3b0] sm:$0xff]  ;;  %v14285_v10 = vpack.c.bf16 %v11600_v31, %v11598_v52 }
 0x4b7   : > { %v14519_v28 = vpack.c.bf16 %v12005_v60, %v12004_v40  ;;  %v19161_v52 = vld [vmem:[#allocation2 + $0xd1] sm:$0xff]  ;;  %v11601_v40 = vld [vmem:[%s22475_s6 + $0x7e0] sm:$0xff] }
 0x4b8   : > { %4545 = vmatmul.mubr.f32.gmra.mrb[24].mxu1 %v19138_v58  ;;  %14517 = vmatpush1.bf16.msra.mxu0 %v14516_v55  ;;  %22858 = vst [vmem:[#allocation29_spill] sm:$0xff] %v19161_v52  ;;  %v14287_v55 = vpack.c.bf16 %v11599_v5, %v11597_v38  ;;  %v11603_v60 = vld [vmem:[%s22475_s6 + $0x7f0] sm:$0xff]  ;;  %v11606_v58 = vld [vmem:[%s22475_s6 + $0x808] sm:$0xff]  ;;  %v12009_v5 = vld [vmem:[%s22479_s10 + $0x3d8] sm:$0xff] }
 0x4b9   : > { %4550 = vmatprep.mubr.f32.mxu1 %v18876_v18  ;;  %14280 = vmatpush1.bf16.msra.mxu1 %v14279_v17  ;;  %v11602_v17 = vld [vmem:[%s22475_s6 + $0x7e8] sm:$0xff]  ;;  %v12008_v38 = vld [vmem:[%s22479_s10 + $0x3d0] sm:$0xff] }
 0x4ba   : > { %14282 = vmatprep.subr.bf16.mxu1 %v14281_v21  ;;  %14518 = vmatprep.subr.bf16.mxu0 %v22854_v0  ;;  %v12006_v21 = vld [vmem:[%s22479_s10 + $0x3c0] sm:$0xff]  ;;  %v14289_v31 = vpack.c.bf16 %v11604_v19, %v11602_v17  ;;  %v14525_v19 = vpack.c.bf16 %v12009_v5, %v12008_v38  ;;  %v19230_v38 = vld [vmem:[#allocation2 + $0x149] sm:$0xff]  ;;  %v19234_v5 = vld [vmem:[#allocation2 + $0x151] sm:$0xff] }
 0x4bb   : > { %22860 = vst [vmem:[#allocation31_spill] sm:$0xff] %v19230_v38  ;;  %22861 = vst [vmem:[#allocation33_spill] sm:$0xff] %v19234_v5 }
 0x4bc   : > { %4551 = vmatmul.mubr.f32.gmra.mrb[26].mxu1 %v19161_v52  ;;  %14520 = vmatpush1.bf16.msra.mxu0 %v14519_v28  ;;  %v14522_v52 = vpack.c.bf16 %v12007_v4, %v12006_v21  ;;  %v14291_v28 = vpack.c.bf16 %v11603_v60, %v11601_v40  ;;  %v19195_v21 = vld [vmem:[#allocation2 + $0xf1] sm:$0xff]  ;;  %v12010_v4 = vld [vmem:[%s22479_s10 + $0x3e0] sm:$0xff] }
 0x4bd   : > { %4556 = vmatprep.mubr.f32.mxu1 %v18876_v18  ;;  %14284 = vmatpush1.bf16.msra.mxu1 %v14283_v15  ;;  %v11608_v15 = vld [vmem:[%s22475_s6 + $0x818] sm:$0xff] }
 0x4be   : > { %14286 = vmatprep.subr.bf16.mxu1 %v14285_v10  ;;  %14521 = vmatprep.subr.bf16.mxu0 %v22854_v0  ;;  %v19184_v10 = vld [vmem:[#allocation2 + $0xe9] sm:$0xff]  ;;  %v14293_v17 = vpack.c.bf16 %v11608_v15, %v11606_v58  ;;  %v19217_v60 = vld [vmem:[#allocation2 + $0x111] sm:$0xff] }
 0x4bf   : > { %22859 = vst [vmem:[#allocation30_spill] sm:$0xff] %v19184_v10  ;;  %v19222_v15 = vld [vmem:[#allocation2 + $0x129] sm:$0xff] }
 0x4c0   : > { %4557 = vmatmul.mubr.f32.gmra.mrb[28].mxu1 %v19184_v10  ;;  %14523 = vmatpush1.bf16.msra.mxu0 %v14522_v52  ;;  %v12011_v10 = vld [vmem:[%s22479_s10 + $0x3e8] sm:$0xff] }
 0x4c1   : > { %4562 = vmatprep.mubr.f32.mxu1 %v18876_v18  ;;  %14288 = vmatpush1.bf16.msra.mxu1 %v14287_v55  ;;  %v14528_v58 = vpack.c.bf16 %v12011_v10, %v12010_v4  ;;  %v19206_v52 = vld [vmem:[#allocation2 + $0x109] sm:$0xff]  ;;  %v19226_v10 = vld [vmem:[#allocation2 + $0x131] sm:$0xff] }
 0x4c2   : > { %14290 = vmatprep.subr.bf16.mxu1 %v14289_v31  ;;  %14524 = vmatprep.subr.bf16.mxu0 %v22854_v0  ;;  %v12012_v55 = vld [vmem:[%s22479_s10 + $0x3f0] sm:$0xff]  ;;  %v12013_v31 = vld [vmem:[%s22479_s10 + $0x3f8] sm:$0xff] }
 0x4c3   : > { %v14531_v40 = vpack.c.bf16 %v12013_v31, %v12012_v55  ;;  %v19250_v4 = vld [vmem:[#allocation2 + $0x191] sm:$0xff]  ;;  %v19262_v31 = vld [vmem:[#allocation2 + $0x1c9] sm:$0xff] }
 0x4c4   : > { %4563 = vmatmul.mubr.f32.gmra.mrb[30].mxu1 %v19195_v21  ;;  %14526 = vmatpush1.bf16.msra.mxu0 %v14525_v19  ;;  %v19246_v19 = vld [vmem:[#allocation2 + $0x189] sm:$0xff]  ;;  %22865 = vst [vmem:[#allocation40_spill] sm:$0xff] %v19250_v4  ;;  %v19258_v55 = vld [vmem:[#allocation2 + $0x1b1] sm:$0xff]  ;;  %22868 = vst [vmem:[#allocation17_spill] sm:$0xff] %v19262_v31 }
 0x4c5   : > { %4568 = vmatprep.mubr.f32.mxu1 %v18876_v18  ;;  %14292 = vmatpush1.bf16.msra.mxu1 %v14291_v28  ;;  %v19238_v28 = vld [vmem:[#allocation2 + $0x169] sm:$0xff]  ;;  %22864 = vst [vmem:[#allocation39_spill] sm:$0xff] %v19246_v19  ;;  %22867 = vst [vmem:[#allocation42_spill] sm:$0xff] %v19258_v55 }
 0x4c6   : > { %14294 = vmatprep.subr.bf16.mxu1 %v14293_v17  ;;  %14527 = vmatprep.subr.bf16.mxu0 %v22854_v0  ;;  %22862 = vst [vmem:[#allocation34_spill] sm:$0xff] %v19238_v28  ;;  %v19242_v17 = vld [vmem:[#allocation2 + $0x171] sm:$0xff] }
 0x4c7   : > { %22863 = vst [vmem:[#allocation36_spill] sm:$0xff] %v19242_v17 }
 0x4c8   : > { %4569 = vmatmul.mubr.f32.gmra.mrb[32].mxu1 %v19206_v52  ;;  %14529 = vmatpush1.bf16.msra.mxu0 %v14528_v58  ;;  %v19254_v58 = vld [vmem:[#allocation2 + $0x1a9] sm:$0xff] }
 0x4c9   : > { %4574 = vmatprep.mubr.f32.mxu1 %v18876_v18  ;;  %14530 = vmatprep.subr.bf16.mxu0 %v22854_v0  ;;  %22866 = vst [vmem:[#allocation41_spill] sm:$0xff] %v19254_v58 }
 0x4cc   : > { %4575 = vmatmul.mubr.f32.gmra.mrb[34].mxu1 %v19217_v60  ;;  %14532 = vmatpush1.bf16.msra.mxu0 %v14531_v40  ;;  %v22869_v40 = vld [vmem:[#allocation43_spill] sm:$0xff] }
 0x4cd   : > { %4580 = vmatprep.mubr.f32.mxu1 %v18876_v18  ;;  %14577 = vmatprep.subr.bf16.mxu0 %v22854_v0 }
 0x4d0   : > { %4581 = vmatmul.mubr.f32.gmra.mrb[36].mxu1 %v19222_v15 }
 0x4d1   : > { %4586 = vmatprep.mubr.f32.mxu1 %v18876_v18 }
 0x4d4   : > { %4587 = vmatmul.mubr.f32.gmra.mrb[38].mxu1 %v19226_v10 }
 0x4d5   : > { %4592 = vmatprep.mubr.f32.mxu1 %v18876_v18 }
 0x4d8   : > { %4593 = vmatmul.mubr.f32.gmra.mrb[40].mxu1 %v19230_v38  ;;  %v22872_v38 = vld [vmem:[#allocation22_spill] sm:$0xff] }
 0x4d9   : > { %4598 = vmatprep.mubr.f32.mxu1 %v18876_v18 }
 0x4dc   : > { %4599 = vmatmul.mubr.f32.gmra.mrb[42].mxu1 %v19234_v5  ;;  %v11614_v5 = vld [vmem:[%s22475_s6 + $0x848] sm:$0xff] }
 0x4dd   : > { %4604 = vmatprep.mubr.f32.mxu1 %v18876_v18 }
 0x4e0   : > { %4605 = vmatmul.mubr.f32.gmra.mrb[44].mxu1 %v19238_v28  ;;  %v11611_v28 = vld [vmem:[%s22475_s6 + $0x830] sm:$0xff] }
 0x4e1   : > { %4610 = vmatprep.mubr.f32.mxu1 %v18876_v18 }
 0x4e4   : > { %4611 = vmatmul.mubr.f32.gmra.mrb[46].mxu1 %v19242_v17  ;;  %v11609_v17 = vld [vmem:[%s22475_s6 + $0x820] sm:$0xff] }
 0x4e5   : > { %4616 = vmatprep.mubr.f32.mxu1 %v18876_v18 }
 0x4e8   : > { %4617 = vmatmul.mubr.f32.gmra.mrb[48].mxu1 %v19246_v19  ;;  %v22871_v19 = vld [vmem:[#allocation19_spill] sm:$0xff] }
 0x4e9   : > { %4622 = vmatprep.mubr.f32.mxu1 %v18876_v18 }
 0x4ec   : > { %4623 = vmatmul.mubr.f32.gmra.mrb[50].mxu1 %v19250_v4  ;;  %v22870_v4 = vld [vmem:[#allocation44_spill] sm:$0xff] }
 0x4ed   : > { %4628 = vmatprep.mubr.f32.mxu1 %v18876_v18 }
 0x4f0   : > { %4629 = vmatmul.mubr.f32.gmra.mrb[52].mxu1 %v19254_v58  ;;  %v11607_v58 = vld [vmem:[%s22475_s6 + $0x810] sm:$0xff] }
 0x4f1   : > { %4634 = vmatprep.mubr.f32.mxu1 %v18876_v18 }
 0x4f4   : > { %4635 = vmatmul.mubr.f32.gmra.mrb[54].mxu1 %v19258_v55  ;;  %v11605_v55 = vld [vmem:[%s22475_s6 + $0x800] sm:$0xff] }
 0x4f5   : > { %4640 = vmatprep.mubr.f32.mxu1 %v18876_v18 }
 0x4f8   : > { %4641 = vmatmul.mubr.f32.gmra.mrb[56].mxu1 %v19262_v31  ;;  %v11610_v31 = vld [vmem:[%s22475_s6 + $0x828] sm:$0xff] }
 0x4f9   : > { %4646 = vmatprep.mubr.f32.mxu1 %v18876_v18 }
 0x4fc   : > { %4647 = vmatmul.mubr.f32.gmra.mrb[58].mxu1 %v22869_v40  ;;  %v11612_v40 = vld [vmem:[%s22475_s6 + $0x838] sm:$0xff] }
 0x4fd   : > { %4652 = vmatprep.mubr.f32.mxu1 %v18876_v18 }
 0x500   : > { %4653 = vmatmul.mubr.f32.gmra.mrb[60].mxu1 %v22870_v4  ;;  %v14297_v4 = vpack.c.bf16 %v11612_v40, %v11610_v31  ;;  %v11615_v31 = vld [vmem:[%s22475_s6 + $0x850] sm:$0xff]  ;;  %v11618_v40 = vld [vmem:[%s22475_s6 + $0x868] sm:$0xff] }
 0x501   : > { %4658 = vmatprep.mubr.f32.mxu1 %v18876_v18  ;;  %v14295_v18 = vpack.c.bf16 %v11607_v58, %v11605_v55  ;;  %v11613_v55 = vld [vmem:[%s22475_s6 + $0x840] sm:$0xff] }
 0x504   : > { %4659 = vmatmul.mubr.f32.gmra.mrb[62].mxu1 %v22871_v19  ;;  %v11616_v19 = vld [vmem:[%s22475_s6 + $0x858] sm:$0xff] }
 0x505   : > { %4826 = vmatprep.mubr.f32.mxu1 %v18537_v8  ;;  %v14299_v8 = vpack.c.bf16 %v11611_v28, %v11609_v17  ;;  %v14301_v58 = vpack.c.bf16 %v11616_v19, %v11614_v5  ;;  %v14303_v5 = vpack.c.bf16 %v11615_v31, %v11613_v55  ;;  %v11617_v17 = vld [vmem:[%s22475_s6 + $0x860] sm:$0xff]  ;;  %v11619_v19 = vld [vmem:[%s22475_s6 + $0x870] sm:$0xff] }
 0x506   : > { %v11621_v55 = vld [vmem:[%s22475_s6 + $0x880] sm:$0xff]  ;;  %v11623_v31 = vld [vmem:[%s22475_s6 + $0x890] sm:$0xff] }
 0x508   : > { %4827 = vmatmul.mubr.f32.vlgmr.msra.gmra.mrb[0].mxu1 %v22872_v38  ;;  %v11620_v38 = vld [vmem:[%s22475_s6 + $0x878] sm:$0xff] }
 0x509   : > { %14296 = vmatpush1.bf16.msra.mxu1 %v14295_v18  ;;  %4832 = vmatprep.mubr.f32.mxu1 %v18559_v13  ;;  %v22873_v13 = vld [vmem:[#allocation23_spill] sm:$0xff]  ;;  %v14305_v28 = vpack.c.bf16 %v11620_v38, %v11618_v40  ;;  %v22874_v18 = vld [vmem:[#allocation24_spill] sm:$0xff]  ;;  %v11626_v40 = vld [vmem:[%s22475_s6 + $0x8a8] sm:$0xff]  ;;  %v14311_v38 = vpack.c.bf16 %v11623_v31, %v11621_v55 }
 0x50a   : > { %14298 = vmatprep.subr.bf16.mxu1 %v14297_v4  ;;  %v11622_v4 = vld [vmem:[%s22475_s6 + $0x888] sm:$0xff]  ;;  %v11635_v55 = vld [vmem:[%s22475_s6 + $0x8f0] sm:$0xff] }
 0x50c   : > { %4833 = vmatmul.mubr.f32.gmra.mrb[2].mxu1 %v22873_v13 }
 0x50d   : > { %4838 = vmatprep.mubr.f32.mxu1 %v18581_v39  ;;  %14300 = vmatpush1.bf16.msra.mxu1 %v14299_v8  ;;  %v11624_v39 = vld [vmem:[%s22475_s6 + $0x898] sm:$0xff]  ;;  %v14307_v8 = vpack.c.bf16 %v11619_v19, %v11617_v17  ;;  %v11630_v17 = vld [vmem:[%s22475_s6 + $0x8c8] sm:$0xff] }
 0x50e   : > { %14302 = vmatprep.subr.bf16.mxu1 %v14301_v58  ;;  %v14309_v58 = vpack.c.bf16 %v11624_v39, %v11622_v4  ;;  %v11629_v4 = vld [vmem:[%s22475_s6 + $0x8c0] sm:$0xff]  ;;  %v11631_v39 = vld [vmem:[%s22475_s6 + $0x8d0] sm:$0xff] }
 0x510   : > { %4839 = vmatmul.mubr.f32.gmra.mrb[4].mxu1 %v22874_v18  ;;  %v11634_v18 = vld [vmem:[%s22475_s6 + $0x8e8] sm:$0xff] }
 0x511   : > { %4844 = vmatprep.mubr.f32.mxu1 %v18604_v45  ;;  %14304 = vmatpush1.bf16.msra.mxu1 %v14303_v5  ;;  %v11628_v45 = vld [vmem:[%s22475_s6 + $0x8b8] sm:$0xff]  ;;  %v11625_v5 = vld [vmem:[%s22475_s6 + $0x8a0] sm:$0xff] }
 0x512   : > { %14306 = vmatprep.subr.bf16.mxu1 %v14305_v28  ;;  %v14313_v13 = vpack.c.bf16 %v11628_v45, %v11626_v40  ;;  %v11627_v28 = vld [vmem:[%s22475_s6 + $0x8b0] sm:$0xff] }
 0x514   : > { %4845 = vmatmul.mubr.f32.gmra.mrb[6].mxu1 %v18608_v24  ;;  %v14315_v24 = vpack.c.bf16 %v11627_v28, %v11625_v5 }
 0x515   : > { %4850 = vmatprep.mubr.f32.mxu1 %v18613_v51  ;;  %14308 = vmatpush1.bf16.msra.mxu1 %v14307_v8  ;;  %v11632_v51 = vld [vmem:[%s22475_s6 + $0x8d8] sm:$0xff] }
 0x516   : > { %14310 = vmatprep.subr.bf16.mxu1 %v14309_v58  ;;  %v14317_v19 = vpack.c.bf16 %v11632_v51, %v11630_v17  ;;  %v11633_v58 = vld [vmem:[%s22475_s6 + $0x8e0] sm:$0xff] }
 0x518   : > { %4851 = vmatmul.mubr.f32.gmra.mrb[8].mxu1 %v18618_v41  ;;  %v11636_v41 = vld [vmem:[%s22475_s6 + $0x8f8] sm:$0xff] }
 0x519   : > { %4856 = vmatprep.mubr.f32.mxu1 %v18623_v43  ;;  %14312 = vmatpush1.bf16.msra.mxu1 %v14311_v38  ;;  %v14319_v43 = vpack.c.bf16 %v11631_v39, %v11629_v4  ;;  %v14321_v8 = vpack.c.bf16 %v11636_v41, %v11634_v18 }
 0x51a   : > { %14314 = vmatprep.subr.bf16.mxu1 %v14313_v13 }
 0x51c   : > { %4857 = vmatmul.mubr.f32.gmra.mrb[10].mxu1 %v18629_v22  ;;  %v14323_v22 = vpack.c.bf16 %v11635_v55, %v11633_v58 }
 0x51d   : > { %4862 = vmatprep.mubr.f32.mxu1 %v18634_v23  ;;  %14316 = vmatpush1.bf16.msra.mxu1 %v14315_v24  ;;  %v19391_v23 = vld [vmem:[%s22478_s9] ss:$0 sm:$0xff] }
 0x51e   : > { %14318 = vmatprep.subr.bf16.mxu1 %v14317_v19 }
 0x520   : > { %4863 = vmatmul.mubr.f32.gmra.mrb[12].mxu1 %v18639_v50 }
 0x521   : > { %4868 = vmatprep.mubr.f32.mxu1 %v18644_v62  ;;  %14320 = vmatpush1.bf16.msra.mxu1 %v14319_v43 }
 0x522   : > { %14322 = vmatprep.subr.bf16.mxu1 %v14321_v8 }
 0x524   : > { %4869 = vmatmul.mubr.f32.gmra.mrb[14].mxu1 %v18649_v54 }
 0x525   : > { %4874 = vmatprep.mubr.f32.mxu1 %v18654_v34  ;;  %14324 = vmatpush1.bf16.msra.mxu1 %v14323_v22 }
 0x526   : > { %14325 = vmatprep.subr.bf16.mxu1 %v22854_v0 }
 0x528   : > { %4875 = vmatmul.mubr.f32.gmra.mrb[16].mxu1 %v18659_v29 }
 0x529   : > { %4880 = vmatprep.mubr.f32.mxu1 %v18664_v53 }
 0x52c   : > { %4881 = vmatmul.mubr.f32.gmra.mrb[18].mxu1 %v18669_v25 }
 0x52d   : > { %4886 = vmatprep.mubr.f32.mxu1 %v18674_v1 }
 0x530   : > { %4887 = vmatmul.mubr.f32.gmra.mrb[20].mxu1 %v18679_v32 }
 0x531   : > { %4892 = vmatprep.mubr.f32.mxu1 %v18684_v26 }
 0x534   : > { %4893 = vmatmul.mubr.f32.gmra.mrb[22].mxu1 %v18689_v59 }
 0x535   : > { %4898 = vmatprep.mubr.f32.mxu1 %v18694_v61 }
 0x538   : > { %4899 = vmatmul.mubr.f32.gmra.mrb[24].mxu1 %v18699_v9 }
 0x539   : > { %4904 = vmatprep.mubr.f32.mxu1 %v18704_v35 }
 0x53a   : > { %v13677_v50 = vpop.f32.mrb[32].mxu0 }
 0x53b   : > { %v19395_v62 = vadd.f32 %v13677_v50, %v19391_v23  ;;  %v7924_v54 = vpop.f32.mrb[33].mxu0 }
 0x53c   : > { %v19398_v34 = vadd.f32 %v19391_v23, %v7924_v54  ;;  %4905 = vmatmul.mubr.f32.gmra.mrb[26].mxu1 %v18709_v47 }
 0x53d   : > { %v22605_v29 = vmax.f32 %v19395_v62, 0.0  ;;  %4910 = vmatprep.mubr.f32.mxu1 %v18714_v37 }
 0x53e   : > { %v22606_v53 = vmax.f32 %v19398_v34, 0.0  ;;  %v13680_v25 = vpop.f32.mrb[34].mxu0 }
 0x53f   : > { %8187 = vst [vmem:[#allocation2 + $0x30] sm:$0xff] %v22605_v29  ;;  %v8125_v1 = vadd.f32 %v13680_v25, %v19391_v23  ;;  %v7934_v32 = vpop.f32.mrb[35].mxu0  ;;  %v22883_v29 = vld [vmem:[#allocation9_spill] sm:$0xff] }
 0x540   : > { %8186 = vst [vmem:[#allocation2 + $0x28] sm:$0xff] %v22606_v53  ;;  %v8124_v26 = vadd.f32 %v19391_v23, %v7934_v32  ;;  %4911 = vmatmul.mubr.f32.gmra.mrb[28].mxu1 %v18719_v12 }
 0x541   : > { %v19411_v59 = vmax.f32 %v8125_v1, 0.0  ;;  %4916 = vmatprep.mubr.f32.mxu1 %v18724_v49 }
 0x542   : > { %v19414_v61 = vmax.f32 %v8124_v26, 0.0  ;;  %v13683_v9 = vpop.f32.mrb[36].mxu0 }
 0x543   : > { %8189 = vst [vmem:[#allocation2 + $0x50] sm:$0xff] %v19411_v59  ;;  %v8127_v35 = vadd.f32 %v13683_v9, %v19391_v23  ;;  %v7944_v47 = vpop.f32.mrb[37].mxu0 }
 0x544   : > { %8188 = vst [vmem:[#allocation2 + $0x48] sm:$0xff] %v19414_v61  ;;  %v8126_v37 = vadd.f32 %v19391_v23, %v7944_v47  ;;  %4917 = vmatmul.mubr.f32.gmra.mrb[30].mxu1 %v18729_v46  ;;  %9436 = vmatprep.mubr.f32.mxu0 %v19414_v61 }
 0x545   : > { %v19422_v12 = vmax.f32 %v8127_v35, 0.0  ;;  %4922 = vmatprep.mubr.f32.mxu1 %v18734_v56 }
 0x546   : > { %v19425_v49 = vmax.f32 %v8126_v37, 0.0  ;;  %v13686_v31 = vpop.f32.mrb[38].mxu0 }
 0x547   : > { %8191 = vst [vmem:[#allocation2 + $0x70] sm:$0xff] %v19422_v12  ;;  %v8129_v40 = vadd.f32 %v13686_v31, %v19391_v23  ;;  %v7954_v45 = vpop.f32.mrb[39].mxu0 }
 0x548   : > { %8190 = vst [vmem:[#allocation2 + $0x68] sm:$0xff] %v19425_v49  ;;  %v8128_v38 = vadd.f32 %v19391_v23, %v7954_v45  ;;  %4923 = vmatmul.mubr.f32.gmra.mrb[32].mxu1 %v18739_v42 }
 0x549   : > { %v19432_v46 = vmax.f32 %v8129_v40, 0.0  ;;  %4928 = vmatprep.mubr.f32.mxu1 %v18744_v11 }
 0x54a   : > { %v19435_v13 = vmax.f32 %v8128_v38, 0.0  ;;  %v13689_v56 = vpop.f32.mrb[40].mxu0  ;;  %v15643_v38 = vld [vmem:[#allocation2 + $0x1a7] sm:$0xff] }
 0x54b   : > { %8193 = vst [vmem:[#allocation2 + $0x90] sm:$0xff] %v19432_v46  ;;  %v8131_v5 = vadd.f32 %v13689_v56, %v19391_v23  ;;  %v7964_v28 = vpop.f32.mrb[41].mxu0  ;;  %v19439_v17 = vld [vmem:[#allocation2 + $0x47] sm:$0xff]  ;;  %v19453_v39 = vld [vmem:[#allocation2 + $0x4f] sm:$0xff] }
 0x54c   : > { %8192 = vst [vmem:[#allocation2 + $0x88] sm:$0xff] %v19435_v13  ;;  %v8130_v51 = vadd.f32 %v19391_v23, %v7964_v28  ;;  %4929 = vmatmul.mubr.f32.gmra.mrb[34].mxu1 %v18749_v2  ;;  %9437 = vmatmul.mubr.f32.vlgmr.msra.gmra.mrb[64].mxu0 %v19439_v17  ;;  %v15644_v56 = vld [vmem:[#allocation2 + $0x1b0] sm:$0xff] }
 0x54d   : > { %v19445_v42 = vmax.f32 %v8131_v5, 0.0  ;;  %4934 = vmatprep.mubr.f32.mxu1 %v18754_v44  ;;  %9441 = vmatprep.mubr.f32.mxu0 %v19411_v59 }
 0x54e   : > { %v19449_v11 = vmax.f32 %v8130_v51, 0.0  ;;  %v13692_v24 = vpop.f32.mrb[42].mxu0 }
 0x54f   : > { %8195 = vst [vmem:[#allocation2 + $0xb0] sm:$0xff] %v19445_v42  ;;  %v8133_v19 = vadd.f32 %v13692_v24, %v19391_v23  ;;  %v7974_v4 = vpop.f32.mrb[43].mxu0  ;;  %v19467_v58 = vld [vmem:[#allocation2 + $0x67] sm:$0xff]  ;;  %v19481_v25 = vld [vmem:[#allocation2 + $0x6f] sm:$0xff] }
 0x550   : > { %8194 = vst [vmem:[#allocation2 + $0xa8] sm:$0xff] %v19449_v11  ;;  %v8132_v2 = vadd.f32 %v19391_v23, %v7974_v4  ;;  %4935 = vmatmul.mubr.f32.gmra.mrb[36].mxu1 %v18760_v48  ;;  %9442 = vmatmul.mubr.f32.gmra.mrb[66].mxu0 %v19453_v39 }
 0x551   : > { %v19459_v44 = vmax.f32 %v8133_v19, 0.0  ;;  %4940 = vmatprep.mubr.f32.mxu1 %v18765_v33  ;;  %9446 = vmatprep.mubr.f32.mxu0 %v19425_v49 }
 0x552   : > { %v19463_v18 = vmax.f32 %v8132_v2, 0.0  ;;  %v13695_v41 = vpop.f32.mrb[44].mxu0  ;;  %v15645_v2 = vld [vmem:[#allocation2 + $0x1af] sm:$0xff] }
 0x553   : > { %8197 = vst [vmem:[#allocation2 + $0xd0] sm:$0xff] %v19459_v44  ;;  %v8135_v43 = vadd.f32 %v13695_v41, %v19391_v23  ;;  %v7984_v8 = vpop.f32.mrb[45].mxu0  ;;  %v19495_v35 = vld [vmem:[#allocation2 + $0x87] sm:$0xff]  ;;  %v19509_v45 = vld [vmem:[#allocation2 + $0x8f] sm:$0xff] }
 0x554   : > { %8196 = vst [vmem:[#allocation2 + $0xc8] sm:$0xff] %v19463_v18  ;;  %v8134_v48 = vadd.f32 %v19391_v23, %v7984_v8  ;;  %4941 = vmatmul.mubr.f32.gmra.mrb[38].mxu1 %v18769_v36  ;;  %9447 = vmatmul.mubr.f32.gmra.mrb[68].mxu0 %v19467_v58 }
 0x555   : > { %v19473_v33 = vmax.f32 %v8135_v43, 0.0  ;;  %4946 = vmatprep.mubr.f32.mxu1 %v18774_v63  ;;  %9451 = vmatprep.mubr.f32.mxu0 %v19422_v12  ;;  %v15646_v43 = vld [vmem:[#allocation2 + $0x1c8] sm:$0xff] }
 0x556   : > { %v19477_v55 = vmax.f32 %v8134_v48, 0.0  ;;  %v13698_v22 = vpop.f32.mrb[46].mxu0 }
 0x557   : > { %8199 = vst [vmem:[#allocation2 + $0xf0] sm:$0xff] %v19473_v33  ;;  %v8137_v50 = vadd.f32 %v13698_v22, %v19391_v23  ;;  %v7994_v54 = vpop.f32.mrb[47].mxu0  ;;  %v19521_v19 = vld [vmem:[#allocation2 + $0xa7] sm:$0xff] }
 0x558   : > { %8198 = vst [vmem:[#allocation2 + $0xe8] sm:$0xff] %v19477_v55  ;;  %v8136_v36 = vadd.f32 %v19391_v23, %v7994_v54  ;;  %4947 = vmatmul.mubr.f32.gmra.mrb[40].mxu1 %v18779_v6  ;;  %9452 = vmatmul.mubr.f32.gmra.mrb[70].mxu0 %v19481_v25  ;;  %v19533_v54 = vld [vmem:[#allocation2 + $0xaf] sm:$0xff] }
 0x559   : > { %v19487_v63 = vmax.f32 %v8137_v50, 0.0  ;;  %4952 = vmatprep.mubr.f32.mxu1 %v18784_v30  ;;  %9456 = vmatprep.mubr.f32.mxu0 %v19435_v13 }
 0x55a   : > { %v19491_v1 = vmax.f32 %v8136_v36, 0.0  ;;  %v13701_v32 = vpop.f32.mrb[48].mxu0 }
 0x55b   : > { %8201 = vst [vmem:[#allocation2 + $0x110] sm:$0xff] %v19487_v63  ;;  %v8139_v26 = vadd.f32 %v13701_v32, %v19391_v23  ;;  %v8004_v9 = vpop.f32.mrb[49].mxu0  ;;  %v15647_v32 = vld [vmem:[#allocation2 + $0x1c7] sm:$0xff] }
 0x55c   : > { %8200 = vst [vmem:[#allocation2 + $0x108] sm:$0xff] %v19491_v1  ;;  %v8138_v6 = vadd.f32 %v19391_v23, %v8004_v9  ;;  %4953 = vmatmul.mubr.f32.gmra.mrb[42].mxu1 %v18789_v14  ;;  %9457 = vmatmul.mubr.f32.gmra.mrb[72].mxu0 %v19495_v35  ;;  %v15648_v9 = vld [vmem:[#allocation2 + $0x1d0] sm:$0xff] }
 0x55d   : > { %v19501_v30 = vmax.f32 %v8139_v26, 0.0  ;;  %4958 = vmatprep.mubr.f32.mxu1 %v18794_v27  ;;  %9461 = vmatprep.mubr.f32.mxu0 %v19432_v46 }
 0x55e   : > { %v19505_v47 = vmax.f32 %v8138_v6, 0.0  ;;  %v13704_v37 = vpop.f32.mrb[50].mxu0 }
 0x55f   : > { %8203 = vst [vmem:[#allocation2 + $0x130] sm:$0xff] %v19501_v30  ;;  %v8141_v31 = vadd.f32 %v13704_v37, %v19391_v23  ;;  %v8014_v40 = vpop.f32.mrb[51].mxu0 }
 0x560   : > { %22875 = vst [vmem:[#allocation18_spill] sm:$0xff] %v19505_v47  ;;  %8202 = vst [vmem:[#allocation2 + $0x128] sm:$0xff] %v19505_v47  ;;  %v8140_v14 = vadd.f32 %v19391_v23, %v8014_v40  ;;  %4959 = vmatmul.mubr.f32.gmra.mrb[44].mxu1 %v15643_v38  ;;  %9462 = vmatmul.mubr.f32.gmra.mrb[74].mxu0 %v19509_v45 }
 0x561   : > { %v19514_v27 = vmax.f32 %v8141_v31, 0.0  ;;  %4964 = vmatprep.mubr.f32.mxu1 %v15644_v56  ;;  %9466 = vmatprep.mubr.f32.mxu0 %v19449_v11  ;;  %v15649_v56 = vld [vmem:[#allocation2 + $0x1cf] sm:$0xff] }
 0x562   : > { %v19517_v5 = vmax.f32 %v8140_v14, 0.0  ;;  %v13707_v28 = vpop.f32.mrb[52].mxu0  ;;  %v19545_v14 = vld [vmem:[#allocation2 + $0xc7] sm:$0xff] }
 0x563   : > { %8205 = vst [vmem:[#allocation2 + $0x150] sm:$0xff] %v19514_v27  ;;  %v8143_v51 = vadd.f32 %v13707_v28, %v19391_v23  ;;  %v8024_v24 = vpop.f32.mrb[53].mxu0 }
 0x564   : > { %8204 = vst [vmem:[#allocation2 + $0x148] sm:$0xff] %v19517_v5  ;;  %v8142_v4 = vadd.f32 %v19391_v23, %v8024_v24  ;;  %4965 = vmatmul.mubr.f32.gmra.mrb[46].mxu1 %v15645_v2  ;;  %9467 = vmatmul.mubr.f32.gmra.mrb[76].mxu0 %v19521_v19 }
 0x565   : > { %v19526_v41 = vmax.f32 %v8143_v51, 0.0  ;;  %4970 = vmatprep.mubr.f32.mxu1 %v15646_v43  ;;  %9471 = vmatprep.mubr.f32.mxu0 %v19445_v42  ;;  %v15650_v51 = vld [vmem:[#allocation2 + $0x1e8] sm:$0xff] }
 0x566   : > { %v19529_v8 = vmax.f32 %v8142_v4, 0.0  ;;  %v13710_v48 = vpop.f32.mrb[54].mxu0 }
 0x567   : > { %22876 = vst [vmem:[#allocation32_spill] sm:$0xff] %v19526_v41  ;;  %8207 = vst [vmem:[#allocation2 + $0x170] sm:$0xff] %v19526_v41  ;;  %v8145_v22 = vadd.f32 %v13710_v48, %v19391_v23  ;;  %v8034_v50 = vpop.f32.mrb[55].mxu0  ;;  %v19557_v48 = vld [vmem:[#allocation2 + $0xcf] sm:$0xff] }
 0x568   : > { %8206 = vst [vmem:[#allocation2 + $0x168] sm:$0xff] %v19529_v8  ;;  %v8144_v36 = vadd.f32 %v19391_v23, %v8034_v50  ;;  %4971 = vmatmul.mubr.f32.gmra.mrb[48].mxu1 %v15647_v32  ;;  %9472 = vmatmul.mubr.f32.gmra.mrb[78].mxu0 %v19533_v54  ;;  %v15651_v50 = vld [vmem:[#allocation2 + $0x1e7] sm:$0xff]  ;;  %v15652_v32 = vld [vmem:[#allocation2 + $0x1f0] sm:$0xff] }
 0x569   : > { %v19538_v26 = vmax.f32 %v8145_v22, 0.0  ;;  %4976 = vmatprep.mubr.f32.mxu1 %v15648_v9  ;;  %9476 = vmatprep.mubr.f32.mxu0 %v19463_v18  ;;  %v19617_v53 = vld [vmem:[#allocation2 + $0x12f] sm:$0xff] }
 0x56a   : > { %v19541_v6 = vmax.f32 %v8144_v36, 0.0  ;;  %v13713_v37 = vpop.f32.mrb[56].mxu0 }
 0x56b   : > { %22877 = vst [vmem:[#allocation35_spill] sm:$0xff] %v19538_v26  ;;  %8209 = vst [vmem:[#allocation2 + $0x190] sm:$0xff] %v19538_v26  ;;  %v8147_v31 = vadd.f32 %v13713_v37, %v19391_v23  ;;  %v8044_v40 = vpop.f32.mrb[57].mxu0 }
 0x56c   : > { %22878 = vst [vmem:[#allocation37_spill] sm:$0xff] %v19541_v6  ;;  %8208 = vst [vmem:[#allocation2 + $0x188] sm:$0xff] %v19541_v6  ;;  %v8146_v38 = vadd.f32 %v19391_v23, %v8044_v40  ;;  %4977 = vmatmul.mubr.f32.gmra.mrb[50].mxu1 %v15649_v56  ;;  %9477 = vmatmul.mubr.f32.gmra.mrb[80].mxu0 %v19545_v14 }
 0x56d   : > { %v19550_v28 = vmax.f32 %v8147_v31, 0.0  ;;  %4982 = vmatprep.mubr.f32.mxu1 %v15650_v51  ;;  %9481 = vmatprep.mubr.f32.mxu0 %v19459_v44  ;;  %v15653_v51 = vld [vmem:[#allocation2 + $0x1ef] sm:$0xff] }
 0x56e   : > { %v19553_v24 = vmax.f32 %v8146_v38, 0.0  ;;  %v13716_v4 = vpop.f32.mrb[58].mxu0  ;;  %v19569_v38 = vld [vmem:[#allocation2 + $0xe7] sm:$0xff] }
 0x56f   : > { %22879 = vst [vmem:[#allocation38_spill] sm:$0xff] %v19550_v28  ;;  %8211 = vst [vmem:[#allocation2 + $0x1b0] sm:$0xff] %v19550_v28  ;;  %v8149_v2 = vadd.f32 %v13716_v4, %v19391_v23  ;;  %v8054_v43 = vpop.f32.mrb[59].mxu0 }
 0x570   : > { %22880 = vst [vmem:[#allocation11_spill] sm:$0xff] %v19553_v24  ;;  %8210 = vst [vmem:[#allocation2 + $0x1a8] sm:$0xff] %v19553_v24  ;;  %v8148_v22 = vadd.f32 %v19391_v23, %v8054_v43  ;;  %4983 = vmatmul.mubr.f32.gmra.mrb[52].mxu1 %v15651_v50  ;;  %9482 = vmatmul.mubr.f32.gmra.mrb[82].mxu0 %v19557_v48 }
 0x571   : > { %v19562_v36 = vmax.f32 %v8149_v2, 0.0  ;;  %4988 = vmatprep.mubr.f32.mxu1 %v15652_v32  ;;  %9486 = vmatprep.mubr.f32.mxu0 %v19477_v55  ;;  %v15654_v2 = vld [vmem:[#allocation2 + $0x208] sm:$0xff] }
 0x572   : > { %v19565_v9 = vmax.f32 %v8148_v22, 0.0  ;;  %v13719_v37 = vpop.f32.mrb[60].mxu0 }
 0x573   : > { %8213 = vst [vmem:[#allocation2 + $0x1d0] sm:$0xff] %v19562_v36  ;;  %v8151_v31 = vadd.f32 %v13719_v37, %v19391_v23  ;;  %v8064_v40 = vpop.f32.mrb[61].mxu0  ;;  %v19581_v37 = vld [vmem:[#allocation2 + $0xef] sm:$0xff] }
 0x574   : > { %22881 = vst [vmem:[#allocation12_spill] sm:$0xff] %v19565_v9  ;;  %8212 = vst [vmem:[#allocation2 + $0x1c8] sm:$0xff] %v19565_v9  ;;  %v8150_v56 = vadd.f32 %v19391_v23, %v8064_v40  ;;  %4989 = vmatmul.mubr.f32.gmra.mrb[54].mxu1 %v15653_v51  ;;  %9487 = vmatmul.mubr.f32.gmra.mrb[84].mxu0 %v19569_v38 }
 0x575   : > { %v19574_v4 = vmax.f32 %v8151_v31, 0.0  ;;  %4994 = vmatprep.mubr.f32.mxu1 %v15654_v2  ;;  %9491 = vmatprep.mubr.f32.mxu0 %v19473_v33  ;;  %v15655_v31 = vld [vmem:[#allocation2 + $0x207] sm:$0xff] }
 0x576   : > { %v19577_v43 = vmax.f32 %v8150_v56, 0.0  ;;  %v13722_v22 = vpop.f32.mrb[62].mxu0  ;;  %v15656_v56 = vld [vmem:[#allocation2 + $0x210] sm:$0xff] }
 0x577   : > { %8215 = vst [vmem:[#allocation2 + $0x1f0] sm:$0xff] %v19574_v4  ;;  %v8153_v50 = vadd.f32 %v13722_v22, %v19391_v23  ;;  %v8074_v32 = vpop.f32.mrb[63].mxu0  ;;  %v19592_v22 = vld [vmem:[#allocation2 + $0x107] sm:$0xff] }
 0x578   : > { %8214 = vst [vmem:[#allocation2 + $0x1e8] sm:$0xff] %v19577_v43  ;;  %v8152_v40 = vadd.f32 %v19391_v23, %v8074_v32  ;;  %4995 = vmatmul.mubr.f32.gmra.mrb[56].mxu1 %v15655_v31  ;;  %9492 = vmatmul.mubr.f32.gmra.mrb[86].mxu0 %v19581_v37  ;;  %v19598_v23 = vld [vmem:[#allocation2] sm:$0xff]  ;;  %v19601_v32 = vld [vmem:[#allocation2 + $0x10f] sm:$0xff] }
 0x579   : > { %v19586_v51 = vmax.f32 %v8153_v50, 0.0  ;;  %5000 = vmatprep.mubr.f32.mxu1 %v15656_v56  ;;  %9496 = vmatprep.mubr.f32.mxu0 %v19491_v1  ;;  %v3370_v50 = vld [vmem:[#allocation2 + $0x227] sm:$0xff]  ;;  %22884 = vst [vmem:[#allocation13_spill] sm:$0xff] %v19601_v32 }
 0x57a   : > { %v19589_v2 = vmax.f32 %v8152_v40, 0.0  ;;  %v3371_v40 = vld [vmem:[#allocation2 + $0x22f] sm:$0xff]  ;;  %v19612_v56 = vld [vmem:[#allocation2 + $0x127] sm:$0xff] }
 0x57b   : > { %22882 = vst [vmem:[#allocation10_spill] sm:$0xff] %v19586_v51  ;;  %8217 = vst [vmem:[#allocation2 + $0x210] sm:$0xff] %v19586_v51  ;;  %v11935_v31 = vld [vmem:[%s22479_s10 + $0x188] sm:$0xff] }
 0x57c   : > { %8216 = vst [vmem:[#allocation2 + $0x208] sm:$0xff] %v19589_v2  ;;  %5001 = vmatmul.mubr.f32.gmra.mrb[58].mxu1 %v22883_v29  ;;  %9497 = vmatmul.mubr.f32.gmra.mrb[88].mxu0 %v19592_v22  ;;  %v11934_v29 = vld [vmem:[%s22479_s10 + $0x180] sm:$0xff] }
 0x57d   : > { %9501 = vmatprep.mubr.f32.mxu0 %v19487_v63  ;;  %5006 = vmatprep.mubr.f32.mxu1 %v19598_v23 }
 0x580   : > { %5007 = vmatmul.mubr.f32.gmra.mrb[60].mxu1 %v3370_v50  ;;  %9502 = vmatmul.mubr.f32.gmra.mrb[90].mxu0 %v19601_v32  ;;  %v14326_v50 = vpack.c.bf16 %v11935_v31, %v11934_v29  ;;  %v11937_v32 = vld [vmem:[%s22479_s10 + $0x198] sm:$0xff]  ;;  %v19630_v29 = vld [vmem:[#allocation2 + $0x147] sm:$0xff] }
 0x581   : > { %9506 = vmatprep.mubr.f32.mxu0 %v19505_v47  ;;  %5012 = vmatprep.mubr.f32.mxu1 %v19598_v23  ;;  %v11936_v47 = vld [vmem:[%s22479_s10 + $0x190] sm:$0xff]  ;;  %v11938_v31 = vld [vmem:[%s22479_s10 + $0x1a0] sm:$0xff] }
 0x584   : > { %5013 = vmatmul.mubr.f32.gmra.mrb[62].mxu1 %v3371_v40  ;;  %9507 = vmatmul.mubr.f32.gmra.mrb[92].mxu0 %v19612_v56  ;;  %v14329_v40 = vpack.c.bf16 %v11937_v32, %v11936_v47  ;;  %v19642_v32 = vld [vmem:[#allocation2 + $0x14f] sm:$0xff] }
 0x585   : > { %9511 = vmatprep.mubr.f32.mxu0 %v19501_v30  ;;  %5083 = vmatprep.mubr.f32.mxu1 %v19598_v23 }
 0x588   : > { %5084 = vmatmul.mubr.f32.vlgmr.msra.gmra.mrb[0].mxu1 %v18942_v7  ;;  %9512 = vmatmul.mubr.f32.gmra.mrb[94].mxu0 %v19617_v53  ;;  %v11939_v7 = vld [vmem:[%s22479_s10 + $0x1a8] sm:$0xff] }
 0x589   : > { %14327 = vmatpush1.bf16.msra.mxu1 %v14326_v50  ;;  %9516 = vmatprep.mubr.f32.mxu0 %v19517_v5  ;;  %v14332_v47 = vpack.c.bf16 %v11939_v7, %v11938_v31  ;;  %v11940_v50 = vld [vmem:[%s22479_s10 + $0x1b0] sm:$0xff]  ;;  %v19655_v31 = vld [vmem:[#allocation2 + $0x167] sm:$0xff] }
 0x58a   : > { %5089 = vmatprep.mubr.f32.mxu1 %v19598_v23  ;;  %14328 = vmatprep.subr.bf16.mxu1 %v22854_v0  ;;  %v11942_v7 = vld [vmem:[%s22479_s10 + $0x1c0] sm:$0xff] }
 0x58c   : > { %5090 = vmatmul.mubr.f32.gmra.mrb[2].mxu1 %v18969_v3  ;;  %9517 = vmatmul.mubr.f32.gmra.mrb[96].mxu0 %v19630_v29  ;;  %v11941_v3 = vld [vmem:[%s22479_s10 + $0x1b8] sm:$0xff] }
 0x58d   : > { %9521 = vmatprep.mubr.f32.mxu0 %v19514_v27  ;;  %5095 = vmatprep.mubr.f32.mxu1 %v19598_v23 }
 0x58e   : > { %14330 = vmatpush1.bf16.msra.mxu1 %v14329_v40  ;;  %v14335_v40 = vpack.c.bf16 %v11941_v3, %v11940_v50  ;;  %v19668_v50 = vld [vmem:[#allocation2 + $0x16f] sm:$0xff] }
 0x58f   : > { %14331 = vmatprep.subr.bf16.mxu1 %v22854_v0  ;;  %v11944_v3 = vld [vmem:[%s22479_s10 + $0x1d0] sm:$0xff] }
 0x590   : > { %5096 = vmatmul.mubr.f32.gmra.mrb[4].mxu1 %v18997_v57  ;;  %9522 = vmatmul.mubr.f32.gmra.mrb[98].mxu0 %v19642_v32  ;;  %v11943_v57 = vld [vmem:[%s22479_s10 + $0x1c8] sm:$0xff] }
 0x591   : > { %9526 = vmatprep.mubr.f32.mxu0 %v19529_v8  ;;  %5101 = vmatprep.mubr.f32.mxu1 %v19598_v23 }
 0x592   : > { %14333 = vmatpush1.bf16.msra.mxu1 %v14332_v47  ;;  %v14338_v47 = vpack.c.bf16 %v11943_v57, %v11942_v7  ;;  %v19681_v7 = vld [vmem:[#allocation2 + $0x187] sm:$0xff] }
 0x593   : > { %14334 = vmatprep.subr.bf16.mxu1 %v22854_v0  ;;  %v11946_v57 = vld [vmem:[%s22479_s10 + $0x1e0] sm:$0xff] }
 0x594   : > { %5102 = vmatmul.mubr.f32.gmra.mrb[6].mxu1 %v19023_v20  ;;  %9527 = vmatmul.mubr.f32.gmra.mrb[100].mxu0 %v19655_v31  ;;  %v11945_v20 = vld [vmem:[%s22479_s10 + $0x1d8] sm:$0xff] }
 0x595   : > { %9531 = vmatprep.mubr.f32.mxu0 %v19526_v41  ;;  %5107 = vmatprep.mubr.f32.mxu1 %v19598_v23  ;;  %v22885_v41 = vld [vmem:[#allocation25_spill] sm:$0xff] }
 0x596   : > { %14336 = vmatpush1.bf16.msra.mxu1 %v14335_v40  ;;  %v14341_v40 = vpack.c.bf16 %v11945_v20, %v11944_v3  ;;  %v19694_v3 = vld [vmem:[#allocation2 + $0x18f] sm:$0xff] }
 0x597   : > { %14337 = vmatprep.subr.bf16.mxu1 %v22854_v0  ;;  %v11948_v20 = vld [vmem:[%s22479_s10 + $0x1f0] sm:$0xff] }
 0x598   : > { %5108 = vmatmul.mubr.f32.gmra.mrb[8].mxu1 %v19046_v16  ;;  %9532 = vmatmul.mubr.f32.gmra.mrb[102].mxu0 %v19668_v50  ;;  %v11947_v16 = vld [vmem:[%s22479_s10 + $0x1e8] sm:$0xff] }
 0x599   : > { %9536 = vmatprep.mubr.f32.mxu0 %v19541_v6  ;;  %5113 = vmatprep.mubr.f32.mxu1 %v19598_v23  ;;  %v22886_v6 = vld [vmem:[#allocation26_spill] sm:$0xff] }
 0x59a   : > { %14339 = vmatpush1.bf16.msra.mxu1 %v14338_v47  ;;  %v14344_v47 = vpack.c.bf16 %v11947_v16, %v11946_v57  ;;  %v19707_v57 = vld [vmem:[#allocation2 + $0x1a7] sm:$0xff] }
 0x59b   : > { %14340 = vmatprep.subr.bf16.mxu1 %v22854_v0  ;;  %v11950_v16 = vld [vmem:[%s22479_s10 + $0x200] sm:$0xff] }
 0x59c   : > { %5114 = vmatmul.mubr.f32.gmra.mrb[10].mxu1 %v22885_v41  ;;  %9537 = vmatmul.mubr.f32.gmra.mrb[104].mxu0 %v19681_v7  ;;  %v11949_v41 = vld [vmem:[%s22479_s10 + $0x1f8] sm:$0xff] }
 0x59d   : > { %9541 = vmatprep.mubr.f32.mxu0 %v19538_v26  ;;  %5119 = vmatprep.mubr.f32.mxu1 %v19598_v23  ;;  %v22887_v26 = vld [vmem:[#allocation27_spill] sm:$0xff] }
 0x59e   : > { %14342 = vmatpush1.bf16.msra.mxu1 %v14341_v40  ;;  %v14347_v40 = vpack.c.bf16 %v11949_v41, %v11948_v20  ;;  %v19720_v20 = vld [vmem:[#allocation2 + $0x1af] sm:$0xff] }
 0x59f   : > { %14343 = vmatprep.subr.bf16.mxu1 %v22854_v0  ;;  %v11952_v41 = vld [vmem:[%s22479_s10 + $0x210] sm:$0xff] }
 0x5a0   : > { %5120 = vmatmul.mubr.f32.gmra.mrb[12].mxu1 %v22886_v6  ;;  %9542 = vmatmul.mubr.f32.gmra.mrb[106].mxu0 %v19694_v3  ;;  %v11951_v6 = vld [vmem:[%s22479_s10 + $0x208] sm:$0xff] }
 0x5a1   : > { %9546 = vmatprep.mubr.f32.mxu0 %v19553_v24  ;;  %5125 = vmatprep.mubr.f32.mxu1 %v19598_v23  ;;  %v22888_v24 = vld [vmem:[#allocation28_spill] sm:$0xff] }
 0x5a2   : > { %14345 = vmatpush1.bf16.msra.mxu1 %v14344_v47  ;;  %v14350_v47 = vpack.c.bf16 %v11951_v6, %v11950_v16  ;;  %v19733_v16 = vld [vmem:[#allocation2 + $0x1c7] sm:$0xff] }
 0x5a3   : > { %14346 = vmatprep.subr.bf16.mxu1 %v22854_v0  ;;  %v11954_v6 = vld [vmem:[%s22479_s10 + $0x220] sm:$0xff] }
 0x5a4   : > { %5126 = vmatmul.mubr.f32.gmra.mrb[14].mxu1 %v22887_v26  ;;  %9547 = vmatmul.mubr.f32.gmra.mrb[108].mxu0 %v19707_v57  ;;  %v11953_v26 = vld [vmem:[%s22479_s10 + $0x218] sm:$0xff] }
 0x5a5   : > { %9551 = vmatprep.mubr.f32.mxu0 %v19550_v28  ;;  %5131 = vmatprep.mubr.f32.mxu1 %v19598_v23  ;;  %v22889_v28 = vld [vmem:[#allocation29_spill] sm:$0xff] }
 0x5a6   : > { %14348 = vmatpush1.bf16.msra.mxu1 %v14347_v40  ;;  %v14353_v40 = vpack.c.bf16 %v11953_v26, %v11952_v41  ;;  %v19746_v41 = vld [vmem:[#allocation2 + $0x1cf] sm:$0xff] }
 0x5a7   : > { %14349 = vmatprep.subr.bf16.mxu1 %v22854_v0  ;;  %v11956_v26 = vld [vmem:[%s22479_s10 + $0x230] sm:$0xff] }
 0x5a8   : > { %5132 = vmatmul.mubr.f32.gmra.mrb[16].mxu1 %v22888_v24  ;;  %9552 = vmatmul.mubr.f32.gmra.mrb[110].mxu0 %v19720_v20  ;;  %v11955_v24 = vld [vmem:[%s22479_s10 + $0x228] sm:$0xff] }
 0x5a9   : > { %9556 = vmatprep.mubr.f32.mxu0 %v19565_v9  ;;  %5137 = vmatprep.mubr.f32.mxu1 %v19598_v23  ;;  %v22890_v9 = vld [vmem:[#allocation30_spill] sm:$0xff] }
 0x5aa   : > { %14351 = vmatpush1.bf16.msra.mxu1 %v14350_v47  ;;  %v14356_v47 = vpack.c.bf16 %v11955_v24, %v11954_v6  ;;  %v19759_v6 = vld [vmem:[#allocation2 + $0x1e7] sm:$0xff] }
 0x5ab   : > { %14352 = vmatprep.subr.bf16.mxu1 %v22854_v0  ;;  %v11958_v24 = vld [vmem:[%s22479_s10 + $0x240] sm:$0xff] }
 0x5ac   : > { %5138 = vmatmul.mubr.f32.gmra.mrb[18].mxu1 %v22889_v28  ;;  %9557 = vmatmul.mubr.f32.gmra.mrb[112].mxu0 %v19733_v16  ;;  %v11957_v28 = vld [vmem:[%s22479_s10 + $0x238] sm:$0xff] }
 0x5ad   : > { %9561 = vmatprep.mubr.f32.mxu0 %v19562_v36  ;;  %5143 = vmatprep.mubr.f32.mxu1 %v19598_v23 }
 0x5ae   : > { %14354 = vmatpush1.bf16.msra.mxu1 %v14353_v40  ;;  %v14359_v40 = vpack.c.bf16 %v11957_v28, %v11956_v26  ;;  %v19772_v26 = vld [vmem:[#allocation2 + $0x1ef] sm:$0xff] }
 0x5af   : > { %14355 = vmatprep.subr.bf16.mxu1 %v22854_v0  ;;  %v11960_v28 = vld [vmem:[%s22479_s10 + $0x250] sm:$0xff] }
 0x5b0   : > { %5144 = vmatmul.mubr.f32.gmra.mrb[20].mxu1 %v22890_v9  ;;  %9562 = vmatmul.mubr.f32.gmra.mrb[114].mxu0 %v19746_v41  ;;  %v11959_v9 = vld [vmem:[%s22479_s10 + $0x248] sm:$0xff] }
 0x5b1   : > { %9566 = vmatprep.mubr.f32.mxu0 %v19577_v43  ;;  %5149 = vmatprep.mubr.f32.mxu1 %v19598_v23 }
 0x5b2   : > { %14357 = vmatpush1.bf16.msra.mxu1 %v14356_v47  ;;  %v14362_v47 = vpack.c.bf16 %v11959_v9, %v11958_v24  ;;  %v19785_v24 = vld [vmem:[#allocation2 + $0x207] sm:$0xff] }
 0x5b3   : > { %14358 = vmatprep.subr.bf16.mxu1 %v22854_v0  ;;  %22891 = vst [vmem:[#allocation14_spill] sm:$0xff] %v19785_v24  ;;  %v11962_v9 = vld [vmem:[%s22479_s10 + $0x260] sm:$0xff] }
 0x5b4   : > { %5150 = vmatmul.mubr.f32.gmra.mrb[22].mxu1 %v19195_v21  ;;  %9567 = vmatmul.mubr.f32.gmra.mrb[116].mxu0 %v19759_v6  ;;  %v11961_v21 = vld [vmem:[%s22479_s10 + $0x258] sm:$0xff] }
 0x5b5   : > { %9571 = vmatprep.mubr.f32.mxu0 %v19574_v4  ;;  %5155 = vmatprep.mubr.f32.mxu1 %v19598_v23 }
 0x5b6   : > { %14360 = vmatpush1.bf16.msra.mxu1 %v14359_v40  ;;  %v14365_v40 = vpack.c.bf16 %v11961_v21, %v11960_v28  ;;  %v19798_v28 = vld [vmem:[#allocation2 + $0x20f] sm:$0xff] }
 0x5b7   : > { %14361 = vmatprep.subr.bf16.mxu1 %v22854_v0  ;;  %22892 = vst [vmem:[#allocation15_spill] sm:$0xff] %v19798_v28  ;;  %v11964_v21 = vld [vmem:[%s22479_s10 + $0x270] sm:$0xff] }
 0x5b8   : > { %5156 = vmatmul.mubr.f32.gmra.mrb[24].mxu1 %v19206_v52  ;;  %9572 = vmatmul.mubr.f32.gmra.mrb[118].mxu0 %v19772_v26  ;;  %v11963_v52 = vld [vmem:[%s22479_s10 + $0x268] sm:$0xff] }
 0x5b9   : > { %9576 = vmatprep.mubr.f32.mxu0 %v19589_v2  ;;  %5161 = vmatprep.mubr.f32.mxu1 %v19598_v23 }
 0x5ba   : > { %14363 = vmatpush1.bf16.msra.mxu1 %v14362_v47  ;;  %v14368_v47 = vpack.c.bf16 %v11963_v52, %v11962_v9  ;;  %v11967_v9 = vld [vmem:[%s22479_s10 + $0x288] sm:$0xff] }
 0x5bb   : > { %14364 = vmatprep.subr.bf16.mxu1 %v22854_v0 }
 0x5bc   : > { %5162 = vmatmul.mubr.f32.gmra.mrb[26].mxu1 %v19217_v60  ;;  %9577 = vmatmul.mubr.f32.gmra.mrb[120].mxu0 %v19785_v24  ;;  %v11965_v60 = vld [vmem:[%s22479_s10 + $0x278] sm:$0xff]  ;;  %v22895_v24 = vld [vmem:[#allocation34_spill] sm:$0xff] }
 0x5bd   : > { %9581 = vmatprep.mubr.f32.mxu0 %v19586_v51  ;;  %5167 = vmatprep.mubr.f32.mxu1 %v19598_v23  ;;  %v14371_v52 = vpack.c.bf16 %v11965_v60, %v11964_v21  ;;  %v22898_v21 = vld [vmem:[#allocation40_spill] sm:$0xff]  ;;  %v22899_v60 = vld [vmem:[#allocation41_spill] sm:$0xff] }
 0x5be   : > { %14366 = vmatpush1.bf16.msra.mxu1 %v14365_v40  ;;  %v11966_v40 = vld [vmem:[%s22479_s10 + $0x280] sm:$0xff] }
 0x5bf   : > { %14367 = vmatprep.subr.bf16.mxu1 %v22854_v0  ;;  %v14373_v51 = vpack.c.bf16 %v11967_v9, %v11966_v40  ;;  %v22902_v40 = vld [vmem:[#allocation43_spill] sm:$0xff]  ;;  %v22903_v9 = vld [vmem:[#allocation44_spill] sm:$0xff] }
 0x5c0   : > { %5168 = vmatmul.mubr.f32.gmra.mrb[28].mxu1 %v19222_v15  ;;  %9582 = vmatmul.mubr.f32.gmra.mrb[122].mxu0 %v19798_v28  ;;  %v22893_v15 = vld [vmem:[#allocation31_spill] sm:$0xff]  ;;  %v22894_v28 = vld [vmem:[#allocation33_spill] sm:$0xff] }
 0x5c1   : > { %5173 = vmatprep.mubr.f32.mxu1 %v19598_v23  ;;  %9586 = vmatprep.mubr.f32.mxu0 %v19598_v23 }
 0x5c2   : > { %14369 = vmatpush1.bf16.msra.mxu1 %v14368_v47  ;;  %v22896_v47 = vld [vmem:[#allocation36_spill] sm:$0xff] }
 0x5c3   : > { %14370 = vmatprep.subr.bf16.mxu1 %v22854_v0 }
 0x5c4   : > { %5174 = vmatmul.mubr.f32.gmra.mrb[30].mxu1 %v19226_v10  ;;  %v22897_v10 = vld [vmem:[#allocation39_spill] sm:$0xff] }
 0x5c5   : > { %5179 = vmatprep.mubr.f32.mxu1 %v19598_v23 }
 0x5c6   : > { %14372 = vmatpush1.bf16.msra.mxu1 %v14371_v52  ;;  %v22904_v52 = vld [vmem:[#allocation19_spill] sm:$0xff] }
 0x5c7   : > { %14374 = vmatprep.subr.bf16.mxu1 %v14373_v51 }
 0x5c8   : > { %5180 = vmatmul.mubr.f32.gmra.mrb[32].mxu1 %v22893_v15  ;;  %v22905_v15 = vld [vmem:[#allocation20_spill] sm:$0xff] }
 0x5c9   : > { %5185 = vmatprep.mubr.f32.mxu1 %v19598_v23 }
 0x5cc   : > { %5186 = vmatmul.mubr.f32.gmra.mrb[34].mxu1 %v22894_v28  ;;  %v22900_v28 = vld [vmem:[#allocation42_spill] sm:$0xff] }
 0x5cd   : > { %5191 = vmatprep.mubr.f32.mxu1 %v19598_v23 }
 0x5d0   : > { %5192 = vmatmul.mubr.f32.gmra.mrb[36].mxu1 %v22895_v24  ;;  %v22901_v24 = vld [vmem:[#allocation17_spill] sm:$0xff] }
 0x5d1   : > { %5197 = vmatprep.mubr.f32.mxu1 %v19598_v23 }
 0x5d4   : > { %5198 = vmatmul.mubr.f32.gmra.mrb[38].mxu1 %v22896_v47  ;;  %v22906_v47 = vld [vmem:[#allocation21_spill] sm:$0xff] }
 0x5d5   : > { %5203 = vmatprep.mubr.f32.mxu1 %v19598_v23 }
 0x5d8   : > { %5204 = vmatmul.mubr.f32.gmra.mrb[40].mxu1 %v22897_v10  ;;  %v3442_v10 = vld [vmem:[#allocation2 + $0x229] sm:$0xff] }
 0x5d9   : > { %5209 = vmatprep.mubr.f32.mxu1 %v19598_v23 }
 0x5dc   : > { %5210 = vmatmul.mubr.f32.gmra.mrb[42].mxu1 %v22898_v21  ;;  %v3443_v21 = vld [vmem:[#allocation2 + $0x231] sm:$0xff] }
 0x5dd   : > { %5215 = vmatprep.mubr.f32.mxu1 %v19598_v23 }
 0x5e0   : > { %5216 = vmatmul.mubr.f32.gmra.mrb[44].mxu1 %v22899_v60  ;;  %v11968_v60 = vld [vmem:[%s22479_s10 + $0x290] sm:$0xff] }
 0x5e1   : > { %5221 = vmatprep.mubr.f32.mxu1 %v19598_v23 }
 0x5e4   : > { %5222 = vmatmul.mubr.f32.gmra.mrb[46].mxu1 %v22900_v28  ;;  %v11969_v28 = vld [vmem:[%s22479_s10 + $0x298] sm:$0xff] }
 0x5e5   : > { %5227 = vmatprep.mubr.f32.mxu1 %v19598_v23 }
 0x5e8   : > { %5228 = vmatmul.mubr.f32.gmra.mrb[48].mxu1 %v22901_v24  ;;  %v22907_v24 = vmax.f32 %v19398_v34, 0.0  ;;  %v11972_v34 = vld [vmem:[%s22479_s10 + $0x2b0] sm:$0xff] }
 0x5e9   : > { %5233 = vmatprep.mubr.f32.mxu1 %v19598_v23 }
 0x5ec   : > { %5234 = vmatmul.mubr.f32.gmra.mrb[50].mxu1 %v22902_v40  ;;  %v14377_v40 = vpack.c.bf16 %v11969_v28, %v11968_v60  ;;  %v11975_v60 = vld [vmem:[%s22479_s10 + $0x2c8] sm:$0xff] }
 0x5ed   : > { %5239 = vmatprep.mubr.f32.mxu1 %v19598_v23 }
 0x5f0   : > { %5240 = vmatmul.mubr.f32.gmra.mrb[52].mxu1 %v22903_v9  ;;  %v8220_v9 = vld [vmem:[#allocation2 + $0x27] sm:$0xff] }
 0x5f1   : > { %5245 = vmatprep.mubr.f32.mxu1 %v19598_v23 }
 0x5f4   : > { %5246 = vmatmul.mubr.f32.gmra.mrb[54].mxu1 %v22904_v52  ;;  %v11970_v52 = vld [vmem:[%s22479_s10 + $0x2a0] sm:$0xff] }
 0x5f5   : > { %5251 = vmatprep.mubr.f32.mxu1 %v19598_v23 }
 0x5f8   : > { %5252 = vmatmul.mubr.f32.gmra.mrb[56].mxu1 %v22905_v15  ;;  %v22908_v15 = vmax.f32 %v19395_v62, 0.0  ;;  %v11974_v62 = vld [vmem:[%s22479_s10 + $0x2c0] sm:$0xff] }
 0x5f9   : > { %5257 = vmatprep.mubr.f32.mxu1 %v19598_v23  ;;  %v14389_v28 = vpack.c.bf16 %v11975_v60, %v11974_v62 }
 0x5fc   : > { %5258 = vmatmul.mubr.f32.gmra.mrb[58].mxu1 %v22906_v47 }
 0x5fd   : > { %5263 = vmatprep.mubr.f32.mxu1 %v19598_v23 }
 0x600   : > { %5264 = vmatmul.mubr.f32.gmra.mrb[60].mxu1 %v3442_v10  ;;  %v8221_v10 = vld [vmem:[#allocation2 + $0x2f] sm:$0xff] }
 0x601   : > { %5269 = vmatprep.mubr.f32.mxu1 %v19598_v23  ;;  %v11971_v23 = vld [vmem:[%s22479_s10 + $0x2a8] sm:$0xff] }
 0x602   : > { %v14381_v47 = vpack.c.bf16 %v11971_v23, %v11970_v52 }
 0x604   : > { %5270 = vmatmul.mubr.f32.gmra.mrb[62].mxu1 %v3443_v21  ;;  %v11973_v21 = vld [vmem:[%s22479_s10 + $0x2b8] sm:$0xff] }
 0x605   : > { %8487 = vmatprep.mubr.f32.mxu1 %v22907_v24  ;;  %v11977_v24 = vld [vmem:[%s22479_s10 + $0x2d8] sm:$0xff] }
 0x608   : > { %8488 = vmatmul.mubr.f32.vlgmr.msra.gmra.mrb[64].mxu1 %v8220_v9  ;;  %v11981_v9 = vld [vmem:[%s22479_s10 + $0x2f8] sm:$0xff] }
 0x609   : > { %14376 = vmatpush3.bf16.msra.mxu1 %v14373_v51  ;;  %8492 = vmatprep.mubr.f32.mxu1 %v22908_v15  ;;  %v14385_v51 = vpack.c.bf16 %v11973_v21, %v11972_v34 }
 0x60a   : > { %14378 = vmatprep.subr.bf16.mxu1 %v14377_v40 }
 0x60c   : > { %8493 = vmatmul.mubr.f32.gmra.mrb[66].mxu1 %v8221_v10 }
 0x60d   : > { %8497 = vmatprep.mubr.f32.mxu1 %v19414_v61  ;;  %14380 = vmatpush3.bf16.msra.mxu1 %v14377_v40  ;;  %v11976_v61 = vld [vmem:[%s22479_s10 + $0x2d0] sm:$0xff]  ;;  %v11979_v40 = vld [vmem:[%s22479_s10 + $0x2e8] sm:$0xff] }
 0x60e   : > { %14382 = vmatprep.subr.bf16.mxu1 %v14381_v47 }
 0x610   : > { %8498 = vmatmul.mubr.f32.gmra.mrb[68].mxu1 %v19439_v17  ;;  %v14393_v17 = vpack.c.bf16 %v11977_v24, %v11976_v61  ;;  %v22927_v61 = vld [vmem:[#allocation32_spill] sm:$0xff] }
 0x611   : > { %8502 = vmatprep.mubr.f32.mxu1 %v19411_v59  ;;  %14384 = vmatpush3.bf16.msra.mxu1 %v14381_v47  ;;  %v11978_v59 = vld [vmem:[%s22479_s10 + $0x2e0] sm:$0xff] }
 0x612   : > { %14386 = vmatprep.subr.bf16.mxu1 %v14385_v51 }
 0x614   : > { %8503 = vmatmul.mubr.f32.gmra.mrb[70].mxu1 %v19453_v39  ;;  %v14397_v39 = vpack.c.bf16 %v11979_v40, %v11978_v59 }
 0x615   : > { %8507 = vmatprep.mubr.f32.mxu1 %v19425_v49  ;;  %14388 = vmatpush3.bf16.msra.mxu1 %v14385_v51  ;;  %v11980_v49 = vld [vmem:[%s22479_s10 + $0x2f0] sm:$0xff] }
 0x616   : > { %14390 = vmatprep.subr.bf16.mxu1 %v14389_v28 }
 0x618   : > { %8508 = vmatmul.mubr.f32.gmra.mrb[72].mxu1 %v19467_v58  ;;  %v14401_v58 = vpack.c.bf16 %v11981_v9, %v11980_v49 }
 0x619   : > { %8512 = vmatprep.mubr.f32.mxu1 %v19422_v12  ;;  %14392 = vmatpush3.bf16.msra.mxu1 %v14389_v28 }
 0x61a   : > { %14394 = vmatprep.subr.bf16.mxu1 %v14393_v17 }
 0x61c   : > { %8513 = vmatmul.mubr.f32.gmra.mrb[74].mxu1 %v19481_v25 }
 0x61d   : > { %8517 = vmatprep.mubr.f32.mxu1 %v19435_v13  ;;  %14396 = vmatpush3.bf16.msra.mxu1 %v14393_v17 }
 0x61e   : > { %14398 = vmatprep.subr.bf16.mxu1 %v14397_v39 }
 0x61f   : > { %v19904_v52 = vpop.f32.mrb[64].mxu0 }
 0x620   : > { %22909 = vst [vmem:[#allocation16_spill] sm:$0xff] %v19904_v52  ;;  %8518 = vmatmul.mubr.f32.gmra.mrb[76].mxu1 %v19495_v35  ;;  %v9440_v12 = vpop.f32.mrb[65].mxu0 }
 0x621   : > { %8522 = vmatprep.mubr.f32.mxu1 %v19432_v46  ;;  %14400 = vmatpush3.bf16.msra.mxu1 %v14397_v39  ;;  %v22931_v39 = vld [vmem:[#allocation37_spill] sm:$0xff] }
 0x622   : > { %14402 = vmatprep.subr.bf16.mxu1 %v14401_v58 }
 0x623   : > { %v19908_v23 = vpop.f32.mrb[66].mxu0 }
 0x624   : > { %22910 = vst [vmem:[#allocation22_spill] sm:$0xff] %v19908_v23  ;;  %8523 = vmatmul.mubr.f32.gmra.mrb[78].mxu1 %v19509_v45  ;;  %v9445_v15 = vpop.f32.mrb[67].mxu0 }
 0x625   : > { %8527 = vmatprep.mubr.f32.mxu1 %v19449_v11  ;;  %14404 = vmatpush3.bf16.msra.mxu1 %v14401_v58  ;;  %v22933_v15 = vld [vmem:[#allocation35_spill] sm:$0xff] }
 0x626   : > { %14405 = vmatprep.subr.bf16.mxu1 %v22854_v0 }
 0x627   : > { %v19913_v13 = vpop.f32.mrb[68].mxu0 }
 0x628   : > { %22911 = vst [vmem:[#allocation23_spill] sm:$0xff] %v19913_v13  ;;  %8528 = vmatmul.mubr.f32.gmra.mrb[80].mxu1 %v19521_v19  ;;  %v9450_v25 = vpop.f32.mrb[69].mxu0 }
 0x629   : > { %8532 = vmatprep.mubr.f32.mxu1 %v19445_v42 }
 0x62b   : > { %v19917_v46 = vpop.f32.mrb[70].mxu0 }
 0x62c   : > { %22912 = vst [vmem:[#allocation24_spill] sm:$0xff] %v19917_v46  ;;  %8533 = vmatmul.mubr.f32.gmra.mrb[82].mxu1 %v19533_v54  ;;  %v9455_v35 = vpop.f32.mrb[71].mxu0 }
 0x62d   : > { %8537 = vmatprep.mubr.f32.mxu1 %v19463_v18 }
 0x62f   : > { %v19921_v45 = vpop.f32.mrb[72].mxu0 }
 0x630   : > { %22913 = vst [vmem:[#allocation9_spill] sm:$0xff] %v19921_v45  ;;  %8538 = vmatmul.mubr.f32.gmra.mrb[84].mxu1 %v19545_v14  ;;  %v9460_v11 = vpop.f32.mrb[73].mxu0 }
 0x631   : > { %8542 = vmatprep.mubr.f32.mxu1 %v19459_v44 }
 0x633   : > { %v19925_v47 = vpop.f32.mrb[74].mxu0 }
 0x634   : > { %22914 = vst [vmem:[#allocation25_spill] sm:$0xff] %v19925_v47  ;;  %8543 = vmatmul.mubr.f32.gmra.mrb[86].mxu1 %v19557_v48  ;;  %v9465_v19 = vpop.f32.mrb[75].mxu0 }
 0x635   : > { %8547 = vmatprep.mubr.f32.mxu1 %v19477_v55 }
 0x637   : > { %v19929_v42 = vpop.f32.mrb[76].mxu0 }
 0x638   : > { %22915 = vst [vmem:[#allocation26_spill] sm:$0xff] %v19929_v42  ;;  %8548 = vmatmul.mubr.f32.gmra.mrb[88].mxu1 %v19569_v38  ;;  %v9470_v54 = vpop.f32.mrb[77].mxu0  ;;  %v22919_v38 = vld [vmem:[#allocation13_spill] sm:$0xff] }
 0x639   : > { %8552 = vmatprep.mubr.f32.mxu1 %v19473_v33  ;;  %v22920_v33 = vld [vmem:[#allocation18_spill] sm:$0xff] }
 0x63b   : > { %v19933_v18 = vpop.f32.mrb[78].mxu0 }
 0x63c   : > { %22916 = vst [vmem:[#allocation27_spill] sm:$0xff] %v19933_v18  ;;  %8553 = vmatmul.mubr.f32.gmra.mrb[90].mxu1 %v19581_v37  ;;  %v9475_v14 = vpop.f32.mrb[79].mxu0 }
 0x63d   : > { %8557 = vmatprep.mubr.f32.mxu1 %v19491_v1 }
 0x63f   : > { %v19937_v44 = vpop.f32.mrb[80].mxu0 }
 0x640   : > { %22917 = vst [vmem:[#allocation28_spill] sm:$0xff] %v19937_v44  ;;  %8558 = vmatmul.mubr.f32.gmra.mrb[92].mxu1 %v19592_v22  ;;  %v9480_v48 = vpop.f32.mrb[81].mxu0  ;;  %v20590_v44 = vld [vmem:[%s20540_s23 + $0x38] sm:$0xff] }
 0x641   : > { %8562 = vmatprep.mubr.f32.mxu1 %v19487_v63  ;;  %v5342_v63 = vlaneseq }
 0x643   : > { %v19941_v55 = vpop.f32.mrb[82].mxu0  ;;  %v5343_v62 = vshrl.u32 %v5342_v63, 7 }
 0x644   : > { %22918 = vst [vmem:[#allocation29_spill] sm:$0xff] %v19941_v55  ;;  %8563 = vmatmul.mubr.f32.gmra.mrb[94].mxu1 %v22919_v38  ;;  %v9485_v10 = vpop.f32.mrb[83].mxu0  ;;  %v22938_v38 = vld [vmem:[#allocation11_spill] sm:$0xff]  ;;  %v20604_v55 = vld [vmem:[%s20540_s23 + $0x48] sm:$0xff] }
 0x645   : > { %8567 = vmatprep.mubr.f32.mxu1 %v22920_v33  ;;  %v19960_v60 = vsub.s32 0, %v5343_v62 }
 0x647   : > { %v19945_v34 = vpop.f32.mrb[84].mxu0  ;;  %22925 = vst [vmem:[#allocation36_spill] sm:$0xff] %v19960_v60 }
 0x648   : > { %22921 = vst [vmem:[#allocation30_spill] sm:$0xff] %v19945_v34  ;;  %8568 = vmatmul.mubr.f32.gmra.mrb[96].mxu1 %v19612_v56  ;;  %v9490_v37 = vpop.f32.mrb[85].mxu0 }
 0x649   : > { %8572 = vmatprep.mubr.f32.mxu1 %v19501_v30 }
 0x64b   : > { %v19949_v1 = vpop.f32.mrb[86].mxu0 }
 0x64c   : > { %22922 = vst [vmem:[#allocation31_spill] sm:$0xff] %v19949_v1  ;;  %8573 = vmatmul.mubr.f32.gmra.mrb[98].mxu1 %v19617_v53  ;;  %v9495_v22 = vpop.f32.mrb[87].mxu0  ;;  %v5340_v53 = vld [vmem:[%s22476_s7] sm:$0x3] }
 0x64d   : > { %8577 = vmatprep.mubr.f32.mxu1 %v19517_v5  ;;  %v5348_v5 = vsub.s32 1, %v5343_v62 }
 0x64f   : > { %v19953_v21 = vpop.f32.mrb[88].mxu0 }
 0x650   : > { %22923 = vst [vmem:[#allocation33_spill] sm:$0xff] %v19953_v21  ;;  %8578 = vmatmul.mubr.f32.gmra.mrb[100].mxu1 %v19630_v29  ;;  %v9500_v51 = vpop.f32.mrb[89].mxu0 }
 0x651   : > { %8582 = vmatprep.mubr.f32.mxu1 %v19514_v27  ;;  %v19970_v27 = vrot.slane %v5340_v53, %v19960_v60  ;;  %v22941_v51 = vld [vmem:[#allocation38_spill] sm:$0xff]  ;;  %v8330_v60 = vld [vmem:[%s22479_s10 + $0x20] sm:$0xff] }
 0x653   : > { %v19957_v56 = vpop.f32.mrb[90].mxu0 }
 0x654   : > { %22924 = vst [vmem:[#allocation34_spill] sm:$0xff] %v19957_v56  ;;  %8583 = vmatmul.mubr.f32.gmra.mrb[102].mxu1 %v19642_v32  ;;  %v9505_v30 = vpop.f32.mrb[91].mxu0  ;;  %v19973_v32 = vrot.slane %v5340_v53, %v5348_v5 }
 0x655   : > { %8587 = vmatprep.mubr.f32.mxu1 %v19529_v8 }
 0x657   : > { %v19966_v28 = vpop.f32.mrb[92].mxu0 }
 0x658   : > { %22926 = vst [vmem:[#allocation39_spill] sm:$0xff] %v19966_v28  ;;  %8588 = vmatmul.mubr.f32.gmra.mrb[104].mxu1 %v19655_v31  ;;  %v9510_v29 = vpop.f32.mrb[93].mxu0 }
 0x659   : > { %8592 = vmatprep.mubr.f32.mxu1 %v22927_v61 }
 0x65b   : > { %v5085_v24 = vpop.f32.mrb[0].mxu1  ;;  %v19975_v17 = vpop.f32.mrb[94].mxu0 }
 0x65c   : > { %22928 = vst [vmem:[#allocation40_spill] sm:$0xff] %v19975_v17  ;;  %v5087_v8 = vpop.f32.mrb[1].mxu1  ;;  %8593 = vmatmul.mubr.f32.gmra.mrb[106].mxu1 %v19668_v50  ;;  %v9515_v59 = vpop.f32.mrb[95].mxu0  ;;  %v19979_v40 = vadd.f32 %v19970_v27, %v5085_v24 }
 0x65d   : > { %v19982_v31 = vadd.f32 %v19973_v32, %v5087_v8  ;;  %8597 = vmatprep.mubr.f32.mxu1 %v22931_v39  ;;  %v22947_v8 = vld [vmem:[#allocation12_spill] sm:$0xff] }
 0x65e   : > { %22929 = vst [vmem:[#allocation41_spill] sm:$0xff] %v19979_v40  ;;  %9989 = vrot.lane.b32.xlu0 %v19979_v40, %s15850_s17  ;;  %v15707_v40 = vld [vmem:[#allocation2 + $0x1a8] sm:$0xff] }
 0x65f   : > { %22930 = vst [vmem:[#allocation42_spill] sm:$0xff] %v19982_v31  ;;  %v5091_v49 = vpop.f32.mrb[2].mxu1  ;;  %v19987_v9 = vpop.f32.mrb[96].mxu0  ;;  %v10117_v58 = vadd.f32 1.0, %v19982_v31  ;;  %v20660_v31 = vld [vmem:[%s20540_s23 + $0x88] sm:$0xff] }
 0x660   : > { %22932 = vst [vmem:[#allocation17_spill] sm:$0xff] %v19987_v9  ;;  %v5093_v12 = vpop.f32.mrb[3].mxu1  ;;  %8598 = vmatmul.mubr.f32.gmra.mrb[108].mxu1 %v19681_v7  ;;  %v9520_v50 = vpop.f32.mrb[97].mxu0  ;;  %v20000_v54 = vadd.f32 %v19970_v27, %v5091_v49 }
 0x661   : > { %8602 = vmatprep.mubr.f32.mxu1 %v22933_v15  ;;  %v19993_v25 = vadd.f32 %v19973_v32, %v5093_v12 }
 0x662   : > { %10181 = vrot.lane.b32.xlu0 %v10117_v58, %s15850_s17  ;;  %22936 = vst [vmem:[#allocation19_spill] sm:$0xff] %v20000_v54 }
 0x663   : > { %22934 = vst [vmem:[#allocation43_spill] sm:$0xff] %v19993_v25  ;;  %v5097_v35 = vpop.f32.mrb[4].mxu1  ;;  %v19996_v11 = vpop.f32.mrb[98].mxu0  ;;  %v10118_v19 = vadd.f32 1.0, %v19993_v25  ;;  %v20674_v25 = vld [vmem:[%s20540_s23 + $0x98] sm:$0xff] }
 0x664   : > { %22935 = vst [vmem:[#allocation44_spill] sm:$0xff] %v19996_v11  ;;  %v5099_v14 = vpop.f32.mrb[5].mxu1  ;;  %8603 = vmatmul.mubr.f32.gmra.mrb[110].mxu1 %v19694_v3  ;;  %v9525_v7 = vpop.f32.mrb[99].mxu0  ;;  %v20011_v10 = vadd.f32 %v19970_v27, %v5097_v35 }
 0x665   : > { %v20004_v48 = vadd.f32 %v19973_v32, %v5099_v14  ;;  %8607 = vmatprep.mubr.f32.mxu1 %v22938_v38  ;;  %10183 = vrot.lane.b32.xlu1 %v10118_v19, %s15850_s17 }
 0x666   : > { %9991 = vrot.lane.b32.xlu0 %v20000_v54, %s15850_s17  ;;  %22939 = vst [vmem:[#allocation21_spill] sm:$0xff] %v20011_v10 }
 0x667   : > { %22937 = vst [vmem:[#allocation20_spill] sm:$0xff] %v20004_v48  ;;  %v5103_v33 = vpop.f32.mrb[6].mxu1  ;;  %v20013_v37 = vpop.f32.mrb[100].mxu0  ;;  %v10119_v22 = vadd.f32 1.0, %v20004_v48 }
 0x668   : > { %22940 = vst [vmem:[#allocation13_spill] sm:$0xff] %v20013_v37  ;;  %v5105_v3 = vpop.f32.mrb[7].mxu1  ;;  %8608 = vmatmul.mubr.f32.gmra.mrb[112].mxu1 %v19707_v57  ;;  %v9530_v63 = vpop.f32.mrb[101].mxu0  ;;  %v20022_v62 = vadd.f32 %v19970_v27, %v5103_v33 }
 0x669   : > { %8612 = vmatprep.mubr.f32.mxu1 %v22941_v51  ;;  %9993 = vrot.lane.b32.xlu1 %v20011_v10, %s15850_s17  ;;  %v20025_v30 = vadd.f32 %v19973_v32, %v5105_v3  ;;  %v20702_v10 = vld [vmem:[%s20540_s23 + $0xb8] sm:$0xff] }
 0x66a   : > { %10185 = vrot.lane.b32.xlu0 %v10119_v22, %s15850_s17  ;;  %22942 = vst [vmem:[#allocation18_spill] sm:$0xff] %v20022_v62  ;;  %23015 = vst [vmem:[#allocation104_spill] sm:$0xff] %v20702_v10 }
 0x66b   : > { %22943 = vst [vmem:[#allocation32_spill] sm:$0xff] %v20025_v30  ;;  %v5109_v53 = vpop.f32.mrb[8].mxu1  ;;  %v20027_v5 = vpop.f32.mrb[102].mxu0  ;;  %v10120_v49 = vadd.f32 1.0, %v20025_v30 }
 0x66c   : > { %22944 = vst [vmem:[#allocation37_spill] sm:$0xff] %v20027_v5  ;;  %v20030_v29 = vadd.f32 %v19970_v27, %v5109_v53  ;;  %v5111_v57 = vpop.f32.mrb[9].mxu1  ;;  %8613 = vmatmul.mubr.f32.gmra.mrb[114].mxu1 %v19720_v20  ;;  %v9535_v61 = vpop.f32.mrb[103].mxu0 }
 0x66d   : > { %v20034_v24 = vadd.f32 %v19973_v32, %v5111_v57  ;;  %8617 = vmatprep.mubr.f32.mxu1 %v22947_v8  ;;  %9995 = vrot.lane.b32.xlu1 %v20022_v62, %s15850_s17 }
 0x66e   : > { %22945 = vst [vmem:[#allocation35_spill] sm:$0xff] %v20030_v29  ;;  %9997 = vrot.lane.b32.xlu0 %v20030_v29, %s15850_s17  ;;  %v20688_v29 = vld [vmem:[%s20540_s23 + $0xa8] sm:$0xff] }
 0x66f   : > { %22946 = vst [vmem:[#allocation11_spill] sm:$0xff] %v20034_v24  ;;  %v5115_v59 = vpop.f32.mrb[10].mxu1  ;;  %v20041_v39 = vpop.f32.mrb[104].mxu0  ;;  %v10121_v58 = vadd.f32 1.0, %v20034_v24 }
 0x670   : > { %22948 = vst [vmem:[#allocation38_spill] sm:$0xff] %v20041_v39  ;;  %v5117_v20 = vpop.f32.mrb[11].mxu1  ;;  %8618 = vmatmul.mubr.f32.gmra.mrb[116].mxu1 %v19733_v16  ;;  %v9540_v12 = vpop.f32.mrb[105].mxu0  ;;  %v20050_v50 = vadd.f32 %v19970_v27, %v5115_v59  ;;  %v8300_v39 = vld [vmem:[#allocation2 + $0xa9] sm:$0xff] }
 0x671   : > { %8622 = vmatprep.mubr.f32.mxu1 %v19562_v36  ;;  %10187 = vrot.lane.b32.xlu1 %v10120_v49, %s15850_s17  ;;  %v20053_v15 = vadd.f32 %v19973_v32, %v5117_v20  ;;  %v22961_v12 = vld [vmem:[#allocation14_spill] sm:$0xff] }
 0x672   : > { %10189 = vrot.lane.b32.xlu0 %v10121_v58, %s15850_s17  ;;  %22949 = vst [vmem:[#allocation12_spill] sm:$0xff] %v20050_v50 }
 0x673   : > { %22950 = vst [vmem:[#allocation45_spill] sm:$0xff] %v20053_v15  ;;  %v5121_v35 = vpop.f32.mrb[12].mxu1  ;;  %v20055_v19 = vpop.f32.mrb[106].mxu0  ;;  %v10122_v22 = vadd.f32 1.0, %v20053_v15 }
 0x674   : > { %22951 = vst [vmem:[#allocation46_spill] sm:$0xff] %v20055_v19  ;;  %v20058_v14 = vadd.f32 %v19970_v27, %v5121_v35  ;;  %v5123_v16 = vpop.f32.mrb[13].mxu1  ;;  %8623 = vmatmul.mubr.f32.gmra.mrb[118].mxu1 %v19746_v41  ;;  %v9545_v36 = vpop.f32.mrb[107].mxu0 }
 0x675   : > { %v20062_v7 = vadd.f32 %v19973_v32, %v5123_v16  ;;  %8627 = vmatprep.mubr.f32.mxu1 %v19577_v43  ;;  %9999 = vrot.lane.b32.xlu1 %v20050_v50, %s15850_s17  ;;  %v22962_v16 = vld [vmem:[#allocation10_spill] sm:$0xff] }
 0x676   : > { %22952 = vst [vmem:[#allocation47_spill] sm:$0xff] %v20058_v14  ;;  %10001 = vrot.lane.b32.xlu0 %v20058_v14, %s15850_s17  ;;  %v8327_v36 = vld [vmem:[%s22479_s10 + $0x8] sm:$0xff] }
 0x677   : > { %22953 = vst [vmem:[#allocation48_spill] sm:$0xff] %v20062_v7  ;;  %v5127_v38 = vpop.f32.mrb[14].mxu1  ;;  %v20069_v33 = vpop.f32.mrb[108].mxu0  ;;  %v10123_v3 = vadd.f32 1.0, %v20062_v7 }
 0x678   : > { %22954 = vst [vmem:[#allocation49_spill] sm:$0xff] %v20069_v33  ;;  %v5129_v41 = vpop.f32.mrb[15].mxu1  ;;  %8628 = vmatmul.mubr.f32.gmra.mrb[120].mxu1 %v19759_v6  ;;  %v9550_v63 = vpop.f32.mrb[109].mxu0  ;;  %v20078_v43 = vadd.f32 %v19970_v27, %v5127_v38 }
 0x679   : > { %8632 = vmatprep.mubr.f32.mxu1 %v19574_v4  ;;  %10191 = vrot.lane.b32.xlu1 %v10122_v22, %s15850_s17  ;;  %v20081_v51 = vadd.f32 %v19973_v32, %v5129_v41 }
 0x67a   : > { %10193 = vrot.lane.b32.xlu0 %v10123_v3, %s15850_s17  ;;  %22955 = vst [vmem:[#allocation50_spill] sm:$0xff] %v20078_v43 }
 0x67b   : > { %22956 = vst [vmem:[#allocation51_spill] sm:$0xff] %v20081_v51  ;;  %v5133_v53 = vpop.f32.mrb[16].mxu1  ;;  %v20083_v57 = vpop.f32.mrb[110].mxu0  ;;  %v10124_v58 = vadd.f32 1.0, %v20081_v51 }
 0x67c   : > { %22957 = vst [vmem:[#allocation52_spill] sm:$0xff] %v20083_v57  ;;  %v20086_v61 = vadd.f32 %v19970_v27, %v5133_v53  ;;  %v5135_v6 = vpop.f32.mrb[17].mxu1  ;;  %8633 = vmatmul.mubr.f32.gmra.mrb[122].mxu1 %v19772_v26  ;;  %v9555_v4 = vpop.f32.mrb[111].mxu0  ;;  %v8335_v57 = vld [vmem:[%s22479_s10 + $0x48] sm:$0xff] }
 0x67d   : > { %v20090_v8 = vadd.f32 %v19973_v32, %v5135_v6  ;;  %8637 = vmatprep.mubr.f32.mxu1 %v19589_v2  ;;  %10003 = vrot.lane.b32.xlu1 %v20078_v43, %s15850_s17  ;;  %v8326_v2 = vld [vmem:[%s22479_s10] sm:$0xff]  ;;  %v22967_v6 = vld [vmem:[#allocation15_spill] sm:$0xff] }
 0x67e   : > { %22958 = vst [vmem:[#allocation53_spill] sm:$0xff] %v20086_v61  ;;  %10005 = vrot.lane.b32.xlu0 %v20086_v61, %s15850_s17 }
 0x67f   : > { %22959 = vst [vmem:[#allocation54_spill] sm:$0xff] %v20090_v8  ;;  %v5139_v59 = vpop.f32.mrb[18].mxu1  ;;  %v20097_v49 = vpop.f32.mrb[112].mxu0  ;;  %v10125_v20 = vadd.f32 1.0, %v20090_v8 }
 0x680   : > { %22960 = vst [vmem:[#allocation55_spill] sm:$0xff] %v20097_v49  ;;  %v5141_v26 = vpop.f32.mrb[19].mxu1  ;;  %8638 = vmatmul.mubr.f32.gmra.mrb[124].mxu1 %v22961_v12  ;;  %v9560_v35 = vpop.f32.mrb[113].mxu0  ;;  %v20112_v38 = vadd.f32 %v19970_v27, %v5139_v59  ;;  %v14406_v59 = vpack.c.bf16 %v8327_v36, %v8326_v2  ;;  %v8329_v12 = vld [vmem:[%s22479_s10 + $0x18] sm:$0xff]  ;;  %v8294_v36 = vld [vmem:[#allocation2 + $0x49] sm:$0xff] }
 0x681   : > { %8642 = vmatprep.mubr.f32.mxu1 %v22962_v16  ;;  %10195 = vrot.lane.b32.xlu1 %v10124_v58, %s15850_s17  ;;  %v20117_v41 = vadd.f32 %v19973_v32, %v5141_v26  ;;  %v8292_v58 = vld [vmem:[#allocation2 + $0x29] sm:$0xff] }
 0x682   : > { %10197 = vrot.lane.b32.xlu0 %v10125_v20, %s15850_s17  ;;  %22963 = vst [vmem:[#allocation14_spill] sm:$0xff] %v20112_v38  ;;  %v8328_v26 = vld [vmem:[%s22479_s10 + $0x10] sm:$0xff] }
 0x683   : > { %v5145_v22 = vpop.f32.mrb[20].mxu1  ;;  %v20114_v3 = vpop.f32.mrb[114].mxu0  ;;  %22965 = vst [vmem:[#allocation56_spill] sm:$0xff] %v20117_v41  ;;  %v8296_v49 = vld [vmem:[#allocation2 + $0x69] sm:$0xff] }
 0x684   : > { %22964 = vst [vmem:[#allocation10_spill] sm:$0xff] %v20114_v3  ;;  %v20120_v63 = vadd.f32 %v19970_v27, %v5145_v22  ;;  %v5147_v53 = vpop.f32.mrb[21].mxu1  ;;  %8643 = vmatmul.mubr.f32.gmra.mrb[126].mxu1 %v22967_v6  ;;  %v9565_v4 = vpop.f32.mrb[115].mxu0  ;;  %v8293_v22 = vld [vmem:[#allocation2 + $0x31] sm:$0xff] }
 0x685   : > { %v20124_v20 = vadd.f32 %v19973_v32, %v5147_v53  ;;  %13755 = vmatprep.mubr.f32.mxu1 %v8292_v58  ;;  %10007 = vrot.lane.b32.xlu1 %v20112_v38, %s15850_s17  ;;  %v10126_v4 = vadd.f32 1.0, %v20117_v41  ;;  %v14409_v58 = vpack.c.bf16 %v8329_v12, %v8328_v26  ;;  %v20646_v38 = vld [vmem:[%s20540_s23 + $0x78] sm:$0xff] }
 0x686   : > { %22966 = vst [vmem:[#allocation57_spill] sm:$0xff] %v20120_v63  ;;  %10009 = vrot.lane.b32.xlu0 %v20120_v63, %s15850_s17  ;;  %v20632_v63 = vld [vmem:[%s20540_s23 + $0x68] sm:$0xff] }
 0x687   : > { %22968 = vst [vmem:[#allocation15_spill] sm:$0xff] %v20124_v20  ;;  %v5151_v35 = vpop.f32.mrb[22].mxu1  ;;  %v20136_v16 = vpop.f32.mrb[116].mxu0  ;;  %v10127_v53 = vadd.f32 1.0, %v20124_v20  ;;  %v8351_v20 = vld [vmem:[%s22479_s10 + $0xc8] sm:$0xff] }
 0x688   : > { %22969 = vst [vmem:[#allocation58_spill] sm:$0xff] %v20136_v16  ;;  %v5153_v6 = vpop.f32.mrb[23].mxu1  ;;  %13756 = vmatmul.mubr.f32.vlgmr.msra.gmra.mrb[128].mxu1 %v8293_v22  ;;  %v9570_v2 = vpop.f32.mrb[117].mxu0  ;;  %v8331_v16 = vld [vmem:[%s22479_s10 + $0x28] sm:$0xff]  ;;  %v20152_v26 = vadd.f32 %v19970_v27, %v5151_v35  ;;  %v8332_v35 = vld [vmem:[%s22479_s10 + $0x30] sm:$0xff] }
 0x689   : > { %14407 = vmatpush1.bf16.msra.mxu1 %v14406_v59  ;;  %13758 = vmatprep.mubr.f32.mxu1 %v8294_v36  ;;  %v8295_v59 = vld [vmem:[#allocation2 + $0x51] sm:$0xff]  ;;  %v20155_v12 = vadd.f32 %v19973_v32, %v5153_v6 }
 0x68a   : > { %10199 = vrot.lane.b32.xlu1 %v10126_v4, %s15850_s17  ;;  %10201 = vrot.lane.b32.xlu0 %v10127_v53, %s15850_s17  ;;  %22971 = vst [vmem:[#allocation60_spill] sm:$0xff] %v20152_v26  ;;  %v8333_v6 = vld [vmem:[%s22479_s10 + $0x38] sm:$0xff] }
 0x68b   : > { %v5157_v22 = vpop.f32.mrb[24].mxu1  ;;  %14408 = vmatprep.subr.bf16.mxu1 %v22854_v0  ;;  %v20149_v2 = vpop.f32.mrb[118].mxu0  ;;  %22972 = vst [vmem:[#allocation61_spill] sm:$0xff] %v20155_v12  ;;  %v14415_v33 = vpack.c.bf16 %v8333_v6, %v8332_v35 }
 0x68c   : > { %22970 = vst [vmem:[#allocation59_spill] sm:$0xff] %v20149_v2  ;;  %v20158_v53 = vadd.f32 %v19970_v27, %v5157_v22  ;;  %v5159_v36 = vpop.f32.mrb[25].mxu1  ;;  %13759 = vmatmul.mubr.f32.gmra.mrb[130].mxu1 %v8295_v59  ;;  %v9575_v4 = vpop.f32.mrb[119].mxu0  ;;  %v14412_v2 = vpack.c.bf16 %v8331_v16, %v8330_v60  ;;  %v8297_v60 = vld [vmem:[#allocation2 + $0x71] sm:$0xff] }
 0x68d   : > { %v20161_v3 = vadd.f32 %v19973_v32, %v5159_v36  ;;  %14410 = vmatpush1.bf16.msra.mxu1 %v14409_v58  ;;  %13761 = vmatprep.mubr.f32.mxu1 %v8296_v49  ;;  %v8298_v36 = vld [vmem:[#allocation2 + $0x89] sm:$0xff]  ;;  %v10128_v4 = vadd.f32 1.0, %v20155_v12 }
 0x68e   : > { %22973 = vst [vmem:[#allocation62_spill] sm:$0xff] %v20158_v53  ;;  %10011 = vrot.lane.b32.xlu1 %v20152_v26, %s15850_s17  ;;  %10013 = vrot.lane.b32.xlu0 %v20158_v53, %s15850_s17  ;;  %v8355_v12 = vld [vmem:[%s22479_s10 + $0xe8] sm:$0xff]  ;;  %v20618_v26 = vld [vmem:[%s20540_s23 + $0x58] sm:$0xff] }
 0x68f   : > { %22974 = vst [vmem:[#allocation63_spill] sm:$0xff] %v20161_v3  ;;  %v5163_v22 = vpop.f32.mrb[26].mxu1  ;;  %14411 = vmatprep.subr.bf16.mxu1 %v22854_v0  ;;  %v20174_v58 = vpop.f32.mrb[120].mxu0  ;;  %v10129_v49 = vadd.f32 1.0, %v20161_v3  ;;  %v8342_v3 = vld [vmem:[%s22479_s10 + $0x80] sm:$0xff] }
 0x690   : > { %22975 = vst [vmem:[#allocation64_spill] sm:$0xff] %v20174_v58  ;;  %v5165_v16 = vpop.f32.mrb[27].mxu1  ;;  %13762 = vmatmul.mubr.f32.gmra.mrb[132].mxu1 %v8297_v60  ;;  %v9580_v59 = vpop.f32.mrb[121].mxu0  ;;  %v8334_v58 = vld [vmem:[%s22479_s10 + $0x40] sm:$0xff]  ;;  %v20190_v35 = vadd.f32 %v19970_v27, %v5163_v22  ;;  %v8336_v22 = vld [vmem:[%s22479_s10 + $0x50] sm:$0xff] }
 0x691   : > { %14413 = vmatpush1.bf16.msra.mxu1 %v14412_v2  ;;  %13764 = vmatprep.mubr.f32.mxu1 %v8298_v36  ;;  %v8299_v2 = vld [vmem:[#allocation2 + $0x91] sm:$0xff]  ;;  %v20193_v6 = vadd.f32 %v19973_v32, %v5165_v16 }
 0x692   : > { %10203 = vrot.lane.b32.xlu1 %v10128_v4, %s15850_s17  ;;  %10205 = vrot.lane.b32.xlu0 %v10129_v49, %s15850_s17  ;;  %22977 = vst [vmem:[#allocation66_spill] sm:$0xff] %v20190_v35  ;;  %v8337_v16 = vld [vmem:[%s22479_s10 + $0x58] sm:$0xff] }
 0x693   : > { %v5169_v60 = vpop.f32.mrb[28].mxu1  ;;  %14414 = vmatprep.subr.bf16.mxu1 %v22854_v0  ;;  %v20187_v59 = vpop.f32.mrb[122].mxu0  ;;  %22978 = vst [vmem:[#allocation67_spill] sm:$0xff] %v20193_v6 }
 0x694   : > { %22976 = vst [vmem:[#allocation65_spill] sm:$0xff] %v20187_v59  ;;  %v20196_v49 = vadd.f32 %v19970_v27, %v5169_v60  ;;  %v5171_v36 = vpop.f32.mrb[29].mxu1  ;;  %13765 = vmatmul.mubr.f32.gmra.mrb[134].mxu1 %v8299_v2  ;;  %v9585_v4 = vpop.f32.mrb[123].mxu0  ;;  %v14418_v59 = vpack.c.bf16 %v8335_v57, %v8334_v58  ;;  %v8302_v58 = vld [vmem:[#allocation2 + $0xc9] sm:$0xff]  ;;  %v10130_v2 = vadd.f32 1.0, %v20193_v6 }
 0x695   : > { %v20199_v19 = vadd.f32 %v19973_v32, %v5171_v36  ;;  %14416 = vmatpush1.bf16.msra.mxu1 %v14415_v33  ;;  %13767 = vmatprep.mubr.f32.mxu1 %v8300_v39  ;;  %v8301_v33 = vld [vmem:[#allocation2 + $0xb1] sm:$0xff]  ;;  %v14421_v36 = vpack.c.bf16 %v8337_v16, %v8336_v22  ;;  %v8338_v4 = vld [vmem:[%s22479_s10 + $0x60] sm:$0xff]  ;;  %v8347_v6 = vld [vmem:[%s22479_s10 + $0xa8] sm:$0xff] }
 0x696   : > { %22979 = vst [vmem:[#allocation68_spill] sm:$0xff] %v20196_v49  ;;  %10015 = vrot.lane.b32.xlu1 %v20190_v35, %s15850_s17  ;;  %10017 = vrot.lane.b32.xlu0 %v20196_v49, %s15850_s17 }
 0x697   : > { %22980 = vst [vmem:[#allocation69_spill] sm:$0xff] %v20199_v19  ;;  %v5175_v60 = vpop.f32.mrb[30].mxu1  ;;  %14417 = vmatprep.subr.bf16.mxu1 %v22854_v0  ;;  %v10131_v39 = vadd.f32 1.0, %v20199_v19  ;;  %v8339_v19 = vld [vmem:[%s22479_s10 + $0x68] sm:$0xff] }
 0x698   : > { %v5177_v57 = vpop.f32.mrb[31].mxu1  ;;  %13768 = vmatmul.mubr.f32.gmra.mrb[136].mxu1 %v8301_v33  ;;  %v8303_v33 = vld [vmem:[#allocation2 + $0xd1] sm:$0xff]  ;;  %v14424_v5 = vpack.c.bf16 %v8339_v19, %v8338_v4 }
 0x699   : > { %14419 = vmatpush1.bf16.msra.mxu1 %v14418_v59  ;;  %13770 = vmatprep.mubr.f32.mxu1 %v8302_v58  ;;  %v20224_v59 = vadd.f32 %v19970_v27, %v5175_v60  ;;  %v20227_v22 = vadd.f32 %v19973_v32, %v5177_v57  ;;  %v8304_v58 = vld [vmem:[#allocation2 + $0xe9] sm:$0xff]  ;;  %v8341_v60 = vld [vmem:[%s22479_s10 + $0x78] sm:$0xff] }
 0x69a   : > { %10207 = vrot.lane.b32.xlu1 %v10130_v2, %s15850_s17  ;;  %10209 = vrot.lane.b32.xlu0 %v10131_v39, %s15850_s17 }
 0x69b   : > { %v5181_v37 = vpop.f32.mrb[32].mxu1  ;;  %14420 = vmatprep.subr.bf16.mxu1 %v22854_v0  ;;  %22981 = vst [vmem:[#allocation70_spill] sm:$0xff] %v20224_v59  ;;  %22982 = vst [vmem:[#allocation71_spill] sm:$0xff] %v20227_v22 }
 0x69c   : > { %v20230_v16 = vadd.f32 %v19970_v27, %v5181_v37  ;;  %v5183_v39 = vpop.f32.mrb[33].mxu1  ;;  %13771 = vmatmul.mubr.f32.gmra.mrb[138].mxu1 %v8303_v33  ;;  %v8340_v37 = vld [vmem:[%s22479_s10 + $0x70] sm:$0xff] }
 0x69d   : > { %v20233_v2 = vadd.f32 %v19973_v32, %v5183_v39  ;;  %14422 = vmatpush1.bf16.msra.mxu1 %v14421_v36  ;;  %13773 = vmatprep.mubr.f32.mxu1 %v8304_v58  ;;  %v8305_v36 = vld [vmem:[#allocation2 + $0xf1] sm:$0xff]  ;;  %v8306_v33 = vld [vmem:[#allocation2 + $0x109] sm:$0xff]  ;;  %v10132_v39 = vadd.f32 1.0, %v20227_v22  ;;  %v14427_v58 = vpack.c.bf16 %v8341_v60, %v8340_v37 }
 0x69e   : > { %22983 = vst [vmem:[#allocation72_spill] sm:$0xff] %v20230_v16  ;;  %10019 = vrot.lane.b32.xlu1 %v20224_v59, %s15850_s17  ;;  %10021 = vrot.lane.b32.xlu0 %v20230_v16, %s15850_s17  ;;  %v20576_v16 = vld [vmem:[%s20540_s23 + $0x28] sm:$0xff] }
 0x69f   : > { %22984 = vst [vmem:[#allocation73_spill] sm:$0xff] %v20233_v2  ;;  %v5187_v57 = vpop.f32.mrb[34].mxu1  ;;  %14423 = vmatprep.subr.bf16.mxu1 %v22854_v0  ;;  %v10133_v19 = vadd.f32 1.0, %v20233_v2  ;;  %v8343_v2 = vld [vmem:[%s22479_s10 + $0x88] sm:$0xff] }
 0x6a0   : > { %v5189_v4 = vpop.f32.mrb[35].mxu1  ;;  %13774 = vmatmul.mubr.f32.gmra.mrb[140].mxu1 %v8305_v36  ;;  %v8307_v36 = vld [vmem:[#allocation2 + $0x111] sm:$0xff]  ;;  %v14430_v22 = vpack.c.bf16 %v8343_v2, %v8342_v3 }
 0x6a1   : > { %14425 = vmatpush1.bf16.msra.mxu1 %v14424_v5  ;;  %13776 = vmatprep.mubr.f32.mxu1 %v8306_v33  ;;  %v20258_v5 = vadd.f32 %v19970_v27, %v5187_v57  ;;  %v20261_v37 = vadd.f32 %v19973_v32, %v5189_v4  ;;  %v8308_v33 = vld [vmem:[#allocation2 + $0x129] sm:$0xff]  ;;  %v8345_v57 = vld [vmem:[%s22479_s10 + $0x98] sm:$0xff] }
 0x6a2   : > { %10211 = vrot.lane.b32.xlu1 %v10132_v39, %s15850_s17  ;;  %10213 = vrot.lane.b32.xlu0 %v10133_v19, %s15850_s17  ;;  %v8309_v3 = vld [vmem:[#allocation2 + $0x131] sm:$0xff] }
 0x6a3   : > { %v5193_v9 = vpop.f32.mrb[36].mxu1  ;;  %14426 = vmatprep.subr.bf16.mxu1 %v22854_v0  ;;  %22985 = vst [vmem:[#allocation74_spill] sm:$0xff] %v20258_v5  ;;  %22986 = vst [vmem:[#allocation75_spill] sm:$0xff] %v20261_v37  ;;  %v10134_v2 = vadd.f32 1.0, %v20261_v37 }
 0x6a4   : > { %v20264_v60 = vadd.f32 %v19970_v27, %v5193_v9  ;;  %v5195_v19 = vpop.f32.mrb[37].mxu1  ;;  %13777 = vmatmul.mubr.f32.gmra.mrb[142].mxu1 %v8307_v36  ;;  %v8344_v9 = vld [vmem:[%s22479_s10 + $0x90] sm:$0xff] }
 0x6a5   : > { %v20267_v39 = vadd.f32 %v19973_v32, %v5195_v19  ;;  %14428 = vmatpush1.bf16.msra.mxu1 %v14427_v58  ;;  %13779 = vmatprep.mubr.f32.mxu1 %v8308_v33  ;;  %v8310_v19 = vld [vmem:[#allocation2 + $0x149] sm:$0xff]  ;;  %v14433_v33 = vpack.c.bf16 %v8345_v57, %v8344_v9 }
 0x6a6   : > { %22987 = vst [vmem:[#allocation76_spill] sm:$0xff] %v20264_v60  ;;  %10023 = vrot.lane.b32.xlu1 %v20258_v5, %s15850_s17  ;;  %10025 = vrot.lane.b32.xlu0 %v20264_v60, %s15850_s17  ;;  %v15686_v60 = vld [vmem:[#allocation2 + $0xef] sm:$0xff] }
 0x6a7   : > { %22988 = vst [vmem:[#allocation77_spill] sm:$0xff] %v20267_v39  ;;  %v10135_v4 = vadd.f32 1.0, %v20267_v39  ;;  %v5199_v36 = vpop.f32.mrb[38].mxu1  ;;  %14429 = vmatprep.subr.bf16.mxu1 %v22854_v0  ;;  %v8346_v39 = vld [vmem:[%s22479_s10 + $0xa0] sm:$0xff] }
 0x6a8   : > { %v5201_v58 = vpop.f32.mrb[39].mxu1  ;;  %13780 = vmatmul.mubr.f32.gmra.mrb[144].mxu1 %v8309_v3  ;;  %v8311_v3 = vld [vmem:[#allocation2 + $0x151] sm:$0xff]  ;;  %v14436_v37 = vpack.c.bf16 %v8347_v6, %v8346_v39 }
 0x6a9   : > { %14431 = vmatpush1.bf16.msra.mxu1 %v14430_v22  ;;  %13782 = vmatprep.mubr.f32.mxu1 %v8310_v19  ;;  %v20292_v22 = vadd.f32 %v19970_v27, %v5199_v36  ;;  %v20295_v9 = vadd.f32 %v19973_v32, %v5201_v58  ;;  %v8349_v36 = vld [vmem:[%s22479_s10 + $0xb8] sm:$0xff] }
 0x6aa   : > { %10215 = vrot.lane.b32.xlu1 %v10134_v2, %s15850_s17  ;;  %10217 = vrot.lane.b32.xlu0 %v10135_v4, %s15850_s17  ;;  %v8312_v2 = vld [vmem:[#allocation2 + $0x169] sm:$0xff]  ;;  %v8313_v6 = vld [vmem:[#allocation2 + $0x171] sm:$0xff] }
 0x6ab   : > { %v5205_v11 = vpop.f32.mrb[40].mxu1  ;;  %14432 = vmatprep.subr.bf16.mxu1 %v22854_v0  ;;  %22989 = vst [vmem:[#allocation78_spill] sm:$0xff] %v20292_v22  ;;  %22990 = vst [vmem:[#allocation79_spill] sm:$0xff] %v20295_v9  ;;  %v10136_v39 = vadd.f32 1.0, %v20295_v9 }
 0x6ac   : > { %v20298_v57 = vadd.f32 %v19970_v27, %v5205_v11  ;;  %v5207_v4 = vpop.f32.mrb[41].mxu1  ;;  %13783 = vmatmul.mubr.f32.gmra.mrb[146].mxu1 %v8311_v3  ;;  %v8348_v11 = vld [vmem:[%s22479_s10 + $0xb0] sm:$0xff] }
 0x6ad   : > { %v20301_v19 = vadd.f32 %v19973_v32, %v5207_v4  ;;  %14434 = vmatpush1.bf16.msra.mxu1 %v14433_v33  ;;  %13785 = vmatprep.mubr.f32.mxu1 %v8312_v2  ;;  %v8314_v4 = vld [vmem:[#allocation2 + $0x189] sm:$0xff]  ;;  %v14439_v2 = vpack.c.bf16 %v8349_v36, %v8348_v11 }
 0x6ae   : > { %22991 = vst [vmem:[#allocation80_spill] sm:$0xff] %v20298_v57  ;;  %10027 = vrot.lane.b32.xlu1 %v20292_v22, %s15850_s17  ;;  %10029 = vrot.lane.b32.xlu0 %v20298_v57, %s15850_s17  ;;  %v20561_v57 = vld [vmem:[%s20540_s23 + $0x18] sm:$0xff] }
 0x6af   : > { %22992 = vst [vmem:[#allocation81_spill] sm:$0xff] %v20301_v19  ;;  %v10137_v58 = vadd.f32 1.0, %v20301_v19  ;;  %v5211_v3 = vpop.f32.mrb[42].mxu1  ;;  %14435 = vmatprep.subr.bf16.mxu1 %v22854_v0  ;;  %v8350_v19 = vld [vmem:[%s22479_s10 + $0xc0] sm:$0xff] }
 0x6b0   : > { %v5213_v33 = vpop.f32.mrb[43].mxu1  ;;  %13786 = vmatmul.mubr.f32.gmra.mrb[148].mxu1 %v8313_v6  ;;  %v8315_v6 = vld [vmem:[#allocation2 + $0x191] sm:$0xff]  ;;  %v14442_v9 = vpack.c.bf16 %v8351_v20, %v8350_v19 }
 0x6b1   : > { %14437 = vmatpush1.bf16.msra.mxu1 %v14436_v37  ;;  %13788 = vmatprep.mubr.f32.mxu1 %v8314_v4  ;;  %v20326_v37 = vadd.f32 %v19970_v27, %v5211_v3  ;;  %v20329_v11 = vadd.f32 %v19973_v32, %v5213_v33  ;;  %v8353_v3 = vld [vmem:[%s22479_s10 + $0xd8] sm:$0xff] }
 0x6b2   : > { %10219 = vrot.lane.b32.xlu1 %v10136_v39, %s15850_s17  ;;  %10221 = vrot.lane.b32.xlu0 %v10137_v58, %s15850_s17  ;;  %v8316_v39 = vld [vmem:[#allocation2 + $0x1a9] sm:$0xff]  ;;  %v8317_v20 = vld [vmem:[#allocation2 + $0x1b1] sm:$0xff] }
 0x6b3   : > { %v5217_v28 = vpop.f32.mrb[44].mxu1  ;;  %14438 = vmatprep.subr.bf16.mxu1 %v22854_v0  ;;  %22993 = vst [vmem:[#allocation82_spill] sm:$0xff] %v20326_v37  ;;  %22994 = vst [vmem:[#allocation83_spill] sm:$0xff] %v20329_v11  ;;  %v10138_v19 = vadd.f32 1.0, %v20329_v11 }
 0x6b4   : > { %v20332_v36 = vadd.f32 %v19970_v27, %v5217_v28  ;;  %v5219_v58 = vpop.f32.mrb[45].mxu1  ;;  %13789 = vmatmul.mubr.f32.gmra.mrb[150].mxu1 %v8315_v6  ;;  %v8352_v28 = vld [vmem:[%s22479_s10 + $0xd0] sm:$0xff] }
 0x6b5   : > { %v20335_v4 = vadd.f32 %v19973_v32, %v5219_v58  ;;  %14440 = vmatpush1.bf16.msra.mxu1 %v14439_v2  ;;  %13791 = vmatprep.mubr.f32.mxu1 %v8316_v39  ;;  %v8318_v58 = vld [vmem:[#allocation2 + $0x1c9] sm:$0xff]  ;;  %v14445_v39 = vpack.c.bf16 %v8353_v3, %v8352_v28 }
 0x6b6   : > { %22995 = vst [vmem:[#allocation84_spill] sm:$0xff] %v20332_v36  ;;  %10031 = vrot.lane.b32.xlu1 %v20326_v37, %s15850_s17  ;;  %10033 = vrot.lane.b32.xlu0 %v20332_v36, %s15850_s17 }
 0x6b7   : > { %22996 = vst [vmem:[#allocation85_spill] sm:$0xff] %v20335_v4  ;;  %v10139_v33 = vadd.f32 1.0, %v20335_v4  ;;  %v5223_v6 = vpop.f32.mrb[46].mxu1  ;;  %14441 = vmatprep.subr.bf16.mxu1 %v22854_v0  ;;  %v8354_v4 = vld [vmem:[%s22479_s10 + $0xe0] sm:$0xff] }
 0x6b8   : > { %v5225_v2 = vpop.f32.mrb[47].mxu1  ;;  %13792 = vmatmul.mubr.f32.gmra.mrb[152].mxu1 %v8317_v20  ;;  %v8319_v20 = vld [vmem:[#allocation2 + $0x1d1] sm:$0xff]  ;;  %v14448_v11 = vpack.c.bf16 %v8355_v12, %v8354_v4 }
 0x6b9   : > { %14443 = vmatpush1.bf16.msra.mxu1 %v14442_v9  ;;  %13794 = vmatprep.mubr.f32.mxu1 %v8318_v58  ;;  %v20360_v9 = vadd.f32 %v19970_v27, %v5223_v6  ;;  %v20363_v28 = vadd.f32 %v19973_v32, %v5225_v2  ;;  %v8357_v6 = vld [vmem:[%s22479_s10 + $0xf8] sm:$0xff] }
 0x6ba   : > { %10223 = vrot.lane.b32.xlu1 %v10138_v19, %s15850_s17  ;;  %10225 = vrot.lane.b32.xlu0 %v10139_v33, %s15850_s17  ;;  %v8320_v19 = vld [vmem:[#allocation2 + $0x1e9] sm:$0xff]  ;;  %v8321_v12 = vld [vmem:[#allocation2 + $0x1f1] sm:$0xff] }
 0x6bb   : > { %v5229_v17 = vpop.f32.mrb[48].mxu1  ;;  %14444 = vmatprep.subr.bf16.mxu1 %v22854_v0  ;;  %22997 = vst [vmem:[#allocation86_spill] sm:$0xff] %v20360_v9  ;;  %22998 = vst [vmem:[#allocation87_spill] sm:$0xff] %v20363_v28  ;;  %v10140_v4 = vadd.f32 1.0, %v20363_v28 }
 0x6bc   : > { %v20366_v3 = vadd.f32 %v19970_v27, %v5229_v17  ;;  %v5231_v33 = vpop.f32.mrb[49].mxu1  ;;  %13795 = vmatmul.mubr.f32.gmra.mrb[154].mxu1 %v8319_v20  ;;  %v8356_v17 = vld [vmem:[%s22479_s10 + $0xf0] sm:$0xff] }
 0x6bd   : > { %v20369_v58 = vadd.f32 %v19973_v32, %v5231_v33  ;;  %14446 = vmatpush1.bf16.msra.mxu1 %v14445_v39  ;;  %13797 = vmatprep.mubr.f32.mxu1 %v8320_v19  ;;  %v8322_v33 = vld [vmem:[#allocation2 + $0x209] sm:$0xff]  ;;  %v8358_v19 = vld [vmem:[%s22479_s10 + $0x100] sm:$0xff] }
 0x6be   : > { %22999 = vst [vmem:[#allocation88_spill] sm:$0xff] %v20366_v3  ;;  %10035 = vrot.lane.b32.xlu1 %v20360_v9, %s15850_s17  ;;  %10037 = vrot.lane.b32.xlu0 %v20366_v3, %s15850_s17  ;;  %v8359_v3 = vld [vmem:[%s22479_s10 + $0x108] sm:$0xff] }
 0x6bf   : > { %23000 = vst [vmem:[#allocation89_spill] sm:$0xff] %v20369_v58  ;;  %v10141_v2 = vadd.f32 1.0, %v20369_v58  ;;  %v5235_v20 = vpop.f32.mrb[50].mxu1  ;;  %14447 = vmatprep.subr.bf16.mxu1 %v22854_v0  ;;  %v14451_v58 = vpack.c.bf16 %v8357_v6, %v8356_v17  ;;  %v14453_v28 = vpack.c.bf16 %v8359_v3, %v8358_v19  ;;  %v8360_v17 = vld [vmem:[%s22479_s10 + $0x110] sm:$0xff]  ;;  %v8361_v6 = vld [vmem:[%s22479_s10 + $0x118] sm:$0xff] }
 0x6c0   : > { %v5237_v39 = vpop.f32.mrb[51].mxu1  ;;  %13798 = vmatmul.mubr.f32.gmra.mrb[156].mxu1 %v8321_v12  ;;  %v8323_v12 = vld [vmem:[#allocation2 + $0x211] sm:$0xff]  ;;  %v20394_v8 = vadd.f32 %v19970_v27, %v5235_v20 }
 0x6c1   : > { %14449 = vmatpush1.bf16.msra.mxu1 %v14448_v11  ;;  %13800 = vmatprep.mubr.f32.mxu1 %v8322_v33  ;;  %v20397_v21 = vadd.f32 %v19973_v32, %v5237_v39  ;;  %v14457_v39 = vpack.c.bf16 %v8361_v6, %v8360_v17 }
 0x6c2   : > { %10227 = vrot.lane.b32.xlu1 %v10140_v4, %s15850_s17  ;;  %10229 = vrot.lane.b32.xlu0 %v10141_v2, %s15850_s17  ;;  %23001 = vst [vmem:[#allocation90_spill] sm:$0xff] %v20394_v8  ;;  %v20411_v2 = vld [vmem:[#allocation2] sm:$0xff] }
 0x6c3   : > { %v5241_v9 = vpop.f32.mrb[52].mxu1  ;;  %14450 = vmatprep.subr.bf16.mxu1 %v22854_v0  ;;  %23002 = vst [vmem:[#allocation91_spill] sm:$0xff] %v20397_v21  ;;  %v10142_v33 = vadd.f32 1.0, %v20397_v21 }
 0x6c4   : > { %v20400_v36 = vadd.f32 %v19970_v27, %v5241_v9  ;;  %v5243_v11 = vpop.f32.mrb[53].mxu1  ;;  %13801 = vmatmul.mubr.f32.gmra.mrb[158].mxu1 %v8323_v12  ;;  %v8218_v9 = vld [vmem:[#allocation2 + $0x7] sm:$0xff] }
 0x6c5   : > { %v20409_v3 = vadd.f32 %v19973_v32, %v5243_v11  ;;  %14452 = vmatpush1.bf16.msra.mxu1 %v14451_v58  ;;  %8937 = vmatprep.mubr.f32.mxu1 %v20411_v2  ;;  %v8362_v58 = vld [vmem:[%s22479_s10 + $0x120] sm:$0xff]  ;;  %v8363_v12 = vld [vmem:[%s22479_s10 + $0x128] sm:$0xff] }
 0x6c6   : > { %23003 = vst [vmem:[#allocation92_spill] sm:$0xff] %v20400_v36  ;;  %10039 = vrot.lane.b32.xlu1 %v20394_v8, %s15850_s17  ;;  %10041 = vrot.lane.b32.xlu0 %v20400_v36, %s15850_s17  ;;  %v8219_v11 = vld [vmem:[#allocation2 + $0xf] sm:$0xff]  ;;  %v14461_v6 = vpack.c.bf16 %v8363_v12, %v8362_v58  ;;  %v15660_v36 = vld [vmem:[#allocation2 + $0x27] sm:$0xff] }
 0x6c7   : > { %23004 = vst [vmem:[#allocation93_spill] sm:$0xff] %v20409_v3  ;;  %v10143_v20 = vadd.f32 1.0, %v20409_v3  ;;  %v5247_v4 = vpop.f32.mrb[54].mxu1  ;;  %14454 = vmatprep.subr.bf16.mxu1 %v14453_v28 }
 0x6c8   : > { %v5249_v19 = vpop.f32.mrb[55].mxu1  ;;  %8938 = vmatmul.mubr.f32.vlgmr.msra.gmra.mrb[160].mxu1 %v8218_v9  ;;  %v20430_v9 = vadd.f32 %v19970_v27, %v5247_v4  ;;  %v15659_v4 = vld [vmem:[#allocation2 + $0x28] sm:$0xff] }
 0x6c9   : > { %14456 = vmatpush3.bf16.msra.mxu1 %v14453_v28  ;;  %8942 = vmatprep.mubr.f32.mxu1 %v20411_v2  ;;  %v20433_v3 = vadd.f32 %v19973_v32, %v5249_v19 }
 0x6ca   : > { %10231 = vrot.lane.b32.xlu1 %v10142_v33, %s15850_s17  ;;  %10233 = vrot.lane.b32.xlu0 %v10143_v20, %s15850_s17  ;;  %23005 = vst [vmem:[#allocation94_spill] sm:$0xff] %v20430_v9  ;;  %v8364_v33 = vld [vmem:[%s22479_s10 + $0x130] sm:$0xff]  ;;  %v8365_v20 = vld [vmem:[%s22479_s10 + $0x138] sm:$0xff] }
 0x6cb   : > { %v5253_v17 = vpop.f32.mrb[56].mxu1  ;;  %14458 = vmatprep.subr.bf16.mxu1 %v14457_v39  ;;  %23006 = vst [vmem:[#allocation95_spill] sm:$0xff] %v20433_v3 }
 0x6cc   : > { %v20436_v21 = vadd.f32 %v19970_v27, %v5253_v17  ;;  %v5255_v28 = vpop.f32.mrb[57].mxu1  ;;  %8943 = vmatmul.mubr.f32.gmra.mrb[162].mxu1 %v8219_v11  ;;  %v14465_v11 = vpack.c.bf16 %v8365_v20, %v8364_v33  ;;  %v10144_v17 = vadd.f32 1.0, %v20433_v3 }
 0x6cd   : > { %v20445_v58 = vadd.f32 %v19973_v32, %v5255_v28  ;;  %8947 = vmatprep.mubr.f32.mxu1 %v15659_v4  ;;  %14460 = vmatpush3.bf16.msra.mxu1 %v14457_v39  ;;  %v8366_v39 = vld [vmem:[%s22479_s10 + $0x140] sm:$0xff]  ;;  %v8367_v4 = vld [vmem:[%s22479_s10 + $0x148] sm:$0xff] }
 0x6ce   : > { %23007 = vst [vmem:[#allocation96_spill] sm:$0xff] %v20436_v21  ;;  %10043 = vrot.lane.b32.xlu1 %v20430_v9, %s15850_s17  ;;  %10045 = vrot.lane.b32.xlu0 %v20436_v21, %s15850_s17  ;;  %v15661_v9 = vld [vmem:[#allocation2 + $0x30] sm:$0xff]  ;;  %v14469_v20 = vpack.c.bf16 %v8367_v4, %v8366_v39  ;;  %v8370_v4 = vld [vmem:[%s22479_s10 + $0x160] sm:$0xff] }
 0x6cf   : > { %23008 = vst [vmem:[#allocation97_spill] sm:$0xff] %v20445_v58  ;;  %v10145_v19 = vadd.f32 1.0, %v20445_v58  ;;  %v5259_v12 = vpop.f32.mrb[58].mxu1  ;;  %14462 = vmatprep.subr.bf16.mxu1 %v14461_v6  ;;  %v15662_v21 = vld [vmem:[#allocation2 + $0x2f] sm:$0xff] }
 0x6d0   : > { %8948 = vmatmul.mubr.f32.gmra.mrb[164].mxu1 %v15660_v36  ;;  %v5261_v28 = vpop.f32.mrb[59].mxu1  ;;  %v20462_v36 = vadd.f32 %v19970_v27, %v5259_v12 }
 0x6d1   : > { %8952 = vmatprep.mubr.f32.mxu1 %v15661_v9  ;;  %14464 = vmatpush3.bf16.msra.mxu1 %v14461_v6  ;;  %v20465_v58 = vadd.f32 %v19973_v32, %v5261_v28  ;;  %v8368_v6 = vld [vmem:[%s22479_s10 + $0x150] sm:$0xff] }
 0x6d2   : > { %10235 = vrot.lane.b32.xlu1 %v10144_v17, %s15850_s17  ;;  %10237 = vrot.lane.b32.xlu0 %v10145_v19, %s15850_s17  ;;  %23009 = vst [vmem:[#allocation98_spill] sm:$0xff] %v20462_v36  ;;  %v8369_v19 = vld [vmem:[%s22479_s10 + $0x158] sm:$0xff]  ;;  %v15663_v17 = vld [vmem:[#allocation2 + $0x48] sm:$0xff] }
 0x6d3   : > { %v5265_v33 = vpop.f32.mrb[60].mxu1  ;;  %14466 = vmatprep.subr.bf16.mxu1 %v14465_v11  ;;  %23010 = vst [vmem:[#allocation99_spill] sm:$0xff] %v20465_v58  ;;  %v14473_v39 = vpack.c.bf16 %v8369_v19, %v8368_v6 }
 0x6d4   : > { %v20468_v3 = vadd.f32 %v19970_v27, %v5265_v33  ;;  %8953 = vmatmul.mubr.f32.gmra.mrb[166].mxu1 %v15662_v21  ;;  %v5267_v9 = vpop.f32.mrb[61].mxu1  ;;  %v8371_v33 = vld [vmem:[%s22479_s10 + $0x168] sm:$0xff] }
 0x6d5   : > { %v20477_v12 = vadd.f32 %v19973_v32, %v5267_v9  ;;  %8957 = vmatprep.mubr.f32.mxu1 %v15663_v17  ;;  %14468 = vmatpush3.bf16.msra.mxu1 %v14465_v11  ;;  %v10146_v11 = vadd.f32 1.0, %v20465_v58  ;;  %v15664_v9 = vld [vmem:[#allocation2 + $0x47] sm:$0xff]  ;;  %v14477_v6 = vpack.c.bf16 %v8371_v33, %v8370_v4 }
 0x6d6   : > { %23011 = vst [vmem:[#allocation100_spill] sm:$0xff] %v20468_v3  ;;  %10047 = vrot.lane.b32.xlu1 %v20462_v36, %s15850_s17  ;;  %10049 = vrot.lane.b32.xlu0 %v20468_v3, %s15850_s17  ;;  %v15665_v36 = vld [vmem:[#allocation2 + $0x50] sm:$0xff]  ;;  %v15667_v4 = vld [vmem:[#allocation2 + $0x68] sm:$0xff] }
 0x6d7   : > { %23012 = vst [vmem:[#allocation101_spill] sm:$0xff] %v20477_v12  ;;  %v10147_v21 = vadd.f32 1.0, %v20477_v12  ;;  %v5271_v28 = vpop.f32.mrb[62].mxu1  ;;  %14470 = vmatprep.subr.bf16.mxu1 %v14469_v20  ;;  %v8372_v12 = vld [vmem:[%s22479_s10 + $0x170] sm:$0xff] }
 0x6d8   : > { %8958 = vmatmul.mubr.f32.gmra.mrb[168].mxu1 %v15664_v9  ;;  %v5273_v17 = vpop.f32.mrb[63].mxu1  ;;  %v8373_v9 = vld [vmem:[%s22479_s10 + $0x178] sm:$0xff]  ;;  %v20502_v58 = vadd.f32 %v19970_v27, %v5271_v28  ;;  %v12014_v27 = vld [vmem:[%s22479_s10 + $0x400] sm:$0xff] }
 0x6d9   : > { %8962 = vmatprep.mubr.f32.mxu1 %v15665_v36  ;;  %14472 = vmatpush3.bf16.msra.mxu1 %v14469_v20  ;;  %v20505_v20 = vadd.f32 %v19973_v32, %v5273_v17  ;;  %v15666_v36 = vld [vmem:[#allocation2 + $0x4f] sm:$0xff]  ;;  %v14481_v33 = vpack.c.bf16 %v8373_v9, %v8372_v12  ;;  %v15668_v17 = vld [vmem:[#allocation2 + $0x67] sm:$0xff] }
 0x6da   : > { %10239 = vrot.lane.b32.xlu1 %v10146_v11, %s15850_s17  ;;  %10241 = vrot.lane.b32.xlu0 %v10147_v21, %s15850_s17  ;;  %23013 = vst [vmem:[#allocation102_spill] sm:$0xff] %v20502_v58  ;;  %v12015_v32 = vld [vmem:[%s22479_s10 + $0x408] sm:$0xff] }
 0x6db   : > { %v20493_v19 = vpop.f32.mrb[64].mxu1  ;;  %14474 = vmatprep.subr.bf16.mxu1 %v14473_v39  ;;  %23014 = vst [vmem:[#allocation103_spill] sm:$0xff] %v20505_v20  ;;  %v10148_v28 = vadd.f32 1.0, %v20505_v20  ;;  %v20519_v12 = vpack.c.bf16 %v12015_v32, %v12014_v27  ;;  %v15674_v27 = vld [vmem:[#allocation2 + $0x8f] sm:$0xff] }
 0x6dc   : > { %8963 = vmatmul.mubr.f32.gmra.mrb[170].mxu1 %v15666_v36  ;;  %v8491_v21 = vpop.f32.mrb[65].mxu1  ;;  %v15669_v36 = vld [vmem:[#allocation2 + $0x70] sm:$0xff]  ;;  %v15675_v20 = vld [vmem:[#allocation2 + $0xa8] sm:$0xff] }
 0x6dd   : > { %8967 = vmatprep.mubr.f32.mxu1 %v15667_v4  ;;  %14476 = vmatpush3.bf16.msra.mxu1 %v14473_v39  ;;  %v15670_v21 = vld [vmem:[#allocation2 + $0x6f] sm:$0xff] }
 0x6de   : > { %10051 = vrot.lane.b32.xlu1 %v20502_v58, %s15850_s17  ;;  %14478 = vmatprep.subr.bf16.mxu1 %v14477_v6  ;;  %v15671_v58 = vld [vmem:[#allocation2 + $0x88] sm:$0xff] }
 0x6df   : > { %v20509_v11 = vpop.f32.mrb[66].mxu1 }
 0x6e0   : > { %8968 = vmatmul.mubr.f32.gmra.mrb[172].mxu1 %v15668_v17  ;;  %v8496_v39 = vpop.f32.mrb[67].mxu1 }
 0x6e1   : > { %8972 = vmatprep.mubr.f32.mxu1 %v15669_v36  ;;  %14480 = vmatpush3.bf16.msra.mxu1 %v14477_v6  ;;  %v15672_v39 = vld [vmem:[#allocation2 + $0x87] sm:$0xff]  ;;  %v15673_v36 = vld [vmem:[#allocation2 + $0x90] sm:$0xff] }
 0x6e2   : > { %10243 = vrot.lane.b32.xlu1 %v10148_v28, %s15850_s17  ;;  %14482 = vmatprep.subr.bf16.mxu1 %v14481_v33 }
 0x6e3   : > { %v20521_v9 = vpop.f32.mrb[68].mxu1 }
 0x6e4   : > { %8973 = vmatmul.mubr.f32.gmra.mrb[174].mxu1 %v15670_v21  ;;  %v8501_v4 = vpop.f32.mrb[69].mxu1 }
 0x6e5   : > { %8977 = vmatprep.mubr.f32.mxu1 %v15671_v58  ;;  %14484 = vmatpush3.bf16.msra.mxu1 %v14481_v33  ;;  %v15676_v58 = vld [vmem:[#allocation2 + $0xa7] sm:$0xff]  ;;  %v15677_v4 = vld [vmem:[#allocation2 + $0xb0] sm:$0xff] }
 0x6e6   : > { %14534 = vmatprep.subr.bf16.mxu1 %v20519_v12 }
 0x6e7   : > { %v20524_v17 = vpop.f32.mrb[70].mxu1 }
 0x6e8   : > { %8978 = vmatmul.mubr.f32.gmra.mrb[176].mxu1 %v15672_v39  ;;  %v8506_v6 = vpop.f32.mrb[71].mxu1  ;;  %v15678_v39 = vld [vmem:[#allocation2 + $0xaf] sm:$0xff] }
 0x6e9   : > { %8982 = vmatprep.mubr.f32.mxu1 %v15673_v36  ;;  %v15679_v36 = vld [vmem:[#allocation2 + $0xc8] sm:$0xff] }
 0x6eb   : > { %v20526_v28 = vpop.f32.mrb[72].mxu1 }
 0x6ec   : > { %8983 = vmatmul.mubr.f32.gmra.mrb[178].mxu1 %v15674_v27  ;;  %v8511_v32 = vpop.f32.mrb[73].mxu1  ;;  %v15680_v27 = vld [vmem:[#allocation2 + $0xc7] sm:$0xff] }
 0x6ed   : > { %8987 = vmatprep.mubr.f32.mxu1 %v15675_v20  ;;  %v15681_v32 = vld [vmem:[#allocation2 + $0xd0] sm:$0xff] }
 0x6ef   : > { %v20528_v21 = vpop.f32.mrb[74].mxu1 }
 0x6f0   : > { %8988 = vmatmul.mubr.f32.gmra.mrb[180].mxu1 %v15676_v58  ;;  %v8516_v33 = vpop.f32.mrb[75].mxu1  ;;  %v15682_v58 = vld [vmem:[#allocation2 + $0xcf] sm:$0xff] }
 0x6f1   : > { %8992 = vmatprep.mubr.f32.mxu1 %v15677_v4  ;;  %v15683_v4 = vld [vmem:[#allocation2 + $0xe8] sm:$0xff] }
 0x6f3   : > { %v20530_v3 = vpop.f32.mrb[76].mxu1 }
 0x6f4   : > { %8993 = vmatmul.mubr.f32.gmra.mrb[182].mxu1 %v15678_v39  ;;  %v8521_v6 = vpop.f32.mrb[77].mxu1  ;;  %v20543_v39 = vld [vmem:[%s20540_s23] sm:$0xff] }
 0x6f5   : > { %8997 = vmatprep.mubr.f32.mxu1 %v15679_v36  ;;  %v20546_v6 = vld [vmem:[%s20540_s23 + $0x8] sm:$0xff] }
 0x6f6   : > { %v10375_v23 = vsel %vm10373_vm2, %v20546_v6, 0.0 }
 0x6f7   : > { %v20532_v8 = vpop.f32.mrb[78].mxu1 }
 0x6f8   : > { %8998 = vmatmul.mubr.f32.gmra.mrb[184].mxu1 %v15680_v27  ;;  %v8526_v20 = vpop.f32.mrb[79].mxu1  ;;  %v10443_v27 = vmul.f32 %v20543_v39, %v20543_v39 }
 0x6f9   : > { %9002 = vmatprep.mubr.f32.mxu1 %v15681_v32  ;;  %v10444_v20 = vmul.f32 %v20546_v6, %v20546_v6  ;;  %v15684_v32 = vld [vmem:[#allocation2 + $0xe7] sm:$0xff] }
 0x6fa   : > { %v10475_v37 = vsel %vm10373_vm2, %v10443_v27, 0.0  ;;  %v15687_v27 = vld [vmem:[#allocation2 + $0x108] sm:$0xff]  ;;  %v20752_v6 = vld [vmem:[%s20540_s23 + $0xe0] sm:$0xff] }
 0x6fb   : > { %v20534_v41 = vpop.f32.mrb[80].mxu1  ;;  %v10476_v22 = vsel %vm10373_vm2, %v10444_v20, 0.0  ;;  %23021 = vst [vmem:[#allocation110_spill] sm:$0xff] %v20752_v6 }
 0x6fc   : > { %9003 = vmatmul.mubr.f32.gmra.mrb[186].mxu1 %v15682_v58  ;;  %v8531_v33 = vpop.f32.mrb[81].mxu1  ;;  %v20555_v58 = vld [vmem:[%s20540_s23 + $0x10] sm:$0xff]  ;;  %v10477_v34 = vadd.f32 %v10476_v22, %v10475_v37 }
 0x6fd   : > { %9007 = vmatprep.mubr.f32.mxu1 %v15683_v4  ;;  %v15685_v4 = vld [vmem:[#allocation2 + $0xf0] sm:$0xff]  ;;  %v10445_v56 = vmul.f32 %v20555_v58, %v20555_v58 }
 0x6ff   : > { %v20548_v36 = vpop.f32.mrb[82].mxu1 }
 0x700   : > { %9008 = vmatmul.mubr.f32.gmra.mrb[188].mxu1 %v15684_v32  ;;  %v8536_v33 = vpop.f32.mrb[83].mxu1  ;;  %v10446_v32 = vmul.f32 %v20561_v57, %v20561_v57 }
 0x701   : > { %9012 = vmatprep.mubr.f32.mxu1 %v15685_v4  ;;  %v10478_v33 = vsel %vm10373_vm2, %v10445_v56, 0.0  ;;  %v20570_v4 = vld [vmem:[%s20540_s23 + $0x20] sm:$0xff]  ;;  %v10448_v56 = vmul.f32 %v20576_v16, %v20576_v16 }
 0x702   : > { %v10447_v1 = vmul.f32 %v20570_v4, %v20570_v4  ;;  %v10479_v20 = vadd.f32 %v10478_v33, %v10477_v34  ;;  %v10480_v5 = vsel %vm10373_vm2, %v10446_v32, 0.0  ;;  %v15689_v34 = vld [vmem:[#allocation2 + $0x110] sm:$0xff] }
 0x703   : > { %v20564_v7 = vpop.f32.mrb[84].mxu1  ;;  %v10484_v24 = vsel %vm10373_vm2, %v10448_v56, 0.0 }
 0x704   : > { %9013 = vmatmul.mubr.f32.gmra.mrb[190].mxu1 %v15686_v60  ;;  %v8541_v51 = vpop.f32.mrb[85].mxu1  ;;  %v10481_v60 = vadd.f32 %v10480_v5, %v10479_v20  ;;  %v10482_v37 = vsel %vm10373_vm2, %v10447_v1, 0.0  ;;  %v10450_v1 = vmul.f32 %v20590_v44, %v20590_v44 }
 0x705   : > { %9017 = vmatprep.mubr.f32.mxu1 %v15687_v27  ;;  %v15688_v51 = vld [vmem:[#allocation2 + $0x107] sm:$0xff]  ;;  %v20584_v27 = vld [vmem:[%s20540_s23 + $0x30] sm:$0xff] }
 0x706   : > { %v10449_v32 = vmul.f32 %v20584_v27, %v20584_v27  ;;  %v10483_v33 = vadd.f32 %v10482_v37, %v10481_v60  ;;  %v15691_v60 = vld [vmem:[#allocation2 + $0x128] sm:$0xff]  ;;  %v10488_v15 = vsel %vm10373_vm2, %v10450_v1, 0.0 }
 0x707   : > { %v20578_v22 = vpop.f32.mrb[86].mxu1 }
 0x708   : > { %9018 = vmatmul.mubr.f32.gmra.mrb[192].mxu1 %v15688_v51  ;;  %v8546_v59 = vpop.f32.mrb[87].mxu1  ;;  %v10485_v20 = vadd.f32 %v10484_v24, %v10483_v33  ;;  %v10486_v51 = vsel %vm10373_vm2, %v10449_v32, 0.0  ;;  %v10452_v32 = vmul.f32 %v20604_v55, %v20604_v55 }
 0x709   : > { %9022 = vmatprep.mubr.f32.mxu1 %v15689_v34  ;;  %v15690_v59 = vld [vmem:[#allocation2 + $0x10f] sm:$0xff]  ;;  %v20598_v34 = vld [vmem:[%s20540_s23 + $0x40] sm:$0xff] }
 0x70a   : > { %v10451_v56 = vmul.f32 %v20598_v34, %v20598_v34  ;;  %v10487_v37 = vadd.f32 %v10486_v51, %v10485_v20  ;;  %v15693_v20 = vld [vmem:[#allocation2 + $0x130] sm:$0xff]  ;;  %v10492_v53 = vsel %vm10373_vm2, %v10452_v32, 0.0 }
 0x70b   : > { %v20592_v5 = vpop.f32.mrb[88].mxu1 }
 0x70c   : > { %9023 = vmatmul.mubr.f32.gmra.mrb[194].mxu1 %v15690_v59  ;;  %v8551_v49 = vpop.f32.mrb[89].mxu1  ;;  %v10489_v33 = vadd.f32 %v10488_v15, %v10487_v37  ;;  %v10490_v59 = vsel %vm10373_vm2, %v10451_v56, 0.0  ;;  %v10454_v56 = vmul.f32 %v20618_v26, %v20618_v26 }
 0x70d   : > { %9027 = vmatprep.mubr.f32.mxu1 %v15691_v60  ;;  %v15692_v49 = vld [vmem:[#allocation2 + $0x127] sm:$0xff]  ;;  %v20612_v60 = vld [vmem:[%s20540_s23 + $0x50] sm:$0xff] }
 0x70e   : > { %v10453_v1 = vmul.f32 %v20612_v60, %v20612_v60  ;;  %v10491_v51 = vadd.f32 %v10490_v59, %v10489_v33  ;;  %v15695_v33 = vld [vmem:[#allocation2 + $0x148] sm:$0xff]  ;;  %v10496_v42 = vsel %vm10373_vm2, %v10454_v56, 0.0 }
 0x70f   : > { %v20606_v24 = vpop.f32.mrb[90].mxu1 }
 0x710   : > { %9028 = vmatmul.mubr.f32.gmra.mrb[196].mxu1 %v15692_v49  ;;  %v8556_v35 = vpop.f32.mrb[91].mxu1  ;;  %v10493_v37 = vadd.f32 %v10492_v53, %v10491_v51  ;;  %v10494_v49 = vsel %vm10373_vm2, %v10453_v1, 0.0  ;;  %v10456_v1 = vmul.f32 %v20632_v63, %v20632_v63 }
 0x711   : > { %9032 = vmatprep.mubr.f32.mxu1 %v15693_v20  ;;  %v15694_v35 = vld [vmem:[#allocation2 + $0x12f] sm:$0xff]  ;;  %v20626_v20 = vld [vmem:[%s20540_s23 + $0x60] sm:$0xff] }
 0x712   : > { %v10455_v32 = vmul.f32 %v20626_v20, %v20626_v20  ;;  %v10495_v59 = vadd.f32 %v10494_v49, %v10493_v37  ;;  %v15697_v37 = vld [vmem:[#allocation2 + $0x150] sm:$0xff]  ;;  %v10500_v18 = vsel %vm10373_vm2, %v10456_v1, 0.0 }
 0x713   : > { %v20620_v15 = vpop.f32.mrb[92].mxu1 }
 0x714   : > { %9033 = vmatmul.mubr.f32.gmra.mrb[198].mxu1 %v15694_v35  ;;  %v8561_v48 = vpop.f32.mrb[93].mxu1  ;;  %v10497_v51 = vadd.f32 %v10496_v42, %v10495_v59  ;;  %v10498_v35 = vsel %vm10373_vm2, %v10455_v32, 0.0  ;;  %v10458_v32 = vmul.f32 %v20646_v38, %v20646_v38 }
 0x715   : > { %9037 = vmatprep.mubr.f32.mxu1 %v15695_v33  ;;  %v15696_v48 = vld [vmem:[#allocation2 + $0x147] sm:$0xff]  ;;  %v20640_v33 = vld [vmem:[%s20540_s23 + $0x70] sm:$0xff] }
 0x716   : > { %v10457_v56 = vmul.f32 %v20640_v33, %v20640_v33  ;;  %v10499_v49 = vadd.f32 %v10498_v35, %v10497_v51  ;;  %v15699_v51 = vld [vmem:[#allocation2 + $0x168] sm:$0xff]  ;;  %v10504_v43 = vsel %vm10373_vm2, %v10458_v32, 0.0 }
 0x717   : > { %v20634_v53 = vpop.f32.mrb[94].mxu1 }
 0x718   : > { %9038 = vmatmul.mubr.f32.gmra.mrb[200].mxu1 %v15696_v48  ;;  %v8566_v30 = vpop.f32.mrb[95].mxu1  ;;  %v10501_v59 = vadd.f32 %v10500_v18, %v10499_v49  ;;  %v10502_v48 = vsel %vm10373_vm2, %v10457_v56, 0.0  ;;  %v10460_v56 = vmul.f32 %v20660_v31, %v20660_v31 }
 0x719   : > { %9042 = vmatprep.mubr.f32.mxu1 %v15697_v37  ;;  %v15698_v30 = vld [vmem:[#allocation2 + $0x14f] sm:$0xff]  ;;  %v20654_v37 = vld [vmem:[%s20540_s23 + $0x80] sm:$0xff] }
 0x71a   : > { %v10459_v1 = vmul.f32 %v20654_v37, %v20654_v37  ;;  %v10503_v35 = vadd.f32 %v10502_v48, %v10501_v59  ;;  %v15701_v59 = vld [vmem:[#allocation2 + $0x170] sm:$0xff]  ;;  %v10508_v14 = vsel %vm10373_vm2, %v10460_v56, 0.0 }
 0x71b   : > { %v20648_v42 = vpop.f32.mrb[96].mxu1 }
 0x71c   : > { %9043 = vmatmul.mubr.f32.gmra.mrb[202].mxu1 %v15698_v30  ;;  %v8571_v61 = vpop.f32.mrb[97].mxu1  ;;  %v10505_v49 = vadd.f32 %v10504_v43, %v10503_v35  ;;  %v10506_v30 = vsel %vm10373_vm2, %v10459_v1, 0.0  ;;  %v10462_v1 = vmul.f32 %v20674_v25, %v20674_v25 }
 0x71d   : > { %9047 = vmatprep.mubr.f32.mxu1 %v15699_v51  ;;  %v15700_v61 = vld [vmem:[#allocation2 + $0x167] sm:$0xff]  ;;  %v20668_v51 = vld [vmem:[%s20540_s23 + $0x90] sm:$0xff] }
 0x71e   : > { %v10461_v32 = vmul.f32 %v20668_v51, %v20668_v51  ;;  %v10507_v48 = vadd.f32 %v10506_v30, %v10505_v49  ;;  %v15703_v49 = vld [vmem:[#allocation2 + $0x188] sm:$0xff]  ;;  %v10512_v50 = vsel %vm10373_vm2, %v10462_v1, 0.0 }
 0x71f   : > { %v20662_v18 = vpop.f32.mrb[98].mxu1 }
 0x720   : > { %9048 = vmatmul.mubr.f32.gmra.mrb[204].mxu1 %v15700_v61  ;;  %v8576_v45 = vpop.f32.mrb[99].mxu1  ;;  %v10509_v35 = vadd.f32 %v10508_v14, %v10507_v48  ;;  %v10510_v61 = vsel %vm10373_vm2, %v10461_v32, 0.0  ;;  %v10464_v32 = vmul.f32 %v20688_v29, %v20688_v29 }
 0x721   : > { %9052 = vmatprep.mubr.f32.mxu1 %v15701_v59  ;;  %v15702_v45 = vld [vmem:[#allocation2 + $0x16f] sm:$0xff]  ;;  %v20682_v59 = vld [vmem:[%s20540_s23 + $0xa0] sm:$0xff] }
 0x722   : > { %v10463_v56 = vmul.f32 %v20682_v59, %v20682_v59  ;;  %v10511_v30 = vadd.f32 %v10510_v61, %v10509_v35  ;;  %v15705_v35 = vld [vmem:[#allocation2 + $0x190] sm:$0xff]  ;;  %v10516_v13 = vsel %vm10373_vm2, %v10464_v32, 0.0  ;;  %v10545_v32 = vld [vmem:[%s22472_s3 + $0x8] sm:$0xff] }
 0x723   : > { %v20676_v43 = vpop.f32.mrb[100].mxu1 }
 0x724   : > { %9053 = vmatmul.mubr.f32.gmra.mrb[206].mxu1 %v15702_v45  ;;  %v8581_v47 = vpop.f32.mrb[101].mxu1  ;;  %v10513_v48 = vadd.f32 %v10512_v50, %v10511_v30  ;;  %v10514_v45 = vsel %vm10373_vm2, %v10463_v56, 0.0  ;;  %v10466_v56 = vmul.f32 %v20702_v10, %v20702_v10  ;;  %v10471_v10 = vmul.f32 %v20752_v6, %v20752_v6 }
 0x725   : > { %9057 = vmatprep.mubr.f32.mxu1 %v15703_v49  ;;  %v15704_v47 = vld [vmem:[#allocation2 + $0x187] sm:$0xff]  ;;  %v20696_v49 = vld [vmem:[%s20540_s23 + $0xb0] sm:$0xff] }
 0x726   : > { %v10465_v1 = vmul.f32 %v20696_v49, %v20696_v49  ;;  %v10515_v61 = vadd.f32 %v10514_v45, %v10513_v48  ;;  %v20716_v48 = vld [vmem:[%s20540_s23 + $0xc0] sm:$0xff] }
 0x727   : > { %v20690_v14 = vpop.f32.mrb[102].mxu1  ;;  %23016 = vst [vmem:[#allocation105_spill] sm:$0xff] %v20716_v48 }
 0x728   : > { %9058 = vmatmul.mubr.f32.gmra.mrb[208].mxu1 %v15704_v47  ;;  %v8586_v62 = vpop.f32.mrb[103].mxu1  ;;  %v10517_v30 = vadd.f32 %v10516_v13, %v10515_v61  ;;  %v10518_v47 = vsel %vm10373_vm2, %v10465_v1, 0.0  ;;  %v10467_v13 = vmul.f32 %v20716_v48, %v20716_v48  ;;  %v20723_v61 = vld [vmem:[%s20540_s23 + $0xc8] sm:$0xff] }
 0x729   : > { %9062 = vmatprep.mubr.f32.mxu1 %v15705_v35  ;;  %v15706_v62 = vld [vmem:[#allocation2 + $0x18f] sm:$0xff]  ;;  %v10544_v35 = vld [vmem:[%s22472_s3] sm:$0xff]  ;;  %23018 = vst [vmem:[#allocation107_spill] sm:$0xff] %v20723_v61 }
 0x72a   : > { %v20718_v46 = vpack.c.bf16 %v10545_v32, %v10544_v35  ;;  %v10519_v1 = vadd.f32 %v10518_v47, %v10517_v30  ;;  %v15708_v35 = vld [vmem:[#allocation2 + $0x1a7] sm:$0xff]  ;;  %v20734_v30 = vld [vmem:[%s20540_s23 + $0xd0] sm:$0xff] }
 0x72b   : > { %v20704_v50 = vpop.f32.mrb[104].mxu1  ;;  %23019 = vst [vmem:[#allocation108_spill] sm:$0xff] %v20734_v30  ;;  %v15709_v32 = vld [vmem:[#allocation2 + $0x1b0] sm:$0xff] }
 0x72c   : > { %9063 = vmatmul.mubr.f32.gmra.mrb[210].mxu1 %v15706_v62  ;;  %v8591_v45 = vpop.f32.mrb[105].mxu1  ;;  %23017 = vst [vmem:[#allocation106_spill] sm:$0xff] %v20718_v46  ;;  %v10520_v62 = vsel %vm10373_vm2, %v10466_v56, 0.0  ;;  %14579 = vmatpush3.bf16.msra.mxu0 %v20718_v46  ;;  %v10374_v56 = vsel %vm10373_vm2, %v20543_v39, 0.0  ;;  %v15710_v48 = vld [vmem:[#allocation2 + $0x1af] sm:$0xff] }
 0x72d   : > { %9067 = vmatprep.mubr.f32.mxu1 %v15707_v40  ;;  %v10468_v45 = vmul.f32 %v20723_v61, %v20723_v61  ;;  %v10521_v52 = vadd.f32 %v10520_v62, %v10519_v1  ;;  %v10522_v40 = vsel %vm10373_vm2, %v10467_v13, 0.0  ;;  %14580 = vmatprep.subr.bf16.mxu0 %v22854_v0  ;;  %v10469_v1 = vmul.f32 %v20734_v30, %v20734_v30 }
 0x72e   : > { %v10376_v30 = vadd.f32 %v10375_v23, %v10374_v56 }
 0x72f   : > { %v20726_v54 = vpop.f32.mrb[106].mxu1  ;;  %v10523_v13 = vadd.f32 %v10522_v40, %v10521_v52  ;;  %v10524_v62 = vsel %vm10373_vm2, %v10468_v45, 0.0  ;;  %v15711_v40 = vld [vmem:[#allocation2 + $0x1c8] sm:$0xff]  ;;  %v10377_v45 = vsel %vm10373_vm2, %v20555_v58, 0.0  ;;  %v20768_v58 = vld [vmem:[%s20540_s23 + $0xf0] sm:$0xff] }
 0x730   : > { %9068 = vmatmul.mubr.f32.gmra.mrb[212].mxu1 %v15708_v35  ;;  %v8596_v47 = vpop.f32.mrb[107].mxu1  ;;  %v20744_v35 = vld [vmem:[%s20540_s23 + $0xd8] sm:$0xff]  ;;  %23023 = vst [vmem:[#allocation112_spill] sm:$0xff] %v20768_v58 }
 0x731   : > { %9072 = vmatprep.mubr.f32.mxu1 %v15709_v32  ;;  %23020 = vst [vmem:[#allocation109_spill] sm:$0xff] %v20744_v35  ;;  %v10470_v39 = vmul.f32 %v20744_v35, %v20744_v35  ;;  %v10525_v47 = vadd.f32 %v10524_v62, %v10523_v13  ;;  %v10526_v32 = vsel %vm10373_vm2, %v10469_v1, 0.0  ;;  %v20760_v62 = vld [vmem:[%s20540_s23 + $0xe8] sm:$0xff]  ;;  %v10530_v1 = vsel %vm10373_vm2, %v10471_v10, 0.0 }
 0x732   : > { %23022 = vst [vmem:[#allocation111_spill] sm:$0xff] %v20760_v62  ;;  %v10472_v23 = vmul.f32 %v20760_v62, %v20760_v62 }
 0x733   : > { %v20746_v61 = vpop.f32.mrb[108].mxu1  ;;  %v10527_v46 = vadd.f32 %v10526_v32, %v10525_v47  ;;  %v10528_v13 = vsel %vm10373_vm2, %v10470_v39, 0.0  ;;  %v15713_v47 = vld [vmem:[#allocation2 + $0x1d0] sm:$0xff]  ;;  %v10379_v39 = vsel %vm10373_vm2, %v20561_v57, 0.0  ;;  %v10473_v32 = vmul.f32 %v20768_v58, %v20768_v58  ;;  %v15716_v58 = vld [vmem:[#allocation2 + $0x1e7] sm:$0xff] }
 0x734   : > { %9073 = vmatmul.mubr.f32.gmra.mrb[214].mxu1 %v15710_v48  ;;  %v8601_v52 = vpop.f32.mrb[109].mxu1  ;;  %v10532_v62 = vsel %vm10373_vm2, %v10472_v23, 0.0  ;;  %v10546_v57 = vld [vmem:[%s22472_s3 + $0x10] sm:$0xff]  ;;  %v10547_v23 = vld [vmem:[%s22472_s3 + $0x18] sm:$0xff] }
 0x735   : > { %9077 = vmatprep.mubr.f32.mxu1 %v15711_v40  ;;  %v10529_v56 = vadd.f32 %v10528_v13, %v10527_v46  ;;  %v15712_v52 = vld [vmem:[#allocation2 + $0x1c7] sm:$0xff]  ;;  %v10378_v40 = vadd.f32 %v10377_v45, %v10376_v30  ;;  %v20776_v46 = vld [vmem:[%s20540_s23 + $0xf8] sm:$0xff]  ;;  %v15714_v45 = vld [vmem:[#allocation2 + $0x1cf] sm:$0xff] }
 0x736   : > { %23024 = vst [vmem:[#allocation113_spill] sm:$0xff] %v20776_v46  ;;  %v10474_v13 = vmul.f32 %v20776_v46, %v20776_v46 }
 0x737   : > { %v20762_v48 = vpop.f32.mrb[110].mxu1  ;;  %v10531_v35 = vadd.f32 %v10530_v1, %v10529_v56  ;;  %v10380_v56 = vadd.f32 %v10379_v39, %v10378_v40  ;;  %v10548_v40 = vld [vmem:[%s22472_s3 + $0x20] sm:$0xff]  ;;  %v10549_v39 = vld [vmem:[%s22472_s3 + $0x28] sm:$0xff] }
 0x738   : > { %9078 = vmatmul.mubr.f32.gmra.mrb[216].mxu1 %v15712_v52  ;;  %v8606_v6 = vpop.f32.mrb[111].mxu1  ;;  %v15715_v52 = vld [vmem:[#allocation2 + $0x1e8] sm:$0xff] }
 0x739   : > { %9082 = vmatprep.mubr.f32.mxu1 %v15713_v47  ;;  %v10533_v30 = vadd.f32 %v10532_v62, %v10531_v35  ;;  %v10534_v6 = vsel %vm10373_vm2, %v10473_v32, 0.0  ;;  %v20789_v47 = vpack.c.bf16 %v10547_v23, %v10546_v57  ;;  %v10381_v35 = vsel %vm10373_vm2, %v20570_v4, 0.0  ;;  %v8290_v23 = vld [vmem:[#allocation2 + $0x9] sm:$0xff] }
 0x73a   : > { %v10536_v32 = vsel %vm10373_vm2, %v10474_v13, 0.0  ;;  %v10382_v4 = vadd.f32 %v10381_v35, %v10380_v56  ;;  %v12017_v56 = vld [vmem:[%s22479_s10 + $0x418] sm:$0xff]  ;;  %v15718_v35 = vld [vmem:[#allocation2 + $0x1ef] sm:$0xff] }
 0x73b   : > { %v20778_v10 = vpop.f32.mrb[112].mxu1  ;;  %v10535_v62 = vadd.f32 %v10534_v6, %v10533_v30  ;;  %14582 = vmatpush3.bf16.msra.mxu0 %v20789_v47  ;;  %v15717_v30 = vld [vmem:[#allocation2 + $0x1f0] sm:$0xff]  ;;  %v20804_v6 = vpack.c.bf16 %v10549_v39, %v10548_v40 }
 0x73c   : > { %23025 = vst [vmem:[#allocation114_spill] sm:$0xff] %v20778_v10  ;;  %9083 = vmatmul.mubr.f32.gmra.mrb[218].mxu1 %v15714_v45  ;;  %v8611_v1 = vpop.f32.mrb[113].mxu1  ;;  %v8252_v10 = vld [vmem:[#allocation2 + $0x227] sm:$0xff]  ;;  %14583 = vmatprep.subr.bf16.mxu0 %v22854_v0  ;;  %v8291_v40 = vld [vmem:[#allocation2 + $0x11] sm:$0xff] }
 0x73d   : > { %9087 = vmatprep.mubr.f32.mxu1 %v15715_v52  ;;  %v10537_v46 = vadd.f32 %v10536_v32, %v10535_v62  ;;  %9587 = vmatmul.mubr.f32.gmra.mrb[124].mxu0 %v8252_v10  ;;  %v12016_v52 = vld [vmem:[%s22479_s10 + $0x410] sm:$0xff] }
 0x73e   : > { %9591 = vmatprep.mubr.f32.mxu0 %v20411_v2  ;;  %v10550_v39 = vld [vmem:[%s22472_s3 + $0x30] sm:$0xff] }
 0x73f   : > { %v20794_v45 = vpop.f32.mrb[114].mxu1  ;;  %v10538_v57 = vrot.slane %v10537_v46, 4  ;;  %14585 = vmatpush3.bf16.msra.mxu0 %v20804_v6 }
 0x740   : > { %9088 = vmatmul.mubr.f32.gmra.mrb[220].mxu1 %v15716_v58  ;;  %v8616_v13 = vpop.f32.mrb[115].mxu1  ;;  %v10383_v58 = vsel %vm10373_vm2, %v20576_v16, 0.0  ;;  %v8253_v16 = vld [vmem:[#allocation2 + $0x22f] sm:$0xff]  ;;  %14586 = vmatprep.subr.bf16.mxu0 %v22854_v0 }
 0x741   : > { %9092 = vmatprep.mubr.f32.mxu1 %v15717_v30  ;;  %v10539_v10 = vadd.f32 %v10538_v57, %v10537_v46  ;;  %v10384_v62 = vadd.f32 %v10383_v58, %v10382_v4  ;;  %9592 = vmatmul.mubr.f32.gmra.mrb[126].mxu0 %v8253_v16  ;;  %v10551_v13 = vld [vmem:[%s22472_s3 + $0x38] sm:$0xff]  ;;  %v10385_v46 = vsel %vm10373_vm2, %v20584_v27, 0.0  ;;  %v14537_v57 = vpack.c.bf16 %v12017_v56, %v12016_v52  ;;  %v12018_v58 = vld [vmem:[%s22479_s10 + $0x420] sm:$0xff]  ;;  %v15719_v52 = vld [vmem:[#allocation2 + $0x29] sm:$0xff] }
 0x742   : > { %v10387_v56 = vsel %vm10373_vm2, %v20590_v44, 0.0  ;;  %13998 = vmatprep.mubr.msk.f32.mxu0 %vm15851_vm3, %v20411_v2  ;;  %v10389_v2 = vsel %vm10373_vm2, %v20598_v34, 0.0 }
 0x743   : > { %v20809_v1 = vpop.f32.mrb[116].mxu1  ;;  %v10540_v30 = vrot.slane %v10539_v10, 2 }
 0x744   : > { %9093 = vmatmul.mubr.f32.gmra.mrb[222].mxu1 %v15718_v35  ;;  %v8621_v32 = vpop.f32.mrb[117].mxu1  ;;  %v20827_v35 = vpack.c.bf16 %v10551_v13, %v10550_v39 }
 0x745   : > { %13835 = vmatprep.mubr.f32.mxu1 %v8290_v23  ;;  %v12019_v23 = vld [vmem:[%s22479_s10 + $0x428] sm:$0xff]  ;;  %v10541_v16 = vadd.f32 %v10540_v30, %v10539_v10  ;;  %v10386_v32 = vadd.f32 %v10385_v46, %v10384_v62  ;;  %v12020_v62 = vld [vmem:[%s22479_s10 + $0x430] sm:$0xff] }
 0x746   : > { %23026 = vst [vmem:[#allocation115_spill] sm:$0xff] %v20827_v35  ;;  %14588 = vmatpush3.bf16.msra.mxu0 %v20827_v35  ;;  %v14541_v13 = vpack.c.bf16 %v12019_v23, %v12018_v58  ;;  %v15720_v46 = vld [vmem:[#allocation2 + $0x31] sm:$0xff]  ;;  %v20851_v58 = vld [vmem:[#allocation2 + $0x49] sm:$0xff] }
 0x747   : > { %v20829_v4 = vpop.f32.mrb[118].mxu1  ;;  %v10542_v39 = vrot.slane %v10541_v16, 1  ;;  %v10388_v44 = vadd.f32 %v10387_v56, %v10386_v32  ;;  %v12023_v32 = vld [vmem:[%s22479_s10 + $0x448] sm:$0xff]  ;;  %v20865_v56 = vld [vmem:[#allocation2 + $0x51] sm:$0xff] }
 0x748   : > { %13836 = vmatmul.mubr.f32.vlgmr.msra.gmra.mrb[224].mxu1 %v8291_v40  ;;  %v8626_v27 = vpop.f32.mrb[119].mxu1  ;;  %v20914_v35 = vld [vmem:[#allocation2 + $0xb1] sm:$0xff] }
 0x749   : > { %14536 = vmatpush3.bf16.msra.mxu1 %v20519_v12  ;;  %13838 = vmatprep.mubr.f32.mxu1 %v15719_v52  ;;  %v12021_v12 = vld [vmem:[%s22479_s10 + $0x438] sm:$0xff]  ;;  %v10543_v40 = vadd.f32 %v10542_v39, %v10541_v16  ;;  %v12022_v16 = vld [vmem:[%s22479_s10 + $0x440] sm:$0xff]  ;;  %v10390_v34 = vadd.f32 %v10389_v2, %v10388_v44  ;;  %v10391_v39 = vsel %vm10373_vm2, %v20604_v55, 0.0  ;;  %v20884_v2 = vld [vmem:[#allocation2 + $0x89] sm:$0xff]  ;;  %v10393_v55 = vsel %vm10373_vm2, %v20612_v60, 0.0  ;;  %23031 = vst [vmem:[#allocation120_spill] sm:$0xff] %v20914_v35 }
 0x74a   : > { %14538 = vmatprep.subr.bf16.mxu1 %v14537_v57  ;;  %v14545_v23 = vpack.c.bf16 %v12021_v12, %v12020_v62  ;;  %v14549_v62 = vpack.c.bf16 %v12023_v32, %v12022_v16  ;;  %v10395_v60 = vsel %vm10373_vm2, %v20618_v26, 0.0 }
 0x74b   : > { %v20843_v10 = vpop.f32.mrb[120].mxu1  ;;  %13999 = vmatmul.mubr.msk.f32.vlgmr.msra.gmra.mrb[128].mxu0 %vm10373_vm2, %v10543_v40  ;;  %v12024_v40 = vld [vmem:[%s22479_s10 + $0x450] sm:$0xff] }
 0x74c   : > { %23027 = vst [vmem:[#allocation116_spill] sm:$0xff] %v20843_v10  ;;  %13839 = vmatmul.mubr.f32.gmra.mrb[226].mxu1 %v15720_v46  ;;  %v8631_v30 = vpop.f32.mrb[121].mxu1  ;;  %v12025_v46 = vld [vmem:[%s22479_s10 + $0x458] sm:$0xff] }
 0x74d   : > { %13841 = vmatprep.mubr.f32.mxu1 %v20851_v58  ;;  %14540 = vmatpush3.bf16.msra.mxu1 %v14537_v57  ;;  %v20868_v57 = vld [vmem:[#allocation2 + $0x69] sm:$0xff]  ;;  %v20881_v30 = vld [vmem:[#allocation2 + $0x71] sm:$0xff]  ;;  %v14553_v16 = vpack.c.bf16 %v12025_v46, %v12024_v40 }
 0x74e   : > { %14542 = vmatprep.subr.bf16.mxu1 %v14541_v13 }
 0x74f   : > { %v20857_v27 = vpop.f32.mrb[122].mxu1 }
 0x750   : > { %v8636_v52 = vpop.f32.mrb[123].mxu1  ;;  %13842 = vmatmul.mubr.f32.gmra.mrb[228].mxu1 %v20865_v56 }
 0x751   : > { %13844 = vmatprep.mubr.f32.mxu1 %v20868_v57  ;;  %14544 = vmatpush3.bf16.msra.mxu1 %v14541_v13  ;;  %v10392_v13 = vadd.f32 %v10391_v39, %v10390_v34  ;;  %v12026_v52 = vld [vmem:[%s22479_s10 + $0x460] sm:$0xff]  ;;  %v12027_v34 = vld [vmem:[%s22479_s10 + $0x468] sm:$0xff] }
 0x752   : > { %14546 = vmatprep.subr.bf16.mxu1 %v14545_v23  ;;  %v14557_v40 = vpack.c.bf16 %v12027_v34, %v12026_v52  ;;  %v20920_v52 = vld [vmem:[#allocation2 + $0xc9] sm:$0xff]  ;;  %v10397_v34 = vsel %vm10373_vm2, %v20626_v20, 0.0  ;;  %v10399_v20 = vsel %vm10373_vm2, %v20632_v63, 0.0  ;;  %v10401_v63 = vsel %vm10373_vm2, %v20640_v33, 0.0 }
 0x753   : > { %v20873_v12 = vpop.f32.mrb[124].mxu1  ;;  %v10403_v33 = vsel %vm10373_vm2, %v20646_v38, 0.0  ;;  %v10405_v38 = vsel %vm10373_vm2, %v20654_v37, 0.0  ;;  %v10407_v37 = vsel %vm10373_vm2, %v20660_v31, 0.0  ;;  %v10409_v31 = vsel %vm10373_vm2, %v20668_v51, 0.0 }
 0x754   : > { %23028 = vst [vmem:[#allocation117_spill] sm:$0xff] %v20873_v12  ;;  %v8641_v44 = vpop.f32.mrb[125].mxu1  ;;  %13845 = vmatmul.mubr.f32.gmra.mrb[230].mxu1 %v20881_v30  ;;  %v20900_v12 = vld [vmem:[#allocation2 + $0xa9] sm:$0xff]  ;;  %v10411_v51 = vsel %vm10373_vm2, %v20674_v25, 0.0  ;;  %v10413_v25 = vsel %vm10373_vm2, %v20682_v59, 0.0  ;;  %v10415_v59 = vsel %vm10373_vm2, %v20688_v29, 0.0 }
 0x755   : > { %13847 = vmatprep.mubr.f32.mxu1 %v20884_v2  ;;  %14548 = vmatpush3.bf16.msra.mxu1 %v14545_v23  ;;  %v20897_v44 = vld [vmem:[#allocation2 + $0x91] sm:$0xff]  ;;  %v10394_v23 = vadd.f32 %v10393_v55, %v10392_v13 }
 0x756   : > { %14550 = vmatprep.subr.bf16.mxu1 %v14549_v62 }
 0x757   : > { %v20889_v32 = vpop.f32.mrb[126].mxu1  ;;  %v10396_v26 = vadd.f32 %v10395_v60, %v10394_v23  ;;  %v20934_v60 = vld [vmem:[#allocation2 + $0xe9] sm:$0xff] }
 0x758   : > { %23029 = vst [vmem:[#allocation118_spill] sm:$0xff] %v20889_v32  ;;  %v8646_v39 = vpop.f32.mrb[127].mxu1  ;;  %13848 = vmatmul.mubr.f32.gmra.mrb[232].mxu1 %v20897_v44  ;;  %v12029_v32 = vld [vmem:[%s22479_s10 + $0x478] sm:$0xff] }
 0x759   : > { %13850 = vmatprep.mubr.f32.mxu1 %v20900_v12  ;;  %14552 = vmatpush3.bf16.msra.mxu1 %v14549_v62  ;;  %v12028_v39 = vld [vmem:[%s22479_s10 + $0x470] sm:$0xff] }
 0x75a   : > { %14554 = vmatprep.subr.bf16.mxu1 %v14553_v16 }
 0x75b   : > { %v13757_v46 = vpop.f32.mrb[128].mxu1 }
 0x75c   : > { %v20912_v13 = vadd.f32 %v13757_v46, %v20509_v11  ;;  %v8714_v55 = vpop.f32.mrb[129].mxu1  ;;  %13851 = vmatmul.mubr.f32.gmra.mrb[234].mxu1 %v20914_v35  ;;  %v14561_v11 = vpack.c.bf16 %v12029_v32, %v12028_v39  ;;  %v20928_v35 = vld [vmem:[#allocation2 + $0xd1] sm:$0xff] }
 0x75d   : > { %v20918_v62 = vadd.f32 %v8714_v55, %v20493_v19  ;;  %13853 = vmatprep.mubr.f32.mxu1 %v20920_v52  ;;  %14556 = vmatpush3.bf16.msra.mxu1 %v14553_v16  ;;  %v10398_v19 = vadd.f32 %v10397_v34, %v10396_v26  ;;  %v20942_v39 = vld [vmem:[#allocation2 + $0xf1] sm:$0xff]  ;;  %v20948_v55 = vld [vmem:[#allocation2 + $0x109] sm:$0xff] }
 0x75e   : > { %23030 = vst [vmem:[#allocation119_spill] sm:$0xff] %v20912_v13  ;;  %14558 = vmatprep.subr.bf16.mxu1 %v14557_v40  ;;  %v20957_v34 = vld [vmem:[#allocation2 + $0x111] sm:$0xff] }
 0x75f   : > { %v13760_v46 = vpop.f32.mrb[130].mxu1 }
 0x760   : > { %v20926_v13 = vadd.f32 %v13760_v46, %v20524_v17  ;;  %v8724_v10 = vpop.f32.mrb[131].mxu1  ;;  %13854 = vmatmul.mubr.f32.gmra.mrb[236].mxu1 %v20928_v35 }
 0x761   : > { %v20932_v23 = vadd.f32 %v8724_v10, %v20521_v9  ;;  %13856 = vmatprep.mubr.f32.mxu1 %v20934_v60  ;;  %14560 = vmatpush3.bf16.msra.mxu1 %v14557_v40  ;;  %v10400_v9 = vadd.f32 %v10399_v20, %v10398_v19  ;;  %v20963_v19 = vld [vmem:[#allocation2 + $0x129] sm:$0xff] }
 0x762   : > { %14562 = vmatprep.subr.bf16.mxu1 %v14561_v11 }
 0x763   : > { %v13763_v17 = vpop.f32.mrb[132].mxu1 }
 0x764   : > { %v20940_v16 = vadd.f32 %v13763_v17, %v20528_v21  ;;  %v8734_v32 = vpop.f32.mrb[133].mxu1  ;;  %13857 = vmatmul.mubr.f32.gmra.mrb[238].mxu1 %v20942_v39  ;;  %v20971_v17 = vld [vmem:[#allocation2 + $0x131] sm:$0xff] }
 0x765   : > { %v20946_v10 = vadd.f32 %v8734_v32, %v20526_v28  ;;  %13859 = vmatprep.mubr.f32.mxu1 %v20948_v55  ;;  %14564 = vmatpush3.bf16.msra.mxu1 %v14561_v11  ;;  %v10402_v28 = vadd.f32 %v10401_v63, %v10400_v9  ;;  %v20977_v9 = vld [vmem:[#allocation2 + $0x149] sm:$0xff] }
 0x766   : > { %14565 = vmatprep.subr.bf16.mxu1 %v22854_v0 }
 0x767   : > { %v13766_v21 = vpop.f32.mrb[134].mxu1  ;;  %v10404_v32 = vadd.f32 %v10403_v33, %v10402_v28  ;;  %v20991_v33 = vld [vmem:[#allocation2 + $0x169] sm:$0xff] }
 0x768   : > { %v20955_v40 = vadd.f32 %v13766_v21, %v20532_v8  ;;  %v8744_v26 = vpop.f32.mrb[135].mxu1  ;;  %13860 = vmatmul.mubr.f32.gmra.mrb[240].mxu1 %v20957_v34 }
 0x769   : > { %v20961_v46 = vadd.f32 %v8744_v26, %v20530_v3  ;;  %13862 = vmatprep.mubr.f32.mxu1 %v20963_v19  ;;  %v20985_v26 = vld [vmem:[#allocation2 + $0x151] sm:$0xff]  ;;  %v10406_v28 = vadd.f32 %v10405_v38, %v10404_v32  ;;  %v21005_v38 = vld [vmem:[#allocation2 + $0x189] sm:$0xff] }
 0x76b   : > { %v13769_v11 = vpop.f32.mrb[136].mxu1  ;;  %v10408_v32 = vadd.f32 %v10407_v37, %v10406_v28  ;;  %v21019_v37 = vld [vmem:[#allocation2 + $0x1a9] sm:$0xff] }
 0x76c   : > { %v20969_v8 = vadd.f32 %v13769_v11, %v20548_v36  ;;  %v8754_v20 = vpop.f32.mrb[137].mxu1  ;;  %13863 = vmatmul.mubr.f32.gmra.mrb[242].mxu1 %v20971_v17 }
 0x76d   : > { %v20975_v3 = vadd.f32 %v8754_v20, %v20534_v41  ;;  %13865 = vmatprep.mubr.f32.mxu1 %v20977_v9  ;;  %v10410_v28 = vadd.f32 %v10409_v31, %v10408_v32  ;;  %v21033_v31 = vld [vmem:[#allocation2 + $0x1c9] sm:$0xff] }
 0x76f   : > { %v13772_v63 = vpop.f32.mrb[138].mxu1  ;;  %v10412_v32 = vadd.f32 %v10411_v51, %v10410_v28  ;;  %v21047_v51 = vld [vmem:[#allocation2 + $0x1e9] sm:$0xff] }
 0x770   : > { %v20983_v36 = vadd.f32 %v13772_v63, %v20578_v22  ;;  %v8764_v21 = vpop.f32.mrb[139].mxu1  ;;  %13866 = vmatmul.mubr.f32.gmra.mrb[244].mxu1 %v20985_v26  ;;  %v20999_v63 = vld [vmem:[#allocation2 + $0x171] sm:$0xff] }
 0x771   : > { %v20989_v41 = vadd.f32 %v8764_v21, %v20564_v7  ;;  %13868 = vmatprep.mubr.f32.mxu1 %v20991_v33  ;;  %v10414_v28 = vadd.f32 %v10413_v25, %v10412_v32  ;;  %v10417_v25 = vsel %vm10373_vm2, %v20696_v49, 0.0 }
 0x773   : > { %v13775_v11 = vpop.f32.mrb[140].mxu1  ;;  %v10416_v32 = vadd.f32 %v10415_v59, %v10414_v28  ;;  %v23038_v28 = vld [vmem:[#allocation104_spill] sm:$0xff] }
 0x774   : > { %v20997_v22 = vadd.f32 %v13775_v11, %v20606_v24  ;;  %v8774_v20 = vpop.f32.mrb[141].mxu1  ;;  %13869 = vmatmul.mubr.f32.gmra.mrb[246].mxu1 %v20999_v63 }
 0x775   : > { %v21003_v7 = vadd.f32 %v8774_v20, %v20592_v5  ;;  %13871 = vmatprep.mubr.f32.mxu1 %v21005_v38 }
 0x776   : > { %23032 = vst [vmem:[#allocation121_spill] sm:$0xff] %v20997_v22  ;;  %v21013_v22 = vld [vmem:[#allocation2 + $0x191] sm:$0xff] }
 0x777   : > { %v13778_v21 = vpop.f32.mrb[142].mxu1 }
 0x778   : > { %v21011_v24 = vadd.f32 %v13778_v21, %v20634_v53  ;;  %v8784_v11 = vpop.f32.mrb[143].mxu1  ;;  %13872 = vmatmul.mubr.f32.gmra.mrb[248].mxu1 %v21013_v22 }
 0x779   : > { %v21017_v5 = vadd.f32 %v8784_v11, %v20620_v15  ;;  %13874 = vmatprep.mubr.f32.mxu1 %v21019_v37 }
 0x77a   : > { %23033 = vst [vmem:[#allocation122_spill] sm:$0xff] %v21011_v24  ;;  %v21027_v24 = vld [vmem:[#allocation2 + $0x1b1] sm:$0xff] }
 0x77b   : > { %v13781_v20 = vpop.f32.mrb[144].mxu1 }
 0x77c   : > { %v21025_v53 = vadd.f32 %v13781_v20, %v20662_v18  ;;  %v8794_v21 = vpop.f32.mrb[145].mxu1  ;;  %13875 = vmatmul.mubr.f32.gmra.mrb[250].mxu1 %v21027_v24 }
 0x77d   : > { %v21031_v15 = vadd.f32 %v8794_v21, %v20648_v42  ;;  %13877 = vmatprep.mubr.f32.mxu1 %v21033_v31 }
 0x77e   : > { %23034 = vst [vmem:[#allocation123_spill] sm:$0xff] %v21025_v53  ;;  %v21041_v53 = vld [vmem:[#allocation2 + $0x1d1] sm:$0xff] }
 0x77f   : > { %v13784_v11 = vpop.f32.mrb[146].mxu1 }
 0x780   : > { %v21039_v18 = vadd.f32 %v13784_v11, %v20690_v14  ;;  %v8804_v20 = vpop.f32.mrb[147].mxu1  ;;  %13878 = vmatmul.mubr.f32.gmra.mrb[252].mxu1 %v21041_v53 }
 0x781   : > { %v21045_v42 = vadd.f32 %v8804_v20, %v20676_v43  ;;  %13880 = vmatprep.mubr.f32.mxu1 %v21047_v51 }
 0x782   : > { %23035 = vst [vmem:[#allocation124_spill] sm:$0xff] %v21039_v18  ;;  %v21055_v18 = vld [vmem:[#allocation2 + $0x1f1] sm:$0xff] }
 0x783   : > { %v13787_v21 = vpop.f32.mrb[148].mxu1 }
 0x784   : > { %v21053_v14 = vadd.f32 %v13787_v21, %v20726_v54  ;;  %v8814_v11 = vpop.f32.mrb[149].mxu1  ;;  %13881 = vmatmul.mubr.f32.gmra.mrb[254].mxu1 %v21055_v18  ;;  %v10418_v21 = vadd.f32 %v10417_v25, %v10416_v32 }
 0x785   : > { %v21059_v43 = vadd.f32 %v8814_v11, %v20704_v50  ;;  %13915 = vmatprep.mubr.f32.mxu1 %v20851_v58  ;;  %v23037_v50 = vld [vmem:[#allocation106_spill] sm:$0xff]  ;;  %v10419_v58 = vsel %vm10373_vm2, %v23038_v28, 0.0  ;;  %v23042_v28 = vld [vmem:[#allocation120_spill] sm:$0xff] }
 0x786   : > { %23036 = vst [vmem:[#allocation125_spill] sm:$0xff] %v21053_v14  ;;  %v23039_v11 = vld [vmem:[#allocation114_spill] sm:$0xff] }
 0x787   : > { %v13790_v20 = vpop.f32.mrb[150].mxu1 }
 0x788   : > { %v21065_v29 = vadd.f32 %v13790_v20, %v20762_v48  ;;  %v8824_v54 = vpop.f32.mrb[151].mxu1  ;;  %13916 = vmatmul.mubr.f32.vlgmr.msra.gmra.mrb[0].mxu1 %v20865_v56  ;;  %v10420_v56 = vadd.f32 %v10419_v58, %v10418_v21  ;;  %v23043_v58 = vld [vmem:[#allocation116_spill] sm:$0xff] }
 0x789   : > { %v21069_v14 = vadd.f32 %v8824_v54, %v20746_v61  ;;  %13918 = vmatprep.mubr.f32.mxu1 %v20868_v57  ;;  %14567 = vmatpush3.bf16.msra.mxu1 %v23037_v50  ;;  %v23040_v57 = vld [vmem:[#allocation105_spill] sm:$0xff] }
 0x78a   : > { %14568 = vmatprep.subr.bf16.mxu1 %v22854_v0  ;;  %v10421_v32 = vsel %vm10373_vm2, %v23040_v57, 0.0  ;;  %v23047_v57 = vld [vmem:[#allocation117_spill] sm:$0xff] }
 0x78b   : > { %v13793_v49 = vpop.f32.mrb[152].mxu1 }
 0x78c   : > { %v21077_v48 = vadd.f32 %v13793_v49, %v20794_v45  ;;  %v8834_v59 = vpop.f32.mrb[153].mxu1  ;;  %13919 = vmatmul.mubr.f32.gmra.mrb[2].mxu1 %v20881_v30  ;;  %v10422_v30 = vadd.f32 %v10421_v32, %v10420_v56 }
 0x78d   : > { %v21081_v61 = vadd.f32 %v8834_v59, %v23039_v11  ;;  %13921 = vmatprep.mubr.f32.mxu1 %v20884_v2  ;;  %14570 = vmatpush3.bf16.msra.mxu1 %v20789_v47  ;;  %v23041_v47 = vld [vmem:[#allocation107_spill] sm:$0xff] }
 0x78e   : > { %14571 = vmatprep.subr.bf16.mxu1 %v22854_v0  ;;  %v10423_v2 = vsel %vm10373_vm2, %v23041_v47, 0.0 }
 0x78f   : > { %v13796_v25 = vpop.f32.mrb[154].mxu1 }
 0x790   : > { %v21089_v45 = vadd.f32 %v13796_v25, %v20829_v4  ;;  %v8844_v20 = vpop.f32.mrb[155].mxu1  ;;  %13922 = vmatmul.mubr.f32.gmra.mrb[4].mxu1 %v20897_v44  ;;  %v10424_v44 = vadd.f32 %v10423_v2, %v10422_v30  ;;  %v23048_v25 = vld [vmem:[#allocation109_spill] sm:$0xff] }
 0x791   : > { %v21093_v54 = vadd.f32 %v8844_v20, %v20809_v1  ;;  %13924 = vmatprep.mubr.f32.mxu1 %v20900_v12  ;;  %14573 = vmatpush3.bf16.msra.mxu1 %v20804_v6  ;;  %v23044_v12 = vld [vmem:[#allocation115_spill] sm:$0xff]  ;;  %v23045_v6 = vld [vmem:[#allocation108_spill] sm:$0xff] }
 0x792   : > { %14574 = vmatprep.subr.bf16.mxu1 %v22854_v0  ;;  %v10425_v49 = vsel %vm10373_vm2, %v23045_v6, 0.0  ;;  %v23046_v0 = vld [vmem:[#allocation118_spill] sm:$0xff] }
 0x793   : > { %v13799_v21 = vpop.f32.mrb[156].mxu1  ;;  %v10426_v11 = vadd.f32 %v10425_v49, %v10424_v44 }
 0x794   : > { %v21101_v4 = vadd.f32 %v13799_v21, %v20857_v27  ;;  %v8854_v50 = vpop.f32.mrb[157].mxu1  ;;  %13925 = vmatmul.mubr.f32.gmra.mrb[6].mxu1 %v23042_v28  ;;  %v23050_v28 = vld [vmem:[#allocation119_spill] sm:$0xff] }
 0x795   : > { %v21105_v1 = vadd.f32 %v8854_v50, %v23043_v58  ;;  %13927 = vmatprep.mubr.f32.mxu1 %v20920_v52  ;;  %14576 = vmatpush3.bf16.msra.mxu1 %v23044_v12  ;;  %v10427_v52 = vsel %vm10373_vm2, %v23048_v25, 0.0 }
 0x796   : > { %v10428_v2 = vadd.f32 %v10427_v52, %v10426_v11 }
 0x797   : > { %v13802_v59 = vpop.f32.mrb[158].mxu1 }
 0x798   : > { %v21112_v56 = vadd.f32 %v13802_v59, %v23046_v0  ;;  %v8864_v27 = vpop.f32.mrb[159].mxu1  ;;  %13928 = vmatmul.mubr.f32.gmra.mrb[8].mxu1 %v20928_v35  ;;  %v23049_v35 = vld [vmem:[#allocation110_spill] sm:$0xff]  ;;  %v23052_v59 = vld [vmem:[#allocation112_spill] sm:$0xff] }
 0x799   : > { %v21116_v32 = vadd.f32 %v8864_v27, %v23047_v57  ;;  %13930 = vmatprep.mubr.f32.mxu1 %v20934_v60  ;;  %v10429_v21 = vsel %vm10373_vm2, %v23049_v35, 0.0  ;;  %v10433_v0 = vsel %vm10373_vm2, %v23052_v59, 0.0 }
 0x79a   : > { %v10430_v58 = vadd.f32 %v10429_v21, %v10428_v2 }
 0x79b   : > { %v8939_v20 = vpop.f32.mrb[160].mxu1 }
 0x79c   : > { %v21122_v30 = vadd.f32 %v8939_v20, %v20918_v62  ;;  %v8941_v47 = vpop.f32.mrb[161].mxu1  ;;  %13931 = vmatmul.mubr.f32.gmra.mrb[10].mxu1 %v20942_v39  ;;  %v23051_v62 = vld [vmem:[#allocation111_spill] sm:$0xff] }
 0x79d   : > { %13933 = vmatprep.mubr.f32.mxu1 %v20948_v55  ;;  %v10431_v12 = vsel %vm10373_vm2, %v23051_v62, 0.0 }
 0x79e   : > { %v10432_v49 = vadd.f32 %v10431_v12, %v10430_v58 }
 0x79f   : > { %v8944_v50 = vpop.f32.mrb[162].mxu1 }
 0x7a0   : > { %v21129_v44 = vadd.f32 %v8944_v50, %v23050_v28  ;;  %v8946_v60 = vpop.f32.mrb[163].mxu1  ;;  %13934 = vmatmul.mubr.f32.gmra.mrb[12].mxu1 %v20957_v34  ;;  %v10434_v11 = vadd.f32 %v10433_v0, %v10432_v49  ;;  %v15749_v50 = vld [vmem:[#allocation2 + $0x209] sm:$0xff] }
 0x7a1   : > { %13936 = vmatprep.mubr.f32.mxu1 %v20963_v19 }
 0x7a3   : > { %v8949_v39 = vpop.f32.mrb[164].mxu1 }
 0x7a4   : > { %v21136_v6 = vadd.f32 %v8949_v39, %v20932_v23  ;;  %v8951_v55 = vpop.f32.mrb[165].mxu1  ;;  %13937 = vmatmul.mubr.f32.gmra.mrb[14].mxu1 %v20971_v17  ;;  %v23053_v23 = vld [vmem:[#allocation113_spill] sm:$0xff] }
 0x7a5   : > { %13939 = vmatprep.mubr.f32.mxu1 %v20977_v9  ;;  %v10435_v57 = vsel %vm10373_vm2, %v23053_v23, 0.0  ;;  %v15751_v39 = vld [vmem:[#allocation2] sm:$0xff] }
 0x7a6   : > { %v10436_v52 = vadd.f32 %v10435_v57, %v10434_v11 }
 0x7a7   : > { %v8954_v34 = vpop.f32.mrb[166].mxu1 }
 0x7a8   : > { %v21143_v27 = vadd.f32 %v8954_v34, %v20926_v13  ;;  %v8956_v19 = vpop.f32.mrb[167].mxu1  ;;  %13940 = vmatmul.mubr.f32.gmra.mrb[16].mxu1 %v20985_v26 }
 0x7a9   : > { %13942 = vmatprep.mubr.f32.mxu1 %v20991_v33  ;;  %v10437_v33 = vrot.slane %v10436_v52, 4  ;;  %v23054_v19 = vld [vmem:[#allocation121_spill] sm:$0xff] }
 0x7ab   : > { %v8959_v17 = vpop.f32.mrb[168].mxu1 }
 0x7ac   : > { %v21150_v25 = vadd.f32 %v8959_v17, %v20946_v10  ;;  %v8961_v9 = vpop.f32.mrb[169].mxu1  ;;  %13943 = vmatmul.mubr.f32.gmra.mrb[18].mxu1 %v20999_v63  ;;  %v10438_v63 = vadd.f32 %v10437_v33, %v10436_v52  ;;  %v23055_v52 = vld [vmem:[#allocation122_spill] sm:$0xff] }
 0x7ad   : > { %13945 = vmatprep.mubr.f32.mxu1 %v21005_v38 }
 0x7af   : > { %v8964_v13 = vpop.f32.mrb[170].mxu1 }
 0x7b0   : > { %v21155_v20 = vadd.f32 %v8964_v13, %v20940_v16  ;;  %v8966_v26 = vpop.f32.mrb[171].mxu1  ;;  %13946 = vmatmul.mubr.f32.gmra.mrb[20].mxu1 %v21013_v22  ;;  %v10439_v22 = vrot.slane %v10438_v63, 2 }
 0x7b1   : > { %13948 = vmatprep.mubr.f32.mxu1 %v21019_v37 }
 0x7b3   : > { %v8969_v47 = vpop.f32.mrb[172].mxu1 }
 0x7b4   : > { %v21160_v10 = vadd.f32 %v8969_v47, %v20961_v46  ;;  %v8971_v2 = vpop.f32.mrb[173].mxu1  ;;  %13949 = vmatmul.mubr.f32.gmra.mrb[22].mxu1 %v21027_v24  ;;  %v10440_v24 = vadd.f32 %v10439_v22, %v10438_v63  ;;  %v23056_v63 = vld [vmem:[#allocation123_spill] sm:$0xff]  ;;  %v21202_v22 = vpop.permute.xlu1 %10183 }
 0x7b5   : > { %13951 = vmatprep.mubr.f32.mxu1 %v21033_v31  ;;  %v8324_v31 = vld [vmem:[#allocation2 + $0x229] sm:$0xff] }
 0x7b6   : > { %v10441_v58 = vrot.slane %v10440_v24, 1 }
 0x7b7   : > { %v8974_v38 = vpop.f32.mrb[174].mxu1 }
 0x7b8   : > { %v21165_v16 = vadd.f32 %v8974_v38, %v20955_v40  ;;  %v8976_v35 = vpop.f32.mrb[175].mxu1  ;;  %13952 = vmatmul.mubr.f32.gmra.mrb[24].mxu1 %v21041_v53  ;;  %v15750_v53 = vld [vmem:[#allocation2 + $0x211] sm:$0xff] }
 0x7b9   : > { %13954 = vmatprep.mubr.f32.mxu1 %v21047_v51  ;;  %v8325_v51 = vld [vmem:[#allocation2 + $0x231] sm:$0xff] }
 0x7bb   : > { %v8979_v37 = vpop.f32.mrb[176].mxu1 }
 0x7bc   : > { %v21170_v46 = vadd.f32 %v8979_v37, %v20975_v3  ;;  %v8981_v21 = vpop.f32.mrb[177].mxu1  ;;  %13955 = vmatmul.mubr.f32.gmra.mrb[26].mxu1 %v21055_v18  ;;  %v10442_v18 = vadd.f32 %v10441_v58, %v10440_v24  ;;  %v21204_v37 = vpop.permute.xlu0 %9989 }
 0x7bd   : > { %13957 = vmatprep.mubr.f32.mxu1 %v15749_v50 }
 0x7bf   : > { %v8984_v28 = vpop.f32.mrb[178].mxu1 }
 0x7c0   : > { %v21174_v40 = vadd.f32 %v8984_v28, %v20969_v8  ;;  %v8986_v60 = vpop.f32.mrb[179].mxu1  ;;  %13958 = vmatmul.mubr.f32.gmra.mrb[28].mxu1 %v15750_v53  ;;  %v21214_v53 = vpop.permute.xlu0 %10181 }
 0x7c1   : > { %13960 = vmatprep.mubr.f32.mxu1 %v8324_v31  ;;  %v23057_v31 = vld [vmem:[#allocation124_spill] sm:$0xff]  ;;  %v21212_v60 = vpop.permute.xlu1 %9993 }
 0x7c2   : > { %23058 = vst [vmem:[#allocation106_spill] sm:$0xff] %v21212_v60  ;;  %v23112_v60 = vld [vmem:[#allocation42_spill] sm:$0xff] }
 0x7c3   : > { %v8989_v62 = vpop.f32.mrb[180].mxu1 }
 0x7c4   : > { %v21177_v3 = vadd.f32 %v8989_v62, %v20989_v41  ;;  %v8991_v12 = vpop.f32.mrb[181].mxu1  ;;  %13961 = vmatmul.mubr.f32.gmra.mrb[30].mxu1 %v8325_v51 }
 0x7c5   : > { %13979 = vmatprep.mubr.msk.f32.mxu1 %vm15851_vm3, %v15751_v39  ;;  %v21219_v12 = vpop.permute.xlu1 %9995  ;;  %v23059_v39 = vld [vmem:[#allocation125_spill] sm:$0xff] }
 0x7c7   : > { %v8994_v55 = vpop.f32.mrb[182].mxu1 }
 0x7c8   : > { %v21181_v8 = vadd.f32 %v8994_v55, %v20983_v36  ;;  %v8996_v49 = vpop.f32.mrb[183].mxu1  ;;  %13980 = vmatmul.mubr.msk.f32.vlgmr.msra.gmra.mrb[32].mxu1 %vm10373_vm2, %v10442_v18 }
 0x7cb   : > { %v8999_v59 = vpop.f32.mrb[184].mxu1 }
 0x7cc   : > { %v21185_v0 = vadd.f32 %v8999_v59, %v21003_v7  ;;  %v9001_v34 = vpop.f32.mrb[185].mxu1 }
 0x7cf   : > { %v9004_v41 = vpop.f32.mrb[186].mxu1 }
 0x7d0   : > { %v21188_v11 = vadd.f32 %v9004_v41, %v23054_v19  ;;  %v9006_v23 = vpop.f32.mrb[187].mxu1  ;;  %v21229_v19 = vpop.permute.xlu1 %10187 }
 0x7d3   : > { %v9009_v57 = vpop.f32.mrb[188].mxu1 }
 0x7d4   : > { %v21191_v17 = vadd.f32 %v9009_v57, %v21017_v5  ;;  %v9011_v9 = vpop.f32.mrb[189].mxu1 }
 0x7d7   : > { %v9014_v36 = vpop.f32.mrb[190].mxu1 }
 0x7d8   : > { %v21194_v13 = vadd.f32 %v9014_v36, %v23055_v52  ;;  %v9016_v26 = vpop.f32.mrb[191].mxu1  ;;  %v21236_v36 = vpop.permute.xlu1 %9999 }
 0x7d9   : > { %23060 = vst [vmem:[#allocation104_spill] sm:$0xff] %v21236_v36 }
 0x7db   : > { %v9019_v33 = vpop.f32.mrb[192].mxu1 }
 0x7dc   : > { %v21197_v7 = vadd.f32 %v9019_v33, %v21031_v15  ;;  %v9021_v47 = vpop.f32.mrb[193].mxu1 }
 0x7df   : > { %v9024_v2 = vpop.f32.mrb[194].mxu1 }
 0x7e0   : > { %v21200_v38 = vadd.f32 %v9024_v2, %v23056_v63  ;;  %v9026_v35 = vpop.f32.mrb[195].mxu1 }
 0x7e1   : > { %v21246_v35 = vpop.permute.xlu1 %10191 }
 0x7e3   : > { %v9029_v5 = vpop.f32.mrb[196].mxu1 }
 0x7e4   : > { %v21207_v21 = vadd.f32 %v9029_v5, %v21045_v42  ;;  %v9031_v24 = vpop.f32.mrb[197].mxu1  ;;  %v21221_v42 = vpop.permute.xlu0 %9991 }
 0x7e7   : > { %v9034_v50 = vpop.f32.mrb[198].mxu1 }
 0x7e8   : > { %v21210_v28 = vadd.f32 %v9034_v50, %v23057_v31  ;;  %v9036_v15 = vpop.f32.mrb[199].mxu1  ;;  %v21231_v23 = vpop.permute.xlu0 %10185 }
 0x7e9   : > { %v21253_v31 = vpop.permute.xlu1 %10003 }
 0x7ea   : > { %23062 = vst [vmem:[#allocation105_spill] sm:$0xff] %v21253_v31 }
 0x7eb   : > { %v9039_v58 = vpop.f32.mrb[200].mxu1 }
 0x7ec   : > { %v21217_v51 = vadd.f32 %v9039_v58, %v21059_v43  ;;  %v9041_v62 = vpop.f32.mrb[201].mxu1  ;;  %v21238_v26 = vpop.permute.xlu0 %9997 }
 0x7ed   : > { %23061 = vst [vmem:[#allocation114_spill] sm:$0xff] %v21238_v26 }
 0x7ef   : > { %v9044_v18 = vpop.f32.mrb[202].mxu1 }
 0x7f0   : > { %v21224_v55 = vadd.f32 %v9044_v18, %v23059_v39  ;;  %v9046_v49 = vpop.f32.mrb[203].mxu1  ;;  %v21248_v5 = vpop.permute.xlu0 %10189 }
 0x7f1   : > { %v21263_v49 = vpop.permute.xlu1 %10195 }
 0x7f3   : > { %v9049_v59 = vpop.f32.mrb[204].mxu1 }
 0x7f4   : > { %v21227_v34 = vadd.f32 %v9049_v59, %v21069_v14  ;;  %v9051_v41 = vpop.f32.mrb[205].mxu1 }
 0x7f7   : > { %v9054_v43 = vpop.f32.mrb[206].mxu1 }
 0x7f8   : > { %v21234_v57 = vadd.f32 %v9054_v43, %v21065_v29  ;;  %v9056_v9 = vpop.f32.mrb[207].mxu1 }
 0x7f9   : > { %v21270_v9 = vpop.permute.xlu1 %10007 }
 0x7fa   : > { %23064 = vst [vmem:[#allocation120_spill] sm:$0xff] %v21270_v9 }
 0x7fb   : > { %v9059_v52 = vpop.f32.mrb[208].mxu1 }
 0x7fc   : > { %v21241_v33 = vadd.f32 %v9059_v52, %v21081_v61  ;;  %v9061_v14 = vpop.f32.mrb[209].mxu1  ;;  %v21255_v61 = vpop.permute.xlu0 %10001 }
 0x7fd   : > { %23063 = vst [vmem:[#allocation107_spill] sm:$0xff] %v21255_v61 }
 0x7ff   : > { %v9064_v47 = vpop.f32.mrb[210].mxu1 }
 0x800   : > { %v21244_v2 = vadd.f32 %v9064_v47, %v21077_v48  ;;  %v9066_v63 = vpop.f32.mrb[211].mxu1  ;;  %v21265_v59 = vpop.permute.xlu0 %10193 }
 0x803   : > { %v9069_v29 = vpop.f32.mrb[212].mxu1 }
 0x804   : > { %v21251_v24 = vadd.f32 %v9069_v29, %v21093_v54  ;;  %v9071_v50 = vpop.f32.mrb[213].mxu1 }
 0x807   : > { %v9074_v15 = vpop.f32.mrb[214].mxu1 }
 0x808   : > { %v21258_v58 = vadd.f32 %v9074_v15, %v21089_v45  ;;  %v9076_v48 = vpop.f32.mrb[215].mxu1  ;;  %v21272_v45 = vpop.permute.xlu0 %10005 }
 0x809   : > { %23065 = vst [vmem:[#allocation116_spill] sm:$0xff] %v21272_v45 }
 0x80b   : > { %v9079_v62 = vpop.f32.mrb[216].mxu1 }
 0x80c   : > { %v21261_v18 = vadd.f32 %v9079_v62, %v21105_v1  ;;  %v9081_v39 = vpop.f32.mrb[217].mxu1  ;;  %v21286_v62 = vpop.permute.xlu0 %10197 }
 0x80f   : > { %v9084_v54 = vpop.f32.mrb[218].mxu1 }
 0x810   : > { %v21268_v41 = vadd.f32 %v9084_v54, %v21101_v4  ;;  %v9086_v43 = vpop.f32.mrb[219].mxu1  ;;  %v21277_v47 = vpop.f32.mrb[124].mxu0 }
 0x811   : > { %23066 = vst [vmem:[#allocation115_spill] sm:$0xff] %v21277_v47  ;;  %v9590_v63 = vpop.f32.mrb[125].mxu0  ;;  %v21282_v4 = vpop.permute.xlu1 %10199 }
 0x812   : > { %v21296_v63 = vpop.permute.xlu0 %10009 }
 0x813   : > { %v9089_v52 = vpop.f32.mrb[220].mxu1  ;;  %23069 = vst [vmem:[#allocation117_spill] sm:$0xff] %v21296_v63 }
 0x814   : > { %v21275_v14 = vadd.f32 %v9089_v52, %v21116_v32  ;;  %v9091_v1 = vpop.f32.mrb[221].mxu1  ;;  %v21284_v48 = vpop.f32.mrb[126].mxu0 }
 0x815   : > { %23067 = vst [vmem:[#allocation108_spill] sm:$0xff] %v21284_v48  ;;  %v9595_v39 = vpop.f32.mrb[127].mxu0  ;;  %v21294_v1 = vpop.permute.xlu1 %10011 }
 0x816   : > { %23068 = vst [vmem:[#allocation118_spill] sm:$0xff] %v21294_v1  ;;  %v21314_v63 = vpop.permute.xlu0 %10201 }
 0x817   : > { %v9094_v29 = vpop.f32.mrb[222].mxu1 }
 0x818   : > { %v21280_v50 = vadd.f32 %v9094_v29, %v21112_v56  ;;  %v9096_v15 = vpop.f32.mrb[223].mxu1 }
 0x81b   : > { %v13837_v54 = vpop.f32.mrb[224].mxu1 }
 0x81c   : > { %v21289_v32 = vadd.f32 %v13837_v54, %v21129_v44  ;;  %v9164_v43 = vpop.f32.mrb[225].mxu1 }
 0x81d   : > { %v21292_v52 = vadd.f32 %v9164_v43, %v21122_v30  ;;  %v21309_v43 = vpop.permute.xlu1 %10203 }
 0x81e   : > { %v21304_v39 = vpop.f32.mrb[128].mxu0 }
 0x81f   : > { %v13840_v56 = vpop.f32.mrb[226].mxu1  ;;  %23070 = vst [vmem:[#allocation109_spill] sm:$0xff] %v21304_v39  ;;  %v14000_v44 = vpop.f32.mrb[129].mxu0 }
 0x820   : > { %v21299_v29 = vadd.f32 %v13840_v56, %v21143_v27  ;;  %v9174_v15 = vpop.f32.mrb[227].mxu1 }
 0x821   : > { %v21302_v47 = vadd.f32 %v9174_v15, %v21136_v6  ;;  %v21322_v44 = vpop.permute.xlu1 %10015 }
 0x822   : > { %23071 = vst [vmem:[#allocation110_spill] sm:$0xff] %v21322_v44 }
 0x823   : > { %v13843_v54 = vpop.f32.mrb[228].mxu1 }
 0x824   : > { %v21307_v48 = vadd.f32 %v13843_v54, %v21155_v20  ;;  %v9184_v30 = vpop.f32.mrb[229].mxu1  ;;  %v21324_v54 = vpop.permute.xlu0 %10013 }
 0x825   : > { %v21312_v1 = vadd.f32 %v9184_v30, %v21150_v25  ;;  %23072 = vst [vmem:[#allocation119_spill] sm:$0xff] %v21324_v54  ;;  %v21335_v9 = vpop.permute.xlu1 %10207 }
 0x827   : > { %v13846_v27 = vpop.f32.mrb[230].mxu1 }
 0x828   : > { %v21317_v56 = vadd.f32 %v13846_v27, %v21165_v16  ;;  %v9194_v6 = vpop.f32.mrb[231].mxu1 }
 0x829   : > { %v21320_v15 = vadd.f32 %v9194_v6, %v21160_v10  ;;  %v21340_v6 = vpop.permute.xlu0 %10205 }
 0x82b   : > { %v13849_v20 = vpop.f32.mrb[232].mxu1 }
 0x82c   : > { %v21327_v39 = vadd.f32 %v13849_v20, %v21174_v40  ;;  %v9204_v25 = vpop.f32.mrb[233].mxu1 }
 0x82d   : > { %v21330_v30 = vadd.f32 %v9204_v25, %v21170_v46  ;;  %v21348_v25 = vpop.permute.xlu1 %10019 }
 0x82e   : > { %23073 = vst [vmem:[#allocation111_spill] sm:$0xff] %v21348_v25 }
 0x82f   : > { %v13852_v45 = vpop.f32.mrb[234].mxu1 }
 0x830   : > { %v21333_v16 = vadd.f32 %v13852_v45, %v21181_v8  ;;  %v9214_v27 = vpop.f32.mrb[235].mxu1  ;;  %v21350_v45 = vpop.permute.xlu0 %10017 }
 0x831   : > { %v21338_v10 = vadd.f32 %v9214_v27, %v21177_v3  ;;  %23074 = vst [vmem:[#allocation112_spill] sm:$0xff] %v21350_v45  ;;  %v21361_v31 = vpop.permute.xlu1 %10211 }
 0x833   : > { %v13855_v54 = vpop.f32.mrb[236].mxu1 }
 0x834   : > { %v21343_v40 = vadd.f32 %v13855_v54, %v21188_v11  ;;  %v9224_v20 = vpop.f32.mrb[237].mxu1 }
 0x835   : > { %v21346_v46 = vadd.f32 %v9224_v20, %v21185_v0  ;;  %v21366_v20 = vpop.permute.xlu0 %10209 }
 0x837   : > { %v13858_v8 = vpop.f32.mrb[238].mxu1 }
 0x838   : > { %v21353_v44 = vadd.f32 %v13858_v8, %v21194_v13  ;;  %v9234_v3 = vpop.f32.mrb[239].mxu1 }
 0x839   : > { %v21356_v27 = vadd.f32 %v9234_v3, %v21191_v17  ;;  %v21374_v3 = vpop.permute.xlu1 %10023 }
 0x83a   : > { %23075 = vst [vmem:[#allocation113_spill] sm:$0xff] %v21374_v3 }
 0x83b   : > { %v13861_v61 = vpop.f32.mrb[240].mxu1 }
 0x83c   : > { %v21359_v11 = vadd.f32 %v13861_v61, %v21200_v38  ;;  %v9244_v54 = vpop.f32.mrb[241].mxu1  ;;  %v21376_v61 = vpop.permute.xlu0 %10021 }
 0x83d   : > { %v21364_v0 = vadd.f32 %v9244_v54, %v21197_v7  ;;  %23076 = vst [vmem:[#allocation121_spill] sm:$0xff] %v21376_v61  ;;  %v21387_v36 = vpop.permute.xlu1 %10215 }
 0x83f   : > { %v13864_v45 = vpop.f32.mrb[242].mxu1 }
 0x840   : > { %v21369_v13 = vadd.f32 %v13864_v45, %v21210_v28  ;;  %v9254_v8 = vpop.f32.mrb[243].mxu1 }
 0x841   : > { %v21372_v17 = vadd.f32 %v9254_v8, %v21207_v21  ;;  %v21392_v8 = vpop.permute.xlu0 %10213 }
 0x842   : > { %23081 = vst [vmem:[#allocation126_spill] sm:$0xff] %v21392_v8 }
 0x843   : > { %v13867_v38 = vpop.f32.mrb[244].mxu1 }
 0x844   : > { %v21379_v25 = vadd.f32 %v13867_v38, %v21224_v55  ;;  %v9264_v7 = vpop.f32.mrb[245].mxu1 }
 0x845   : > { %v21382_v54 = vadd.f32 %v9264_v7, %v21217_v51  ;;  %v21400_v7 = vpop.permute.xlu1 %10027 }
 0x846   : > { %23077 = vst [vmem:[#allocation122_spill] sm:$0xff] %v21379_v25  ;;  %23084 = vst [vmem:[#allocation129_spill] sm:$0xff] %v21400_v7  ;;  %v23096_v7 = vld [vmem:[#allocation22_spill] sm:$0xff]  ;;  %v23109_v25 = vld [vmem:[#allocation43_spill] sm:$0xff] }
 0x847   : > { %23078 = vst [vmem:[#allocation123_spill] sm:$0xff] %v21382_v54  ;;  %v13870_v26 = vpop.f32.mrb[246].mxu1 }
 0x848   : > { %v21385_v28 = vadd.f32 %v13870_v26, %v21234_v57  ;;  %v9274_v45 = vpop.f32.mrb[247].mxu1  ;;  %v21402_v26 = vpop.permute.xlu0 %10025 }
 0x849   : > { %v21390_v21 = vadd.f32 %v9274_v45, %v21227_v34  ;;  %23085 = vst [vmem:[#allocation130_spill] sm:$0xff] %v21402_v26 }
 0x84a   : > { %23079 = vst [vmem:[#allocation124_spill] sm:$0xff] %v21385_v28 }
 0x84b   : > { %23080 = vst [vmem:[#allocation125_spill] sm:$0xff] %v21390_v21  ;;  %v13873_v61 = vpop.f32.mrb[248].mxu1 }
 0x84c   : > { %v21395_v55 = vadd.f32 %v13873_v61, %v21244_v2  ;;  %v9284_v38 = vpop.f32.mrb[249].mxu1 }
 0x84d   : > { %v21398_v51 = vadd.f32 %v9284_v38, %v21241_v33  ;;  %v21418_v38 = vpop.permute.xlu0 %10217 }
 0x84e   : > { %23082 = vst [vmem:[#allocation127_spill] sm:$0xff] %v21395_v55  ;;  %v21413_v55 = vpop.permute.xlu1 %10219  ;;  %23091 = vst [vmem:[#allocation136_spill] sm:$0xff] %v21418_v38 }
 0x84f   : > { %23083 = vst [vmem:[#allocation128_spill] sm:$0xff] %v21398_v51  ;;  %v13876_v57 = vpop.f32.mrb[250].mxu1  ;;  %23089 = vst [vmem:[#allocation134_spill] sm:$0xff] %v21413_v55  ;;  %v23101_v51 = vld [vmem:[#allocation21_spill] sm:$0xff] }
 0x850   : > { %v21405_v3 = vadd.f32 %v13876_v57, %v21258_v58  ;;  %v9294_v34 = vpop.f32.mrb[251].mxu1  ;;  %v9895_v28 = vadd.f32 1.0, %v23101_v51 }
 0x851   : > { %v21408_v45 = vadd.f32 %v9294_v34, %v21251_v24 }
 0x852   : > { %23086 = vst [vmem:[#allocation131_spill] sm:$0xff] %v21405_v3  ;;  %v21426_v34 = vpop.permute.xlu1 %10031 }
 0x853   : > { %23087 = vst [vmem:[#allocation132_spill] sm:$0xff] %v21408_v45  ;;  %v13879_v21 = vpop.f32.mrb[252].mxu1  ;;  %23094 = vst [vmem:[#allocation139_spill] sm:$0xff] %v21426_v34 }
 0x854   : > { %v21411_v2 = vadd.f32 %v13879_v21, %v21268_v41  ;;  %v9304_v61 = vpop.f32.mrb[253].mxu1  ;;  %v21428_v21 = vpop.permute.xlu0 %10029 }
 0x855   : > { %v21416_v33 = vadd.f32 %v9304_v61, %v21261_v18  ;;  %23095 = vst [vmem:[#allocation140_spill] sm:$0xff] %v21428_v21  ;;  %v21434_v18 = vld [vmem:[%s22480_s11] ss:$0 sm:$0xff]  ;;  %v23097_v61 = vld [vmem:[#allocation16_spill] sm:$0xff] }
 0x856   : > { %23088 = vst [vmem:[#allocation133_spill] sm:$0xff] %v21411_v2  ;;  %v23099_v21 = vld [vmem:[#allocation24_spill] sm:$0xff]  ;;  %v21444_v38 = vpop.permute.xlu1 %10223 }
 0x857   : > { %23090 = vst [vmem:[#allocation135_spill] sm:$0xff] %v21416_v33  ;;  %v13882_v26 = vpop.f32.mrb[254].mxu1  ;;  %23102 = vst [vmem:[#allocation22_spill] sm:$0xff] %v21444_v38 }
 0x858   : > { %v21421_v58 = vadd.f32 %v13882_v26, %v21280_v50  ;;  %v9314_v57 = vpop.f32.mrb[255].mxu1 }
 0x859   : > { %v21424_v24 = vadd.f32 %v9314_v57, %v21275_v14 }
 0x85a   : > { %23092 = vst [vmem:[#allocation137_spill] sm:$0xff] %v21421_v58 }
 0x85b   : > { %23093 = vst [vmem:[#allocation138_spill] sm:$0xff] %v21424_v24  ;;  %v13917_v41 = vpop.f32.mrb[0].mxu1  ;;  %v23098_v24 = vld [vmem:[#allocation19_spill] sm:$0xff] }
 0x85c   : > { %v9669_v2 = vadd.f32 %v13917_v41, %v23096_v7  ;;  %v9663_v45 = vpop.f32.mrb[1].mxu1  ;;  %v9894_v34 = vadd.f32 1.0, %v23098_v24  ;;  %v23100_v41 = vld [vmem:[#allocation41_spill] sm:$0xff] }
 0x85d   : > { %v9664_v50 = vadd.f32 %v9663_v45, %v23097_v61  ;;  %v9893_v3 = vadd.f32 1.0, %v23100_v41  ;;  %v23103_v61 = vld [vmem:[#allocation23_spill] sm:$0xff] }
 0x85e   : > { %v9823_v26 = vadd.f32 %v9669_v2, %v21289_v32  ;;  %v23104_v2 = vld [vmem:[#allocation18_spill] sm:$0xff] }
 0x85f   : > { %v9822_v14 = vadd.f32 %v9664_v50, %v21292_v52  ;;  %v13920_v57 = vpop.f32.mrb[2].mxu1  ;;  %v9896_v52 = vadd.f32 1.0, %v23104_v2  ;;  %v21449_v50 = vpop.permute.xlu0 %10221 }
 0x860   : > { %v9862_v58 = vadd.f32 %v21434_v18, %v9823_v26  ;;  %v9679_v33 = vadd.f32 %v13920_v57, %v23099_v21  ;;  %v9673_v7 = vpop.f32.mrb[3].mxu1  ;;  %23105 = vst [vmem:[#allocation16_spill] sm:$0xff] %v21449_v50  ;;  %v23106_v57 = vld [vmem:[#allocation35_spill] sm:$0xff]  ;;  %v23108_v50 = vld [vmem:[#allocation25_spill] sm:$0xff] }
 0x861   : > { %v9861_v45 = vadd.f32 %v21434_v18, %v9822_v14  ;;  %v9674_v32 = vadd.f32 %v9673_v7, %v23103_v61  ;;  %v9897_v41 = vadd.f32 1.0, %v23106_v57  ;;  %v23107_v7 = vld [vmem:[#allocation12_spill] sm:$0xff] }
 0x862   : > { %v21451_v24 = vmul.f32 %v9894_v34, %v9862_v58  ;;  %v9825_v26 = vadd.f32 %v9679_v33, %v21299_v29  ;;  %v10278_v21 = vmul.f32 %v21202_v22, %v9862_v58  ;;  %v9898_v61 = vadd.f32 1.0, %v23107_v7  ;;  %v23110_v33 = vld [vmem:[#allocation47_spill] sm:$0xff] }
 0x863   : > { %v21456_v54 = vmul.f32 %v9893_v3, %v9861_v45  ;;  %v9824_v51 = vadd.f32 %v9674_v32, %v21302_v47  ;;  %v13923_v38 = vpop.f32.mrb[4].mxu1  ;;  %v10277_v14 = vmul.f32 %v21214_v53, %v9861_v45  ;;  %v9899_v22 = vadd.f32 1.0, %v23110_v33  ;;  %v23111_v3 = vld [vmem:[#allocation9_spill] sm:$0xff]  ;;  %v23113_v32 = vld [vmem:[#allocation50_spill] sm:$0xff]  ;;  %v23118_v7 = vld [vmem:[#allocation27_spill] sm:$0xff] }
 0x864   : > { %v9864_v2 = vadd.f32 %v21434_v18, %v9825_v26  ;;  %v9689_v34 = vadd.f32 %v13923_v38, %v23108_v50  ;;  %v9683_v55 = vpop.f32.mrb[5].mxu1  ;;  %v10310_v29 = vadd.f32 %v10278_v21, %v23109_v25  ;;  %v9900_v8 = vadd.f32 1.0, %v23113_v32  ;;  %v23114_v50 = vld [vmem:[#allocation53_spill] sm:$0xff]  ;;  %v21477_v26 = vpop.permute.xlu1 %10035  ;;  %v23122_v32 = vld [vmem:[#allocation20_spill] sm:$0xff] }
 0x865   : > { %v9863_v58 = vadd.f32 %v21434_v18, %v9824_v51  ;;  %v9684_v57 = vadd.f32 %v9683_v55, %v23111_v3  ;;  %v10309_v47 = vadd.f32 %v10277_v14, %v23112_v60  ;;  %v21475_v25 = vadd.f32 1.0, %v23114_v50  ;;  %23115 = vst [vmem:[#allocation19_spill] sm:$0xff] %v21477_v26  ;;  %v23116_v51 = vld [vmem:[#allocation14_spill] sm:$0xff]  ;;  %v21485_v14 = vpop.permute.xlu0 %10033 }
 0x866   : > { %v21469_v53 = vmul.f32 %v9896_v52, %v9864_v2  ;;  %v9827_v45 = vadd.f32 %v9689_v34, %v21307_v48  ;;  %10873 = vrot.lane.b32.xlu1 %v10310_v29, %s15850_s17  ;;  %v10280_v38 = vmul.f32 %v21229_v19, %v9864_v2  ;;  %v9902_v48 = vadd.f32 1.0, %v23116_v51  ;;  %23117 = vst [vmem:[#allocation24_spill] sm:$0xff] %v21485_v14  ;;  %v23119_v29 = vld [vmem:[#allocation32_spill] sm:$0xff] }
 0x867   : > { %v21479_v21 = vmul.f32 %v9895_v28, %v9863_v58  ;;  %v9826_v55 = vadd.f32 %v9684_v57, %v21312_v1  ;;  %v13926_v60 = vpop.f32.mrb[6].mxu1  ;;  %10871 = vrot.lane.b32.xlu0 %v10309_v47, %s15850_s17  ;;  %v10279_v52 = vmul.f32 %v21231_v23, %v9863_v58  ;;  %v23120_v28 = vld [vmem:[#allocation57_spill] sm:$0xff]  ;;  %v23121_v57 = vld [vmem:[#allocation26_spill] sm:$0xff]  ;;  %v23123_v58 = vld [vmem:[#allocation60_spill] sm:$0xff] }
 0x868   : > { %v9866_v19 = vadd.f32 %v21434_v18, %v9827_v45  ;;  %v9699_v2 = vadd.f32 %v13926_v60, %v23118_v7  ;;  %v9693_v34 = vpop.f32.mrb[7].mxu1  ;;  %v10312_v33 = vadd.f32 %v10280_v38, %v23119_v29  ;;  %v21491_v3 = vadd.f32 1.0, %v23120_v28  ;;  %v23124_v60 = vld [vmem:[#allocation62_spill] sm:$0xff] }
 0x869   : > { %v9865_v1 = vadd.f32 %v21434_v18, %v9826_v55  ;;  %v9694_v47 = vadd.f32 %v9693_v34, %v23121_v57  ;;  %v10311_v23 = vadd.f32 %v10279_v52, %v23122_v32  ;;  %v21497_v50 = vadd.f32 1.0, %v23123_v58  ;;  %v23128_v32 = vld [vmem:[#allocation68_spill] sm:$0xff]  ;;  %v21521_v58 = vpop.permute.xlu1 %10227 }
 0x86a   : > { %v21499_v51 = vmul.f32 %v9898_v61, %v9866_v19  ;;  %v9829_v45 = vadd.f32 %v9699_v2, %v21317_v56  ;;  %10877 = vrot.lane.b32.xlu1 %v10312_v33, %s15850_s17  ;;  %v10282_v38 = vmul.f32 %v21246_v35, %v9866_v19  ;;  %v21505_v7 = vadd.f32 1.0, %v23124_v60  ;;  %v23125_v61 = vld [vmem:[#allocation66_spill] sm:$0xff]  ;;  %v23126_v2 = vld [vmem:[#allocation29_spill] sm:$0xff] }
 0x86b   : > { %v21507_v29 = vmul.f32 %v9897_v41, %v9865_v1  ;;  %v9828_v55 = vadd.f32 %v9694_v47, %v21320_v15  ;;  %v13929_v34 = vpop.f32.mrb[8].mxu1  ;;  %10875 = vrot.lane.b32.xlu0 %v10311_v23, %s15850_s17  ;;  %v10281_v52 = vmul.f32 %v21248_v5, %v9865_v1  ;;  %v21513_v28 = vadd.f32 1.0, %v23125_v61  ;;  %v23127_v19 = vld [vmem:[#allocation45_spill] sm:$0xff]  ;;  %v23129_v47 = vld [vmem:[#allocation28_spill] sm:$0xff]  ;;  %v23130_v5 = vld [vmem:[#allocation11_spill] sm:$0xff] }
 0x86c   : > { %v9868_v56 = vadd.f32 %v21434_v18, %v9829_v45  ;;  %v9709_v33 = vadd.f32 %v13929_v34, %v23126_v2  ;;  %v9703_v35 = vpop.f32.mrb[9].mxu1  ;;  %v10314_v57 = vadd.f32 %v10282_v38, %v23127_v19  ;;  %v21519_v41 = vadd.f32 1.0, %v23128_v32  ;;  %v23131_v60 = vld [vmem:[#allocation70_spill] sm:$0xff]  ;;  %v21529_v45 = vpop.permute.xlu0 %10225  ;;  %v23132_v19 = vld [vmem:[#allocation72_spill] sm:$0xff] }
 0x86d   : > { %v9867_v15 = vadd.f32 %v21434_v18, %v9828_v55  ;;  %v9704_v23 = vadd.f32 %v9703_v35, %v23129_v47  ;;  %v10313_v1 = vadd.f32 %v10281_v52, %v23130_v5  ;;  %v21527_v61 = vadd.f32 1.0, %v23131_v60 }
 0x86e   : > { %v21531_v34 = vmul.f32 %v9900_v8, %v9868_v56  ;;  %v9831_v38 = vadd.f32 %v9709_v33, %v21327_v39  ;;  %10881 = vrot.lane.b32.xlu1 %v10314_v57, %s15850_s17  ;;  %v10284_v2 = vmul.f32 %v21263_v49, %v9868_v56  ;;  %v21537_v32 = vadd.f32 1.0, %v23132_v19  ;;  %v23133_v8 = vld [vmem:[#allocation74_spill] sm:$0xff]  ;;  %v23134_v33 = vld [vmem:[#allocation31_spill] sm:$0xff]  ;;  %v23136_v19 = vld [vmem:[#allocation76_spill] sm:$0xff] }
 0x86f   : > { %v21539_v55 = vmul.f32 %v9899_v22, %v9867_v15  ;;  %v9830_v52 = vadd.f32 %v9704_v23, %v21330_v30  ;;  %v13932_v35 = vpop.f32.mrb[10].mxu1  ;;  %10879 = vrot.lane.b32.xlu0 %v10313_v1, %s15850_s17  ;;  %v10283_v47 = vmul.f32 %v21265_v59, %v9867_v15  ;;  %v21545_v5 = vadd.f32 1.0, %v23133_v8  ;;  %v23135_v56 = vld [vmem:[#allocation51_spill] sm:$0xff]  ;;  %v23137_v23 = vld [vmem:[#allocation30_spill] sm:$0xff]  ;;  %v23138_v1 = vld [vmem:[#allocation48_spill] sm:$0xff] }
 0x870   : > { %v9870_v39 = vadd.f32 %v21434_v18, %v9831_v38  ;;  %v9719_v57 = vadd.f32 %v13932_v35, %v23134_v33  ;;  %v9713_v49 = vpop.f32.mrb[11].mxu1  ;;  %v10316_v60 = vadd.f32 %v10284_v2, %v23135_v56  ;;  %v21551_v22 = vadd.f32 1.0, %v23136_v19  ;;  %v23139_v59 = vld [vmem:[#allocation78_spill] sm:$0xff]  ;;  %v23140_v35 = vld [vmem:[#allocation80_spill] sm:$0xff]  ;;  %v21567_v56 = vpop.permute.xlu1 %10039 }
 0x871   : > { %v9869_v30 = vadd.f32 %v21434_v18, %v9830_v52  ;;  %v9714_v14 = vadd.f32 %v9713_v49, %v23137_v23  ;;  %v10315_v26 = vadd.f32 %v10283_v47, %v23138_v1  ;;  %v21557_v15 = vadd.f32 1.0, %v23139_v59  ;;  %23141 = vst [vmem:[#allocation41_spill] sm:$0xff] %v21567_v56  ;;  %v23145_v1 = vld [vmem:[#allocation56_spill] sm:$0xff] }
 0x872   : > { %v21559_v8 = vmul.f32 %v9902_v48, %v9870_v39  ;;  %v9833_v38 = vadd.f32 %v9719_v57, %v21333_v16  ;;  %10885 = vrot.lane.b32.xlu1 %v10316_v60, %s15850_s17  ;;  %v10286_v2 = vmul.f32 %v21282_v4, %v9870_v39  ;;  %v21565_v33 = vadd.f32 1.0, %v23140_v35  ;;  %v23142_v16 = vld [vmem:[#allocation82_spill] sm:$0xff]  ;;  %v21578_v60 = vpop.permute.xlu0 %10037  ;;  %v23146_v59 = vld [vmem:[#allocation84_spill] sm:$0xff] }
 0x873   : > { %v21570_v52 = vmul.f32 %v21475_v25, %v9869_v30  ;;  %v9832_v47 = vadd.f32 %v9714_v14, %v21338_v10  ;;  %v13935_v49 = vpop.f32.mrb[12].mxu1  ;;  %10883 = vrot.lane.b32.xlu0 %v10315_v26, %s15850_s17  ;;  %v10285_v48 = vmul.f32 %v21286_v62, %v9869_v30  ;;  %v21576_v57 = vadd.f32 1.0, %v23142_v16  ;;  %23143 = vst [vmem:[#allocation21_spill] sm:$0xff] %v21578_v60  ;;  %v23144_v39 = vld [vmem:[#allocation34_spill] sm:$0xff]  ;;  %v23147_v26 = vld [vmem:[#allocation33_spill] sm:$0xff] }
 0x874   : > { %v9872_v4 = vadd.f32 %v21434_v18, %v9833_v38  ;;  %v9729_v19 = vadd.f32 %v13935_v49, %v23144_v39  ;;  %v9723_v23 = vpop.f32.mrb[13].mxu1  ;;  %v10318_v25 = vadd.f32 %v10286_v2, %v23145_v1  ;;  %v21584_v35 = vadd.f32 1.0, %v23146_v59  ;;  %v23148_v62 = vld [vmem:[#allocation54_spill] sm:$0xff]  ;;  %v23150_v49 = vld [vmem:[#allocation88_spill] sm:$0xff] }
 0x875   : > { %v9871_v10 = vadd.f32 %v21434_v18, %v9832_v47  ;;  %v9724_v14 = vadd.f32 %v9723_v23, %v23147_v26  ;;  %v10317_v30 = vadd.f32 %v10285_v48, %v23148_v62  ;;  %v23149_v16 = vld [vmem:[#allocation86_spill] sm:$0xff]  ;;  %v21599_v39 = vadd.f32 1.0, %v23150_v49  ;;  %v23154_v62 = vld [vmem:[#allocation92_spill] sm:$0xff] }
 0x876   : > { %v21590_v56 = vadd.f32 1.0, %v23149_v16  ;;  %v21593_v60 = vmul.f32 %v21497_v50, %v9872_v4  ;;  %v9835_v38 = vadd.f32 %v9729_v19, %v21343_v40  ;;  %10889 = vrot.lane.b32.xlu1 %v10318_v25, %s15850_s17  ;;  %v10288_v2 = vmul.f32 %v21309_v43, %v9872_v4  ;;  %v23151_v1 = vld [vmem:[#allocation90_spill] sm:$0xff]  ;;  %v23152_v19 = vld [vmem:[#allocation40_spill] sm:$0xff]  ;;  %v23153_v25 = vld [vmem:[#allocation61_spill] sm:$0xff]  ;;  %v21616_v16 = vpop.permute.xlu1 %10231 }
 0x877   : > { %v21602_v47 = vmul.f32 %v21491_v3, %v9871_v10  ;;  %v9834_v48 = vadd.f32 %v9724_v14, %v21346_v46  ;;  %v13938_v23 = vpop.f32.mrb[14].mxu1  ;;  %10887 = vrot.lane.b32.xlu0 %v10317_v30, %s15850_s17  ;;  %v10287_v50 = vmul.f32 %v21314_v63, %v9871_v10  ;;  %v21608_v59 = vadd.f32 1.0, %v23151_v1  ;;  %v23155_v14 = vld [vmem:[#allocation39_spill] sm:$0xff]  ;;  %v23157_v49 = vld [vmem:[#allocation94_spill] sm:$0xff] }
 0x878   : > { %v9874_v40 = vadd.f32 %v21434_v18, %v9835_v38  ;;  %v9739_v43 = vadd.f32 %v13938_v23, %v23152_v19  ;;  %v9733_v4 = vpop.f32.mrb[15].mxu1  ;;  %v10320_v26 = vadd.f32 %v10288_v2, %v23153_v25  ;;  %v21614_v3 = vadd.f32 1.0, %v23154_v62  ;;  %v23156_v63 = vld [vmem:[#allocation15_spill] sm:$0xff]  ;;  %v21624_v38 = vpop.permute.xlu0 %10229  ;;  %v23158_v25 = vld [vmem:[#allocation96_spill] sm:$0xff] }
 0x879   : > { %v9873_v46 = vadd.f32 %v21434_v18, %v9834_v48  ;;  %v9734_v30 = vadd.f32 %v9733_v4, %v23155_v14  ;;  %v10319_v10 = vadd.f32 %v10287_v50, %v23156_v63  ;;  %v21622_v1 = vadd.f32 1.0, %v23157_v49  ;;  %v23161_v14 = vld [vmem:[#allocation98_spill] sm:$0xff] }
 0x87a   : > { %v21627_v23 = vmul.f32 %v21513_v28, %v9874_v40  ;;  %v9837_v2 = vadd.f32 %v9739_v43, %v21353_v44  ;;  %10893 = vrot.lane.b32.xlu1 %v10320_v26, %s15850_s17  ;;  %v10290_v19 = vmul.f32 %v21335_v9, %v9874_v40  ;;  %v21633_v48 = vadd.f32 1.0, %v23158_v25  ;;  %v23162_v43 = vld [vmem:[#allocation44_spill] sm:$0xff]  ;;  %v23163_v26 = vld [vmem:[#allocation67_spill] sm:$0xff] }
 0x87b   : > { %v21636_v4 = vmul.f32 %v21505_v7, %v9873_v46  ;;  %v9836_v50 = vadd.f32 %v9734_v30, %v21356_v27  ;;  %v13941_v62 = vpop.f32.mrb[16].mxu1  ;;  %10891 = vrot.lane.b32.xlu0 %v10319_v10, %s15850_s17  ;;  %v10289_v28 = vmul.f32 %v21340_v6, %v9873_v46  ;;  %v21642_v63 = vadd.f32 1.0, %v23161_v14  ;;  %v23164_v25 = vld [vmem:[#allocation100_spill] sm:$0xff]  ;;  %v23165_v30 = vld [vmem:[#allocation17_spill] sm:$0xff]  ;;  %v23166_v10 = vld [vmem:[#allocation63_spill] sm:$0xff] }
 0x87c   : > { %23159 = vst [vmem:[#allocation23_spill] sm:$0xff] %v21633_v48  ;;  %v9876_v44 = vadd.f32 %v21434_v18, %v9837_v2  ;;  %v9749_v9 = vadd.f32 %v13941_v62, %v23162_v43  ;;  %v9743_v40 = vpop.f32.mrb[17].mxu1  ;;  %v10322_v49 = vadd.f32 %v10290_v19, %v23163_v26  ;;  %v21648_v7 = vadd.f32 1.0, %v23164_v25  ;;  %v21661_v62 = vpop.permute.xlu1 %10043  ;;  %v23167_v43 = vld [vmem:[#allocation102_spill] sm:$0xff] }
 0x87d   : > { %23160 = vst [vmem:[#allocation18_spill] sm:$0xff] %v21636_v4  ;;  %v9875_v27 = vadd.f32 %v21434_v18, %v9836_v50  ;;  %v9744_v48 = vadd.f32 %v9743_v40, %v23165_v30  ;;  %v10321_v4 = vadd.f32 %v10289_v28, %v23166_v10  ;;  %v10086_v19 = vadd.f32 %v21221_v42, %v21451_v24  ;;  %v23168_v24 = vld [vmem:[#allocation37_spill] sm:$0xff]  ;;  %v23169_v40 = vld [vmem:[#allocation71_spill] sm:$0xff] }
 0x87e   : > { %v21654_v6 = vmul.f32 %v21527_v61, %v9876_v44  ;;  %v9839_v46 = vadd.f32 %v9749_v9, %v21359_v11  ;;  %10897 = vrot.lane.b32.xlu1 %v10322_v49, %s15850_s17  ;;  %v10292_v2 = vmul.f32 %v21361_v31, %v9876_v44  ;;  %v10085_v11 = vadd.f32 %v21204_v37, %v21456_v54  ;;  %v21674_v44 = vpop.permute.xlu0 %10041 }
 0x87f   : > { %v21664_v50 = vmul.f32 %v21519_v41, %v9875_v27  ;;  %v9838_v14 = vadd.f32 %v9744_v48, %v21364_v0  ;;  %v13944_v28 = vpop.f32.mrb[18].mxu1  ;;  %10895 = vrot.lane.b32.xlu0 %v10321_v4, %s15850_s17  ;;  %v10291_v61 = vmul.f32 %v21366_v20, %v9875_v27  ;;  %v21672_v31 = vadd.f32 1.0, %v23167_v43  ;;  %v23170_v4 = vld [vmem:[#allocation13_spill] sm:$0xff]  ;;  %v23175_v43 = vld [vmem:[#allocation106_spill] sm:$0xff] }
 0x880   : > { %v9878_v42 = vadd.f32 %v21434_v18, %v9839_v46  ;;  %v9759_v41 = vadd.f32 %v13944_v28, %v23168_v24  ;;  %v9753_v9 = vpop.f32.mrb[19].mxu1  ;;  %v10324_v0 = vadd.f32 %v10292_v2, %v23169_v40  ;;  %v23171_v20 = vld [vmem:[#allocation69_spill] sm:$0xff]  ;;  %v10088_v37 = vadd.f32 %v21219_v12, %v21469_v53  ;;  %v23172_v12 = vld [vmem:[#allocation126_spill] sm:$0xff] }
 0x881   : > { %v9877_v48 = vadd.f32 %v21434_v18, %v9838_v14  ;;  %v9754_v26 = vadd.f32 %v9753_v9, %v23170_v4  ;;  %v10323_v49 = vadd.f32 %v10291_v61, %v23171_v20  ;;  %v21690_v30 = vadd.f32 1.0, %v10086_v19  ;;  %v23173_v14 = vld [vmem:[#allocation46_spill] sm:$0xff]  ;;  %v23177_v9 = vld [vmem:[#allocation73_spill] sm:$0xff] }
 0x882   : > { %v21685_v54 = vmul.f32 %v21545_v5, %v9878_v42  ;;  %v9841_v25 = vadd.f32 %v9759_v41, %v21369_v13  ;;  %10901 = vrot.lane.b32.xlu1 %v10324_v0, %s15850_s17  ;;  %v10294_v27 = vmul.f32 %v21387_v36, %v9878_v42  ;;  %v21698_v5 = vadd.f32 1.0, %v10085_v11  ;;  %v23174_v36 = vld [vmem:[#allocation75_spill] sm:$0xff]  ;;  %v21705_v42 = vpop.permute.xlu1 %10235  ;;  %v23176_v24 = vld [vmem:[#allocation38_spill] sm:$0xff]  ;;  %v21712_v0 = vpop.permute.xlu0 %10233 }
 0x883   : > { %v21693_v10 = vmul.f32 %v21537_v32, %v9877_v48  ;;  %v9840_v46 = vadd.f32 %v9754_v26, %v21372_v17  ;;  %v13947_v2 = vpop.f32.mrb[20].mxu1  ;;  %10899 = vrot.lane.b32.xlu0 %v10323_v49, %s15850_s17  ;;  %v10293_v53 = vmul.f32 %v23172_v12, %v9877_v48  ;;  %v10087_v32 = vadd.f32 %v23175_v43, %v21479_v21  ;;  %v23178_v4 = vld [vmem:[#allocation122_spill] sm:$0xff]  ;;  %v23180_v49 = vld [vmem:[#allocation104_spill] sm:$0xff] }
 0x884   : > { %v9880_v13 = vadd.f32 %v21434_v18, %v9841_v25  ;;  %v9769_v28 = vadd.f32 %v13947_v2, %v23173_v14  ;;  %v9763_v61 = vpop.f32.mrb[21].mxu1  ;;  %v10326_v19 = vadd.f32 %v10294_v27, %v23174_v36  ;;  %v21710_v11 = vadd.f32 1.0, %v10088_v37  ;;  %v23179_v21 = vld [vmem:[#allocation134_spill] sm:$0xff]  ;;  %v23182_v12 = vld [vmem:[#allocation136_spill] sm:$0xff] }
 0x885   : > { %v9879_v17 = vadd.f32 %v21434_v18, %v9840_v46  ;;  %v9764_v41 = vadd.f32 %v9763_v61, %v23176_v24  ;;  %v10325_v40 = vadd.f32 %v10293_v53, %v23177_v9  ;;  %v10090_v25 = vadd.f32 %v23180_v49, %v21499_v51  ;;  %v23181_v46 = vld [vmem:[#allocation123_spill] sm:$0xff]  ;;  %v23183_v53 = vld [vmem:[#allocation114_spill] sm:$0xff]  ;;  %v23184_v61 = vld [vmem:[#allocation52_spill] sm:$0xff] }
 0x886   : > { %v21715_v48 = vmul.f32 %v21557_v15, %v9880_v13  ;;  %v9843_v26 = vadd.f32 %v9769_v28, %v23178_v4  ;;  %10905 = vrot.lane.b32.xlu1 %v10326_v19, %s15850_s17  ;;  %v10296_v20 = vmul.f32 %v23179_v21, %v9880_v13  ;;  %v10089_v14 = vadd.f32 %v23183_v53, %v21507_v29  ;;  %v23185_v19 = vld [vmem:[#allocation79_spill] sm:$0xff]  ;;  %v23186_v24 = vld [vmem:[#allocation49_spill] sm:$0xff]  ;;  %v23190_v49 = vld [vmem:[#allocation22_spill] sm:$0xff] }
 0x887   : > { %v21723_v27 = vmul.f32 %v21551_v22, %v9879_v17  ;;  %v9842_v37 = vadd.f32 %v9764_v41, %v23181_v46  ;;  %v13950_v2 = vpop.f32.mrb[22].mxu1  ;;  %10903 = vrot.lane.b32.xlu0 %v10325_v40, %s15850_s17  ;;  %v10295_v15 = vmul.f32 %v23182_v12, %v9879_v17  ;;  %v21733_v43 = vadd.f32 1.0, %v10087_v32  ;;  %v23187_v9 = vld [vmem:[#allocation77_spill] sm:$0xff]  ;;  %v21748_v46 = vpop.permute.xlu1 %10047 }
 0x888   : > { %v9882_v28 = vadd.f32 %v21434_v18, %v9843_v26  ;;  %v9779_v13 = vadd.f32 %v13950_v2, %v23184_v61  ;;  %v9773_v36 = vpop.f32.mrb[23].mxu1  ;;  %v10328_v51 = vadd.f32 %v10296_v20, %v23185_v19  ;;  %v23188_v17 = vld [vmem:[#allocation105_spill] sm:$0xff]  ;;  %v23189_v26 = vld [vmem:[#allocation124_spill] sm:$0xff]  ;;  %v21746_v32 = vadd.f32 1.0, %v10090_v25  ;;  %v21758_v61 = vpop.permute.xlu0 %10045  ;;  %v23193_v25 = vld [vmem:[#allocation10_spill] sm:$0xff] }
 0x889   : > { %v9881_v22 = vadd.f32 %v21434_v18, %v9842_v37  ;;  %v9774_v41 = vadd.f32 %v9773_v36, %v23186_v24  ;;  %v10327_v40 = vadd.f32 %v10295_v15, %v23187_v9  ;;  %v10092_v4 = vadd.f32 %v23188_v17, %v21531_v34  ;;  %v23191_v2 = vld [vmem:[#allocation125_spill] sm:$0xff]  ;;  %v23192_v34 = vld [vmem:[#allocation16_spill] sm:$0xff]  ;;  %v23194_v19 = vld [vmem:[#allocation83_spill] sm:$0xff] }
 0x88a   : > { %v21741_v29 = vmul.f32 %v21576_v57, %v9882_v28  ;;  %v9845_v21 = vadd.f32 %v9779_v13, %v23189_v26  ;;  %10909 = vrot.lane.b32.xlu1 %v10328_v51, %s15850_s17  ;;  %v10298_v20 = vmul.f32 %v23190_v49, %v9882_v28  ;;  %v21756_v53 = vadd.f32 1.0, %v10089_v14  ;;  %v23196_v9 = vld [vmem:[#allocation55_spill] sm:$0xff]  ;;  %v23197_v17 = vld [vmem:[#allocation81_spill] sm:$0xff] }
 0x88b   : > { %v21751_v37 = vmul.f32 %v21565_v33, %v9881_v22  ;;  %v9844_v12 = vadd.f32 %v9774_v41, %v23191_v2  ;;  %v13953_v15 = vpop.f32.mrb[24].mxu1  ;;  %10907 = vrot.lane.b32.xlu0 %v10327_v40, %s15850_s17  ;;  %v10297_v57 = vmul.f32 %v23192_v34, %v9881_v22  ;;  %v23195_v33 = vld [vmem:[#allocation107_spill] sm:$0xff]  ;;  %v21768_v14 = vadd.f32 1.0, %v10092_v4  ;;  %v23199_v2 = vld [vmem:[#allocation120_spill] sm:$0xff] }
 0x88c   : > { %v9884_v28 = vadd.f32 %v21434_v18, %v9845_v21  ;;  %v9789_v13 = vadd.f32 %v13953_v15, %v23193_v25  ;;  %v9783_v36 = vpop.f32.mrb[25].mxu1  ;;  %v10330_v51 = vadd.f32 %v10298_v20, %v23194_v19  ;;  %v10091_v24 = vadd.f32 %v23195_v33, %v21539_v55  ;;  %v23198_v21 = vld [vmem:[#allocation127_spill] sm:$0xff]  ;;  %v23200_v15 = vld [vmem:[#allocation128_spill] sm:$0xff] }
 0x88d   : > { %v9883_v41 = vadd.f32 %v21434_v18, %v9844_v12  ;;  %v9784_v40 = vadd.f32 %v9783_v36, %v23196_v9  ;;  %v10329_v22 = vadd.f32 %v10297_v57, %v23197_v17  ;;  %v10094_v55 = vadd.f32 %v23199_v2, %v21559_v8  ;;  %v23201_v4 = vld [vmem:[#allocation116_spill] sm:$0xff]  ;;  %v23202_v36 = vld [vmem:[#allocation59_spill] sm:$0xff]  ;;  %v23204_v9 = vld [vmem:[#allocation58_spill] sm:$0xff] }
 0x88e   : > { %v21771_v26 = vmul.f32 %v21590_v56, %v9884_v28  ;;  %v9847_v49 = vadd.f32 %v9789_v13, %v23198_v21  ;;  %10913 = vrot.lane.b32.xlu1 %v10330_v51, %s15850_s17  ;;  %v10300_v20 = vmul.f32 %v21521_v58, %v9884_v28  ;;  %v10093_v25 = vadd.f32 %v23201_v4, %v21570_v52  ;;  %v23203_v19 = vld [vmem:[#allocation87_spill] sm:$0xff]  ;;  %v23205_v17 = vld [vmem:[#allocation85_spill] sm:$0xff]  ;;  %v10238_v52 = vpop.permute.xlu0 %10237 }
 0x88f   : > { %v21779_v12 = vmul.f32 %v21584_v35, %v9883_v41  ;;  %v9846_v34 = vadd.f32 %v9784_v40, %v23200_v15  ;;  %v13956_v57 = vpop.f32.mrb[26].mxu1  ;;  %10911 = vrot.lane.b32.xlu0 %v10329_v22, %s15850_s17  ;;  %v10299_v56 = vmul.f32 %v21529_v45, %v9883_v41  ;;  %v21789_v51 = vadd.f32 1.0, %v10091_v24  ;;  %v10240_v35 = vpop.permute.xlu1 %10239  ;;  %v23206_v45 = vld [vmem:[#allocation118_spill] sm:$0xff] }
 0x890   : > { %v9886_v13 = vadd.f32 %v21434_v18, %v9847_v49  ;;  %v9799_v58 = vadd.f32 %v13956_v57, %v23202_v36  ;;  %v9793_v28 = vpop.f32.mrb[27].mxu1  ;;  %v10332_v8 = vadd.f32 %v10300_v20, %v23203_v19  ;;  %v10096_v41 = vadd.f32 %v23206_v45, %v21593_v60  ;;  %v23207_v49 = vld [vmem:[#allocation131_spill] sm:$0xff]  ;;  %v23209_v36 = vld [vmem:[#allocation65_spill] sm:$0xff] }
 0x891   : > { %v9885_v33 = vadd.f32 %v21434_v18, %v9846_v34  ;;  %v9794_v40 = vadd.f32 %v9793_v28, %v23204_v9  ;;  %v10331_v22 = vadd.f32 %v10299_v56, %v23205_v17  ;;  %v21802_v20 = vadd.f32 1.0, %v10094_v55  ;;  %v23208_v34 = vld [vmem:[#allocation132_spill] sm:$0xff] }
 0x892   : > { %v21797_v21 = vmul.f32 %v21608_v59, %v9886_v13  ;;  %v9849_v2 = vadd.f32 %v9799_v58, %v23207_v49  ;;  %10917 = vrot.lane.b32.xlu1 %v10332_v8, %s15850_s17  ;;  %v10302_v24 = vmul.f32 %v21616_v16, %v9886_v13  ;;  %v21810_v59 = vadd.f32 1.0, %v10093_v25  ;;  %v23210_v16 = vld [vmem:[#allocation91_spill] sm:$0xff]  ;;  %v23211_v13 = vld [vmem:[#allocation117_spill] sm:$0xff]  ;;  %v23212_v8 = vld [vmem:[#allocation64_spill] sm:$0xff] }
 0x893   : > { %v21805_v15 = vmul.f32 %v21599_v39, %v9885_v33  ;;  %v9848_v57 = vadd.f32 %v9794_v40, %v23208_v34  ;;  %v13959_v56 = vpop.f32.mrb[28].mxu1  ;;  %10915 = vrot.lane.b32.xlu0 %v10331_v22, %s15850_s17  ;;  %v10301_v60 = vmul.f32 %v21624_v38, %v9885_v33  ;;  %v10095_v39 = vadd.f32 %v23211_v13, %v21602_v47  ;;  %v23213_v40 = vld [vmem:[#allocation89_spill] sm:$0xff]  ;;  %v23215_v49 = vld [vmem:[#allocation110_spill] sm:$0xff]  ;;  %v23216_v34 = vld [vmem:[#allocation135_spill] sm:$0xff] }
 0x894   : > { %v9888_v4 = vadd.f32 %v21434_v18, %v9849_v2  ;;  %v9809_v58 = vadd.f32 %v13959_v56, %v23209_v36  ;;  %v9803_v28 = vpop.f32.mrb[29].mxu1  ;;  %v10334_v55 = vadd.f32 %v10302_v24, %v23210_v16  ;;  %v21820_v22 = vadd.f32 1.0, %v10096_v41  ;;  %v23214_v25 = vld [vmem:[#allocation133_spill] sm:$0xff]  ;;  %v21830_v2 = vpop.permute.xlu1 %10051  ;;  %v23217_v56 = vld [vmem:[#allocation18_spill] sm:$0xff]  ;;  %v23220_v16 = vld [vmem:[#allocation95_spill] sm:$0xff] }
 0x895   : > { %v9887_v19 = vadd.f32 %v21434_v18, %v9848_v57  ;;  %v9804_v9 = vadd.f32 %v9803_v28, %v23212_v8  ;;  %v10333_v17 = vadd.f32 %v10301_v60, %v23213_v40  ;;  %v10098_v47 = vadd.f32 %v23215_v49, %v21627_v23  ;;  %v23218_v60 = vld [vmem:[#allocation119_spill] sm:$0xff]  ;;  %v23222_v40 = vld [vmem:[#allocation93_spill] sm:$0xff] }
 0x896   : > { %v21823_v38 = vmul.f32 %v21622_v1, %v9888_v4  ;;  %v9851_v33 = vadd.f32 %v9809_v58, %v23214_v25  ;;  %10921 = vrot.lane.b32.xlu1 %v10334_v55, %s15850_s17  ;;  %v10304_v45 = vmul.f32 %v21705_v42, %v9888_v4  ;;  %v10097_v36 = vadd.f32 %v23218_v60, %v23217_v56  ;;  %v21838_v58 = vpop.permute.xlu0 %10049  ;;  %v23219_v4 = vld [vmem:[#allocation108_spill] sm:$0xff]  ;;  %v23221_v8 = vld [vmem:[#allocation115_spill] sm:$0xff]  ;;  %v23224_v49 = vld [vmem:[#allocation137_spill] sm:$0xff] }
 0x897   : > { %v9951_v24 = vmul.f32 %v21614_v3, %v9887_v19  ;;  %v9850_v57 = vadd.f32 %v9804_v9, %v23216_v34  ;;  %v13962_v41 = vpop.f32.mrb[30].mxu1  ;;  %10919 = vrot.lane.b32.xlu0 %v10333_v17, %s15850_s17  ;;  %v10303_v1 = vmul.f32 %v21712_v0, %v9887_v19  ;;  %v21843_v3 = vadd.f32 1.0, %v10095_v39  ;;  %v23223_v19 = vld [vmem:[#allocation111_spill] sm:$0xff] }
 0x898   : > { %v9890_v42 = vadd.f32 %v21434_v18, %v9851_v33  ;;  %v9819_v23 = vadd.f32 %v13962_v41, %v23219_v4  ;;  %v9813_v28 = vpop.f32.mrb[31].mxu1  ;;  %v10336_v55 = vadd.f32 %v10304_v45, %v23220_v16  ;;  %v10100_v17 = vadd.f32 %v23223_v19, %v21654_v6  ;;  %v23225_v39 = vld [vmem:[#allocation23_spill] sm:$0xff]  ;;  %v10244_v16 = vpop.permute.xlu1 %10243  ;;  %v23231_v19 = vld [vmem:[#allocation109_spill] sm:$0xff] }
 0x899   : > { %v9889_v13 = vadd.f32 %v21434_v18, %v9850_v57  ;;  %v9814_v9 = vadd.f32 %v9813_v28, %v23221_v8  ;;  %v10335_v0 = vadd.f32 %v10303_v1, %v23222_v40  ;;  %v21853_v41 = vadd.f32 1.0, %v10098_v47  ;;  %v23226_v57 = vld [vmem:[#allocation138_spill] sm:$0xff]  ;;  %v23229_v8 = vld [vmem:[#allocation97_spill] sm:$0xff] }
 0x89a   : > { %v9954_v25 = vmul.f32 %v21642_v63, %v9890_v42  ;;  %v9853_v33 = vadd.f32 %v9819_v23, %v23224_v49  ;;  %10925 = vrot.lane.b32.xlu1 %v10336_v55, %s15850_s17  ;;  %v10306_v34 = vmul.f32 %v10240_v35, %v9890_v42  ;;  %v21860_v4 = vadd.f32 1.0, %v10097_v36  ;;  %v23227_v23 = vld [vmem:[#allocation99_spill] sm:$0xff]  ;;  %v23228_v35 = vld [vmem:[#allocation112_spill] sm:$0xff] }
 0x89b   : > { %v21856_v45 = vmul.f32 %v23225_v39, %v9889_v13  ;;  %v9852_v56 = vadd.f32 %v9814_v9, %v23226_v57  ;;  %v10621_v60 = vpop.f32.mrb[32].mxu1  ;;  %10923 = vrot.lane.b32.xlu0 %v10335_v0, %s15850_s17  ;;  %v10305_v1 = vmul.f32 %v10238_v52, %v9889_v13  ;;  %v10099_v47 = vadd.f32 %v23228_v35, %v21664_v50  ;;  %v23230_v52 = vld [vmem:[#allocation113_spill] sm:$0xff]  ;;  %v10242_v13 = vpop.permute.xlu0 %10241 }
 0x89c   : > { %v9892_v63 = vadd.f32 %v21434_v18, %v9853_v33  ;;  %v10698_v6 = vmul.f32 %v10621_v60, %v10621_v60  ;;  %v10338_v28 = vadd.f32 %v10306_v34, %v23227_v23  ;;  %v13981_v42 = vpop.f32.mrb[33].mxu1  ;;  %v21868_v40 = vadd.f32 1.0, %v10100_v17  ;;  %v23232_v33 = vld [vmem:[#allocation121_spill] sm:$0xff] }
 0x89d   : > { %v9891_v55 = vadd.f32 %v21434_v18, %v9852_v56  ;;  %v10337_v9 = vadd.f32 %v10305_v1, %v23229_v8  ;;  %v10102_v36 = vadd.f32 %v23230_v52, %v21685_v54  ;;  %v10101_v34 = vadd.f32 %v23232_v33, %v21693_v10  ;;  %v23233_v54 = vld [vmem:[#allocation129_spill] sm:$0xff]  ;;  %v23235_v1 = vld [vmem:[#allocation103_spill] sm:$0xff]  ;;  %v23237_v10 = vld [vmem:[#allocation140_spill] sm:$0xff] }
 0x89e   : > { %v21873_v0 = vmul.f32 %v21672_v31, %v9892_v63  ;;  %v10699_v49 = vsub.f32 %v23231_v19, %v10698_v6  ;;  %10929 = vrot.lane.b32.xlu1 %v10338_v28, %s15850_s17  ;;  %v10308_v50 = vmul.f32 %v10244_v16, %v9892_v63  ;;  %v10104_v39 = vadd.f32 %v23233_v54, %v21715_v48  ;;  %v23234_v31 = vld [vmem:[#allocation130_spill] sm:$0xff]  ;;  %v23236_v63 = vld [vmem:[#allocation139_spill] sm:$0xff]  ;;  %v23241_v8 = vld [vmem:[#allocation41_spill] sm:$0xff] }
 0x89f   : > { %v21880_v18 = vmul.f32 %v21648_v7, %v9891_v55  ;;  %10927 = vrot.lane.b32.xlu0 %v10337_v9, %s15850_s17  ;;  %v10307_v17 = vmul.f32 %v10242_v13, %v9891_v55  ;;  %v10103_v57 = vadd.f32 %v23234_v31, %v21723_v27  ;;  %v10106_v23 = vadd.f32 %v23236_v63, %v21741_v29  ;;  %v23238_v7 = vld [vmem:[#allocation101_spill] sm:$0xff]  ;;  %v23239_v42 = vld [vmem:[#allocation19_spill] sm:$0xff]  ;;  %v23240_v55 = vld [vmem:[#allocation24_spill] sm:$0xff] }
 0x8a0   : > { %v10700_v56 = vmax.f32 %v10699_v49, 0.0  ;;  %v10340_v6 = vadd.f32 %v10308_v50, %v23235_v1  ;;  %v10105_v28 = vadd.f32 %v23237_v10, %v21751_v37  ;;  %v10108_v16 = vadd.f32 %v23239_v42, %v21771_v26  ;;  %v23242_v52 = vld [vmem:[#allocation21_spill] sm:$0xff]  ;;  %v23243_v19 = vld [vmem:[#allocation36_spill] sm:$0xff]  ;;  %v22016_v42 = vld [vmem:[%s20540_s23 + $0x70] sm:$0xff] }
 0x8a1   : > { %v10339_v35 = vadd.f32 %v10307_v17, %v23238_v7  ;;  %v10107_v48 = vadd.f32 %v23240_v55, %v21779_v12  ;;  %v10110_v27 = vadd.f32 %v23241_v8, %v21797_v21  ;;  %v10109_v29 = vadd.f32 %v23242_v52, %v21805_v15  ;;  %v21939_v17 = vld [vmem:[%s20540_s23 + $0x8] sm:$0xff]  ;;  %v22011_v55 = vld [vmem:[%s20540_s23 + $0x78] sm:$0xff]  ;;  %v22036_v63 = vld [vmem:[%s20540_s23 + $0x90] sm:$0xff] }
 0x8a2   : > { %v10701_v9 = vadd.f32 1e-05, %v10700_v56  ;;  %10933 = vrot.lane.b32.xlu1 %v10340_v6, %s15850_s17  ;;  %v10112_v37 = vadd.f32 %v21661_v62, %v21823_v38  ;;  %v10111_v13 = vadd.f32 %v21674_v44, %v9951_v24  ;;  %v21906_v49 = vrot.slane %v10621_v60, %v23243_v19  ;;  %v21961_v6 = vld [vmem:[%s20540_s23 + $0x28] sm:$0xff]  ;;  %v22031_v10 = vld [vmem:[%s20540_s23 + $0x98] sm:$0xff]  ;;  %v22050_v8 = vld [vmem:[%s20540_s23 + $0xa0] sm:$0xff] }
 0x8a3   : > { %10931 = vrot.lane.b32.xlu0 %v10339_v35, %s15850_s17  ;;  %v21909_v26 = vadd.f32 1.0, %v10099_v47  ;;  %v21911_v12 = vadd.f32 1.0, %v10102_v36  ;;  %v21913_v21 = vadd.f32 1.0, %v10101_v34  ;;  %v21915_v15 = vadd.f32 1.0, %v10104_v39  ;;  %v21944_v39 = vld [vmem:[%s20540_s23] sm:$0xff]  ;;  %v21981_v35 = vld [vmem:[%s20540_s23 + $0x48] sm:$0xff] }
 0x8a4   : > { %15467 = vrsqrt.f32 %v10701_v9  ;;  %v21917_v62 = vadd.f32 1.0, %v10103_v57  ;;  %v21919_v44 = vadd.f32 1.0, %v10106_v23  ;;  %v21921_v38 = vadd.f32 1.0, %v10105_v28  ;;  %v21949_v57 = vld [vmem:[%s20540_s23 + $0x18] sm:$0xff]  ;;  %v21966_v23 = vld [vmem:[%s20540_s23 + $0x20] sm:$0xff]  ;;  %v22001_v52 = vld [vmem:[%s20540_s23 + $0x68] sm:$0xff] }
 0x8a5   : > { %v21923_v24 = vadd.f32 1.0, %v10108_v16  ;;  %v21925_v60 = vadd.f32 1.0, %v10107_v48  ;;  %v21927_v47 = vadd.f32 1.0, %v10110_v27  ;;  %v21929_v36 = vadd.f32 1.0, %v10109_v29  ;;  %v21971_v28 = vld [vmem:[%s20540_s23 + $0x38] sm:$0xff]  ;;  %v21986_v16 = vld [vmem:[%s20540_s23 + $0x40] sm:$0xff] }
 0x8a6   : > { %v21931_v50 = vadd.f32 1.0, %v10112_v37  ;;  %v21933_v33 = vadd.f32 1.0, %v10111_v13  ;;  %v21936_v34 = vadd.f32 %v21748_v46, %v9954_v25  ;;  %v10113_v46 = vadd.f32 %v21758_v61, %v21856_v45  ;;  %v21956_v25 = vld [vmem:[%s20540_s23 + $0x10] sm:$0xff]  ;;  %v21991_v48 = vld [vmem:[%s20540_s23 + $0x58] sm:$0xff]  ;;  %v22006_v37 = vld [vmem:[%s20540_s23 + $0x60] sm:$0xff]  ;;  %s434_s17 = sand.u32 1, %s15838_s22  }
 0x8a7   : > { %23244 = vst [vmem:[#allocation35_spill] sm:$0xff] %v21923_v24  ;;  %23245 = vst [vmem:[#allocation12_spill] sm:$0xff] %v21925_v60  ;;  %v21976_v45 = vld [vmem:[%s20540_s23 + $0x30] sm:$0xff]  ;;  %v22021_v7 = vld [vmem:[%s20540_s23 + $0x88] sm:$0xff]  ;;  %v10116_v13 = vadd.f32 %v21830_v2, %v21873_v0  ;;  %v10115_v56 = vadd.f32 %v21838_v58, %v21880_v18  ;;  %s22428_s25 = scalar_lea.sflag [#allocation4], %s434_s17 }
 0x8a8   : > { %23246 = vst [vmem:[#allocation25_spill] sm:$0xff] %v21927_v47  ;;  %23247 = vst [vmem:[#allocation43_spill] sm:$0xff] %v21929_v36  ;;  %v21996_v27 = vld [vmem:[%s20540_s23 + $0x50] sm:$0xff]  ;;  %v22026_v61 = vld [vmem:[%s20540_s23 + $0x80] sm:$0xff]  ;;  %v22093_v31 = vadd.f32 1.0, %v21936_v34  ;;  %v23255_v34 = vsub.f32 %v21939_v17, %v21906_v49  ;;  %v23259_v17 = vsub.f32 %v21961_v6, %v21906_v49 }
 0x8a9   : > { %23248 = vst [vmem:[#allocation47_spill] sm:$0xff] %v21931_v50  ;;  %23249 = vst [vmem:[#allocation9_spill] sm:$0xff] %v21933_v33  ;;  %v22041_v1 = vld [vmem:[%s20540_s23 + $0xa8] sm:$0xff]  ;;  %v22055_v9 = vld [vmem:[%s20540_s23 + $0xb8] sm:$0xff] }
 0x8aa   : > { %v22060_v29 = vld [vmem:[%s20540_s23 + $0xb0] sm:$0xff]  ;;  %v22065_v0 = vld [vmem:[%s20540_s23 + $0xc8] sm:$0xff]  ;;  %v22070_v33 = vld [vmem:[%s20540_s23 + $0xc0] sm:$0xff] }
 0x8ab   : > { %v10729_v2 = vsub.f32 %v22060_v29, %v21906_v49  ;;  %23250 = vst [vmem:[#allocation42_spill] sm:$0xff] %v22065_v0  ;;  %23251 = vst [vmem:[#allocation50_spill] sm:$0xff] %v22070_v33  ;;  %v22075_v54 = vld [vmem:[%s20540_s23 + $0xd8] sm:$0xff]  ;;  %v22080_v36 = vld [vmem:[%s20540_s23 + $0xd0] sm:$0xff] }
 0x8ac   : > { %23252 = vst [vmem:[#allocation53_spill] sm:$0xff] %v22075_v54  ;;  %23253 = vst [vmem:[#allocation14_spill] sm:$0xff] %v22080_v36  ;;  %v22085_v47 = vld [vmem:[%s20540_s23 + $0xe8] sm:$0xff]  ;;  %v22096_v33 = vld [vmem:[%s20540_s23 + $0xe0] sm:$0xff]  ;;  %v22100_v54 = vadd.f32 1.0, %v10113_v46  ;;  %v22104_v36 = vadd.f32 1.0, %v10116_v13 }
 0x8ad   : > { %v10735_v50 = vsub.f32 %v22096_v33, %v21906_v49  ;;  %v15782_v60 = vld [vmem:[%s20540_s23 + $0xf8] sm:$0xff]  ;;  %v15783_v24 = vld [vmem:[%s20540_s23 + $0xf0] sm:$0xff]  ;;  %v23256_v33 = vsub.f32 %v21944_v39, %v21906_v49  ;;  %v23260_v39 = vsub.f32 %v21966_v23, %v21906_v49  ;;  %s11135_s23 = sshll.u32 %s434_s17, 8 }
 0x8ae   : > { %v15468_v18 = vpop.eup %15467  ;;  %v10738_v29 = vsub.f32 %v15782_v60, %v21906_v49  ;;  %v10737_v58 = vsub.f32 %v15783_v24, %v21906_v49  ;;  %v23257_v60 = vsub.f32 %v21949_v57, %v21906_v49  ;;  %v23258_v24 = vsub.f32 %v21956_v25, %v21906_v49  ;;  %s22321_s4 = scalar_lea.vmem [#allocation3], %s11135_s23 }
 0x8af   : > { %v22090_v0 = vrot.slane %v15468_v18, %v23243_v19  ;;  %v22108_v19 = vadd.f32 1.0, %v10115_v56  ;;  %v23261_v57 = vsub.f32 %v21971_v28, %v21906_v49  ;;  %v23262_v25 = vsub.f32 %v21976_v45, %v21906_v49  ;;  %s11045_s29 = sshll.u32 %s22321_s4, 4  ;;  %s22419_s29 = int_to_ptr.vmem [resolvable:$true] %s11045_s29 }
 0x8b0   : > { %s15784_s19 = scalar_lea.vmem %s22419_s29, 4096  ;;  %p15791_p0 = scmp.lt.s32.totalorder %s22419_s29, %s15789_s0 }
 0x8b1   : > { %23254 = vst [vmem:[#allocation27_spill] sm:$0xff] %v22108_v19  ;;  %v10744_v18 = vmul.f32 %v22090_v0, %v23255_v34  ;;  %v10743_v46 = vmul.f32 %v22090_v0, %v23256_v33  ;;  %v10746_v13 = vmul.f32 %v22090_v0, %v23257_v60  ;;  %v10745_v56 = vmul.f32 %v22090_v0, %v23258_v24  ;;  %p15785_p11 = scmp.ne.s32.totalorder %s22419_s29, %s15784_s19  ;;  %p15792_p1 = scmp.lt.s32.totalorder %s15790_s15, %s15784_s19 }
 0x8b2   : > { %v10748_v34 = vmul.f32 %v22090_v0, %v23259_v17  ;;  %v10747_v33 = vmul.f32 %v22090_v0, %v23260_v39  ;;  %v10750_v60 = vmul.f32 %v22090_v0, %v23261_v57  ;;  %v10749_v24 = vmul.f32 %v22090_v0, %v23262_v25 }
 0x8b3   : > { %v10808_v19 = vmul.f32 %v21690_v30, %v10744_v18  ;;  %v10807_v6 = vmul.f32 %v21698_v5, %v10743_v46  ;;  %v22145_v17 = vmul.f32 %v21710_v11, %v10746_v13  ;;  %v22148_v23 = vmul.f32 %v21733_v43, %v10745_v56  ;;  %p15786_p12 = pnand %p15785_p11, %p15958_p5  ;;  %p15793_p2 = por %p15792_p1, %p15791_p0 }
 0x8b4   : > { %v22151_v39 = vmul.f32 %v21746_v32, %v10748_v34  ;;  %v22154_v28 = vmul.f32 %v21756_v53, %v10747_v33  ;;  %v22157_v45 = vmul.f32 %v21768_v14, %v10750_v60  ;;  %v22160_v57 = vmul.f32 %v21789_v51, %v10749_v24 }
 0x8b5   : > { %v23263_v30 = vsub.f32 %v21981_v35, %v21906_v49  ;;  %v23264_v11 = vsub.f32 %v21986_v16, %v21906_v49  ;;  %v23265_v32 = vsub.f32 %v21991_v48, %v21906_v49  ;;  %v23266_v14 = vsub.f32 %v21996_v27, %v21906_v49  ;;  %p15787_p13 = pneg %p15786_p12 }
 0x8b6   : > { %v23267_v35 = vsub.f32 %v22001_v52, %v21906_v49  ;;  %v23268_v16 = vsub.f32 %v22006_v37, %v21906_v49  ;;  %v23269_v48 = vsub.f32 %v22011_v55, %v21906_v49  ;;  %v23270_v27 = vsub.f32 %v22016_v42, %v21906_v49 }
 0x8b7   : > { %v10752_v5 = vmul.f32 %v22090_v0, %v23263_v30  ;;  %v10751_v43 = vmul.f32 %v22090_v0, %v23264_v11  ;;  %v10754_v53 = vmul.f32 %v22090_v0, %v23265_v32  ;;  %v10753_v51 = vmul.f32 %v22090_v0, %v23266_v14  ;;  %p15794_p3 = pnand %p15793_p2, %p15787_p13 }
 0x8b8   : > { %v10756_v18 = vmul.f32 %v22090_v0, %v23267_v35  ;;  %v10755_v46 = vmul.f32 %v22090_v0, %v23268_v16  ;;  %v10758_v13 = vmul.f32 %v22090_v0, %v23269_v48  ;;  %v10757_v56 = vmul.f32 %v22090_v0, %v23270_v27  ;;  %v23282_v35 = vld [vmem:[#allocation50_spill] sm:$0xff] }
 0x8b9   : > { %v22195_v34 = vmul.f32 %v21802_v20, %v10752_v5  ;;  %v22198_v52 = vmul.f32 %v21810_v59, %v10751_v43  ;;  %v22201_v37 = vmul.f32 %v21820_v22, %v10754_v53  ;;  %v22204_v33 = vmul.f32 %v21843_v3, %v10753_v51  ;;  %v23278_v53 = vld [vmem:[#allocation35_spill] sm:$0xff] }
 0x8ba   : > { %v22207_v55 = vmul.f32 %v21853_v41, %v10756_v18  ;;  %v22210_v60 = vmul.f32 %v21860_v4, %v10755_v46  ;;  %v22213_v42 = vmul.f32 %v21868_v40, %v10758_v13  ;;  %v22216_v20 = vmul.f32 %v21909_v26, %v10757_v56  ;;  %v23284_v18 = vld [vmem:[#allocation53_spill] sm:$0xff]  ;;  %v23286_v46 = vld [vmem:[#allocation14_spill] sm:$0xff] }
 0x8bb   : > { %v23271_v59 = vsub.f32 %v22021_v7, %v21906_v49  ;;  %v23272_v3 = vsub.f32 %v22026_v61, %v21906_v49  ;;  %v23273_v4 = vsub.f32 %v22031_v10, %v21906_v49  ;;  %v23274_v40 = vsub.f32 %v22036_v63, %v21906_v49 }
 0x8bc   : > { %v23275_v7 = vsub.f32 %v22041_v1, %v21906_v49  ;;  %v23276_v61 = vsub.f32 %v22050_v8, %v21906_v49  ;;  %v23277_v10 = vsub.f32 %v22055_v9, %v21906_v49  ;;  %v10765_v11 = vmul.f32 %v22090_v0, %v10729_v2 }
 0x8bd   : > { %v10760_v22 = vmul.f32 %v22090_v0, %v23271_v59  ;;  %v10759_v41 = vmul.f32 %v22090_v0, %v23272_v3  ;;  %v10762_v25 = vmul.f32 %v22090_v0, %v23273_v4  ;;  %v10761_v26 = vmul.f32 %v22090_v0, %v23274_v40 }
 0x8be   : > { %v10764_v24 = vmul.f32 %v22090_v0, %v23275_v7  ;;  %v10763_v30 = vmul.f32 %v22090_v0, %v23276_v61  ;;  %v10766_v5 = vmul.f32 %v22090_v0, %v23277_v10  ;;  %v23287_v48 = vsub.f32 %v23286_v46, %v21906_v49 }
 0x8bf   : > { %v22248_v63 = vmul.f32 %v21911_v12, %v10760_v22  ;;  %v22251_v43 = vmul.f32 %v21913_v21, %v10759_v41  ;;  %v22254_v1 = vmul.f32 %v21915_v15, %v10762_v25  ;;  %v22257_v8 = vmul.f32 %v21917_v62, %v10761_v26  ;;  %v23279_v12 = vld [vmem:[#allocation12_spill] sm:$0xff]  ;;  %v23280_v21 = vld [vmem:[#allocation42_spill] sm:$0xff]  ;;  %v23289_v41 = vld [vmem:[#allocation25_spill] sm:$0xff] }
 0x8c0   : > { %v22260_v32 = vmul.f32 %v21919_v44, %v10764_v24  ;;  %v22263_v9 = vmul.f32 %v21921_v38, %v10763_v30  ;;  %v22266_v2 = vmul.f32 %v23278_v53, %v10766_v5  ;;  %v22269_v14 = vmul.f32 %v23279_v12, %v10765_v11  ;;  %v23290_v25 = vld [vmem:[#allocation43_spill] sm:$0xff]  ;;  %v23292_v24 = vld [vmem:[#allocation9_spill] sm:$0xff] }
 0x8c1   : > { %v23281_v51 = vsub.f32 %v23280_v21, %v21906_v49  ;;  %v23283_v62 = vsub.f32 %v23282_v35, %v21906_v49  ;;  %v23285_v38 = vsub.f32 %v23284_v18, %v21906_v49  ;;  %v10769_v13 = vmul.f32 %v22090_v0, %v23287_v48  ;;  %v23291_v26 = vld [vmem:[#allocation47_spill] sm:$0xff] }
 0x8c2   : > { %v23288_v27 = vsub.f32 %v22085_v47, %v21906_v49  ;;  %v10771_v59 = vmul.f32 %v22090_v0, %v10735_v50  ;;  %v10774_v22 = vmul.f32 %v22090_v0, %v10738_v29  ;;  %v10773_v3 = vmul.f32 %v22090_v0, %v10737_v58 }
 0x8c3   : > { %v10768_v15 = vmul.f32 %v22090_v0, %v23281_v51  ;;  %v10767_v44 = vmul.f32 %v22090_v0, %v23283_v62  ;;  %v10770_v16 = vmul.f32 %v22090_v0, %v23285_v38  ;;  %v22304_v61 = vmul.f32 %v23292_v24, %v10769_v13 }
 0x8c4   : > { %v10772_v56 = vmul.f32 %v22090_v0, %v23288_v27  ;;  %v22310_v47 = vmul.f32 %v22100_v54, %v10771_v59  ;;  %v22313_v50 = vmul.f32 %v22104_v36, %v10774_v22  ;;  %v23293_v0 = vld [vmem:[#allocation27_spill] sm:$0xff] }
 0x8c5   : > { %v22295_v4 = vmul.f32 %v23289_v41, %v10768_v15  ;;  %v22298_v40 = vmul.f32 %v23290_v25, %v10767_v44  ;;  %v22301_v7 = vmul.f32 %v23291_v26, %v10770_v16  ;;  %v22316_v58 = vmul.f32 %v23293_v0, %v10773_v3 }
 0x8c6   : > { %v22307_v49 = vmul.f32 %v22093_v31, %v10772_v56 }
 0x8d8   : > { %v10874_v29 = vpop.permute.xlu1 %10873 }
 0x8d9   : > { %v10968_v30 = vadd.f32 %v10874_v29, %v10808_v19  ;;  %v10872_v10 = vpop.permute.xlu0 %10871 }
 0x8da   : > { %v10967_v5 = vadd.f32 %v10872_v10, %v10807_v6 }
 0x8db   : > { %11000 = vst.msk [vmem:[%s22321_s4 + $0x8] sm:$0xff] %vm10373_vm2, %v10968_v30 }
 0x8dc   : > { %10999 = vst.msk [vmem:[%s22321_s4] sm:$0xff] %vm10373_vm2, %v10967_v5  ;;  %v10878_v36 = vpop.permute.xlu1 %10877 }
 0x8dd   : > { %v10970_v54 = vadd.f32 %v10878_v36, %v22145_v17  ;;  %v10876_v31 = vpop.permute.xlu0 %10875 }
 0x8de   : > { %v10969_v19 = vadd.f32 %v10876_v31, %v22148_v23 }
 0x8df   : > { %11002 = vst.msk [vmem:[%s22321_s4 + $0x18] sm:$0xff] %vm10373_vm2, %v10970_v54 }
 0x8e0   : > { %11001 = vst.msk [vmem:[%s22321_s4 + $0x10] sm:$0xff] %vm10373_vm2, %v10969_v19  ;;  %v10882_v6 = vpop.permute.xlu1 %10881 }
 0x8e1   : > { %v10972_v11 = vadd.f32 %v10882_v6, %v22151_v39  ;;  %v10880_v53 = vpop.permute.xlu0 %10879 }
 0x8e2   : > { %v10971_v12 = vadd.f32 %v10880_v53, %v22154_v28 }
 0x8e3   : > { %11004 = vst.msk [vmem:[%s22321_s4 + $0x28] sm:$0xff] %vm10373_vm2, %v10972_v11 }
 0x8e4   : > { %11003 = vst.msk [vmem:[%s22321_s4 + $0x20] sm:$0xff] %vm10373_vm2, %v10971_v12  ;;  %v10886_v17 = vpop.permute.xlu1 %10885 }
 0x8e5   : > { %v10974_v23 = vadd.f32 %v10886_v17, %v22157_v45  ;;  %v10884_v21 = vpop.permute.xlu0 %10883 }
 0x8e6   : > { %v10973_v51 = vadd.f32 %v10884_v21, %v22160_v57 }
 0x8e7   : > { %11006 = vst.msk [vmem:[%s22321_s4 + $0x38] sm:$0xff] %vm10373_vm2, %v10974_v23 }
 0x8e8   : > { %11005 = vst.msk [vmem:[%s22321_s4 + $0x30] sm:$0xff] %vm10373_vm2, %v10973_v51  ;;  %v10890_v39 = vpop.permute.xlu1 %10889 }
 0x8e9   : > { %v10976_v28 = vadd.f32 %v10890_v39, %v22195_v34  ;;  %v10888_v15 = vpop.permute.xlu0 %10887 }
 0x8ea   : > { %v10975_v35 = vadd.f32 %v10888_v15, %v22198_v52 }
 0x8eb   : > { %11008 = vst.msk [vmem:[%s22321_s4 + $0x48] sm:$0xff] %vm10373_vm2, %v10976_v28 }
 0x8ec   : > { %11007 = vst.msk [vmem:[%s22321_s4 + $0x40] sm:$0xff] %vm10373_vm2, %v10975_v35  ;;  %v10894_v45 = vpop.permute.xlu1 %10893 }
 0x8ed   : > { %v10978_v57 = vadd.f32 %v10894_v45, %v22201_v37  ;;  %v10892_v62 = vpop.permute.xlu0 %10891 }
 0x8ee   : > { %v10977_v44 = vadd.f32 %v10892_v62, %v22204_v33 }
 0x8ef   : > { %11010 = vst.msk [vmem:[%s22321_s4 + $0x58] sm:$0xff] %vm10373_vm2, %v10978_v57 }
 0x8f0   : > { %11009 = vst.msk [vmem:[%s22321_s4 + $0x50] sm:$0xff] %vm10373_vm2, %v10977_v44  ;;  %v10898_v34 = vpop.permute.xlu1 %10897 }
 0x8f1   : > { %v10980_v52 = vadd.f32 %v10898_v34, %v22207_v55  ;;  %v10896_v18 = vpop.permute.xlu0 %10895 }
 0x8f2   : > { %v10979_v38 = vadd.f32 %v10896_v18, %v22210_v60 }
 0x8f3   : > { %11012 = vst.msk [vmem:[%s22321_s4 + $0x68] sm:$0xff] %vm10373_vm2, %v10980_v52 }
 0x8f4   : > { %11011 = vst.msk [vmem:[%s22321_s4 + $0x60] sm:$0xff] %vm10373_vm2, %v10979_v38  ;;  %v10902_v37 = vpop.permute.xlu1 %10901 }
 0x8f5   : > { %v10982_v33 = vadd.f32 %v10902_v37, %v22213_v42  ;;  %v10900_v16 = vpop.permute.xlu0 %10899 }
 0x8f6   : > { %v10981_v46 = vadd.f32 %v10900_v16, %v22216_v20 }
 0x8f7   : > { %11014 = vst.msk [vmem:[%s22321_s4 + $0x78] sm:$0xff] %vm10373_vm2, %v10982_v33 }
 0x8f8   : > { %11013 = vst.msk [vmem:[%s22321_s4 + $0x70] sm:$0xff] %vm10373_vm2, %v10981_v46  ;;  %v10906_v55 = vpop.permute.xlu1 %10905 }
 0x8f9   : > { %v10984_v60 = vadd.f32 %v10906_v55, %v22248_v63  ;;  %v10904_v48 = vpop.permute.xlu0 %10903 }
 0x8fa   : > { %v10983_v13 = vadd.f32 %v10904_v48, %v22251_v43 }
 0x8fb   : > { %11016 = vst.msk [vmem:[%s22321_s4 + $0x88] sm:$0xff] %vm10373_vm2, %v10984_v60 }
 0x8fc   : > { %11015 = vst.msk [vmem:[%s22321_s4 + $0x80] sm:$0xff] %vm10373_vm2, %v10983_v13  ;;  %v10910_v42 = vpop.permute.xlu1 %10909 }
 0x8fd   : > { %v10986_v20 = vadd.f32 %v10910_v42, %v22254_v1  ;;  %v10908_v27 = vpop.permute.xlu0 %10907 }
 0x8fe   : > { %v10985_v56 = vadd.f32 %v10908_v27, %v22257_v8 }
 0x8ff   : > { %11018 = vst.msk [vmem:[%s22321_s4 + $0x98] sm:$0xff] %vm10373_vm2, %v10986_v20 }
 0x900   : > { %11017 = vst.msk [vmem:[%s22321_s4 + $0x90] sm:$0xff] %vm10373_vm2, %v10985_v56  ;;  %v10914_v63 = vpop.permute.xlu1 %10913 }
 0x901   : > { %v10988_v43 = vadd.f32 %v10914_v63, %v22260_v32  ;;  %v10912_v59 = vpop.permute.xlu0 %10911 }
 0x902   : > { %v10987_v22 = vadd.f32 %v10912_v59, %v22263_v9 }
 0x903   : > { %11020 = vst.msk [vmem:[%s22321_s4 + $0xa8] sm:$0xff] %vm10373_vm2, %v10988_v43 }
 0x904   : > { %11019 = vst.msk [vmem:[%s22321_s4 + $0xa0] sm:$0xff] %vm10373_vm2, %v10987_v22  ;;  %v10918_v1 = vpop.permute.xlu1 %10917 }
 0x905   : > { %v10990_v8 = vadd.f32 %v10918_v1, %v22266_v2  ;;  %v10916_v3 = vpop.permute.xlu0 %10915 }
 0x906   : > { %v10989_v41 = vadd.f32 %v10916_v3, %v22269_v14 }
 0x907   : > { %11022 = vst.msk [vmem:[%s22321_s4 + $0xb8] sm:$0xff] %vm10373_vm2, %v10990_v8 }
 0x908   : > { %11021 = vst.msk [vmem:[%s22321_s4 + $0xb0] sm:$0xff] %vm10373_vm2, %v10989_v41  ;;  %v10922_v32 = vpop.permute.xlu1 %10921 }
 0x909   : > { %v10992_v9 = vadd.f32 %v10922_v32, %v22295_v4  ;;  %v10920_v25 = vpop.permute.xlu0 %10919 }
 0x90a   : > { %v10991_v26 = vadd.f32 %v10920_v25, %v22298_v40 }
 0x90b   : > { %11024 = vst.msk [vmem:[%s22321_s4 + $0xc8] sm:$0xff] %vm10373_vm2, %v10992_v9 }
 0x90c   : > { %11023 = vst.msk [vmem:[%s22321_s4 + $0xc0] sm:$0xff] %vm10373_vm2, %v10991_v26  ;;  %v10926_v2 = vpop.permute.xlu1 %10925 }
 0x90d   : > { %v10994_v14 = vadd.f32 %v10926_v2, %v22301_v7  ;;  %v10924_v24 = vpop.permute.xlu0 %10923 }
 0x90e   : > { %v10993_v0 = vadd.f32 %v10924_v24, %v22304_v61 }
 0x90f   : > { %11026 = vst.msk [vmem:[%s22321_s4 + $0xd8] sm:$0xff] %vm10373_vm2, %v10994_v14 }
 0x910   : > { %11025 = vst.msk [vmem:[%s22321_s4 + $0xd0] sm:$0xff] %vm10373_vm2, %v10993_v0  ;;  %v10930_v4 = vpop.permute.xlu1 %10929 }
 0x911   : > { %v10996_v40 = vadd.f32 %v10930_v4, %v22307_v49  ;;  %v10928_v29 = vpop.permute.xlu0 %10927 }
 0x912   : > { %v10995_v30 = vadd.f32 %v10928_v29, %v22310_v47 }
 0x913   : > { %11028 = vst.msk [vmem:[%s22321_s4 + $0xe8] sm:$0xff] %vm10373_vm2, %v10996_v40 }
 0x914   : > { %11027 = vst.msk [vmem:[%s22321_s4 + $0xe0] sm:$0xff] %vm10373_vm2, %v10995_v30  ;;  %v10934_v7 = vpop.permute.xlu1 %10933 }
 0x915   : > { %v10998_v61 = vadd.f32 %v10934_v7, %v22313_v50  ;;  %v10932_v10 = vpop.permute.xlu0 %10931 }
 0x916   : > { %v10997_v49 = vadd.f32 %v10932_v10, %v22316_v58 }
 0x917   : > { %11030 = vst.msk [vmem:[%s22321_s4 + $0xf8] sm:$0xff] %vm10373_vm2, %v10998_v61 }
 0x918   : > { %11029 = vst.msk [vmem:[%s22321_s4 + $0xf0] sm:$0xff] %vm10373_vm2, %v10997_v49 }
 0x919   : > { %15797 = shalt.err (!%p15794_p3)
}
 0x91a   : > { %s15798_s18 = scalar_lea.hbm %s22417_s16, 4096  ;;  %s15802_s23 = scalar_lea.hbm %s22481_s12, 8192 }
 0x91b   : > { %p15799_p4 = scmp.ne.s32.totalorder %s22417_s16, %s15798_s18  ;;  %p15803_p9 = scmp.lt.u32.totalorder %s22417_s16, %s22481_s12 }
 0x91c   : > { %p15804_p10 = scmp.lt.u32.totalorder %s15802_s23, %s15798_s18  ;;  %p15806_p12 = scmp.lt.u32.totalorder %s15798_s18, %s22417_s16 }
 0x91d   : > { %p15800_p7 = pnand %p15799_p4, %p15958_p5 }
 0x91e   : > { %p15805_p11 = por %p15804_p10, %p15803_p9 }
 0x91f   : > { %p15801_p8 = pneg %p15800_p7 }
 0x920   : > { %p15807_p13 = por %p15806_p12, %p15805_p11 }
 0x922   : > { %p15808_p0 = pnand %p15807_p13, %p15801_p8 }
 0x924   : > { %15811 = shalt.err (!%p15808_p0)
}
 0x925   : > { %s15853_s27 = smov 128   ;;  %s15854_s26 = smov 8  }
 0x926   : > { %15422 = dma.vmem_to_hbm [thread:$0]  (%p15958_p5), %s22419_s29, 4096, %s22417_s16, %s22428_s25, %s15853_s27, %s15853_s27, %s15854_s26  }
 0x927 PF: > { %p15428_p1 = scmp.ge.s32.totalorder %s15846_s24, 2  ;;  %s11060_s19 = sand.u32 1, %s15834_s21  }
 0x928   : > { %s11061_s28 = scalar_lea.sflag [#allocation4], %s11060_s19 }
 0x929   : > { %p15425_p2 = pnand %p15428_p1, %p15962_p6 }
 0x92b   : > { %15829 = dma.done.wait (!%p15425_p2), %s11061_s28, 4096  }
 0x92c   : > { %15831 = vsyncadd (!%p15425_p2), %s11061_s28, 4294963200  ;;  %s23294_s24 = sld [smem:[#allocation7_spill]]  ;;  %s23295_s0 = sld [smem:[#allocation6_spill]] }
 0x92d   : > { %s23296_s23 = sld [smem:[#allocation8_spill]]  ;;  %s23297_s21 = smov %s15838_s22 }
 0x932   : > { %p22_p3 = scmp.ge.s32.totalorder %s23294_s24, 4   ;;  %s23298_s22 = smov %s23295_s0 }
 0x934   :  { %24 = sbr.rel (!%p22_p3) target bundleno = 6 (0x6), region = 130 }
 0x93b   :  { %11066 = vsyncpa [#allocation4], 1 }
 0x93c   :  { %11068 = vsyncpa [#allocation4 + $0x1], 1 }

</bundles_post_ra>
